<compile_context>
chip_gen: v6e
topology: v6e:2x2x1
jax: 0.10.0
libtpu: 0.0.40
codegen_flags: <defaults>
</compile_context>

<pallas_src>
import functools

import jax
import jax.numpy as jnp
from jax.experimental import pallas as pl
from jax.experimental.pallas import tpu as pltpu


def _class_caps_kernel(x_ref, w_ref, bias_ref, v_ref,
                       u_hat_ref, b_ij_ref, s_ref, *, routing_iterations):
    """x_ref: (bm, IC, NR); w_ref: (IC, NC, OC, NR); bias_ref: (1, NC, OC);
    v_ref: (bm, NC, OC); scratch: u_hat (bm, NC, OC, NR), b_ij (bm, NC, NR),
    s (bm, NC, OC)."""
    x = x_ref[...]                                        # (bm, IC, NR)
    bias = bias_ref[...]                                  # (1, NC, OC)
    bm, IC, NR = x.shape
    NC, OC = w_ref.shape[1], w_ref.shape[2]

    # ---- u_hat build: u_hat[b,c,o,r] = sum_i x[b,i,r] * W[i,c,o,r] ----
    # Chunked along NC so each u_hat element is stored exactly once and each chunk's
    # 8-term FMA chain stays small; x sublane-slices hoisted out of the NC loop.
    xi = [x[:, i, :][:, None, :] for i in range(IC)]      # IC x (bm, 1, NR)
    for c in range(NC):
        acc = xi[0] * w_ref[0, c]                         # (bm, OC, NR)
        for i in range(1, IC):
            acc = acc + xi[i] * w_ref[i, c]
        u_hat_ref[:, c] = acc

    # ---- dynamic routing ----
    for it in range(routing_iterations):
        last = it == routing_iterations - 1

        if it == 0:
            # softmax of an all-zero b_ij is exactly uniform.
            c_ij = jnp.full((bm, NC, NR), 1.0 / NC, jnp.float32)
        else:
            b_ij = b_ij_ref[...]                          # (bm, NC, NR)
            m = jnp.max(b_ij, axis=1, keepdims=True)
            e = jnp.exp(b_ij - m)
            c_ij = e / jnp.sum(e, axis=1, keepdims=True)  # exact divide (fidelity)

        # s[b,c,o] = sum_r c[b,c,r] * u_hat[b,c,o,r]   (chunked along NC)
        for c in range(NC):
            uc = u_hat_ref[:, c]                          # (bm, OC, NR)
            s_ref[:, c] = jnp.sum(c_ij[:, c, :][:, None, :] * uc, axis=-1)

        s = s_ref[...] + bias                             # (bm, NC, OC)

        # squash along out_channels
        ns = jnp.sum(s * s, axis=-1, keepdims=True)       # (bm, NC, 1)
        v = (ns / (1.0 + ns)) * s * jax.lax.rsqrt(ns + 1e-16)

        if last:
            v_ref[...] = v
        else:
            # delta[b,c,r] = sum_o u_hat[b,c,o,r] * v[b,c,o]   (chunked along NC)
            for c in range(NC):
                uc = u_hat_ref[:, c]
                d_c = jnp.sum(uc * v[:, c, :][:, :, None], axis=1)   # (bm, NR)
                if it == 0:
                    b_ij_ref[:, c] = d_c
                else:
                    b_ij_ref[:, c] = b_ij_ref[:, c] + d_c


@functools.partial(jax.jit, static_argnames=("routing_iterations", "batch_block"))
def class_capsules_forward(x, W, bias, *, routing_iterations=3, batch_block=None):
    """x: (B, num_routes, in_channels) f32
    W: (1, num_routes, num_capsules, out_channels, in_channels) f32
    bias: (1, 1, num_capsules, out_channels) f32
    Returns v_j.unsqueeze(-1): (B, num_capsules, out_channels, 1)."""
    if routing_iterations < 1:
        raise ValueError("routing_iterations must be >= 1")

    B, NR, IC = x.shape
    NC, OC = W.shape[2], W.shape[3]

    # Host-side one-time re-layouts: routes -> lanes, OC on the sublane (2nd-minor) axis.
    x_t = jnp.transpose(x, (0, 2, 1)).astype(jnp.float32)          # (B, IC, NR)
    w_t = jnp.transpose(W[0], (3, 1, 2, 0)).astype(jnp.float32)    # (IC, NC, OC, NR)
    b_t = bias.reshape(1, NC, OC).astype(jnp.float32)              # (1, NC, OC)

    # Larger default batch block (amortizes ~0.35us/step grid overhead); still well under
    # every chip's VMEM budget (~18 MiB working set at bm=128 after the layout fix).
    bm = batch_block if batch_block is not None else min(B, 128)
    n_blocks = pl.cdiv(B, bm)
    Bp = n_blocks * bm
    if Bp != B:
        x_t = jnp.pad(x_t, ((0, Bp - B), (0, 0), (0, 0)))

    # Explicit VMEM budget: scratch + double-buffered streams + routing temporaries,
    # capped at 3/4 of physical VMEM (64 MiB on v7x, 128 MiB on v5e/v6e).
    est = 4 * (bm * NC * OC * NR            # u_hat scratch
               + 2 * bm * IC * NR           # x (double buffered)
               + 2 * IC * NC * OC * NR      # W (double buffered, resident)
               + 3 * bm * NC * OC           # out (x2) + s scratch
               + 5 * bm * NC * NR           # b_ij scratch + softmax temporaries
               + 4 * bm * OC * NR)          # per-capsule chunk temporaries
    try:
        vmem_cap = pltpu.get_tpu_info().vmem_capacity_bytes
    except Exception:
        vmem_cap = 64 * 1024 * 1024
    vmem_limit = int(min(max(est * 3 // 2, 32 * 1024 * 1024), vmem_cap * 3 // 4))

    kernel = functools.partial(_class_caps_kernel,
                               routing_iterations=routing_iterations)

    out = pl.pallas_call(
        kernel,
        out_shape=jax.ShapeDtypeStruct((Bp, NC, OC), jnp.float32),
        grid=(n_blocks,),
        in_specs=[
            pl.BlockSpec((bm, IC, NR), lambda b: (b, 0, 0)),            # x block
            pl.BlockSpec((IC, NC, OC, NR), lambda b: (0, 0, 0, 0)),     # W (resident)
            pl.BlockSpec((1, NC, OC), lambda b: (0, 0, 0)),             # bias (resident)
        ],
        out_specs=pl.BlockSpec((bm, NC, OC), lambda b: (b, 0, 0)),
        scratch_shapes=[
            pltpu.VMEM((bm, NC, OC, NR), jnp.float32),   # u_hat (single store pass)
            pltpu.VMEM((bm, NC, NR), jnp.float32),       # b_ij routing logits
            pltpu.VMEM((bm, NC, OC), jnp.float32),       # s accumulator
        ],
        compiler_params=pltpu.CompilerParams(
            dimension_semantics=("parallel",),           # batch shards across TCs (v7x)
            vmem_limit_bytes=vmem_limit),
    )(x_t, w_t, b_t)

    # TODO(synk): torch's .squeeze() would also drop the batch dim when B == 1;
    # here the batch dim is always kept.
    return out[:B][..., None]                            # (B, NC, OC, 1)


def _reference(x, W, bias, routing_iterations):
    """Pure-JAX mirror of the PyTorch routing_algorithm / ClassCapsules.forward."""
    u_hat = jnp.sum(W[0][None, ...] * x[:, :, None, None, :], axis=-1)  # (B,NR,NC,OC)
    B, NR, NC, OC = u_hat.shape
    b_ij = jnp.zeros((B, NR, NC, 1), x.dtype)
    v_j = None
    for it in range(routing_iterations):
        c_ij = jax.nn.softmax(b_ij, axis=2)
        s_j = jnp.sum(c_ij * u_hat, axis=1, keepdims=True) + bias        # (B,1,NC,OC)
        ns = jnp.sum(s_j * s_j, axis=-1, keepdims=True)
        v_j = (ns / (1.0 + ns)) * (s_j / jnp.sqrt(ns + 1e-16))
        if it < routing_iterations - 1:
            delta = jnp.sum(u_hat * v_j, axis=-1, keepdims=True)
            b_ij = b_ij + delta
    v = jnp.squeeze(v_j, axis=1)                                         # (B,NC,OC)
    return v[..., None]


if __name__ == "__main__":
    batch, num_routes, in_channels = 2, 128, 8
    num_capsules, out_channels, routing_iterations = 10, 16, 3

    key = jax.random.PRNGKey(0)
    kx, kw, kb = jax.random.split(key, 3)
    x = jax.random.normal(kx, (batch, num_routes, in_channels), jnp.float32)
    # torch.rand init for parameters
    W = jax.random.uniform(
        kw, (1, num_routes, num_capsules, out_channels, in_channels), jnp.float32)
    bias = jax.random.uniform(kb, (1, 1, num_capsules, out_channels), jnp.float32)

    out = class_capsules_forward(x, W, bias, routing_iterations=routing_iterations)
    out = jax.block_until_ready(out)

    ref = _reference(x, W, bias, routing_iterations)

    assert out.shape == (batch, num_capsules, out_channels, 1)
    assert jnp.allclose(out, ref, atol=1e-4, rtol=1e-4), \
        float(jnp.max(jnp.abs(out - ref)))

    print("KERNEL_OK")
</pallas_src>

<mosaic_0001>
module attributes {stable_mosaic.version = 11 : i64} {
  func.func @_class_caps_kernel(%arg0: i32, %arg1: memref<2x8x128xf32, #tpu.memory_space<vmem>>, %arg2: memref<8x10x16x128xf32, #tpu.memory_space<vmem>>, %arg3: memref<1x10x16xf32, #tpu.memory_space<vmem>>, %arg4: memref<2x10x16xf32, #tpu.memory_space<vmem>>, %arg5: memref<2x10x16x128xf32, #tpu.memory_space<vmem>>, %arg6: memref<2x10x128xf32, #tpu.memory_space<vmem>>, %arg7: memref<2x10x16xf32, #tpu.memory_space<vmem>>) attributes {dimension_semantics = [#tpu.dimension_semantics<parallel>], iteration_bounds = array<i64: 1>, scalar_prefetch = 0 : i64, scratch_operands = 3 : i64, tpu.core_type = #tpu.core_type<tc>, window_params = [{transform_indices = @transform_0, window_bounds = array<i64: 2, 8, 128>}, {pipeline_mode = #tpu.pipeline_mode<synchronous>, transform_indices = @transform_1, window_bounds = array<i64: 8, 10, 16, 128>}, {pipeline_mode = #tpu.pipeline_mode<synchronous>, transform_indices = @transform_2, window_bounds = array<i64: 1, 10, 16>}, {transform_indices = @transform_3, window_bounds = array<i64: 2, 10, 16>}]} {
    %c0 = arith.constant 0 : index
    %c0_0 = arith.constant 0 : index
    %c0_1 = arith.constant 0 : index
    %0 = vector.load %arg1[%c0, %c0_0, %c0_1] : memref<2x8x128xf32, #tpu.memory_space<vmem>>, vector<2x8x128xf32>
    %c0_2 = arith.constant 0 : index
    %c0_3 = arith.constant 0 : index
    %c0_4 = arith.constant 0 : index
    %1 = vector.load %arg3[%c0_2, %c0_3, %c0_4] : memref<1x10x16xf32, #tpu.memory_space<vmem>>, vector<1x10x16xf32>
    %2 = vector.extract_strided_slice %0 {offsets = [0, 0, 0], sizes = [2, 1, 128], strides = [1, 1, 1]} : vector<2x8x128xf32> to vector<2x1x128xf32>
    %3 = vector.shape_cast %2 : vector<2x1x128xf32> to vector<2x128xf32>
    %4 = vector.shape_cast %3 : vector<2x128xf32> to vector<2x1x128xf32>
    %5 = vector.extract_strided_slice %0 {offsets = [0, 1, 0], sizes = [2, 1, 128], strides = [1, 1, 1]} : vector<2x8x128xf32> to vector<2x1x128xf32>
    %6 = vector.shape_cast %5 : vector<2x1x128xf32> to vector<2x128xf32>
    %7 = vector.shape_cast %6 : vector<2x128xf32> to vector<2x1x128xf32>
    %8 = vector.extract_strided_slice %0 {offsets = [0, 2, 0], sizes = [2, 1, 128], strides = [1, 1, 1]} : vector<2x8x128xf32> to vector<2x1x128xf32>
    %9 = vector.shape_cast %8 : vector<2x1x128xf32> to vector<2x128xf32>
    %10 = vector.shape_cast %9 : vector<2x128xf32> to vector<2x1x128xf32>
    %11 = vector.extract_strided_slice %0 {offsets = [0, 3, 0], sizes = [2, 1, 128], strides = [1, 1, 1]} : vector<2x8x128xf32> to vector<2x1x128xf32>
    %12 = vector.shape_cast %11 : vector<2x1x128xf32> to vector<2x128xf32>
    %13 = vector.shape_cast %12 : vector<2x128xf32> to vector<2x1x128xf32>
    %14 = vector.extract_strided_slice %0 {offsets = [0, 4, 0], sizes = [2, 1, 128], strides = [1, 1, 1]} : vector<2x8x128xf32> to vector<2x1x128xf32>
    %15 = vector.shape_cast %14 : vector<2x1x128xf32> to vector<2x128xf32>
    %16 = vector.shape_cast %15 : vector<2x128xf32> to vector<2x1x128xf32>
    %17 = vector.extract_strided_slice %0 {offsets = [0, 5, 0], sizes = [2, 1, 128], strides = [1, 1, 1]} : vector<2x8x128xf32> to vector<2x1x128xf32>
    %18 = vector.shape_cast %17 : vector<2x1x128xf32> to vector<2x128xf32>
    %19 = vector.shape_cast %18 : vector<2x128xf32> to vector<2x1x128xf32>
    %20 = vector.extract_strided_slice %0 {offsets = [0, 6, 0], sizes = [2, 1, 128], strides = [1, 1, 1]} : vector<2x8x128xf32> to vector<2x1x128xf32>
    %21 = vector.shape_cast %20 : vector<2x1x128xf32> to vector<2x128xf32>
    %22 = vector.shape_cast %21 : vector<2x128xf32> to vector<2x1x128xf32>
    %23 = vector.extract_strided_slice %0 {offsets = [0, 7, 0], sizes = [2, 1, 128], strides = [1, 1, 1]} : vector<2x8x128xf32> to vector<2x1x128xf32>
    %24 = vector.shape_cast %23 : vector<2x1x128xf32> to vector<2x128xf32>
    %25 = vector.shape_cast %24 : vector<2x128xf32> to vector<2x1x128xf32>
    %c0_5 = arith.constant 0 : index
    %c0_6 = arith.constant 0 : index
    %c0_7 = arith.constant 0 : index
    %c0_8 = arith.constant 0 : index
    %26 = vector.load %arg2[%c0_5, %c0_6, %c0_7, %c0_8] : memref<8x10x16x128xf32, #tpu.memory_space<vmem>>, vector<1x1x16x128xf32>
    %27 = vector.shape_cast %26 : vector<1x1x16x128xf32> to vector<16x128xf32>
    %28 = vector.shape_cast %27 : vector<16x128xf32> to vector<1x16x128xf32>
    %29 = vector.broadcast %4 : vector<2x1x128xf32> to vector<2x16x128xf32>
    %30 = vector.broadcast %28 : vector<1x16x128xf32> to vector<2x16x128xf32>
    %31 = arith.mulf %29, %30 : vector<2x16x128xf32>
    %c1 = arith.constant 1 : index
    %c0_9 = arith.constant 0 : index
    %c0_10 = arith.constant 0 : index
    %c0_11 = arith.constant 0 : index
    %32 = vector.load %arg2[%c1, %c0_9, %c0_10, %c0_11] : memref<8x10x16x128xf32, #tpu.memory_space<vmem>>, vector<1x1x16x128xf32>
    %33 = vector.shape_cast %32 : vector<1x1x16x128xf32> to vector<16x128xf32>
    %34 = vector.shape_cast %33 : vector<16x128xf32> to vector<1x16x128xf32>
    %35 = vector.broadcast %7 : vector<2x1x128xf32> to vector<2x16x128xf32>
    %36 = vector.broadcast %34 : vector<1x16x128xf32> to vector<2x16x128xf32>
    %37 = arith.mulf %35, %36 : vector<2x16x128xf32>
    %38 = arith.addf %31, %37 : vector<2x16x128xf32>
    %c2 = arith.constant 2 : index
    %c0_12 = arith.constant 0 : index
    %c0_13 = arith.constant 0 : index
    %c0_14 = arith.constant 0 : index
    %39 = vector.load %arg2[%c2, %c0_12, %c0_13, %c0_14] : memref<8x10x16x128xf32, #tpu.memory_space<vmem>>, vector<1x1x16x128xf32>
    %40 = vector.shape_cast %39 : vector<1x1x16x128xf32> to vector<16x128xf32>
    %41 = vector.shape_cast %40 : vector<16x128xf32> to vector<1x16x128xf32>
    %42 = vector.broadcast %10 : vector<2x1x128xf32> to vector<2x16x128xf32>
    %43 = vector.broadcast %41 : vector<1x16x128xf32> to vector<2x16x128xf32>
    %44 = arith.mulf %42, %43 : vector<2x16x128xf32>
    %45 = arith.addf %38, %44 : vector<2x16x128xf32>
    %c3 = arith.constant 3 : index
    %c0_15 = arith.constant 0 : index
    %c0_16 = arith.constant 0 : index
    %c0_17 = arith.constant 0 : index
    %46 = vector.load %arg2[%c3, %c0_15, %c0_16, %c0_17] : memref<8x10x16x128xf32, #tpu.memory_space<vmem>>, vector<1x1x16x128xf32>
    %47 = vector.shape_cast %46 : vector<1x1x16x128xf32> to vector<16x128xf32>
    %48 = vector.shape_cast %47 : vector<16x128xf32> to vector<1x16x128xf32>
    %49 = vector.broadcast %13 : vector<2x1x128xf32> to vector<2x16x128xf32>
    %50 = vector.broadcast %48 : vector<1x16x128xf32> to vector<2x16x128xf32>
    %51 = arith.mulf %49, %50 : vector<2x16x128xf32>
    %52 = arith.addf %45, %51 : vector<2x16x128xf32>
    %c4 = arith.constant 4 : index
    %c0_18 = arith.constant 0 : index
    %c0_19 = arith.constant 0 : index
    %c0_20 = arith.constant 0 : index
    %53 = vector.load %arg2[%c4, %c0_18, %c0_19, %c0_20] : memref<8x10x16x128xf32, #tpu.memory_space<vmem>>, vector<1x1x16x128xf32>
    %54 = vector.shape_cast %53 : vector<1x1x16x128xf32> to vector<16x128xf32>
    %55 = vector.shape_cast %54 : vector<16x128xf32> to vector<1x16x128xf32>
    %56 = vector.broadcast %16 : vector<2x1x128xf32> to vector<2x16x128xf32>
    %57 = vector.broadcast %55 : vector<1x16x128xf32> to vector<2x16x128xf32>
    %58 = arith.mulf %56, %57 : vector<2x16x128xf32>
    %59 = arith.addf %52, %58 : vector<2x16x128xf32>
    %c5 = arith.constant 5 : index
    %c0_21 = arith.constant 0 : index
    %c0_22 = arith.constant 0 : index
    %c0_23 = arith.constant 0 : index
    %60 = vector.load %arg2[%c5, %c0_21, %c0_22, %c0_23] : memref<8x10x16x128xf32, #tpu.memory_space<vmem>>, vector<1x1x16x128xf32>
    %61 = vector.shape_cast %60 : vector<1x1x16x128xf32> to vector<16x128xf32>
    %62 = vector.shape_cast %61 : vector<16x128xf32> to vector<1x16x128xf32>
    %63 = vector.broadcast %19 : vector<2x1x128xf32> to vector<2x16x128xf32>
    %64 = vector.broadcast %62 : vector<1x16x128xf32> to vector<2x16x128xf32>
    %65 = arith.mulf %63, %64 : vector<2x16x128xf32>
    %66 = arith.addf %59, %65 : vector<2x16x128xf32>
    %c6 = arith.constant 6 : index
    %c0_24 = arith.constant 0 : index
    %c0_25 = arith.constant 0 : index
    %c0_26 = arith.constant 0 : index
    %67 = vector.load %arg2[%c6, %c0_24, %c0_25, %c0_26] : memref<8x10x16x128xf32, #tpu.memory_space<vmem>>, vector<1x1x16x128xf32>
    %68 = vector.shape_cast %67 : vector<1x1x16x128xf32> to vector<16x128xf32>
    %69 = vector.shape_cast %68 : vector<16x128xf32> to vector<1x16x128xf32>
    %70 = vector.broadcast %22 : vector<2x1x128xf32> to vector<2x16x128xf32>
    %71 = vector.broadcast %69 : vector<1x16x128xf32> to vector<2x16x128xf32>
    %72 = arith.mulf %70, %71 : vector<2x16x128xf32>
    %73 = arith.addf %66, %72 : vector<2x16x128xf32>
    %c7 = arith.constant 7 : index
    %c0_27 = arith.constant 0 : index
    %c0_28 = arith.constant 0 : index
    %c0_29 = arith.constant 0 : index
    %74 = vector.load %arg2[%c7, %c0_27, %c0_28, %c0_29] : memref<8x10x16x128xf32, #tpu.memory_space<vmem>>, vector<1x1x16x128xf32>
    %75 = vector.shape_cast %74 : vector<1x1x16x128xf32> to vector<16x128xf32>
    %76 = vector.shape_cast %75 : vector<16x128xf32> to vector<1x16x128xf32>
    %77 = vector.broadcast %25 : vector<2x1x128xf32> to vector<2x16x128xf32>
    %78 = vector.broadcast %76 : vector<1x16x128xf32> to vector<2x16x128xf32>
    %79 = arith.mulf %77, %78 : vector<2x16x128xf32>
    %80 = arith.addf %73, %79 : vector<2x16x128xf32>
    %c0_30 = arith.constant 0 : index
    %c0_31 = arith.constant 0 : index
    %c0_32 = arith.constant 0 : index
    %c0_33 = arith.constant 0 : index
    %81 = vector.load %arg5[%c0_30, %c0_31, %c0_32, %c0_33] : memref<2x10x16x128xf32, #tpu.memory_space<vmem>>, vector<2x1x16x128xf32>
    %82 = vector.shape_cast %81 : vector<2x1x16x128xf32> to vector<2x16x128xf32>
    %83 = vector.shape_cast %80 : vector<2x16x128xf32> to vector<2x1x16x128xf32>
    tpu.vector_store %arg5[%c0_30, %c0_31, %c0_32, %c0_33], %83 {strides = array<i32>} : memref<2x10x16x128xf32, #tpu.memory_space<vmem>>, vector<2x1x16x128xf32>,
    %c0_34 = arith.constant 0 : index
    %c1_35 = arith.constant 1 : index
    %c0_36 = arith.constant 0 : index
    %c0_37 = arith.constant 0 : index
    %84 = vector.load %arg2[%c0_34, %c1_35, %c0_36, %c0_37] : memref<8x10x16x128xf32, #tpu.memory_space<vmem>>, vector<1x1x16x128xf32>
    %85 = vector.shape_cast %84 : vector<1x1x16x128xf32> to vector<16x128xf32>
    %86 = vector.shape_cast %85 : vector<16x128xf32> to vector<1x16x128xf32>
    %87 = vector.broadcast %4 : vector<2x1x128xf32> to vector<2x16x128xf32>
    %88 = vector.broadcast %86 : vector<1x16x128xf32> to vector<2x16x128xf32>
    %89 = arith.mulf %87, %88 : vector<2x16x128xf32>
    %c1_38 = arith.constant 1 : index
    %c1_39 = arith.constant 1 : index
    %c0_40 = arith.constant 0 : index
    %c0_41 = arith.constant 0 : index
    %90 = vector.load %arg2[%c1_38, %c1_39, %c0_40, %c0_41] : memref<8x10x16x128xf32, #tpu.memory_space<vmem>>, vector<1x1x16x128xf32>
    %91 = vector.shape_cast %90 : vector<1x1x16x128xf32> to vector<16x128xf32>
    %92 = vector.shape_cast %91 : vector<16x128xf32> to vector<1x16x128xf32>
    %93 = vector.broadcast %7 : vector<2x1x128xf32> to vector<2x16x128xf32>
    %94 = vector.broadcast %92 : vector<1x16x128xf32> to vector<2x16x128xf32>
    %95 = arith.mulf %93, %94 : vector<2x16x128xf32>
    %96 = arith.addf %89, %95 : vector<2x16x128xf32>
    %c2_42 = arith.constant 2 : index
    %c1_43 = arith.constant 1 : index
    %c0_44 = arith.constant 0 : index
    %c0_45 = arith.constant 0 : index
    %97 = vector.load %arg2[%c2_42, %c1_43, %c0_44, %c0_45] : memref<8x10x16x128xf32, #tpu.memory_space<vmem>>, vector<1x1x16x128xf32>
    %98 = vector.shape_cast %97 : vector<1x1x16x128xf32> to vector<16x128xf32>
    %99 = vector.shape_cast %98 : vector<16x128xf32> to vector<1x16x128xf32>
    %100 = vector.broadcast %10 : vector<2x1x128xf32> to vector<2x16x128xf32>
    %101 = vector.broadcast %99 : vector<1x16x128xf32> to vector<2x16x128xf32>
    %102 = arith.mulf %100, %101 : vector<2x16x128xf32>
    %103 = arith.addf %96, %102 : vector<2x16x128xf32>
    %c3_46 = arith.constant 3 : index
    %c1_47 = arith.constant 1 : index
    %c0_48 = arith.constant 0 : index
    %c0_49 = arith.constant 0 : index
    %104 = vector.load %arg2[%c3_46, %c1_47, %c0_48, %c0_49] : memref<8x10x16x128xf32, #tpu.memory_space<vmem>>, vector<1x1x16x128xf32>
    %105 = vector.shape_cast %104 : vector<1x1x16x128xf32> to vector<16x128xf32>
    %106 = vector.shape_cast %105 : vector<16x128xf32> to vector<1x16x128xf32>
    %107 = vector.broadcast %13 : vector<2x1x128xf32> to vector<2x16x128xf32>
    %108 = vector.broadcast %106 : vector<1x16x128xf32> to vector<2x16x128xf32>
    %109 = arith.mulf %107, %108 : vector<2x16x128xf32>
    %110 = arith.addf %103, %109 : vector<2x16x128xf32>
    %c4_50 = arith.constant 4 : index
    %c1_51 = arith.constant 1 : index
    %c0_52 = arith.constant 0 : index
    %c0_53 = arith.constant 0 : index
    %111 = vector.load %arg2[%c4_50, %c1_51, %c0_52, %c0_53] : memref<8x10x16x128xf32, #tpu.memory_space<vmem>>, vector<1x1x16x128xf32>
    %112 = vector.shape_cast %111 : vector<1x1x16x128xf32> to vector<16x128xf32>
    %113 = vector.shape_cast %112 : vector<16x128xf32> to vector<1x16x128xf32>
    %114 = vector.broadcast %16 : vector<2x1x128xf32> to vector<2x16x128xf32>
    %115 = vector.broadcast %113 : vector<1x16x128xf32> to vector<2x16x128xf32>
    %116 = arith.mulf %114, %115 : vector<2x16x128xf32>
    %117 = arith.addf %110, %116 : vector<2x16x128xf32>
    %c5_54 = arith.constant 5 : index
    %c1_55 = arith.constant 1 : index
    %c0_56 = arith.constant 0 : index
    %c0_57 = arith.constant 0 : index
    %118 = vector.load %arg2[%c5_54, %c1_55, %c0_56, %c0_57] : memref<8x10x16x128xf32, #tpu.memory_space<vmem>>, vector<1x1x16x128xf32>
    %119 = vector.shape_cast %118 : vector<1x1x16x128xf32> to vector<16x128xf32>
    %120 = vector.shape_cast %119 : vector<16x128xf32> to vector<1x16x128xf32>
    %121 = vector.broadcast %19 : vector<2x1x128xf32> to vector<2x16x128xf32>
    %122 = vector.broadcast %120 : vector<1x16x128xf32> to vector<2x16x128xf32>
    %123 = arith.mulf %121, %122 : vector<2x16x128xf32>
    %124 = arith.addf %117, %123 : vector<2x16x128xf32>
    %c6_58 = arith.constant 6 : index
    %c1_59 = arith.constant 1 : index
    %c0_60 = arith.constant 0 : index
    %c0_61 = arith.constant 0 : index
    %125 = vector.load %arg2[%c6_58, %c1_59, %c0_60, %c0_61] : memref<8x10x16x128xf32, #tpu.memory_space<vmem>>, vector<1x1x16x128xf32>
    %126 = vector.shape_cast %125 : vector<1x1x16x128xf32> to vector<16x128xf32>
    %127 = vector.shape_cast %126 : vector<16x128xf32> to vector<1x16x128xf32>
    %128 = vector.broadcast %22 : vector<2x1x128xf32> to vector<2x16x128xf32>
    %129 = vector.broadcast %127 : vector<1x16x128xf32> to vector<2x16x128xf32>
    %130 = arith.mulf %128, %129 : vector<2x16x128xf32>
    %131 = arith.addf %124, %130 : vector<2x16x128xf32>
    %c7_62 = arith.constant 7 : index
    %c1_63 = arith.constant 1 : index
    %c0_64 = arith.constant 0 : index
    %c0_65 = arith.constant 0 : index
    %132 = vector.load %arg2[%c7_62, %c1_63, %c0_64, %c0_65] : memref<8x10x16x128xf32, #tpu.memory_space<vmem>>, vector<1x1x16x128xf32>
    %133 = vector.shape_cast %132 : vector<1x1x16x128xf32> to vector<16x128xf32>
    %134 = vector.shape_cast %133 : vector<16x128xf32> to vector<1x16x128xf32>
    %135 = vector.broadcast %25 : vector<2x1x128xf32> to vector<2x16x128xf32>
    %136 = vector.broadcast %134 : vector<1x16x128xf32> to vector<2x16x128xf32>
    %137 = arith.mulf %135, %136 : vector<2x16x128xf32>
    %138 = arith.addf %131, %137 : vector<2x16x128xf32>
    %c0_66 = arith.constant 0 : index
    %c1_67 = arith.constant 1 : index
    %c0_68 = arith.constant 0 : index
    %c0_69 = arith.constant 0 : index
    %139 = vector.load %arg5[%c0_66, %c1_67, %c0_68, %c0_69] : memref<2x10x16x128xf32, #tpu.memory_space<vmem>>, vector<2x1x16x128xf32>
    %140 = vector.shape_cast %139 : vector<2x1x16x128xf32> to vector<2x16x128xf32>
    %141 = vector.shape_cast %138 : vector<2x16x128xf32> to vector<2x1x16x128xf32>
    tpu.vector_store %arg5[%c0_66, %c1_67, %c0_68, %c0_69], %141 {strides = array<i32>} : memref<2x10x16x128xf32, #tpu.memory_space<vmem>>, vector<2x1x16x128xf32>,
    %c0_70 = arith.constant 0 : index
    %c2_71 = arith.constant 2 : index
    %c0_72 = arith.constant 0 : index
    %c0_73 = arith.constant 0 : index
    %142 = vector.load %arg2[%c0_70, %c2_71, %c0_72, %c0_73] : memref<8x10x16x128xf32, #tpu.memory_space<vmem>>, vector<1x1x16x128xf32>
    %143 = vector.shape_cast %142 : vector<1x1x16x128xf32> to vector<16x128xf32>
    %144 = vector.shape_cast %143 : vector<16x128xf32> to vector<1x16x128xf32>
    %145 = vector.broadcast %4 : vector<2x1x128xf32> to vector<2x16x128xf32>
    %146 = vector.broadcast %144 : vector<1x16x128xf32> to vector<2x16x128xf32>
    %147 = arith.mulf %145, %146 : vector<2x16x128xf32>
    %c1_74 = arith.constant 1 : index
    %c2_75 = arith.constant 2 : index
    %c0_76 = arith.constant 0 : index
    %c0_77 = arith.constant 0 : index
    %148 = vector.load %arg2[%c1_74, %c2_75, %c0_76, %c0_77] : memref<8x10x16x128xf32, #tpu.memory_space<vmem>>, vector<1x1x16x128xf32>
    %149 = vector.shape_cast %148 : vector<1x1x16x128xf32> to vector<16x128xf32>
    %150 = vector.shape_cast %149 : vector<16x128xf32> to vector<1x16x128xf32>
    %151 = vector.broadcast %7 : vector<2x1x128xf32> to vector<2x16x128xf32>
    %152 = vector.broadcast %150 : vector<1x16x128xf32> to vector<2x16x128xf32>
    %153 = arith.mulf %151, %152 : vector<2x16x128xf32>
    %154 = arith.addf %147, %153 : vector<2x16x128xf32>
    %c2_78 = arith.constant 2 : index
    %c2_79 = arith.constant 2 : index
    %c0_80 = arith.constant 0 : index
    %c0_81 = arith.constant 0 : index
    %155 = vector.load %arg2[%c2_78, %c2_79, %c0_80, %c0_81] : memref<8x10x16x128xf32, #tpu.memory_space<vmem>>, vector<1x1x16x128xf32>
    %156 = vector.shape_cast %155 : vector<1x1x16x128xf32> to vector<16x128xf32>
    %157 = vector.shape_cast %156 : vector<16x128xf32> to vector<1x16x128xf32>
    %158 = vector.broadcast %10 : vector<2x1x128xf32> to vector<2x16x128xf32>
    %159 = vector.broadcast %157 : vector<1x16x128xf32> to vector<2x16x128xf32>
    %160 = arith.mulf %158, %159 : vector<2x16x128xf32>
    %161 = arith.addf %154, %160 : vector<2x16x128xf32>
    %c3_82 = arith.constant 3 : index
    %c2_83 = arith.constant 2 : index
    %c0_84 = arith.constant 0 : index
    %c0_85 = arith.constant 0 : index
    %162 = vector.load %arg2[%c3_82, %c2_83, %c0_84, %c0_85] : memref<8x10x16x128xf32, #tpu.memory_space<vmem>>, vector<1x1x16x128xf32>
    %163 = vector.shape_cast %162 : vector<1x1x16x128xf32> to vector<16x128xf32>
    %164 = vector.shape_cast %163 : vector<16x128xf32> to vector<1x16x128xf32>
    %165 = vector.broadcast %13 : vector<2x1x128xf32> to vector<2x16x128xf32>
    %166 = vector.broadcast %164 : vector<1x16x128xf32> to vector<2x16x128xf32>
    %167 = arith.mulf %165, %166 : vector<2x16x128xf32>
    %168 = arith.addf %161, %167 : vector<2x16x128xf32>
    %c4_86 = arith.constant 4 : index
    %c2_87 = arith.constant 2 : index
    %c0_88 = arith.constant 0 : index
    %c0_89 = arith.constant 0 : index
    %169 = vector.load %arg2[%c4_86, %c2_87, %c0_88, %c0_89] : memref<8x10x16x128xf32, #tpu.memory_space<vmem>>, vector<1x1x16x128xf32>
    %170 = vector.shape_cast %169 : vector<1x1x16x128xf32> to vector<16x128xf32>
    %171 = vector.shape_cast %170 : vector<16x128xf32> to vector<1x16x128xf32>
    %172 = vector.broadcast %16 : vector<2x1x128xf32> to vector<2x16x128xf32>
    %173 = vector.broadcast %171 : vector<1x16x128xf32> to vector<2x16x128xf32>
    %174 = arith.mulf %172, %173 : vector<2x16x128xf32>
    %175 = arith.addf %168, %174 : vector<2x16x128xf32>
    %c5_90 = arith.constant 5 : index
    %c2_91 = arith.constant 2 : index
    %c0_92 = arith.constant 0 : index
    %c0_93 = arith.constant 0 : index
    %176 = vector.load %arg2[%c5_90, %c2_91, %c0_92, %c0_93] : memref<8x10x16x128xf32, #tpu.memory_space<vmem>>, vector<1x1x16x128xf32>
    %177 = vector.shape_cast %176 : vector<1x1x16x128xf32> to vector<16x128xf32>
    %178 = vector.shape_cast %177 : vector<16x128xf32> to vector<1x16x128xf32>
    %179 = vector.broadcast %19 : vector<2x1x128xf32> to vector<2x16x128xf32>
    %180 = vector.broadcast %178 : vector<1x16x128xf32> to vector<2x16x128xf32>
    %181 = arith.mulf %179, %180 : vector<2x16x128xf32>
    %182 = arith.addf %175, %181 : vector<2x16x128xf32>
    %c6_94 = arith.constant 6 : index
    %c2_95 = arith.constant 2 : index
    %c0_96 = arith.constant 0 : index
    %c0_97 = arith.constant 0 : index
    %183 = vector.load %arg2[%c6_94, %c2_95, %c0_96, %c0_97] : memref<8x10x16x128xf32, #tpu.memory_space<vmem>>, vector<1x1x16x128xf32>
    %184 = vector.shape_cast %183 : vector<1x1x16x128xf32> to vector<16x128xf32>
    %185 = vector.shape_cast %184 : vector<16x128xf32> to vector<1x16x128xf32>
    %186 = vector.broadcast %22 : vector<2x1x128xf32> to vector<2x16x128xf32>
    %187 = vector.broadcast %185 : vector<1x16x128xf32> to vector<2x16x128xf32>
    %188 = arith.mulf %186, %187 : vector<2x16x128xf32>
    %189 = arith.addf %182, %188 : vector<2x16x128xf32>
    %c7_98 = arith.constant 7 : index
    %c2_99 = arith.constant 2 : index
    %c0_100 = arith.constant 0 : index
    %c0_101 = arith.constant 0 : index
    %190 = vector.load %arg2[%c7_98, %c2_99, %c0_100, %c0_101] : memref<8x10x16x128xf32, #tpu.memory_space<vmem>>, vector<1x1x16x128xf32>
    %191 = vector.shape_cast %190 : vector<1x1x16x128xf32> to vector<16x128xf32>
    %192 = vector.shape_cast %191 : vector<16x128xf32> to vector<1x16x128xf32>
    %193 = vector.broadcast %25 : vector<2x1x128xf32> to vector<2x16x128xf32>
    %194 = vector.broadcast %192 : vector<1x16x128xf32> to vector<2x16x128xf32>
    %195 = arith.mulf %193, %194 : vector<2x16x128xf32>
    %196 = arith.addf %189, %195 : vector<2x16x128xf32>
    %c0_102 = arith.constant 0 : index
    %c2_103 = arith.constant 2 : index
    %c0_104 = arith.constant 0 : index
    %c0_105 = arith.constant 0 : index
    %197 = vector.load %arg5[%c0_102, %c2_103, %c0_104, %c0_105] : memref<2x10x16x128xf32, #tpu.memory_space<vmem>>, vector<2x1x16x128xf32>
    %198 = vector.shape_cast %197 : vector<2x1x16x128xf32> to vector<2x16x128xf32>
    %199 = vector.shape_cast %196 : vector<2x16x128xf32> to vector<2x1x16x128xf32>
    tpu.vector_store %arg5[%c0_102, %c2_103, %c0_104, %c0_105], %199 {strides = array<i32>} : memref<2x10x16x128xf32, #tpu.memory_space<vmem>>, vector<2x1x16x128xf32>,
    %c0_106 = arith.constant 0 : index
    %c3_107 = arith.constant 3 : index
    %c0_108 = arith.constant 0 : index
    %c0_109 = arith.constant 0 : index
    %200 = vector.load %arg2[%c0_106, %c3_107, %c0_108, %c0_109] : memref<8x10x16x128xf32, #tpu.memory_space<vmem>>, vector<1x1x16x128xf32>
    %201 = vector.shape_cast %200 : vector<1x1x16x128xf32> to vector<16x128xf32>
    %202 = vector.shape_cast %201 : vector<16x128xf32> to vector<1x16x128xf32>
    %203 = vector.broadcast %4 : vector<2x1x128xf32> to vector<2x16x128xf32>
    %204 = vector.broadcast %202 : vector<1x16x128xf32> to vector<2x16x128xf32>
    %205 = arith.mulf %203, %204 : vector<2x16x128xf32>
    %c1_110 = arith.constant 1 : index
    %c3_111 = arith.constant 3 : index
    %c0_112 = arith.constant 0 : index
    %c0_113 = arith.constant 0 : index
    %206 = vector.load %arg2[%c1_110, %c3_111, %c0_112, %c0_113] : memref<8x10x16x128xf32, #tpu.memory_space<vmem>>, vector<1x1x16x128xf32>
    %207 = vector.shape_cast %206 : vector<1x1x16x128xf32> to vector<16x128xf32>
    %208 = vector.shape_cast %207 : vector<16x128xf32> to vector<1x16x128xf32>
    %209 = vector.broadcast %7 : vector<2x1x128xf32> to vector<2x16x128xf32>
    %210 = vector.broadcast %208 : vector<1x16x128xf32> to vector<2x16x128xf32>
    %211 = arith.mulf %209, %210 : vector<2x16x128xf32>
    %212 = arith.addf %205, %211 : vector<2x16x128xf32>
    %c2_114 = arith.constant 2 : index
    %c3_115 = arith.constant 3 : index
    %c0_116 = arith.constant 0 : index
    %c0_117 = arith.constant 0 : index
    %213 = vector.load %arg2[%c2_114, %c3_115, %c0_116, %c0_117] : memref<8x10x16x128xf32, #tpu.memory_space<vmem>>, vector<1x1x16x128xf32>
    %214 = vector.shape_cast %213 : vector<1x1x16x128xf32> to vector<16x128xf32>
    %215 = vector.shape_cast %214 : vector<16x128xf32> to vector<1x16x128xf32>
    %216 = vector.broadcast %10 : vector<2x1x128xf32> to vector<2x16x128xf32>
    %217 = vector.broadcast %215 : vector<1x16x128xf32> to vector<2x16x128xf32>
    %218 = arith.mulf %216, %217 : vector<2x16x128xf32>
    %219 = arith.addf %212, %218 : vector<2x16x128xf32>
    %c3_118 = arith.constant 3 : index
    %c3_119 = arith.constant 3 : index
    %c0_120 = arith.constant 0 : index
    %c0_121 = arith.constant 0 : index
    %220 = vector.load %arg2[%c3_118, %c3_119, %c0_120, %c0_121] : memref<8x10x16x128xf32, #tpu.memory_space<vmem>>, vector<1x1x16x128xf32>
    %221 = vector.shape_cast %220 : vector<1x1x16x128xf32> to vector<16x128xf32>
    %222 = vector.shape_cast %221 : vector<16x128xf32> to vector<1x16x128xf32>
    %223 = vector.broadcast %13 : vector<2x1x128xf32> to vector<2x16x128xf32>
    %224 = vector.broadcast %222 : vector<1x16x128xf32> to vector<2x16x128xf32>
    %225 = arith.mulf %223, %224 : vector<2x16x128xf32>
    %226 = arith.addf %219, %225 : vector<2x16x128xf32>
    %c4_122 = arith.constant 4 : index
    %c3_123 = arith.constant 3 : index
    %c0_124 = arith.constant 0 : index
    %c0_125 = arith.constant 0 : index
    %227 = vector.load %arg2[%c4_122, %c3_123, %c0_124, %c0_125] : memref<8x10x16x128xf32, #tpu.memory_space<vmem>>, vector<1x1x16x128xf32>
    %228 = vector.shape_cast %227 : vector<1x1x16x128xf32> to vector<16x128xf32>
    %229 = vector.shape_cast %228 : vector<16x128xf32> to vector<1x16x128xf32>
    %230 = vector.broadcast %16 : vector<2x1x128xf32> to vector<2x16x128xf32>
    %231 = vector.broadcast %229 : vector<1x16x128xf32> to vector<2x16x128xf32>
    %232 = arith.mulf %230, %231 : vector<2x16x128xf32>
    %233 = arith.addf %226, %232 : vector<2x16x128xf32>
    %c5_126 = arith.constant 5 : index
    %c3_127 = arith.constant 3 : index
    %c0_128 = arith.constant 0 : index
    %c0_129 = arith.constant 0 : index
    %234 = vector.load %arg2[%c5_126, %c3_127, %c0_128, %c0_129] : memref<8x10x16x128xf32, #tpu.memory_space<vmem>>, vector<1x1x16x128xf32>
    %235 = vector.shape_cast %234 : vector<1x1x16x128xf32> to vector<16x128xf32>
    %236 = vector.shape_cast %235 : vector<16x128xf32> to vector<1x16x128xf32>
    %237 = vector.broadcast %19 : vector<2x1x128xf32> to vector<2x16x128xf32>
    %238 = vector.broadcast %236 : vector<1x16x128xf32> to vector<2x16x128xf32>
    %239 = arith.mulf %237, %238 : vector<2x16x128xf32>
    %240 = arith.addf %233, %239 : vector<2x16x128xf32>
    %c6_130 = arith.constant 6 : index
    %c3_131 = arith.constant 3 : index
    %c0_132 = arith.constant 0 : index
    %c0_133 = arith.constant 0 : index
    %241 = vector.load %arg2[%c6_130, %c3_131, %c0_132, %c0_133] : memref<8x10x16x128xf32, #tpu.memory_space<vmem>>, vector<1x1x16x128xf32>
    %242 = vector.shape_cast %241 : vector<1x1x16x128xf32> to vector<16x128xf32>
    %243 = vector.shape_cast %242 : vector<16x128xf32> to vector<1x16x128xf32>
    %244 = vector.broadcast %22 : vector<2x1x128xf32> to vector<2x16x128xf32>
    %245 = vector.broadcast %243 : vector<1x16x128xf32> to vector<2x16x128xf32>
    %246 = arith.mulf %244, %245 : vector<2x16x128xf32>
    %247 = arith.addf %240, %246 : vector<2x16x128xf32>
    %c7_134 = arith.constant 7 : index
    %c3_135 = arith.constant 3 : index
    %c0_136 = arith.constant 0 : index
    %c0_137 = arith.constant 0 : index
    %248 = vector.load %arg2[%c7_134, %c3_135, %c0_136, %c0_137] : memref<8x10x16x128xf32, #tpu.memory_space<vmem>>, vector<1x1x16x128xf32>
    %249 = vector.shape_cast %248 : vector<1x1x16x128xf32> to vector<16x128xf32>
    %250 = vector.shape_cast %249 : vector<16x128xf32> to vector<1x16x128xf32>
    %251 = vector.broadcast %25 : vector<2x1x128xf32> to vector<2x16x128xf32>
    %252 = vector.broadcast %250 : vector<1x16x128xf32> to vector<2x16x128xf32>
    %253 = arith.mulf %251, %252 : vector<2x16x128xf32>
    %254 = arith.addf %247, %253 : vector<2x16x128xf32>
    %c0_138 = arith.constant 0 : index
    %c3_139 = arith.constant 3 : index
    %c0_140 = arith.constant 0 : index
    %c0_141 = arith.constant 0 : index
    %255 = vector.load %arg5[%c0_138, %c3_139, %c0_140, %c0_141] : memref<2x10x16x128xf32, #tpu.memory_space<vmem>>, vector<2x1x16x128xf32>
    %256 = vector.shape_cast %255 : vector<2x1x16x128xf32> to vector<2x16x128xf32>
    %257 = vector.shape_cast %254 : vector<2x16x128xf32> to vector<2x1x16x128xf32>
    tpu.vector_store %arg5[%c0_138, %c3_139, %c0_140, %c0_141], %257 {strides = array<i32>} : memref<2x10x16x128xf32, #tpu.memory_space<vmem>>, vector<2x1x16x128xf32>,
    %c0_142 = arith.constant 0 : index
    %c4_143 = arith.constant 4 : index
    %c0_144 = arith.constant 0 : index
    %c0_145 = arith.constant 0 : index
    %258 = vector.load %arg2[%c0_142, %c4_143, %c0_144, %c0_145] : memref<8x10x16x128xf32, #tpu.memory_space<vmem>>, vector<1x1x16x128xf32>
    %259 = vector.shape_cast %258 : vector<1x1x16x128xf32> to vector<16x128xf32>
    %260 = vector.shape_cast %259 : vector<16x128xf32> to vector<1x16x128xf32>
    %261 = vector.broadcast %4 : vector<2x1x128xf32> to vector<2x16x128xf32>
    %262 = vector.broadcast %260 : vector<1x16x128xf32> to vector<2x16x128xf32>
    %263 = arith.mulf %261, %262 : vector<2x16x128xf32>
    %c1_146 = arith.constant 1 : index
    %c4_147 = arith.constant 4 : index
    %c0_148 = arith.constant 0 : index
    %c0_149 = arith.constant 0 : index
    %264 = vector.load %arg2[%c1_146, %c4_147, %c0_148, %c0_149] : memref<8x10x16x128xf32, #tpu.memory_space<vmem>>, vector<1x1x16x128xf32>
    %265 = vector.shape_cast %264 : vector<1x1x16x128xf32> to vector<16x128xf32>
    %266 = vector.shape_cast %265 : vector<16x128xf32> to vector<1x16x128xf32>
    %267 = vector.broadcast %7 : vector<2x1x128xf32> to vector<2x16x128xf32>
    %268 = vector.broadcast %266 : vector<1x16x128xf32> to vector<2x16x128xf32>
    %269 = arith.mulf %267, %268 : vector<2x16x128xf32>
    %270 = arith.addf %263, %269 : vector<2x16x128xf32>
    %c2_150 = arith.constant 2 : index
    %c4_151 = arith.constant 4 : index
    %c0_152 = arith.constant 0 : index
    %c0_153 = arith.constant 0 : index
    %271 = vector.load %arg2[%c2_150, %c4_151, %c0_152, %c0_153] : memref<8x10x16x128xf32, #tpu.memory_space<vmem>>, vector<1x1x16x128xf32>
    %272 = vector.shape_cast %271 : vector<1x1x16x128xf32> to vector<16x128xf32>
    %273 = vector.shape_cast %272 : vector<16x128xf32> to vector<1x16x128xf32>
    %274 = vector.broadcast %10 : vector<2x1x128xf32> to vector<2x16x128xf32>
    %275 = vector.broadcast %273 : vector<1x16x128xf32> to vector<2x16x128xf32>
    %276 = arith.mulf %274, %275 : vector<2x16x128xf32>
    %277 = arith.addf %270, %276 : vector<2x16x128xf32>
    %c3_154 = arith.constant 3 : index
    %c4_155 = arith.constant 4 : index
    %c0_156 = arith.constant 0 : index
    %c0_157 = arith.constant 0 : index
    %278 = vector.load %arg2[%c3_154, %c4_155, %c0_156, %c0_157] : memref<8x10x16x128xf32, #tpu.memory_space<vmem>>, vector<1x1x16x128xf32>
    %279 = vector.shape_cast %278 : vector<1x1x16x128xf32> to vector<16x128xf32>
    %280 = vector.shape_cast %279 : vector<16x128xf32> to vector<1x16x128xf32>
    %281 = vector.broadcast %13 : vector<2x1x128xf32> to vector<2x16x128xf32>
    %282 = vector.broadcast %280 : vector<1x16x128xf32> to vector<2x16x128xf32>
    %283 = arith.mulf %281, %282 : vector<2x16x128xf32>
    %284 = arith.addf %277, %283 : vector<2x16x128xf32>
    %c4_158 = arith.constant 4 : index
    %c4_159 = arith.constant 4 : index
    %c0_160 = arith.constant 0 : index
    %c0_161 = arith.constant 0 : index
    %285 = vector.load %arg2[%c4_158, %c4_159, %c0_160, %c0_161] : memref<8x10x16x128xf32, #tpu.memory_space<vmem>>, vector<1x1x16x128xf32>
    %286 = vector.shape_cast %285 : vector<1x1x16x128xf32> to vector<16x128xf32>
    %287 = vector.shape_cast %286 : vector<16x128xf32> to vector<1x16x128xf32>
    %288 = vector.broadcast %16 : vector<2x1x128xf32> to vector<2x16x128xf32>
    %289 = vector.broadcast %287 : vector<1x16x128xf32> to vector<2x16x128xf32>
    %290 = arith.mulf %288, %289 : vector<2x16x128xf32>
    %291 = arith.addf %284, %290 : vector<2x16x128xf32>
    %c5_162 = arith.constant 5 : index
    %c4_163 = arith.constant 4 : index
    %c0_164 = arith.constant 0 : index
    %c0_165 = arith.constant 0 : index
    %292 = vector.load %arg2[%c5_162, %c4_163, %c0_164, %c0_165] : memref<8x10x16x128xf32, #tpu.memory_space<vmem>>, vector<1x1x16x128xf32>
    %293 = vector.shape_cast %292 : vector<1x1x16x128xf32> to vector<16x128xf32>
    %294 = vector.shape_cast %293 : vector<16x128xf32> to vector<1x16x128xf32>
    %295 = vector.broadcast %19 : vector<2x1x128xf32> to vector<2x16x128xf32>
    %296 = vector.broadcast %294 : vector<1x16x128xf32> to vector<2x16x128xf32>
    %297 = arith.mulf %295, %296 : vector<2x16x128xf32>
    %298 = arith.addf %291, %297 : vector<2x16x128xf32>
    %c6_166 = arith.constant 6 : index
    %c4_167 = arith.constant 4 : index
    %c0_168 = arith.constant 0 : index
    %c0_169 = arith.constant 0 : index
    %299 = vector.load %arg2[%c6_166, %c4_167, %c0_168, %c0_169] : memref<8x10x16x128xf32, #tpu.memory_space<vmem>>, vector<1x1x16x128xf32>
    %300 = vector.shape_cast %299 : vector<1x1x16x128xf32> to vector<16x128xf32>
    %301 = vector.shape_cast %300 : vector<16x128xf32> to vector<1x16x128xf32>
    %302 = vector.broadcast %22 : vector<2x1x128xf32> to vector<2x16x128xf32>
    %303 = vector.broadcast %301 : vector<1x16x128xf32> to vector<2x16x128xf32>
    %304 = arith.mulf %302, %303 : vector<2x16x128xf32>
    %305 = arith.addf %298, %304 : vector<2x16x128xf32>
    %c7_170 = arith.constant 7 : index
    %c4_171 = arith.constant 4 : index
    %c0_172 = arith.constant 0 : index
    %c0_173 = arith.constant 0 : index
    %306 = vector.load %arg2[%c7_170, %c4_171, %c0_172, %c0_173] : memref<8x10x16x128xf32, #tpu.memory_space<vmem>>, vector<1x1x16x128xf32>
    %307 = vector.shape_cast %306 : vector<1x1x16x128xf32> to vector<16x128xf32>
    %308 = vector.shape_cast %307 : vector<16x128xf32> to vector<1x16x128xf32>
    %309 = vector.broadcast %25 : vector<2x1x128xf32> to vector<2x16x128xf32>
    %310 = vector.broadcast %308 : vector<1x16x128xf32> to vector<2x16x128xf32>
    %311 = arith.mulf %309, %310 : vector<2x16x128xf32>
    %312 = arith.addf %305, %311 : vector<2x16x128xf32>
    %c0_174 = arith.constant 0 : index
    %c4_175 = arith.constant 4 : index
    %c0_176 = arith.constant 0 : index
    %c0_177 = arith.constant 0 : index
    %313 = vector.load %arg5[%c0_174, %c4_175, %c0_176, %c0_177] : memref<2x10x16x128xf32, #tpu.memory_space<vmem>>, vector<2x1x16x128xf32>
    %314 = vector.shape_cast %313 : vector<2x1x16x128xf32> to vector<2x16x128xf32>
    %315 = vector.shape_cast %312 : vector<2x16x128xf32> to vector<2x1x16x128xf32>
    tpu.vector_store %arg5[%c0_174, %c4_175, %c0_176, %c0_177], %315 {strides = array<i32>} : memref<2x10x16x128xf32, #tpu.memory_space<vmem>>, vector<2x1x16x128xf32>,
    %c0_178 = arith.constant 0 : index
    %c5_179 = arith.constant 5 : index
    %c0_180 = arith.constant 0 : index
    %c0_181 = arith.constant 0 : index
    %316 = vector.load %arg2[%c0_178, %c5_179, %c0_180, %c0_181] : memref<8x10x16x128xf32, #tpu.memory_space<vmem>>, vector<1x1x16x128xf32>
    %317 = vector.shape_cast %316 : vector<1x1x16x128xf32> to vector<16x128xf32>
    %318 = vector.shape_cast %317 : vector<16x128xf32> to vector<1x16x128xf32>
    %319 = vector.broadcast %4 : vector<2x1x128xf32> to vector<2x16x128xf32>
    %320 = vector.broadcast %318 : vector<1x16x128xf32> to vector<2x16x128xf32>
    %321 = arith.mulf %319, %320 : vector<2x16x128xf32>
    %c1_182 = arith.constant 1 : index
    %c5_183 = arith.constant 5 : index
    %c0_184 = arith.constant 0 : index
    %c0_185 = arith.constant 0 : index
    %322 = vector.load %arg2[%c1_182, %c5_183, %c0_184, %c0_185] : memref<8x10x16x128xf32, #tpu.memory_space<vmem>>, vector<1x1x16x128xf32>
    %323 = vector.shape_cast %322 : vector<1x1x16x128xf32> to vector<16x128xf32>
    %324 = vector.shape_cast %323 : vector<16x128xf32> to vector<1x16x128xf32>
    %325 = vector.broadcast %7 : vector<2x1x128xf32> to vector<2x16x128xf32>
    %326 = vector.broadcast %324 : vector<1x16x128xf32> to vector<2x16x128xf32>
    %327 = arith.mulf %325, %326 : vector<2x16x128xf32>
    %328 = arith.addf %321, %327 : vector<2x16x128xf32>
    %c2_186 = arith.constant 2 : index
    %c5_187 = arith.constant 5 : index
    %c0_188 = arith.constant 0 : index
    %c0_189 = arith.constant 0 : index
    %329 = vector.load %arg2[%c2_186, %c5_187, %c0_188, %c0_189] : memref<8x10x16x128xf32, #tpu.memory_space<vmem>>, vector<1x1x16x128xf32>
    %330 = vector.shape_cast %329 : vector<1x1x16x128xf32> to vector<16x128xf32>
    %331 = vector.shape_cast %330 : vector<16x128xf32> to vector<1x16x128xf32>
    %332 = vector.broadcast %10 : vector<2x1x128xf32> to vector<2x16x128xf32>
    %333 = vector.broadcast %331 : vector<1x16x128xf32> to vector<2x16x128xf32>
    %334 = arith.mulf %332, %333 : vector<2x16x128xf32>
    %335 = arith.addf %328, %334 : vector<2x16x128xf32>
    %c3_190 = arith.constant 3 : index
    %c5_191 = arith.constant 5 : index
    %c0_192 = arith.constant 0 : index
    %c0_193 = arith.constant 0 : index
    %336 = vector.load %arg2[%c3_190, %c5_191, %c0_192, %c0_193] : memref<8x10x16x128xf32, #tpu.memory_space<vmem>>, vector<1x1x16x128xf32>
    %337 = vector.shape_cast %336 : vector<1x1x16x128xf32> to vector<16x128xf32>
    %338 = vector.shape_cast %337 : vector<16x128xf32> to vector<1x16x128xf32>
    %339 = vector.broadcast %13 : vector<2x1x128xf32> to vector<2x16x128xf32>
    %340 = vector.broadcast %338 : vector<1x16x128xf32> to vector<2x16x128xf32>
    %341 = arith.mulf %339, %340 : vector<2x16x128xf32>
    %342 = arith.addf %335, %341 : vector<2x16x128xf32>
    %c4_194 = arith.constant 4 : index
    %c5_195 = arith.constant 5 : index
    %c0_196 = arith.constant 0 : index
    %c0_197 = arith.constant 0 : index
    %343 = vector.load %arg2[%c4_194, %c5_195, %c0_196, %c0_197] : memref<8x10x16x128xf32, #tpu.memory_space<vmem>>, vector<1x1x16x128xf32>
    %344 = vector.shape_cast %343 : vector<1x1x16x128xf32> to vector<16x128xf32>
    %345 = vector.shape_cast %344 : vector<16x128xf32> to vector<1x16x128xf32>
    %346 = vector.broadcast %16 : vector<2x1x128xf32> to vector<2x16x128xf32>
    %347 = vector.broadcast %345 : vector<1x16x128xf32> to vector<2x16x128xf32>
    %348 = arith.mulf %346, %347 : vector<2x16x128xf32>
    %349 = arith.addf %342, %348 : vector<2x16x128xf32>
    %c5_198 = arith.constant 5 : index
    %c5_199 = arith.constant 5 : index
    %c0_200 = arith.constant 0 : index
    %c0_201 = arith.constant 0 : index
    %350 = vector.load %arg2[%c5_198, %c5_199, %c0_200, %c0_201] : memref<8x10x16x128xf32, #tpu.memory_space<vmem>>, vector<1x1x16x128xf32>
    %351 = vector.shape_cast %350 : vector<1x1x16x128xf32> to vector<16x128xf32>
    %352 = vector.shape_cast %351 : vector<16x128xf32> to vector<1x16x128xf32>
    %353 = vector.broadcast %19 : vector<2x1x128xf32> to vector<2x16x128xf32>
    %354 = vector.broadcast %352 : vector<1x16x128xf32> to vector<2x16x128xf32>
    %355 = arith.mulf %353, %354 : vector<2x16x128xf32>
    %356 = arith.addf %349, %355 : vector<2x16x128xf32>
    %c6_202 = arith.constant 6 : index
    %c5_203 = arith.constant 5 : index
    %c0_204 = arith.constant 0 : index
    %c0_205 = arith.constant 0 : index
    %357 = vector.load %arg2[%c6_202, %c5_203, %c0_204, %c0_205] : memref<8x10x16x128xf32, #tpu.memory_space<vmem>>, vector<1x1x16x128xf32>
    %358 = vector.shape_cast %357 : vector<1x1x16x128xf32> to vector<16x128xf32>
    %359 = vector.shape_cast %358 : vector<16x128xf32> to vector<1x16x128xf32>
    %360 = vector.broadcast %22 : vector<2x1x128xf32> to vector<2x16x128xf32>
    %361 = vector.broadcast %359 : vector<1x16x128xf32> to vector<2x16x128xf32>
    %362 = arith.mulf %360, %361 : vector<2x16x128xf32>
    %363 = arith.addf %356, %362 : vector<2x16x128xf32>
    %c7_206 = arith.constant 7 : index
    %c5_207 = arith.constant 5 : index
    %c0_208 = arith.constant 0 : index
    %c0_209 = arith.constant 0 : index
    %364 = vector.load %arg2[%c7_206, %c5_207, %c0_208, %c0_209] : memref<8x10x16x128xf32, #tpu.memory_space<vmem>>, vector<1x1x16x128xf32>
    %365 = vector.shape_cast %364 : vector<1x1x16x128xf32> to vector<16x128xf32>
    %366 = vector.shape_cast %365 : vector<16x128xf32> to vector<1x16x128xf32>
    %367 = vector.broadcast %25 : vector<2x1x128xf32> to vector<2x16x128xf32>
    %368 = vector.broadcast %366 : vector<1x16x128xf32> to vector<2x16x128xf32>
    %369 = arith.mulf %367, %368 : vector<2x16x128xf32>
    %370 = arith.addf %363, %369 : vector<2x16x128xf32>
    %c0_210 = arith.constant 0 : index
    %c5_211 = arith.constant 5 : index
    %c0_212 = arith.constant 0 : index
    %c0_213 = arith.constant 0 : index
    %371 = vector.load %arg5[%c0_210, %c5_211, %c0_212, %c0_213] : memref<2x10x16x128xf32, #tpu.memory_space<vmem>>, vector<2x1x16x128xf32>
    %372 = vector.shape_cast %371 : vector<2x1x16x128xf32> to vector<2x16x128xf32>
    %373 = vector.shape_cast %370 : vector<2x16x128xf32> to vector<2x1x16x128xf32>
    tpu.vector_store %arg5[%c0_210, %c5_211, %c0_212, %c0_213], %373 {strides = array<i32>} : memref<2x10x16x128xf32, #tpu.memory_space<vmem>>, vector<2x1x16x128xf32>,
    %c0_214 = arith.constant 0 : index
    %c6_215 = arith.constant 6 : index
    %c0_216 = arith.constant 0 : index
    %c0_217 = arith.constant 0 : index
    %374 = vector.load %arg2[%c0_214, %c6_215, %c0_216, %c0_217] : memref<8x10x16x128xf32, #tpu.memory_space<vmem>>, vector<1x1x16x128xf32>
    %375 = vector.shape_cast %374 : vector<1x1x16x128xf32> to vector<16x128xf32>
    %376 = vector.shape_cast %375 : vector<16x128xf32> to vector<1x16x128xf32>
    %377 = vector.broadcast %4 : vector<2x1x128xf32> to vector<2x16x128xf32>
    %378 = vector.broadcast %376 : vector<1x16x128xf32> to vector<2x16x128xf32>
    %379 = arith.mulf %377, %378 : vector<2x16x128xf32>
    %c1_218 = arith.constant 1 : index
    %c6_219 = arith.constant 6 : index
    %c0_220 = arith.constant 0 : index
    %c0_221 = arith.constant 0 : index
    %380 = vector.load %arg2[%c1_218, %c6_219, %c0_220, %c0_221] : memref<8x10x16x128xf32, #tpu.memory_space<vmem>>, vector<1x1x16x128xf32>
    %381 = vector.shape_cast %380 : vector<1x1x16x128xf32> to vector<16x128xf32>
    %382 = vector.shape_cast %381 : vector<16x128xf32> to vector<1x16x128xf32>
    %383 = vector.broadcast %7 : vector<2x1x128xf32> to vector<2x16x128xf32>
    %384 = vector.broadcast %382 : vector<1x16x128xf32> to vector<2x16x128xf32>
    %385 = arith.mulf %383, %384 : vector<2x16x128xf32>
    %386 = arith.addf %379, %385 : vector<2x16x128xf32>
    %c2_222 = arith.constant 2 : index
    %c6_223 = arith.constant 6 : index
    %c0_224 = arith.constant 0 : index
    %c0_225 = arith.constant 0 : index
    %387 = vector.load %arg2[%c2_222, %c6_223, %c0_224, %c0_225] : memref<8x10x16x128xf32, #tpu.memory_space<vmem>>, vector<1x1x16x128xf32>
    %388 = vector.shape_cast %387 : vector<1x1x16x128xf32> to vector<16x128xf32>
    %389 = vector.shape_cast %388 : vector<16x128xf32> to vector<1x16x128xf32>
    %390 = vector.broadcast %10 : vector<2x1x128xf32> to vector<2x16x128xf32>
    %391 = vector.broadcast %389 : vector<1x16x128xf32> to vector<2x16x128xf32>
    %392 = arith.mulf %390, %391 : vector<2x16x128xf32>
    %393 = arith.addf %386, %392 : vector<2x16x128xf32>
    %c3_226 = arith.constant 3 : index
    %c6_227 = arith.constant 6 : index
    %c0_228 = arith.constant 0 : index
    %c0_229 = arith.constant 0 : index
    %394 = vector.load %arg2[%c3_226, %c6_227, %c0_228, %c0_229] : memref<8x10x16x128xf32, #tpu.memory_space<vmem>>, vector<1x1x16x128xf32>
    %395 = vector.shape_cast %394 : vector<1x1x16x128xf32> to vector<16x128xf32>
    %396 = vector.shape_cast %395 : vector<16x128xf32> to vector<1x16x128xf32>
    %397 = vector.broadcast %13 : vector<2x1x128xf32> to vector<2x16x128xf32>
    %398 = vector.broadcast %396 : vector<1x16x128xf32> to vector<2x16x128xf32>
    %399 = arith.mulf %397, %398 : vector<2x16x128xf32>
    %400 = arith.addf %393, %399 : vector<2x16x128xf32>
    %c4_230 = arith.constant 4 : index
    %c6_231 = arith.constant 6 : index
    %c0_232 = arith.constant 0 : index
    %c0_233 = arith.constant 0 : index
    %401 = vector.load %arg2[%c4_230, %c6_231, %c0_232, %c0_233] : memref<8x10x16x128xf32, #tpu.memory_space<vmem>>, vector<1x1x16x128xf32>
    %402 = vector.shape_cast %401 : vector<1x1x16x128xf32> to vector<16x128xf32>
    %403 = vector.shape_cast %402 : vector<16x128xf32> to vector<1x16x128xf32>
    %404 = vector.broadcast %16 : vector<2x1x128xf32> to vector<2x16x128xf32>
    %405 = vector.broadcast %403 : vector<1x16x128xf32> to vector<2x16x128xf32>
    %406 = arith.mulf %404, %405 : vector<2x16x128xf32>
    %407 = arith.addf %400, %406 : vector<2x16x128xf32>
    %c5_234 = arith.constant 5 : index
    %c6_235 = arith.constant 6 : index
    %c0_236 = arith.constant 0 : index
    %c0_237 = arith.constant 0 : index
    %408 = vector.load %arg2[%c5_234, %c6_235, %c0_236, %c0_237] : memref<8x10x16x128xf32, #tpu.memory_space<vmem>>, vector<1x1x16x128xf32>
    %409 = vector.shape_cast %408 : vector<1x1x16x128xf32> to vector<16x128xf32>
    %410 = vector.shape_cast %409 : vector<16x128xf32> to vector<1x16x128xf32>
    %411 = vector.broadcast %19 : vector<2x1x128xf32> to vector<2x16x128xf32>
    %412 = vector.broadcast %410 : vector<1x16x128xf32> to vector<2x16x128xf32>
    %413 = arith.mulf %411, %412 : vector<2x16x128xf32>
    %414 = arith.addf %407, %413 : vector<2x16x128xf32>
    %c6_238 = arith.constant 6 : index
    %c6_239 = arith.constant 6 : index
    %c0_240 = arith.constant 0 : index
    %c0_241 = arith.constant 0 : index
    %415 = vector.load %arg2[%c6_238, %c6_239, %c0_240, %c0_241] : memref<8x10x16x128xf32, #tpu.memory_space<vmem>>, vector<1x1x16x128xf32>
    %416 = vector.shape_cast %415 : vector<1x1x16x128xf32> to vector<16x128xf32>
    %417 = vector.shape_cast %416 : vector<16x128xf32> to vector<1x16x128xf32>
    %418 = vector.broadcast %22 : vector<2x1x128xf32> to vector<2x16x128xf32>
    %419 = vector.broadcast %417 : vector<1x16x128xf32> to vector<2x16x128xf32>
    %420 = arith.mulf %418, %419 : vector<2x16x128xf32>
    %421 = arith.addf %414, %420 : vector<2x16x128xf32>
    %c7_242 = arith.constant 7 : index
    %c6_243 = arith.constant 6 : index
    %c0_244 = arith.constant 0 : index
    %c0_245 = arith.constant 0 : index
    %422 = vector.load %arg2[%c7_242, %c6_243, %c0_244, %c0_245] : memref<8x10x16x128xf32, #tpu.memory_space<vmem>>, vector<1x1x16x128xf32>
    %423 = vector.shape_cast %422 : vector<1x1x16x128xf32> to vector<16x128xf32>
    %424 = vector.shape_cast %423 : vector<16x128xf32> to vector<1x16x128xf32>
    %425 = vector.broadcast %25 : vector<2x1x128xf32> to vector<2x16x128xf32>
    %426 = vector.broadcast %424 : vector<1x16x128xf32> to vector<2x16x128xf32>
    %427 = arith.mulf %425, %426 : vector<2x16x128xf32>
    %428 = arith.addf %421, %427 : vector<2x16x128xf32>
    %c0_246 = arith.constant 0 : index
    %c6_247 = arith.constant 6 : index
    %c0_248 = arith.constant 0 : index
    %c0_249 = arith.constant 0 : index
    %429 = vector.load %arg5[%c0_246, %c6_247, %c0_248, %c0_249] : memref<2x10x16x128xf32, #tpu.memory_space<vmem>>, vector<2x1x16x128xf32>
    %430 = vector.shape_cast %429 : vector<2x1x16x128xf32> to vector<2x16x128xf32>
    %431 = vector.shape_cast %428 : vector<2x16x128xf32> to vector<2x1x16x128xf32>
    tpu.vector_store %arg5[%c0_246, %c6_247, %c0_248, %c0_249], %431 {strides = array<i32>} : memref<2x10x16x128xf32, #tpu.memory_space<vmem>>, vector<2x1x16x128xf32>,
    %c0_250 = arith.constant 0 : index
    %c7_251 = arith.constant 7 : index
    %c0_252 = arith.constant 0 : index
    %c0_253 = arith.constant 0 : index
    %432 = vector.load %arg2[%c0_250, %c7_251, %c0_252, %c0_253] : memref<8x10x16x128xf32, #tpu.memory_space<vmem>>, vector<1x1x16x128xf32>
    %433 = vector.shape_cast %432 : vector<1x1x16x128xf32> to vector<16x128xf32>
    %434 = vector.shape_cast %433 : vector<16x128xf32> to vector<1x16x128xf32>
    %435 = vector.broadcast %4 : vector<2x1x128xf32> to vector<2x16x128xf32>
    %436 = vector.broadcast %434 : vector<1x16x128xf32> to vector<2x16x128xf32>
    %437 = arith.mulf %435, %436 : vector<2x16x128xf32>
    %c1_254 = arith.constant 1 : index
    %c7_255 = arith.constant 7 : index
    %c0_256 = arith.constant 0 : index
    %c0_257 = arith.constant 0 : index
    %438 = vector.load %arg2[%c1_254, %c7_255, %c0_256, %c0_257] : memref<8x10x16x128xf32, #tpu.memory_space<vmem>>, vector<1x1x16x128xf32>
    %439 = vector.shape_cast %438 : vector<1x1x16x128xf32> to vector<16x128xf32>
    %440 = vector.shape_cast %439 : vector<16x128xf32> to vector<1x16x128xf32>
    %441 = vector.broadcast %7 : vector<2x1x128xf32> to vector<2x16x128xf32>
    %442 = vector.broadcast %440 : vector<1x16x128xf32> to vector<2x16x128xf32>
    %443 = arith.mulf %441, %442 : vector<2x16x128xf32>
    %444 = arith.addf %437, %443 : vector<2x16x128xf32>
    %c2_258 = arith.constant 2 : index
    %c7_259 = arith.constant 7 : index
    %c0_260 = arith.constant 0 : index
    %c0_261 = arith.constant 0 : index
    %445 = vector.load %arg2[%c2_258, %c7_259, %c0_260, %c0_261] : memref<8x10x16x128xf32, #tpu.memory_space<vmem>>, vector<1x1x16x128xf32>
    %446 = vector.shape_cast %445 : vector<1x1x16x128xf32> to vector<16x128xf32>
    %447 = vector.shape_cast %446 : vector<16x128xf32> to vector<1x16x128xf32>
    %448 = vector.broadcast %10 : vector<2x1x128xf32> to vector<2x16x128xf32>
    %449 = vector.broadcast %447 : vector<1x16x128xf32> to vector<2x16x128xf32>
    %450 = arith.mulf %448, %449 : vector<2x16x128xf32>
    %451 = arith.addf %444, %450 : vector<2x16x128xf32>
    %c3_262 = arith.constant 3 : index
    %c7_263 = arith.constant 7 : index
    %c0_264 = arith.constant 0 : index
    %c0_265 = arith.constant 0 : index
    %452 = vector.load %arg2[%c3_262, %c7_263, %c0_264, %c0_265] : memref<8x10x16x128xf32, #tpu.memory_space<vmem>>, vector<1x1x16x128xf32>
    %453 = vector.shape_cast %452 : vector<1x1x16x128xf32> to vector<16x128xf32>
    %454 = vector.shape_cast %453 : vector<16x128xf32> to vector<1x16x128xf32>
    %455 = vector.broadcast %13 : vector<2x1x128xf32> to vector<2x16x128xf32>
    %456 = vector.broadcast %454 : vector<1x16x128xf32> to vector<2x16x128xf32>
    %457 = arith.mulf %455, %456 : vector<2x16x128xf32>
    %458 = arith.addf %451, %457 : vector<2x16x128xf32>
    %c4_266 = arith.constant 4 : index
    %c7_267 = arith.constant 7 : index
    %c0_268 = arith.constant 0 : index
    %c0_269 = arith.constant 0 : index
    %459 = vector.load %arg2[%c4_266, %c7_267, %c0_268, %c0_269] : memref<8x10x16x128xf32, #tpu.memory_space<vmem>>, vector<1x1x16x128xf32>
    %460 = vector.shape_cast %459 : vector<1x1x16x128xf32> to vector<16x128xf32>
    %461 = vector.shape_cast %460 : vector<16x128xf32> to vector<1x16x128xf32>
    %462 = vector.broadcast %16 : vector<2x1x128xf32> to vector<2x16x128xf32>
    %463 = vector.broadcast %461 : vector<1x16x128xf32> to vector<2x16x128xf32>
    %464 = arith.mulf %462, %463 : vector<2x16x128xf32>
    %465 = arith.addf %458, %464 : vector<2x16x128xf32>
    %c5_270 = arith.constant 5 : index
    %c7_271 = arith.constant 7 : index
    %c0_272 = arith.constant 0 : index
    %c0_273 = arith.constant 0 : index
    %466 = vector.load %arg2[%c5_270, %c7_271, %c0_272, %c0_273] : memref<8x10x16x128xf32, #tpu.memory_space<vmem>>, vector<1x1x16x128xf32>
    %467 = vector.shape_cast %466 : vector<1x1x16x128xf32> to vector<16x128xf32>
    %468 = vector.shape_cast %467 : vector<16x128xf32> to vector<1x16x128xf32>
    %469 = vector.broadcast %19 : vector<2x1x128xf32> to vector<2x16x128xf32>
    %470 = vector.broadcast %468 : vector<1x16x128xf32> to vector<2x16x128xf32>
    %471 = arith.mulf %469, %470 : vector<2x16x128xf32>
    %472 = arith.addf %465, %471 : vector<2x16x128xf32>
    %c6_274 = arith.constant 6 : index
    %c7_275 = arith.constant 7 : index
    %c0_276 = arith.constant 0 : index
    %c0_277 = arith.constant 0 : index
    %473 = vector.load %arg2[%c6_274, %c7_275, %c0_276, %c0_277] : memref<8x10x16x128xf32, #tpu.memory_space<vmem>>, vector<1x1x16x128xf32>
    %474 = vector.shape_cast %473 : vector<1x1x16x128xf32> to vector<16x128xf32>
    %475 = vector.shape_cast %474 : vector<16x128xf32> to vector<1x16x128xf32>
    %476 = vector.broadcast %22 : vector<2x1x128xf32> to vector<2x16x128xf32>
    %477 = vector.broadcast %475 : vector<1x16x128xf32> to vector<2x16x128xf32>
    %478 = arith.mulf %476, %477 : vector<2x16x128xf32>
    %479 = arith.addf %472, %478 : vector<2x16x128xf32>
    %c7_278 = arith.constant 7 : index
    %c7_279 = arith.constant 7 : index
    %c0_280 = arith.constant 0 : index
    %c0_281 = arith.constant 0 : index
    %480 = vector.load %arg2[%c7_278, %c7_279, %c0_280, %c0_281] : memref<8x10x16x128xf32, #tpu.memory_space<vmem>>, vector<1x1x16x128xf32>
    %481 = vector.shape_cast %480 : vector<1x1x16x128xf32> to vector<16x128xf32>
    %482 = vector.shape_cast %481 : vector<16x128xf32> to vector<1x16x128xf32>
    %483 = vector.broadcast %25 : vector<2x1x128xf32> to vector<2x16x128xf32>
    %484 = vector.broadcast %482 : vector<1x16x128xf32> to vector<2x16x128xf32>
    %485 = arith.mulf %483, %484 : vector<2x16x128xf32>
    %486 = arith.addf %479, %485 : vector<2x16x128xf32>
    %c0_282 = arith.constant 0 : index
    %c7_283 = arith.constant 7 : index
    %c0_284 = arith.constant 0 : index
    %c0_285 = arith.constant 0 : index
    %487 = vector.load %arg5[%c0_282, %c7_283, %c0_284, %c0_285] : memref<2x10x16x128xf32, #tpu.memory_space<vmem>>, vector<2x1x16x128xf32>
    %488 = vector.shape_cast %487 : vector<2x1x16x128xf32> to vector<2x16x128xf32>
    %489 = vector.shape_cast %486 : vector<2x16x128xf32> to vector<2x1x16x128xf32>
    tpu.vector_store %arg5[%c0_282, %c7_283, %c0_284, %c0_285], %489 {strides = array<i32>} : memref<2x10x16x128xf32, #tpu.memory_space<vmem>>, vector<2x1x16x128xf32>,
    %c0_286 = arith.constant 0 : index
    %c8 = arith.constant 8 : index
    %c0_287 = arith.constant 0 : index
    %c0_288 = arith.constant 0 : index
    %490 = vector.load %arg2[%c0_286, %c8, %c0_287, %c0_288] : memref<8x10x16x128xf32, #tpu.memory_space<vmem>>, vector<1x1x16x128xf32>
    %491 = vector.shape_cast %490 : vector<1x1x16x128xf32> to vector<16x128xf32>
    %492 = vector.shape_cast %491 : vector<16x128xf32> to vector<1x16x128xf32>
    %493 = vector.broadcast %4 : vector<2x1x128xf32> to vector<2x16x128xf32>
    %494 = vector.broadcast %492 : vector<1x16x128xf32> to vector<2x16x128xf32>
    %495 = arith.mulf %493, %494 : vector<2x16x128xf32>
    %c1_289 = arith.constant 1 : index
    %c8_290 = arith.constant 8 : index
    %c0_291 = arith.constant 0 : index
    %c0_292 = arith.constant 0 : index
    %496 = vector.load %arg2[%c1_289, %c8_290, %c0_291, %c0_292] : memref<8x10x16x128xf32, #tpu.memory_space<vmem>>, vector<1x1x16x128xf32>
    %497 = vector.shape_cast %496 : vector<1x1x16x128xf32> to vector<16x128xf32>
    %498 = vector.shape_cast %497 : vector<16x128xf32> to vector<1x16x128xf32>
    %499 = vector.broadcast %7 : vector<2x1x128xf32> to vector<2x16x128xf32>
    %500 = vector.broadcast %498 : vector<1x16x128xf32> to vector<2x16x128xf32>
    %501 = arith.mulf %499, %500 : vector<2x16x128xf32>
    %502 = arith.addf %495, %501 : vector<2x16x128xf32>
    %c2_293 = arith.constant 2 : index
    %c8_294 = arith.constant 8 : index
    %c0_295 = arith.constant 0 : index
    %c0_296 = arith.constant 0 : index
    %503 = vector.load %arg2[%c2_293, %c8_294, %c0_295, %c0_296] : memref<8x10x16x128xf32, #tpu.memory_space<vmem>>, vector<1x1x16x128xf32>
    %504 = vector.shape_cast %503 : vector<1x1x16x128xf32> to vector<16x128xf32>
    %505 = vector.shape_cast %504 : vector<16x128xf32> to vector<1x16x128xf32>
    %506 = vector.broadcast %10 : vector<2x1x128xf32> to vector<2x16x128xf32>
    %507 = vector.broadcast %505 : vector<1x16x128xf32> to vector<2x16x128xf32>
    %508 = arith.mulf %506, %507 : vector<2x16x128xf32>
    %509 = arith.addf %502, %508 : vector<2x16x128xf32>
    %c3_297 = arith.constant 3 : index
    %c8_298 = arith.constant 8 : index
    %c0_299 = arith.constant 0 : index
    %c0_300 = arith.constant 0 : index
    %510 = vector.load %arg2[%c3_297, %c8_298, %c0_299, %c0_300] : memref<8x10x16x128xf32, #tpu.memory_space<vmem>>, vector<1x1x16x128xf32>
    %511 = vector.shape_cast %510 : vector<1x1x16x128xf32> to vector<16x128xf32>
    %512 = vector.shape_cast %511 : vector<16x128xf32> to vector<1x16x128xf32>
    %513 = vector.broadcast %13 : vector<2x1x128xf32> to vector<2x16x128xf32>
    %514 = vector.broadcast %512 : vector<1x16x128xf32> to vector<2x16x128xf32>
    %515 = arith.mulf %513, %514 : vector<2x16x128xf32>
    %516 = arith.addf %509, %515 : vector<2x16x128xf32>
    %c4_301 = arith.constant 4 : index
    %c8_302 = arith.constant 8 : index
    %c0_303 = arith.constant 0 : index
    %c0_304 = arith.constant 0 : index
    %517 = vector.load %arg2[%c4_301, %c8_302, %c0_303, %c0_304] : memref<8x10x16x128xf32, #tpu.memory_space<vmem>>, vector<1x1x16x128xf32>
    %518 = vector.shape_cast %517 : vector<1x1x16x128xf32> to vector<16x128xf32>
    %519 = vector.shape_cast %518 : vector<16x128xf32> to vector<1x16x128xf32>
    %520 = vector.broadcast %16 : vector<2x1x128xf32> to vector<2x16x128xf32>
    %521 = vector.broadcast %519 : vector<1x16x128xf32> to vector<2x16x128xf32>
    %522 = arith.mulf %520, %521 : vector<2x16x128xf32>
    %523 = arith.addf %516, %522 : vector<2x16x128xf32>
    %c5_305 = arith.constant 5 : index
    %c8_306 = arith.constant 8 : index
    %c0_307 = arith.constant 0 : index
    %c0_308 = arith.constant 0 : index
    %524 = vector.load %arg2[%c5_305, %c8_306, %c0_307, %c0_308] : memref<8x10x16x128xf32, #tpu.memory_space<vmem>>, vector<1x1x16x128xf32>
    %525 = vector.shape_cast %524 : vector<1x1x16x128xf32> to vector<16x128xf32>
    %526 = vector.shape_cast %525 : vector<16x128xf32> to vector<1x16x128xf32>
    %527 = vector.broadcast %19 : vector<2x1x128xf32> to vector<2x16x128xf32>
    %528 = vector.broadcast %526 : vector<1x16x128xf32> to vector<2x16x128xf32>
    %529 = arith.mulf %527, %528 : vector<2x16x128xf32>
    %530 = arith.addf %523, %529 : vector<2x16x128xf32>
    %c6_309 = arith.constant 6 : index
    %c8_310 = arith.constant 8 : index
    %c0_311 = arith.constant 0 : index
    %c0_312 = arith.constant 0 : index
    %531 = vector.load %arg2[%c6_309, %c8_310, %c0_311, %c0_312] : memref<8x10x16x128xf32, #tpu.memory_space<vmem>>, vector<1x1x16x128xf32>
    %532 = vector.shape_cast %531 : vector<1x1x16x128xf32> to vector<16x128xf32>
    %533 = vector.shape_cast %532 : vector<16x128xf32> to vector<1x16x128xf32>
    %534 = vector.broadcast %22 : vector<2x1x128xf32> to vector<2x16x128xf32>
    %535 = vector.broadcast %533 : vector<1x16x128xf32> to vector<2x16x128xf32>
    %536 = arith.mulf %534, %535 : vector<2x16x128xf32>
    %537 = arith.addf %530, %536 : vector<2x16x128xf32>
    %c7_313 = arith.constant 7 : index
    %c8_314 = arith.constant 8 : index
    %c0_315 = arith.constant 0 : index
    %c0_316 = arith.constant 0 : index
    %538 = vector.load %arg2[%c7_313, %c8_314, %c0_315, %c0_316] : memref<8x10x16x128xf32, #tpu.memory_space<vmem>>, vector<1x1x16x128xf32>
    %539 = vector.shape_cast %538 : vector<1x1x16x128xf32> to vector<16x128xf32>
    %540 = vector.shape_cast %539 : vector<16x128xf32> to vector<1x16x128xf32>
    %541 = vector.broadcast %25 : vector<2x1x128xf32> to vector<2x16x128xf32>
    %542 = vector.broadcast %540 : vector<1x16x128xf32> to vector<2x16x128xf32>
    %543 = arith.mulf %541, %542 : vector<2x16x128xf32>
    %544 = arith.addf %537, %543 : vector<2x16x128xf32>
    %c0_317 = arith.constant 0 : index
    %c8_318 = arith.constant 8 : index
    %c0_319 = arith.constant 0 : index
    %c0_320 = arith.constant 0 : index
    %545 = vector.load %arg5[%c0_317, %c8_318, %c0_319, %c0_320] : memref<2x10x16x128xf32, #tpu.memory_space<vmem>>, vector<2x1x16x128xf32>
    %546 = vector.shape_cast %545 : vector<2x1x16x128xf32> to vector<2x16x128xf32>
    %547 = vector.shape_cast %544 : vector<2x16x128xf32> to vector<2x1x16x128xf32>
    tpu.vector_store %arg5[%c0_317, %c8_318, %c0_319, %c0_320], %547 {strides = array<i32>} : memref<2x10x16x128xf32, #tpu.memory_space<vmem>>, vector<2x1x16x128xf32>,
    %c0_321 = arith.constant 0 : index
    %c9 = arith.constant 9 : index
    %c0_322 = arith.constant 0 : index
    %c0_323 = arith.constant 0 : index
    %548 = vector.load %arg2[%c0_321, %c9, %c0_322, %c0_323] : memref<8x10x16x128xf32, #tpu.memory_space<vmem>>, vector<1x1x16x128xf32>
    %549 = vector.shape_cast %548 : vector<1x1x16x128xf32> to vector<16x128xf32>
    %550 = vector.shape_cast %549 : vector<16x128xf32> to vector<1x16x128xf32>
    %551 = vector.broadcast %4 : vector<2x1x128xf32> to vector<2x16x128xf32>
    %552 = vector.broadcast %550 : vector<1x16x128xf32> to vector<2x16x128xf32>
    %553 = arith.mulf %551, %552 : vector<2x16x128xf32>
    %c1_324 = arith.constant 1 : index
    %c9_325 = arith.constant 9 : index
    %c0_326 = arith.constant 0 : index
    %c0_327 = arith.constant 0 : index
    %554 = vector.load %arg2[%c1_324, %c9_325, %c0_326, %c0_327] : memref<8x10x16x128xf32, #tpu.memory_space<vmem>>, vector<1x1x16x128xf32>
    %555 = vector.shape_cast %554 : vector<1x1x16x128xf32> to vector<16x128xf32>
    %556 = vector.shape_cast %555 : vector<16x128xf32> to vector<1x16x128xf32>
    %557 = vector.broadcast %7 : vector<2x1x128xf32> to vector<2x16x128xf32>
    %558 = vector.broadcast %556 : vector<1x16x128xf32> to vector<2x16x128xf32>
    %559 = arith.mulf %557, %558 : vector<2x16x128xf32>
    %560 = arith.addf %553, %559 : vector<2x16x128xf32>
    %c2_328 = arith.constant 2 : index
    %c9_329 = arith.constant 9 : index
    %c0_330 = arith.constant 0 : index
    %c0_331 = arith.constant 0 : index
    %561 = vector.load %arg2[%c2_328, %c9_329, %c0_330, %c0_331] : memref<8x10x16x128xf32, #tpu.memory_space<vmem>>, vector<1x1x16x128xf32>
    %562 = vector.shape_cast %561 : vector<1x1x16x128xf32> to vector<16x128xf32>
    %563 = vector.shape_cast %562 : vector<16x128xf32> to vector<1x16x128xf32>
    %564 = vector.broadcast %10 : vector<2x1x128xf32> to vector<2x16x128xf32>
    %565 = vector.broadcast %563 : vector<1x16x128xf32> to vector<2x16x128xf32>
    %566 = arith.mulf %564, %565 : vector<2x16x128xf32>
    %567 = arith.addf %560, %566 : vector<2x16x128xf32>
    %c3_332 = arith.constant 3 : index
    %c9_333 = arith.constant 9 : index
    %c0_334 = arith.constant 0 : index
    %c0_335 = arith.constant 0 : index
    %568 = vector.load %arg2[%c3_332, %c9_333, %c0_334, %c0_335] : memref<8x10x16x128xf32, #tpu.memory_space<vmem>>, vector<1x1x16x128xf32>
    %569 = vector.shape_cast %568 : vector<1x1x16x128xf32> to vector<16x128xf32>
    %570 = vector.shape_cast %569 : vector<16x128xf32> to vector<1x16x128xf32>
    %571 = vector.broadcast %13 : vector<2x1x128xf32> to vector<2x16x128xf32>
    %572 = vector.broadcast %570 : vector<1x16x128xf32> to vector<2x16x128xf32>
    %573 = arith.mulf %571, %572 : vector<2x16x128xf32>
    %574 = arith.addf %567, %573 : vector<2x16x128xf32>
    %c4_336 = arith.constant 4 : index
    %c9_337 = arith.constant 9 : index
    %c0_338 = arith.constant 0 : index
    %c0_339 = arith.constant 0 : index
    %575 = vector.load %arg2[%c4_336, %c9_337, %c0_338, %c0_339] : memref<8x10x16x128xf32, #tpu.memory_space<vmem>>, vector<1x1x16x128xf32>
    %576 = vector.shape_cast %575 : vector<1x1x16x128xf32> to vector<16x128xf32>
    %577 = vector.shape_cast %576 : vector<16x128xf32> to vector<1x16x128xf32>
    %578 = vector.broadcast %16 : vector<2x1x128xf32> to vector<2x16x128xf32>
    %579 = vector.broadcast %577 : vector<1x16x128xf32> to vector<2x16x128xf32>
    %580 = arith.mulf %578, %579 : vector<2x16x128xf32>
    %581 = arith.addf %574, %580 : vector<2x16x128xf32>
    %c5_340 = arith.constant 5 : index
    %c9_341 = arith.constant 9 : index
    %c0_342 = arith.constant 0 : index
    %c0_343 = arith.constant 0 : index
    %582 = vector.load %arg2[%c5_340, %c9_341, %c0_342, %c0_343] : memref<8x10x16x128xf32, #tpu.memory_space<vmem>>, vector<1x1x16x128xf32>
    %583 = vector.shape_cast %582 : vector<1x1x16x128xf32> to vector<16x128xf32>
    %584 = vector.shape_cast %583 : vector<16x128xf32> to vector<1x16x128xf32>
    %585 = vector.broadcast %19 : vector<2x1x128xf32> to vector<2x16x128xf32>
    %586 = vector.broadcast %584 : vector<1x16x128xf32> to vector<2x16x128xf32>
    %587 = arith.mulf %585, %586 : vector<2x16x128xf32>
    %588 = arith.addf %581, %587 : vector<2x16x128xf32>
    %c6_344 = arith.constant 6 : index
    %c9_345 = arith.constant 9 : index
    %c0_346 = arith.constant 0 : index
    %c0_347 = arith.constant 0 : index
    %589 = vector.load %arg2[%c6_344, %c9_345, %c0_346, %c0_347] : memref<8x10x16x128xf32, #tpu.memory_space<vmem>>, vector<1x1x16x128xf32>
    %590 = vector.shape_cast %589 : vector<1x1x16x128xf32> to vector<16x128xf32>
    %591 = vector.shape_cast %590 : vector<16x128xf32> to vector<1x16x128xf32>
    %592 = vector.broadcast %22 : vector<2x1x128xf32> to vector<2x16x128xf32>
    %593 = vector.broadcast %591 : vector<1x16x128xf32> to vector<2x16x128xf32>
    %594 = arith.mulf %592, %593 : vector<2x16x128xf32>
    %595 = arith.addf %588, %594 : vector<2x16x128xf32>
    %c7_348 = arith.constant 7 : index
    %c9_349 = arith.constant 9 : index
    %c0_350 = arith.constant 0 : index
    %c0_351 = arith.constant 0 : index
    %596 = vector.load %arg2[%c7_348, %c9_349, %c0_350, %c0_351] : memref<8x10x16x128xf32, #tpu.memory_space<vmem>>, vector<1x1x16x128xf32>
    %597 = vector.shape_cast %596 : vector<1x1x16x128xf32> to vector<16x128xf32>
    %598 = vector.shape_cast %597 : vector<16x128xf32> to vector<1x16x128xf32>
    %599 = vector.broadcast %25 : vector<2x1x128xf32> to vector<2x16x128xf32>
    %600 = vector.broadcast %598 : vector<1x16x128xf32> to vector<2x16x128xf32>
    %601 = arith.mulf %599, %600 : vector<2x16x128xf32>
    %602 = arith.addf %595, %601 : vector<2x16x128xf32>
    %c0_352 = arith.constant 0 : index
    %c9_353 = arith.constant 9 : index
    %c0_354 = arith.constant 0 : index
    %c0_355 = arith.constant 0 : index
    %603 = vector.load %arg5[%c0_352, %c9_353, %c0_354, %c0_355] : memref<2x10x16x128xf32, #tpu.memory_space<vmem>>, vector<2x1x16x128xf32>
    %604 = vector.shape_cast %603 : vector<2x1x16x128xf32> to vector<2x16x128xf32>
    %605 = vector.shape_cast %602 : vector<2x16x128xf32> to vector<2x1x16x128xf32>
    tpu.vector_store %arg5[%c0_352, %c9_353, %c0_354, %c0_355], %605 {strides = array<i32>} : memref<2x10x16x128xf32, #tpu.memory_space<vmem>>, vector<2x1x16x128xf32>,
    %cst = arith.constant 1.000000e-01 : f32
    %606 = vector.broadcast %cst : f32 to vector<2x10x128xf32>
    %c0_356 = arith.constant 0 : index
    %c0_357 = arith.constant 0 : index
    %c0_358 = arith.constant 0 : index
    %c0_359 = arith.constant 0 : index
    %607 = vector.load %arg5[%c0_356, %c0_357, %c0_358, %c0_359] : memref<2x10x16x128xf32, #tpu.memory_space<vmem>>, vector<2x1x16x128xf32>
    %608 = vector.shape_cast %607 : vector<2x1x16x128xf32> to vector<2x16x128xf32>
    %609 = vector.extract_strided_slice %606 {offsets = [0, 0, 0], sizes = [2, 1, 128], strides = [1, 1, 1]} : vector<2x10x128xf32> to vector<2x1x128xf32>
    %610 = vector.shape_cast %609 : vector<2x1x128xf32> to vector<2x128xf32>
    %611 = vector.shape_cast %610 : vector<2x128xf32> to vector<2x1x128xf32>
    %612 = vector.broadcast %611 : vector<2x1x128xf32> to vector<2x16x128xf32>
    %613 = arith.mulf %612, %608 : vector<2x16x128xf32>
    %cst_360 = arith.constant dense<0.000000e+00> : vector<2x16xf32>
    %614 = vector.multi_reduction <add>, %613, %cst_360 [2] : vector<2x16x128xf32> to vector<2x16xf32>
    %c0_361 = arith.constant 0 : index
    %c0_362 = arith.constant 0 : index
    %c0_363 = arith.constant 0 : index
    %615 = vector.load %arg7[%c0_361, %c0_362, %c0_363] : memref<2x10x16xf32, #tpu.memory_space<vmem>>, vector<2x1x16xf32>
    %616 = vector.shape_cast %615 : vector<2x1x16xf32> to vector<2x16xf32>
    %617 = vector.shape_cast %614 : vector<2x16xf32> to vector<2x1x16xf32>
    tpu.vector_store %arg7[%c0_361, %c0_362, %c0_363], %617 {strides = array<i32>} : memref<2x10x16xf32, #tpu.memory_space<vmem>>, vector<2x1x16xf32>,
    %c0_364 = arith.constant 0 : index
    %c1_365 = arith.constant 1 : index
    %c0_366 = arith.constant 0 : index
    %c0_367 = arith.constant 0 : index
    %618 = vector.load %arg5[%c0_364, %c1_365, %c0_366, %c0_367] : memref<2x10x16x128xf32, #tpu.memory_space<vmem>>, vector<2x1x16x128xf32>
    %619 = vector.shape_cast %618 : vector<2x1x16x128xf32> to vector<2x16x128xf32>
    %620 = vector.extract_strided_slice %606 {offsets = [0, 1, 0], sizes = [2, 1, 128], strides = [1, 1, 1]} : vector<2x10x128xf32> to vector<2x1x128xf32>
    %621 = vector.shape_cast %620 : vector<2x1x128xf32> to vector<2x128xf32>
    %622 = vector.shape_cast %621 : vector<2x128xf32> to vector<2x1x128xf32>
    %623 = vector.broadcast %622 : vector<2x1x128xf32> to vector<2x16x128xf32>
    %624 = arith.mulf %623, %619 : vector<2x16x128xf32>
    %cst_368 = arith.constant dense<0.000000e+00> : vector<2x16xf32>
    %625 = vector.multi_reduction <add>, %624, %cst_368 [2] : vector<2x16x128xf32> to vector<2x16xf32>
    %c0_369 = arith.constant 0 : index
    %c1_370 = arith.constant 1 : index
    %c0_371 = arith.constant 0 : index
    %626 = vector.load %arg7[%c0_369, %c1_370, %c0_371] : memref<2x10x16xf32, #tpu.memory_space<vmem>>, vector<2x1x16xf32>
    %627 = vector.shape_cast %626 : vector<2x1x16xf32> to vector<2x16xf32>
    %628 = vector.shape_cast %625 : vector<2x16xf32> to vector<2x1x16xf32>
    tpu.vector_store %arg7[%c0_369, %c1_370, %c0_371], %628 {strides = array<i32>} : memref<2x10x16xf32, #tpu.memory_space<vmem>>, vector<2x1x16xf32>,
    %c0_372 = arith.constant 0 : index
    %c2_373 = arith.constant 2 : index
    %c0_374 = arith.constant 0 : index
    %c0_375 = arith.constant 0 : index
    %629 = vector.load %arg5[%c0_372, %c2_373, %c0_374, %c0_375] : memref<2x10x16x128xf32, #tpu.memory_space<vmem>>, vector<2x1x16x128xf32>
    %630 = vector.shape_cast %629 : vector<2x1x16x128xf32> to vector<2x16x128xf32>
    %631 = vector.extract_strided_slice %606 {offsets = [0, 2, 0], sizes = [2, 1, 128], strides = [1, 1, 1]} : vector<2x10x128xf32> to vector<2x1x128xf32>
    %632 = vector.shape_cast %631 : vector<2x1x128xf32> to vector<2x128xf32>
    %633 = vector.shape_cast %632 : vector<2x128xf32> to vector<2x1x128xf32>
    %634 = vector.broadcast %633 : vector<2x1x128xf32> to vector<2x16x128xf32>
    %635 = arith.mulf %634, %630 : vector<2x16x128xf32>
    %cst_376 = arith.constant dense<0.000000e+00> : vector<2x16xf32>
    %636 = vector.multi_reduction <add>, %635, %cst_376 [2] : vector<2x16x128xf32> to vector<2x16xf32>
    %c0_377 = arith.constant 0 : index
    %c2_378 = arith.constant 2 : index
    %c0_379 = arith.constant 0 : index
    %637 = vector.load %arg7[%c0_377, %c2_378, %c0_379] : memref<2x10x16xf32, #tpu.memory_space<vmem>>, vector<2x1x16xf32>
    %638 = vector.shape_cast %637 : vector<2x1x16xf32> to vector<2x16xf32>
    %639 = vector.shape_cast %636 : vector<2x16xf32> to vector<2x1x16xf32>
    tpu.vector_store %arg7[%c0_377, %c2_378, %c0_379], %639 {strides = array<i32>} : memref<2x10x16xf32, #tpu.memory_space<vmem>>, vector<2x1x16xf32>,
    %c0_380 = arith.constant 0 : index
    %c3_381 = arith.constant 3 : index
    %c0_382 = arith.constant 0 : index
    %c0_383 = arith.constant 0 : index
    %640 = vector.load %arg5[%c0_380, %c3_381, %c0_382, %c0_383] : memref<2x10x16x128xf32, #tpu.memory_space<vmem>>, vector<2x1x16x128xf32>
    %641 = vector.shape_cast %640 : vector<2x1x16x128xf32> to vector<2x16x128xf32>
    %642 = vector.extract_strided_slice %606 {offsets = [0, 3, 0], sizes = [2, 1, 128], strides = [1, 1, 1]} : vector<2x10x128xf32> to vector<2x1x128xf32>
    %643 = vector.shape_cast %642 : vector<2x1x128xf32> to vector<2x128xf32>
    %644 = vector.shape_cast %643 : vector<2x128xf32> to vector<2x1x128xf32>
    %645 = vector.broadcast %644 : vector<2x1x128xf32> to vector<2x16x128xf32>
    %646 = arith.mulf %645, %641 : vector<2x16x128xf32>
    %cst_384 = arith.constant dense<0.000000e+00> : vector<2x16xf32>
    %647 = vector.multi_reduction <add>, %646, %cst_384 [2] : vector<2x16x128xf32> to vector<2x16xf32>
    %c0_385 = arith.constant 0 : index
    %c3_386 = arith.constant 3 : index
    %c0_387 = arith.constant 0 : index
    %648 = vector.load %arg7[%c0_385, %c3_386, %c0_387] : memref<2x10x16xf32, #tpu.memory_space<vmem>>, vector<2x1x16xf32>
    %649 = vector.shape_cast %648 : vector<2x1x16xf32> to vector<2x16xf32>
    %650 = vector.shape_cast %647 : vector<2x16xf32> to vector<2x1x16xf32>
    tpu.vector_store %arg7[%c0_385, %c3_386, %c0_387], %650 {strides = array<i32>} : memref<2x10x16xf32, #tpu.memory_space<vmem>>, vector<2x1x16xf32>,
    %c0_388 = arith.constant 0 : index
    %c4_389 = arith.constant 4 : index
    %c0_390 = arith.constant 0 : index
    %c0_391 = arith.constant 0 : index
    %651 = vector.load %arg5[%c0_388, %c4_389, %c0_390, %c0_391] : memref<2x10x16x128xf32, #tpu.memory_space<vmem>>, vector<2x1x16x128xf32>
    %652 = vector.shape_cast %651 : vector<2x1x16x128xf32> to vector<2x16x128xf32>
    %653 = vector.extract_strided_slice %606 {offsets = [0, 4, 0], sizes = [2, 1, 128], strides = [1, 1, 1]} : vector<2x10x128xf32> to vector<2x1x128xf32>
    %654 = vector.shape_cast %653 : vector<2x1x128xf32> to vector<2x128xf32>
    %655 = vector.shape_cast %654 : vector<2x128xf32> to vector<2x1x128xf32>
    %656 = vector.broadcast %655 : vector<2x1x128xf32> to vector<2x16x128xf32>
    %657 = arith.mulf %656, %652 : vector<2x16x128xf32>
    %cst_392 = arith.constant dense<0.000000e+00> : vector<2x16xf32>
    %658 = vector.multi_reduction <add>, %657, %cst_392 [2] : vector<2x16x128xf32> to vector<2x16xf32>
    %c0_393 = arith.constant 0 : index
    %c4_394 = arith.constant 4 : index
    %c0_395 = arith.constant 0 : index
    %659 = vector.load %arg7[%c0_393, %c4_394, %c0_395] : memref<2x10x16xf32, #tpu.memory_space<vmem>>, vector<2x1x16xf32>
    %660 = vector.shape_cast %659 : vector<2x1x16xf32> to vector<2x16xf32>
    %661 = vector.shape_cast %658 : vector<2x16xf32> to vector<2x1x16xf32>
    tpu.vector_store %arg7[%c0_393, %c4_394, %c0_395], %661 {strides = array<i32>} : memref<2x10x16xf32, #tpu.memory_space<vmem>>, vector<2x1x16xf32>,
    %c0_396 = arith.constant 0 : index
    %c5_397 = arith.constant 5 : index
    %c0_398 = arith.constant 0 : index
    %c0_399 = arith.constant 0 : index
    %662 = vector.load %arg5[%c0_396, %c5_397, %c0_398, %c0_399] : memref<2x10x16x128xf32, #tpu.memory_space<vmem>>, vector<2x1x16x128xf32>
    %663 = vector.shape_cast %662 : vector<2x1x16x128xf32> to vector<2x16x128xf32>
    %664 = vector.extract_strided_slice %606 {offsets = [0, 5, 0], sizes = [2, 1, 128], strides = [1, 1, 1]} : vector<2x10x128xf32> to vector<2x1x128xf32>
    %665 = vector.shape_cast %664 : vector<2x1x128xf32> to vector<2x128xf32>
    %666 = vector.shape_cast %665 : vector<2x128xf32> to vector<2x1x128xf32>
    %667 = vector.broadcast %666 : vector<2x1x128xf32> to vector<2x16x128xf32>
    %668 = arith.mulf %667, %663 : vector<2x16x128xf32>
    %cst_400 = arith.constant dense<0.000000e+00> : vector<2x16xf32>
    %669 = vector.multi_reduction <add>, %668, %cst_400 [2] : vector<2x16x128xf32> to vector<2x16xf32>
    %c0_401 = arith.constant 0 : index
    %c5_402 = arith.constant 5 : index
    %c0_403 = arith.constant 0 : index
    %670 = vector.load %arg7[%c0_401, %c5_402, %c0_403] : memref<2x10x16xf32, #tpu.memory_space<vmem>>, vector<2x1x16xf32>
    %671 = vector.shape_cast %670 : vector<2x1x16xf32> to vector<2x16xf32>
    %672 = vector.shape_cast %669 : vector<2x16xf32> to vector<2x1x16xf32>
    tpu.vector_store %arg7[%c0_401, %c5_402, %c0_403], %672 {strides = array<i32>} : memref<2x10x16xf32, #tpu.memory_space<vmem>>, vector<2x1x16xf32>,
    %c0_404 = arith.constant 0 : index
    %c6_405 = arith.constant 6 : index
    %c0_406 = arith.constant 0 : index
    %c0_407 = arith.constant 0 : index
    %673 = vector.load %arg5[%c0_404, %c6_405, %c0_406, %c0_407] : memref<2x10x16x128xf32, #tpu.memory_space<vmem>>, vector<2x1x16x128xf32>
    %674 = vector.shape_cast %673 : vector<2x1x16x128xf32> to vector<2x16x128xf32>
    %675 = vector.extract_strided_slice %606 {offsets = [0, 6, 0], sizes = [2, 1, 128], strides = [1, 1, 1]} : vector<2x10x128xf32> to vector<2x1x128xf32>
    %676 = vector.shape_cast %675 : vector<2x1x128xf32> to vector<2x128xf32>
    %677 = vector.shape_cast %676 : vector<2x128xf32> to vector<2x1x128xf32>
    %678 = vector.broadcast %677 : vector<2x1x128xf32> to vector<2x16x128xf32>
    %679 = arith.mulf %678, %674 : vector<2x16x128xf32>
    %cst_408 = arith.constant dense<0.000000e+00> : vector<2x16xf32>
    %680 = vector.multi_reduction <add>, %679, %cst_408 [2] : vector<2x16x128xf32> to vector<2x16xf32>
    %c0_409 = arith.constant 0 : index
    %c6_410 = arith.constant 6 : index
    %c0_411 = arith.constant 0 : index
    %681 = vector.load %arg7[%c0_409, %c6_410, %c0_411] : memref<2x10x16xf32, #tpu.memory_space<vmem>>, vector<2x1x16xf32>
    %682 = vector.shape_cast %681 : vector<2x1x16xf32> to vector<2x16xf32>
    %683 = vector.shape_cast %680 : vector<2x16xf32> to vector<2x1x16xf32>
    tpu.vector_store %arg7[%c0_409, %c6_410, %c0_411], %683 {strides = array<i32>} : memref<2x10x16xf32, #tpu.memory_space<vmem>>, vector<2x1x16xf32>,
    %c0_412 = arith.constant 0 : index
    %c7_413 = arith.constant 7 : index
    %c0_414 = arith.constant 0 : index
    %c0_415 = arith.constant 0 : index
    %684 = vector.load %arg5[%c0_412, %c7_413, %c0_414, %c0_415] : memref<2x10x16x128xf32, #tpu.memory_space<vmem>>, vector<2x1x16x128xf32>
    %685 = vector.shape_cast %684 : vector<2x1x16x128xf32> to vector<2x16x128xf32>
    %686 = vector.extract_strided_slice %606 {offsets = [0, 7, 0], sizes = [2, 1, 128], strides = [1, 1, 1]} : vector<2x10x128xf32> to vector<2x1x128xf32>
    %687 = vector.shape_cast %686 : vector<2x1x128xf32> to vector<2x128xf32>
    %688 = vector.shape_cast %687 : vector<2x128xf32> to vector<2x1x128xf32>
    %689 = vector.broadcast %688 : vector<2x1x128xf32> to vector<2x16x128xf32>
    %690 = arith.mulf %689, %685 : vector<2x16x128xf32>
    %cst_416 = arith.constant dense<0.000000e+00> : vector<2x16xf32>
    %691 = vector.multi_reduction <add>, %690, %cst_416 [2] : vector<2x16x128xf32> to vector<2x16xf32>
    %c0_417 = arith.constant 0 : index
    %c7_418 = arith.constant 7 : index
    %c0_419 = arith.constant 0 : index
    %692 = vector.load %arg7[%c0_417, %c7_418, %c0_419] : memref<2x10x16xf32, #tpu.memory_space<vmem>>, vector<2x1x16xf32>
    %693 = vector.shape_cast %692 : vector<2x1x16xf32> to vector<2x16xf32>
    %694 = vector.shape_cast %691 : vector<2x16xf32> to vector<2x1x16xf32>
    tpu.vector_store %arg7[%c0_417, %c7_418, %c0_419], %694 {strides = array<i32>} : memref<2x10x16xf32, #tpu.memory_space<vmem>>, vector<2x1x16xf32>,
    %c0_420 = arith.constant 0 : index
    %c8_421 = arith.constant 8 : index
    %c0_422 = arith.constant 0 : index
    %c0_423 = arith.constant 0 : index
    %695 = vector.load %arg5[%c0_420, %c8_421, %c0_422, %c0_423] : memref<2x10x16x128xf32, #tpu.memory_space<vmem>>, vector<2x1x16x128xf32>
    %696 = vector.shape_cast %695 : vector<2x1x16x128xf32> to vector<2x16x128xf32>
    %697 = vector.extract_strided_slice %606 {offsets = [0, 8, 0], sizes = [2, 1, 128], strides = [1, 1, 1]} : vector<2x10x128xf32> to vector<2x1x128xf32>
    %698 = vector.shape_cast %697 : vector<2x1x128xf32> to vector<2x128xf32>
    %699 = vector.shape_cast %698 : vector<2x128xf32> to vector<2x1x128xf32>
    %700 = vector.broadcast %699 : vector<2x1x128xf32> to vector<2x16x128xf32>
    %701 = arith.mulf %700, %696 : vector<2x16x128xf32>
    %cst_424 = arith.constant dense<0.000000e+00> : vector<2x16xf32>
    %702 = vector.multi_reduction <add>, %701, %cst_424 [2] : vector<2x16x128xf32> to vector<2x16xf32>
    %c0_425 = arith.constant 0 : index
    %c8_426 = arith.constant 8 : index
    %c0_427 = arith.constant 0 : index
    %703 = vector.load %arg7[%c0_425, %c8_426, %c0_427] : memref<2x10x16xf32, #tpu.memory_space<vmem>>, vector<2x1x16xf32>
    %704 = vector.shape_cast %703 : vector<2x1x16xf32> to vector<2x16xf32>
    %705 = vector.shape_cast %702 : vector<2x16xf32> to vector<2x1x16xf32>
    tpu.vector_store %arg7[%c0_425, %c8_426, %c0_427], %705 {strides = array<i32>} : memref<2x10x16xf32, #tpu.memory_space<vmem>>, vector<2x1x16xf32>,
    %c0_428 = arith.constant 0 : index
    %c9_429 = arith.constant 9 : index
    %c0_430 = arith.constant 0 : index
    %c0_431 = arith.constant 0 : index
    %706 = vector.load %arg5[%c0_428, %c9_429, %c0_430, %c0_431] : memref<2x10x16x128xf32, #tpu.memory_space<vmem>>, vector<2x1x16x128xf32>
    %707 = vector.shape_cast %706 : vector<2x1x16x128xf32> to vector<2x16x128xf32>
    %708 = vector.extract_strided_slice %606 {offsets = [0, 9, 0], sizes = [2, 1, 128], strides = [1, 1, 1]} : vector<2x10x128xf32> to vector<2x1x128xf32>
    %709 = vector.shape_cast %708 : vector<2x1x128xf32> to vector<2x128xf32>
    %710 = vector.shape_cast %709 : vector<2x128xf32> to vector<2x1x128xf32>
    %711 = vector.broadcast %710 : vector<2x1x128xf32> to vector<2x16x128xf32>
    %712 = arith.mulf %711, %707 : vector<2x16x128xf32>
    %cst_432 = arith.constant dense<0.000000e+00> : vector<2x16xf32>
    %713 = vector.multi_reduction <add>, %712, %cst_432 [2] : vector<2x16x128xf32> to vector<2x16xf32>
    %c0_433 = arith.constant 0 : index
    %c9_434 = arith.constant 9 : index
    %c0_435 = arith.constant 0 : index
    %714 = vector.load %arg7[%c0_433, %c9_434, %c0_435] : memref<2x10x16xf32, #tpu.memory_space<vmem>>, vector<2x1x16xf32>
    %715 = vector.shape_cast %714 : vector<2x1x16xf32> to vector<2x16xf32>
    %716 = vector.shape_cast %713 : vector<2x16xf32> to vector<2x1x16xf32>
    tpu.vector_store %arg7[%c0_433, %c9_434, %c0_435], %716 {strides = array<i32>} : memref<2x10x16xf32, #tpu.memory_space<vmem>>, vector<2x1x16xf32>,
    %c0_436 = arith.constant 0 : index
    %c0_437 = arith.constant 0 : index
    %c0_438 = arith.constant 0 : index
    %717 = vector.load %arg7[%c0_436, %c0_437, %c0_438] : memref<2x10x16xf32, #tpu.memory_space<vmem>>, vector<2x10x16xf32>
    %718 = vector.broadcast %1 : vector<1x10x16xf32> to vector<2x10x16xf32>
    %719 = arith.addf %717, %718 : vector<2x10x16xf32>
    %720 = arith.mulf %719, %719 : vector<2x10x16xf32>
    %cst_439 = arith.constant dense<0.000000e+00> : vector<2x10xf32>
    %721 = vector.multi_reduction <add>, %720, %cst_439 [2] : vector<2x10x16xf32> to vector<2x10xf32>
    %722 = vector.shape_cast %721 : vector<2x10xf32> to vector<2x10x1xf32>
    %cst_440 = arith.constant 1.000000e+00 : f32
    %723 = vector.broadcast %cst_440 : f32 to vector<2x10x1xf32>
    %724 = arith.addf %723, %722 : vector<2x10x1xf32>
    %725 = arith.divf %722, %724 : vector<2x10x1xf32>
    %726 = vector.broadcast %725 : vector<2x10x1xf32> to vector<2x10x16xf32>
    %727 = arith.mulf %726, %719 : vector<2x10x16xf32>
    %cst_441 = arith.constant 1.000000e-16 : f32
    %728 = vector.broadcast %cst_441 : f32 to vector<2x10x1xf32>
    %729 = arith.addf %722, %728 : vector<2x10x1xf32>
    %730 = math.rsqrt %729 : vector<2x10x1xf32>
    %731 = vector.broadcast %730 : vector<2x10x1xf32> to vector<2x10x16xf32>
    %732 = arith.mulf %727, %731 : vector<2x10x16xf32>
    %c0_442 = arith.constant 0 : index
    %c0_443 = arith.constant 0 : index
    %c0_444 = arith.constant 0 : index
    %c0_445 = arith.constant 0 : index
    %733 = vector.load %arg5[%c0_442, %c0_443, %c0_444, %c0_445] : memref<2x10x16x128xf32, #tpu.memory_space<vmem>>, vector<2x1x16x128xf32>
    %734 = vector.shape_cast %733 : vector<2x1x16x128xf32> to vector<2x16x128xf32>
    %735 = vector.extract_strided_slice %732 {offsets = [0, 0, 0], sizes = [2, 1, 16], strides = [1, 1, 1]} : vector<2x10x16xf32> to vector<2x1x16xf32>
    %736 = vector.shape_cast %735 : vector<2x1x16xf32> to vector<2x16xf32>
    %737 = vector.shape_cast %736 : vector<2x16xf32> to vector<2x16x1xf32>
    %738 = vector.broadcast %737 : vector<2x16x1xf32> to vector<2x16x128xf32>
    %739 = arith.mulf %734, %738 : vector<2x16x128xf32>
    %cst_446 = arith.constant dense<0.000000e+00> : vector<2x128xf32>
    %740 = vector.multi_reduction <add>, %739, %cst_446 [1] : vector<2x16x128xf32> to vector<2x128xf32>
    %c0_447 = arith.constant 0 : index
    %c0_448 = arith.constant 0 : index
    %c0_449 = arith.constant 0 : index
    %741 = vector.load %arg6[%c0_447, %c0_448, %c0_449] : memref<2x10x128xf32, #tpu.memory_space<vmem>>, vector<2x1x128xf32>
    %742 = vector.shape_cast %741 : vector<2x1x128xf32> to vector<2x128xf32>
    %743 = vector.shape_cast %740 : vector<2x128xf32> to vector<2x1x128xf32>
    tpu.vector_store %arg6[%c0_447, %c0_448, %c0_449], %743 {strides = array<i32>} : memref<2x10x128xf32, #tpu.memory_space<vmem>>, vector<2x1x128xf32>,
    %c0_450 = arith.constant 0 : index
    %c1_451 = arith.constant 1 : index
    %c0_452 = arith.constant 0 : index
    %c0_453 = arith.constant 0 : index
    %744 = vector.load %arg5[%c0_450, %c1_451, %c0_452, %c0_453] : memref<2x10x16x128xf32, #tpu.memory_space<vmem>>, vector<2x1x16x128xf32>
    %745 = vector.shape_cast %744 : vector<2x1x16x128xf32> to vector<2x16x128xf32>
    %746 = vector.extract_strided_slice %732 {offsets = [0, 1, 0], sizes = [2, 1, 16], strides = [1, 1, 1]} : vector<2x10x16xf32> to vector<2x1x16xf32>
    %747 = vector.shape_cast %746 : vector<2x1x16xf32> to vector<2x16xf32>
    %748 = vector.shape_cast %747 : vector<2x16xf32> to vector<2x16x1xf32>
    %749 = vector.broadcast %748 : vector<2x16x1xf32> to vector<2x16x128xf32>
    %750 = arith.mulf %745, %749 : vector<2x16x128xf32>
    %cst_454 = arith.constant dense<0.000000e+00> : vector<2x128xf32>
    %751 = vector.multi_reduction <add>, %750, %cst_454 [1] : vector<2x16x128xf32> to vector<2x128xf32>
    %c0_455 = arith.constant 0 : index
    %c1_456 = arith.constant 1 : index
    %c0_457 = arith.constant 0 : index
    %752 = vector.load %arg6[%c0_455, %c1_456, %c0_457] : memref<2x10x128xf32, #tpu.memory_space<vmem>>, vector<2x1x128xf32>
    %753 = vector.shape_cast %752 : vector<2x1x128xf32> to vector<2x128xf32>
    %754 = vector.shape_cast %751 : vector<2x128xf32> to vector<2x1x128xf32>
    tpu.vector_store %arg6[%c0_455, %c1_456, %c0_457], %754 {strides = array<i32>} : memref<2x10x128xf32, #tpu.memory_space<vmem>>, vector<2x1x128xf32>,
    %c0_458 = arith.constant 0 : index
    %c2_459 = arith.constant 2 : index
    %c0_460 = arith.constant 0 : index
    %c0_461 = arith.constant 0 : index
    %755 = vector.load %arg5[%c0_458, %c2_459, %c0_460, %c0_461] : memref<2x10x16x128xf32, #tpu.memory_space<vmem>>, vector<2x1x16x128xf32>
    %756 = vector.shape_cast %755 : vector<2x1x16x128xf32> to vector<2x16x128xf32>
    %757 = vector.extract_strided_slice %732 {offsets = [0, 2, 0], sizes = [2, 1, 16], strides = [1, 1, 1]} : vector<2x10x16xf32> to vector<2x1x16xf32>
    %758 = vector.shape_cast %757 : vector<2x1x16xf32> to vector<2x16xf32>
    %759 = vector.shape_cast %758 : vector<2x16xf32> to vector<2x16x1xf32>
    %760 = vector.broadcast %759 : vector<2x16x1xf32> to vector<2x16x128xf32>
    %761 = arith.mulf %756, %760 : vector<2x16x128xf32>
    %cst_462 = arith.constant dense<0.000000e+00> : vector<2x128xf32>
    %762 = vector.multi_reduction <add>, %761, %cst_462 [1] : vector<2x16x128xf32> to vector<2x128xf32>
    %c0_463 = arith.constant 0 : index
    %c2_464 = arith.constant 2 : index
    %c0_465 = arith.constant 0 : index
    %763 = vector.load %arg6[%c0_463, %c2_464, %c0_465] : memref<2x10x128xf32, #tpu.memory_space<vmem>>, vector<2x1x128xf32>
    %764 = vector.shape_cast %763 : vector<2x1x128xf32> to vector<2x128xf32>
    %765 = vector.shape_cast %762 : vector<2x128xf32> to vector<2x1x128xf32>
    tpu.vector_store %arg6[%c0_463, %c2_464, %c0_465], %765 {strides = array<i32>} : memref<2x10x128xf32, #tpu.memory_space<vmem>>, vector<2x1x128xf32>,
    %c0_466 = arith.constant 0 : index
    %c3_467 = arith.constant 3 : index
    %c0_468 = arith.constant 0 : index
    %c0_469 = arith.constant 0 : index
    %766 = vector.load %arg5[%c0_466, %c3_467, %c0_468, %c0_469] : memref<2x10x16x128xf32, #tpu.memory_space<vmem>>, vector<2x1x16x128xf32>
    %767 = vector.shape_cast %766 : vector<2x1x16x128xf32> to vector<2x16x128xf32>
    %768 = vector.extract_strided_slice %732 {offsets = [0, 3, 0], sizes = [2, 1, 16], strides = [1, 1, 1]} : vector<2x10x16xf32> to vector<2x1x16xf32>
    %769 = vector.shape_cast %768 : vector<2x1x16xf32> to vector<2x16xf32>
    %770 = vector.shape_cast %769 : vector<2x16xf32> to vector<2x16x1xf32>
    %771 = vector.broadcast %770 : vector<2x16x1xf32> to vector<2x16x128xf32>
    %772 = arith.mulf %767, %771 : vector<2x16x128xf32>
    %cst_470 = arith.constant dense<0.000000e+00> : vector<2x128xf32>
    %773 = vector.multi_reduction <add>, %772, %cst_470 [1] : vector<2x16x128xf32> to vector<2x128xf32>
    %c0_471 = arith.constant 0 : index
    %c3_472 = arith.constant 3 : index
    %c0_473 = arith.constant 0 : index
    %774 = vector.load %arg6[%c0_471, %c3_472, %c0_473] : memref<2x10x128xf32, #tpu.memory_space<vmem>>, vector<2x1x128xf32>
    %775 = vector.shape_cast %774 : vector<2x1x128xf32> to vector<2x128xf32>
    %776 = vector.shape_cast %773 : vector<2x128xf32> to vector<2x1x128xf32>
    tpu.vector_store %arg6[%c0_471, %c3_472, %c0_473], %776 {strides = array<i32>} : memref<2x10x128xf32, #tpu.memory_space<vmem>>, vector<2x1x128xf32>,
    %c0_474 = arith.constant 0 : index
    %c4_475 = arith.constant 4 : index
    %c0_476 = arith.constant 0 : index
    %c0_477 = arith.constant 0 : index
    %777 = vector.load %arg5[%c0_474, %c4_475, %c0_476, %c0_477] : memref<2x10x16x128xf32, #tpu.memory_space<vmem>>, vector<2x1x16x128xf32>
    %778 = vector.shape_cast %777 : vector<2x1x16x128xf32> to vector<2x16x128xf32>
    %779 = vector.extract_strided_slice %732 {offsets = [0, 4, 0], sizes = [2, 1, 16], strides = [1, 1, 1]} : vector<2x10x16xf32> to vector<2x1x16xf32>
    %780 = vector.shape_cast %779 : vector<2x1x16xf32> to vector<2x16xf32>
    %781 = vector.shape_cast %780 : vector<2x16xf32> to vector<2x16x1xf32>
    %782 = vector.broadcast %781 : vector<2x16x1xf32> to vector<2x16x128xf32>
    %783 = arith.mulf %778, %782 : vector<2x16x128xf32>
    %cst_478 = arith.constant dense<0.000000e+00> : vector<2x128xf32>
    %784 = vector.multi_reduction <add>, %783, %cst_478 [1] : vector<2x16x128xf32> to vector<2x128xf32>
    %c0_479 = arith.constant 0 : index
    %c4_480 = arith.constant 4 : index
    %c0_481 = arith.constant 0 : index
    %785 = vector.load %arg6[%c0_479, %c4_480, %c0_481] : memref<2x10x128xf32, #tpu.memory_space<vmem>>, vector<2x1x128xf32>
    %786 = vector.shape_cast %785 : vector<2x1x128xf32> to vector<2x128xf32>
    %787 = vector.shape_cast %784 : vector<2x128xf32> to vector<2x1x128xf32>
    tpu.vector_store %arg6[%c0_479, %c4_480, %c0_481], %787 {strides = array<i32>} : memref<2x10x128xf32, #tpu.memory_space<vmem>>, vector<2x1x128xf32>,
    %c0_482 = arith.constant 0 : index
    %c5_483 = arith.constant 5 : index
    %c0_484 = arith.constant 0 : index
    %c0_485 = arith.constant 0 : index
    %788 = vector.load %arg5[%c0_482, %c5_483, %c0_484, %c0_485] : memref<2x10x16x128xf32, #tpu.memory_space<vmem>>, vector<2x1x16x128xf32>
    %789 = vector.shape_cast %788 : vector<2x1x16x128xf32> to vector<2x16x128xf32>
    %790 = vector.extract_strided_slice %732 {offsets = [0, 5, 0], sizes = [2, 1, 16], strides = [1, 1, 1]} : vector<2x10x16xf32> to vector<2x1x16xf32>
    %791 = vector.shape_cast %790 : vector<2x1x16xf32> to vector<2x16xf32>
    %792 = vector.shape_cast %791 : vector<2x16xf32> to vector<2x16x1xf32>
    %793 = vector.broadcast %792 : vector<2x16x1xf32> to vector<2x16x128xf32>
    %794 = arith.mulf %789, %793 : vector<2x16x128xf32>
    %cst_486 = arith.constant dense<0.000000e+00> : vector<2x128xf32>
    %795 = vector.multi_reduction <add>, %794, %cst_486 [1] : vector<2x16x128xf32> to vector<2x128xf32>
    %c0_487 = arith.constant 0 : index
    %c5_488 = arith.constant 5 : index
    %c0_489 = arith.constant 0 : index
    %796 = vector.load %arg6[%c0_487, %c5_488, %c0_489] : memref<2x10x128xf32, #tpu.memory_space<vmem>>, vector<2x1x128xf32>
    %797 = vector.shape_cast %796 : vector<2x1x128xf32> to vector<2x128xf32>
    %798 = vector.shape_cast %795 : vector<2x128xf32> to vector<2x1x128xf32>
    tpu.vector_store %arg6[%c0_487, %c5_488, %c0_489], %798 {strides = array<i32>} : memref<2x10x128xf32, #tpu.memory_space<vmem>>, vector<2x1x128xf32>,
    %c0_490 = arith.constant 0 : index
    %c6_491 = arith.constant 6 : index
    %c0_492 = arith.constant 0 : index
    %c0_493 = arith.constant 0 : index
    %799 = vector.load %arg5[%c0_490, %c6_491, %c0_492, %c0_493] : memref<2x10x16x128xf32, #tpu.memory_space<vmem>>, vector<2x1x16x128xf32>
    %800 = vector.shape_cast %799 : vector<2x1x16x128xf32> to vector<2x16x128xf32>
    %801 = vector.extract_strided_slice %732 {offsets = [0, 6, 0], sizes = [2, 1, 16], strides = [1, 1, 1]} : vector<2x10x16xf32> to vector<2x1x16xf32>
    %802 = vector.shape_cast %801 : vector<2x1x16xf32> to vector<2x16xf32>
    %803 = vector.shape_cast %802 : vector<2x16xf32> to vector<2x16x1xf32>
    %804 = vector.broadcast %803 : vector<2x16x1xf32> to vector<2x16x128xf32>
    %805 = arith.mulf %800, %804 : vector<2x16x128xf32>
    %cst_494 = arith.constant dense<0.000000e+00> : vector<2x128xf32>
    %806 = vector.multi_reduction <add>, %805, %cst_494 [1] : vector<2x16x128xf32> to vector<2x128xf32>
    %c0_495 = arith.constant 0 : index
    %c6_496 = arith.constant 6 : index
    %c0_497 = arith.constant 0 : index
    %807 = vector.load %arg6[%c0_495, %c6_496, %c0_497] : memref<2x10x128xf32, #tpu.memory_space<vmem>>, vector<2x1x128xf32>
    %808 = vector.shape_cast %807 : vector<2x1x128xf32> to vector<2x128xf32>
    %809 = vector.shape_cast %806 : vector<2x128xf32> to vector<2x1x128xf32>
    tpu.vector_store %arg6[%c0_495, %c6_496, %c0_497], %809 {strides = array<i32>} : memref<2x10x128xf32, #tpu.memory_space<vmem>>, vector<2x1x128xf32>,
    %c0_498 = arith.constant 0 : index
    %c7_499 = arith.constant 7 : index
    %c0_500 = arith.constant 0 : index
    %c0_501 = arith.constant 0 : index
    %810 = vector.load %arg5[%c0_498, %c7_499, %c0_500, %c0_501] : memref<2x10x16x128xf32, #tpu.memory_space<vmem>>, vector<2x1x16x128xf32>
    %811 = vector.shape_cast %810 : vector<2x1x16x128xf32> to vector<2x16x128xf32>
    %812 = vector.extract_strided_slice %732 {offsets = [0, 7, 0], sizes = [2, 1, 16], strides = [1, 1, 1]} : vector<2x10x16xf32> to vector<2x1x16xf32>
    %813 = vector.shape_cast %812 : vector<2x1x16xf32> to vector<2x16xf32>
    %814 = vector.shape_cast %813 : vector<2x16xf32> to vector<2x16x1xf32>
    %815 = vector.broadcast %814 : vector<2x16x1xf32> to vector<2x16x128xf32>
    %816 = arith.mulf %811, %815 : vector<2x16x128xf32>
    %cst_502 = arith.constant dense<0.000000e+00> : vector<2x128xf32>
    %817 = vector.multi_reduction <add>, %816, %cst_502 [1] : vector<2x16x128xf32> to vector<2x128xf32>
    %c0_503 = arith.constant 0 : index
    %c7_504 = arith.constant 7 : index
    %c0_505 = arith.constant 0 : index
    %818 = vector.load %arg6[%c0_503, %c7_504, %c0_505] : memref<2x10x128xf32, #tpu.memory_space<vmem>>, vector<2x1x128xf32>
    %819 = vector.shape_cast %818 : vector<2x1x128xf32> to vector<2x128xf32>
    %820 = vector.shape_cast %817 : vector<2x128xf32> to vector<2x1x128xf32>
    tpu.vector_store %arg6[%c0_503, %c7_504, %c0_505], %820 {strides = array<i32>} : memref<2x10x128xf32, #tpu.memory_space<vmem>>, vector<2x1x128xf32>,
    %c0_506 = arith.constant 0 : index
    %c8_507 = arith.constant 8 : index
    %c0_508 = arith.constant 0 : index
    %c0_509 = arith.constant 0 : index
    %821 = vector.load %arg5[%c0_506, %c8_507, %c0_508, %c0_509] : memref<2x10x16x128xf32, #tpu.memory_space<vmem>>, vector<2x1x16x128xf32>
    %822 = vector.shape_cast %821 : vector<2x1x16x128xf32> to vector<2x16x128xf32>
    %823 = vector.extract_strided_slice %732 {offsets = [0, 8, 0], sizes = [2, 1, 16], strides = [1, 1, 1]} : vector<2x10x16xf32> to vector<2x1x16xf32>
    %824 = vector.shape_cast %823 : vector<2x1x16xf32> to vector<2x16xf32>
    %825 = vector.shape_cast %824 : vector<2x16xf32> to vector<2x16x1xf32>
    %826 = vector.broadcast %825 : vector<2x16x1xf32> to vector<2x16x128xf32>
    %827 = arith.mulf %822, %826 : vector<2x16x128xf32>
    %cst_510 = arith.constant dense<0.000000e+00> : vector<2x128xf32>
    %828 = vector.multi_reduction <add>, %827, %cst_510 [1] : vector<2x16x128xf32> to vector<2x128xf32>
    %c0_511 = arith.constant 0 : index
    %c8_512 = arith.constant 8 : index
    %c0_513 = arith.constant 0 : index
    %829 = vector.load %arg6[%c0_511, %c8_512, %c0_513] : memref<2x10x128xf32, #tpu.memory_space<vmem>>, vector<2x1x128xf32>
    %830 = vector.shape_cast %829 : vector<2x1x128xf32> to vector<2x128xf32>
    %831 = vector.shape_cast %828 : vector<2x128xf32> to vector<2x1x128xf32>
    tpu.vector_store %arg6[%c0_511, %c8_512, %c0_513], %831 {strides = array<i32>} : memref<2x10x128xf32, #tpu.memory_space<vmem>>, vector<2x1x128xf32>,
    %c0_514 = arith.constant 0 : index
    %c9_515 = arith.constant 9 : index
    %c0_516 = arith.constant 0 : index
    %c0_517 = arith.constant 0 : index
    %832 = vector.load %arg5[%c0_514, %c9_515, %c0_516, %c0_517] : memref<2x10x16x128xf32, #tpu.memory_space<vmem>>, vector<2x1x16x128xf32>
    %833 = vector.shape_cast %832 : vector<2x1x16x128xf32> to vector<2x16x128xf32>
    %834 = vector.extract_strided_slice %732 {offsets = [0, 9, 0], sizes = [2, 1, 16], strides = [1, 1, 1]} : vector<2x10x16xf32> to vector<2x1x16xf32>
    %835 = vector.shape_cast %834 : vector<2x1x16xf32> to vector<2x16xf32>
    %836 = vector.shape_cast %835 : vector<2x16xf32> to vector<2x16x1xf32>
    %837 = vector.broadcast %836 : vector<2x16x1xf32> to vector<2x16x128xf32>
    %838 = arith.mulf %833, %837 : vector<2x16x128xf32>
    %cst_518 = arith.constant dense<0.000000e+00> : vector<2x128xf32>
    %839 = vector.multi_reduction <add>, %838, %cst_518 [1] : vector<2x16x128xf32> to vector<2x128xf32>
    %c0_519 = arith.constant 0 : index
    %c9_520 = arith.constant 9 : index
    %c0_521 = arith.constant 0 : index
    %840 = vector.load %arg6[%c0_519, %c9_520, %c0_521] : memref<2x10x128xf32, #tpu.memory_space<vmem>>, vector<2x1x128xf32>
    %841 = vector.shape_cast %840 : vector<2x1x128xf32> to vector<2x128xf32>
    %842 = vector.shape_cast %839 : vector<2x128xf32> to vector<2x1x128xf32>
    tpu.vector_store %arg6[%c0_519, %c9_520, %c0_521], %842 {strides = array<i32>} : memref<2x10x128xf32, #tpu.memory_space<vmem>>, vector<2x1x128xf32>,
    %c0_522 = arith.constant 0 : index
    %c0_523 = arith.constant 0 : index
    %c0_524 = arith.constant 0 : index
    %843 = vector.load %arg6[%c0_522, %c0_523, %c0_524] : memref<2x10x128xf32, #tpu.memory_space<vmem>>, vector<2x10x128xf32>
    %cst_525 = arith.constant dense<0xFF800000> : vector<2x128xf32>
    %844 = vector.multi_reduction <maximumf>, %843, %cst_525 [1] : vector<2x10x128xf32> to vector<2x128xf32>
    %845 = vector.shape_cast %844 : vector<2x128xf32> to vector<2x1x128xf32>
    %846 = vector.broadcast %845 : vector<2x1x128xf32> to vector<2x10x128xf32>
    %847 = arith.subf %843, %846 : vector<2x10x128xf32>
    %848 = math.exp %847 : vector<2x10x128xf32>
    %cst_526 = arith.constant dense<0.000000e+00> : vector<2x128xf32>
    %849 = vector.multi_reduction <add>, %848, %cst_526 [1] : vector<2x10x128xf32> to vector<2x128xf32>
    %850 = vector.shape_cast %849 : vector<2x128xf32> to vector<2x1x128xf32>
    %851 = vector.broadcast %850 : vector<2x1x128xf32> to vector<2x10x128xf32>
    %852 = arith.divf %848, %851 : vector<2x10x128xf32>
    %c0_527 = arith.constant 0 : index
    %c0_528 = arith.constant 0 : index
    %c0_529 = arith.constant 0 : index
    %c0_530 = arith.constant 0 : index
    %853 = vector.load %arg5[%c0_527, %c0_528, %c0_529, %c0_530] : memref<2x10x16x128xf32, #tpu.memory_space<vmem>>, vector<2x1x16x128xf32>
    %854 = vector.shape_cast %853 : vector<2x1x16x128xf32> to vector<2x16x128xf32>
    %855 = vector.extract_strided_slice %852 {offsets = [0, 0, 0], sizes = [2, 1, 128], strides = [1, 1, 1]} : vector<2x10x128xf32> to vector<2x1x128xf32>
    %856 = vector.shape_cast %855 : vector<2x1x128xf32> to vector<2x128xf32>
    %857 = vector.shape_cast %856 : vector<2x128xf32> to vector<2x1x128xf32>
    %858 = vector.broadcast %857 : vector<2x1x128xf32> to vector<2x16x128xf32>
    %859 = arith.mulf %858, %854 : vector<2x16x128xf32>
    %cst_531 = arith.constant dense<0.000000e+00> : vector<2x16xf32>
    %860 = vector.multi_reduction <add>, %859, %cst_531 [2] : vector<2x16x128xf32> to vector<2x16xf32>
    %c0_532 = arith.constant 0 : index
    %c0_533 = arith.constant 0 : index
    %c0_534 = arith.constant 0 : index
    %861 = vector.load %arg7[%c0_532, %c0_533, %c0_534] : memref<2x10x16xf32, #tpu.memory_space<vmem>>, vector<2x1x16xf32>
    %862 = vector.shape_cast %861 : vector<2x1x16xf32> to vector<2x16xf32>
    %863 = vector.shape_cast %860 : vector<2x16xf32> to vector<2x1x16xf32>
    tpu.vector_store %arg7[%c0_532, %c0_533, %c0_534], %863 {strides = array<i32>} : memref<2x10x16xf32, #tpu.memory_space<vmem>>, vector<2x1x16xf32>,
    %c0_535 = arith.constant 0 : index
    %c1_536 = arith.constant 1 : index
    %c0_537 = arith.constant 0 : index
    %c0_538 = arith.constant 0 : index
    %864 = vector.load %arg5[%c0_535, %c1_536, %c0_537, %c0_538] : memref<2x10x16x128xf32, #tpu.memory_space<vmem>>, vector<2x1x16x128xf32>
    %865 = vector.shape_cast %864 : vector<2x1x16x128xf32> to vector<2x16x128xf32>
    %866 = vector.extract_strided_slice %852 {offsets = [0, 1, 0], sizes = [2, 1, 128], strides = [1, 1, 1]} : vector<2x10x128xf32> to vector<2x1x128xf32>
    %867 = vector.shape_cast %866 : vector<2x1x128xf32> to vector<2x128xf32>
    %868 = vector.shape_cast %867 : vector<2x128xf32> to vector<2x1x128xf32>
    %869 = vector.broadcast %868 : vector<2x1x128xf32> to vector<2x16x128xf32>
    %870 = arith.mulf %869, %865 : vector<2x16x128xf32>
    %cst_539 = arith.constant dense<0.000000e+00> : vector<2x16xf32>
    %871 = vector.multi_reduction <add>, %870, %cst_539 [2] : vector<2x16x128xf32> to vector<2x16xf32>
    %c0_540 = arith.constant 0 : index
    %c1_541 = arith.constant 1 : index
    %c0_542 = arith.constant 0 : index
    %872 = vector.load %arg7[%c0_540, %c1_541, %c0_542] : memref<2x10x16xf32, #tpu.memory_space<vmem>>, vector<2x1x16xf32>
    %873 = vector.shape_cast %872 : vector<2x1x16xf32> to vector<2x16xf32>
    %874 = vector.shape_cast %871 : vector<2x16xf32> to vector<2x1x16xf32>
    tpu.vector_store %arg7[%c0_540, %c1_541, %c0_542], %874 {strides = array<i32>} : memref<2x10x16xf32, #tpu.memory_space<vmem>>, vector<2x1x16xf32>,
    %c0_543 = arith.constant 0 : index
    %c2_544 = arith.constant 2 : index
    %c0_545 = arith.constant 0 : index
    %c0_546 = arith.constant 0 : index
    %875 = vector.load %arg5[%c0_543, %c2_544, %c0_545, %c0_546] : memref<2x10x16x128xf32, #tpu.memory_space<vmem>>, vector<2x1x16x128xf32>
    %876 = vector.shape_cast %875 : vector<2x1x16x128xf32> to vector<2x16x128xf32>
    %877 = vector.extract_strided_slice %852 {offsets = [0, 2, 0], sizes = [2, 1, 128], strides = [1, 1, 1]} : vector<2x10x128xf32> to vector<2x1x128xf32>
    %878 = vector.shape_cast %877 : vector<2x1x128xf32> to vector<2x128xf32>
    %879 = vector.shape_cast %878 : vector<2x128xf32> to vector<2x1x128xf32>
    %880 = vector.broadcast %879 : vector<2x1x128xf32> to vector<2x16x128xf32>
    %881 = arith.mulf %880, %876 : vector<2x16x128xf32>
    %cst_547 = arith.constant dense<0.000000e+00> : vector<2x16xf32>
    %882 = vector.multi_reduction <add>, %881, %cst_547 [2] : vector<2x16x128xf32> to vector<2x16xf32>
    %c0_548 = arith.constant 0 : index
    %c2_549 = arith.constant 2 : index
    %c0_550 = arith.constant 0 : index
    %883 = vector.load %arg7[%c0_548, %c2_549, %c0_550] : memref<2x10x16xf32, #tpu.memory_space<vmem>>, vector<2x1x16xf32>
    %884 = vector.shape_cast %883 : vector<2x1x16xf32> to vector<2x16xf32>
    %885 = vector.shape_cast %882 : vector<2x16xf32> to vector<2x1x16xf32>
    tpu.vector_store %arg7[%c0_548, %c2_549, %c0_550], %885 {strides = array<i32>} : memref<2x10x16xf32, #tpu.memory_space<vmem>>, vector<2x1x16xf32>,
    %c0_551 = arith.constant 0 : index
    %c3_552 = arith.constant 3 : index
    %c0_553 = arith.constant 0 : index
    %c0_554 = arith.constant 0 : index
    %886 = vector.load %arg5[%c0_551, %c3_552, %c0_553, %c0_554] : memref<2x10x16x128xf32, #tpu.memory_space<vmem>>, vector<2x1x16x128xf32>
    %887 = vector.shape_cast %886 : vector<2x1x16x128xf32> to vector<2x16x128xf32>
    %888 = vector.extract_strided_slice %852 {offsets = [0, 3, 0], sizes = [2, 1, 128], strides = [1, 1, 1]} : vector<2x10x128xf32> to vector<2x1x128xf32>
    %889 = vector.shape_cast %888 : vector<2x1x128xf32> to vector<2x128xf32>
    %890 = vector.shape_cast %889 : vector<2x128xf32> to vector<2x1x128xf32>
    %891 = vector.broadcast %890 : vector<2x1x128xf32> to vector<2x16x128xf32>
    %892 = arith.mulf %891, %887 : vector<2x16x128xf32>
    %cst_555 = arith.constant dense<0.000000e+00> : vector<2x16xf32>
    %893 = vector.multi_reduction <add>, %892, %cst_555 [2] : vector<2x16x128xf32> to vector<2x16xf32>
    %c0_556 = arith.constant 0 : index
    %c3_557 = arith.constant 3 : index
    %c0_558 = arith.constant 0 : index
    %894 = vector.load %arg7[%c0_556, %c3_557, %c0_558] : memref<2x10x16xf32, #tpu.memory_space<vmem>>, vector<2x1x16xf32>
    %895 = vector.shape_cast %894 : vector<2x1x16xf32> to vector<2x16xf32>
    %896 = vector.shape_cast %893 : vector<2x16xf32> to vector<2x1x16xf32>
    tpu.vector_store %arg7[%c0_556, %c3_557, %c0_558], %896 {strides = array<i32>} : memref<2x10x16xf32, #tpu.memory_space<vmem>>, vector<2x1x16xf32>,
    %c0_559 = arith.constant 0 : index
    %c4_560 = arith.constant 4 : index
    %c0_561 = arith.constant 0 : index
    %c0_562 = arith.constant 0 : index
    %897 = vector.load %arg5[%c0_559, %c4_560, %c0_561, %c0_562] : memref<2x10x16x128xf32, #tpu.memory_space<vmem>>, vector<2x1x16x128xf32>
    %898 = vector.shape_cast %897 : vector<2x1x16x128xf32> to vector<2x16x128xf32>
    %899 = vector.extract_strided_slice %852 {offsets = [0, 4, 0], sizes = [2, 1, 128], strides = [1, 1, 1]} : vector<2x10x128xf32> to vector<2x1x128xf32>
    %900 = vector.shape_cast %899 : vector<2x1x128xf32> to vector<2x128xf32>
    %901 = vector.shape_cast %900 : vector<2x128xf32> to vector<2x1x128xf32>
    %902 = vector.broadcast %901 : vector<2x1x128xf32> to vector<2x16x128xf32>
    %903 = arith.mulf %902, %898 : vector<2x16x128xf32>
    %cst_563 = arith.constant dense<0.000000e+00> : vector<2x16xf32>
    %904 = vector.multi_reduction <add>, %903, %cst_563 [2] : vector<2x16x128xf32> to vector<2x16xf32>
    %c0_564 = arith.constant 0 : index
    %c4_565 = arith.constant 4 : index
    %c0_566 = arith.constant 0 : index
    %905 = vector.load %arg7[%c0_564, %c4_565, %c0_566] : memref<2x10x16xf32, #tpu.memory_space<vmem>>, vector<2x1x16xf32>
    %906 = vector.shape_cast %905 : vector<2x1x16xf32> to vector<2x16xf32>
    %907 = vector.shape_cast %904 : vector<2x16xf32> to vector<2x1x16xf32>
    tpu.vector_store %arg7[%c0_564, %c4_565, %c0_566], %907 {strides = array<i32>} : memref<2x10x16xf32, #tpu.memory_space<vmem>>, vector<2x1x16xf32>,
    %c0_567 = arith.constant 0 : index
    %c5_568 = arith.constant 5 : index
    %c0_569 = arith.constant 0 : index
    %c0_570 = arith.constant 0 : index
    %908 = vector.load %arg5[%c0_567, %c5_568, %c0_569, %c0_570] : memref<2x10x16x128xf32, #tpu.memory_space<vmem>>, vector<2x1x16x128xf32>
    %909 = vector.shape_cast %908 : vector<2x1x16x128xf32> to vector<2x16x128xf32>
    %910 = vector.extract_strided_slice %852 {offsets = [0, 5, 0], sizes = [2, 1, 128], strides = [1, 1, 1]} : vector<2x10x128xf32> to vector<2x1x128xf32>
    %911 = vector.shape_cast %910 : vector<2x1x128xf32> to vector<2x128xf32>
    %912 = vector.shape_cast %911 : vector<2x128xf32> to vector<2x1x128xf32>
    %913 = vector.broadcast %912 : vector<2x1x128xf32> to vector<2x16x128xf32>
    %914 = arith.mulf %913, %909 : vector<2x16x128xf32>
    %cst_571 = arith.constant dense<0.000000e+00> : vector<2x16xf32>
    %915 = vector.multi_reduction <add>, %914, %cst_571 [2] : vector<2x16x128xf32> to vector<2x16xf32>
    %c0_572 = arith.constant 0 : index
    %c5_573 = arith.constant 5 : index
    %c0_574 = arith.constant 0 : index
    %916 = vector.load %arg7[%c0_572, %c5_573, %c0_574] : memref<2x10x16xf32, #tpu.memory_space<vmem>>, vector<2x1x16xf32>
    %917 = vector.shape_cast %916 : vector<2x1x16xf32> to vector<2x16xf32>
    %918 = vector.shape_cast %915 : vector<2x16xf32> to vector<2x1x16xf32>
    tpu.vector_store %arg7[%c0_572, %c5_573, %c0_574], %918 {strides = array<i32>} : memref<2x10x16xf32, #tpu.memory_space<vmem>>, vector<2x1x16xf32>,
    %c0_575 = arith.constant 0 : index
    %c6_576 = arith.constant 6 : index
    %c0_577 = arith.constant 0 : index
    %c0_578 = arith.constant 0 : index
    %919 = vector.load %arg5[%c0_575, %c6_576, %c0_577, %c0_578] : memref<2x10x16x128xf32, #tpu.memory_space<vmem>>, vector<2x1x16x128xf32>
    %920 = vector.shape_cast %919 : vector<2x1x16x128xf32> to vector<2x16x128xf32>
    %921 = vector.extract_strided_slice %852 {offsets = [0, 6, 0], sizes = [2, 1, 128], strides = [1, 1, 1]} : vector<2x10x128xf32> to vector<2x1x128xf32>
    %922 = vector.shape_cast %921 : vector<2x1x128xf32> to vector<2x128xf32>
    %923 = vector.shape_cast %922 : vector<2x128xf32> to vector<2x1x128xf32>
    %924 = vector.broadcast %923 : vector<2x1x128xf32> to vector<2x16x128xf32>
    %925 = arith.mulf %924, %920 : vector<2x16x128xf32>
    %cst_579 = arith.constant dense<0.000000e+00> : vector<2x16xf32>
    %926 = vector.multi_reduction <add>, %925, %cst_579 [2] : vector<2x16x128xf32> to vector<2x16xf32>
    %c0_580 = arith.constant 0 : index
    %c6_581 = arith.constant 6 : index
    %c0_582 = arith.constant 0 : index
    %927 = vector.load %arg7[%c0_580, %c6_581, %c0_582] : memref<2x10x16xf32, #tpu.memory_space<vmem>>, vector<2x1x16xf32>
    %928 = vector.shape_cast %927 : vector<2x1x16xf32> to vector<2x16xf32>
    %929 = vector.shape_cast %926 : vector<2x16xf32> to vector<2x1x16xf32>
    tpu.vector_store %arg7[%c0_580, %c6_581, %c0_582], %929 {strides = array<i32>} : memref<2x10x16xf32, #tpu.memory_space<vmem>>, vector<2x1x16xf32>,
    %c0_583 = arith.constant 0 : index
    %c7_584 = arith.constant 7 : index
    %c0_585 = arith.constant 0 : index
    %c0_586 = arith.constant 0 : index
    %930 = vector.load %arg5[%c0_583, %c7_584, %c0_585, %c0_586] : memref<2x10x16x128xf32, #tpu.memory_space<vmem>>, vector<2x1x16x128xf32>
    %931 = vector.shape_cast %930 : vector<2x1x16x128xf32> to vector<2x16x128xf32>
    %932 = vector.extract_strided_slice %852 {offsets = [0, 7, 0], sizes = [2, 1, 128], strides = [1, 1, 1]} : vector<2x10x128xf32> to vector<2x1x128xf32>
    %933 = vector.shape_cast %932 : vector<2x1x128xf32> to vector<2x128xf32>
    %934 = vector.shape_cast %933 : vector<2x128xf32> to vector<2x1x128xf32>
    %935 = vector.broadcast %934 : vector<2x1x128xf32> to vector<2x16x128xf32>
    %936 = arith.mulf %935, %931 : vector<2x16x128xf32>
    %cst_587 = arith.constant dense<0.000000e+00> : vector<2x16xf32>
    %937 = vector.multi_reduction <add>, %936, %cst_587 [2] : vector<2x16x128xf32> to vector<2x16xf32>
    %c0_588 = arith.constant 0 : index
    %c7_589 = arith.constant 7 : index
    %c0_590 = arith.constant 0 : index
    %938 = vector.load %arg7[%c0_588, %c7_589, %c0_590] : memref<2x10x16xf32, #tpu.memory_space<vmem>>, vector<2x1x16xf32>
    %939 = vector.shape_cast %938 : vector<2x1x16xf32> to vector<2x16xf32>
    %940 = vector.shape_cast %937 : vector<2x16xf32> to vector<2x1x16xf32>
    tpu.vector_store %arg7[%c0_588, %c7_589, %c0_590], %940 {strides = array<i32>} : memref<2x10x16xf32, #tpu.memory_space<vmem>>, vector<2x1x16xf32>,
    %c0_591 = arith.constant 0 : index
    %c8_592 = arith.constant 8 : index
    %c0_593 = arith.constant 0 : index
    %c0_594 = arith.constant 0 : index
    %941 = vector.load %arg5[%c0_591, %c8_592, %c0_593, %c0_594] : memref<2x10x16x128xf32, #tpu.memory_space<vmem>>, vector<2x1x16x128xf32>
    %942 = vector.shape_cast %941 : vector<2x1x16x128xf32> to vector<2x16x128xf32>
    %943 = vector.extract_strided_slice %852 {offsets = [0, 8, 0], sizes = [2, 1, 128], strides = [1, 1, 1]} : vector<2x10x128xf32> to vector<2x1x128xf32>
    %944 = vector.shape_cast %943 : vector<2x1x128xf32> to vector<2x128xf32>
    %945 = vector.shape_cast %944 : vector<2x128xf32> to vector<2x1x128xf32>
    %946 = vector.broadcast %945 : vector<2x1x128xf32> to vector<2x16x128xf32>
    %947 = arith.mulf %946, %942 : vector<2x16x128xf32>
    %cst_595 = arith.constant dense<0.000000e+00> : vector<2x16xf32>
    %948 = vector.multi_reduction <add>, %947, %cst_595 [2] : vector<2x16x128xf32> to vector<2x16xf32>
    %c0_596 = arith.constant 0 : index
    %c8_597 = arith.constant 8 : index
    %c0_598 = arith.constant 0 : index
    %949 = vector.load %arg7[%c0_596, %c8_597, %c0_598] : memref<2x10x16xf32, #tpu.memory_space<vmem>>, vector<2x1x16xf32>
    %950 = vector.shape_cast %949 : vector<2x1x16xf32> to vector<2x16xf32>
    %951 = vector.shape_cast %948 : vector<2x16xf32> to vector<2x1x16xf32>
    tpu.vector_store %arg7[%c0_596, %c8_597, %c0_598], %951 {strides = array<i32>} : memref<2x10x16xf32, #tpu.memory_space<vmem>>, vector<2x1x16xf32>,
    %c0_599 = arith.constant 0 : index
    %c9_600 = arith.constant 9 : index
    %c0_601 = arith.constant 0 : index
    %c0_602 = arith.constant 0 : index
    %952 = vector.load %arg5[%c0_599, %c9_600, %c0_601, %c0_602] : memref<2x10x16x128xf32, #tpu.memory_space<vmem>>, vector<2x1x16x128xf32>
    %953 = vector.shape_cast %952 : vector<2x1x16x128xf32> to vector<2x16x128xf32>
    %954 = vector.extract_strided_slice %852 {offsets = [0, 9, 0], sizes = [2, 1, 128], strides = [1, 1, 1]} : vector<2x10x128xf32> to vector<2x1x128xf32>
    %955 = vector.shape_cast %954 : vector<2x1x128xf32> to vector<2x128xf32>
    %956 = vector.shape_cast %955 : vector<2x128xf32> to vector<2x1x128xf32>
    %957 = vector.broadcast %956 : vector<2x1x128xf32> to vector<2x16x128xf32>
    %958 = arith.mulf %957, %953 : vector<2x16x128xf32>
    %cst_603 = arith.constant dense<0.000000e+00> : vector<2x16xf32>
    %959 = vector.multi_reduction <add>, %958, %cst_603 [2] : vector<2x16x128xf32> to vector<2x16xf32>
    %c0_604 = arith.constant 0 : index
    %c9_605 = arith.constant 9 : index
    %c0_606 = arith.constant 0 : index
    %960 = vector.load %arg7[%c0_604, %c9_605, %c0_606] : memref<2x10x16xf32, #tpu.memory_space<vmem>>, vector<2x1x16xf32>
    %961 = vector.shape_cast %960 : vector<2x1x16xf32> to vector<2x16xf32>
    %962 = vector.shape_cast %959 : vector<2x16xf32> to vector<2x1x16xf32>
    tpu.vector_store %arg7[%c0_604, %c9_605, %c0_606], %962 {strides = array<i32>} : memref<2x10x16xf32, #tpu.memory_space<vmem>>, vector<2x1x16xf32>,
    %c0_607 = arith.constant 0 : index
    %c0_608 = arith.constant 0 : index
    %c0_609 = arith.constant 0 : index
    %963 = vector.load %arg7[%c0_607, %c0_608, %c0_609] : memref<2x10x16xf32, #tpu.memory_space<vmem>>, vector<2x10x16xf32>
    %964 = vector.broadcast %1 : vector<1x10x16xf32> to vector<2x10x16xf32>
    %965 = arith.addf %963, %964 : vector<2x10x16xf32>
    %966 = arith.mulf %965, %965 : vector<2x10x16xf32>
    %cst_610 = arith.constant dense<0.000000e+00> : vector<2x10xf32>
    %967 = vector.multi_reduction <add>, %966, %cst_610 [2] : vector<2x10x16xf32> to vector<2x10xf32>
    %968 = vector.shape_cast %967 : vector<2x10xf32> to vector<2x10x1xf32>
    %cst_611 = arith.constant 1.000000e+00 : f32
    %969 = vector.broadcast %cst_611 : f32 to vector<2x10x1xf32>
    %970 = arith.addf %969, %968 : vector<2x10x1xf32>
    %971 = arith.divf %968, %970 : vector<2x10x1xf32>
    %972 = vector.broadcast %971 : vector<2x10x1xf32> to vector<2x10x16xf32>
    %973 = arith.mulf %972, %965 : vector<2x10x16xf32>
    %cst_612 = arith.constant 1.000000e-16 : f32
    %974 = vector.broadcast %cst_612 : f32 to vector<2x10x1xf32>
    %975 = arith.addf %968, %974 : vector<2x10x1xf32>
    %976 = math.rsqrt %975 : vector<2x10x1xf32>
    %977 = vector.broadcast %976 : vector<2x10x1xf32> to vector<2x10x16xf32>
    %978 = arith.mulf %973, %977 : vector<2x10x16xf32>
    %c0_613 = arith.constant 0 : index
    %c0_614 = arith.constant 0 : index
    %c0_615 = arith.constant 0 : index
    %c0_616 = arith.constant 0 : index
    %979 = vector.load %arg5[%c0_613, %c0_614, %c0_615, %c0_616] : memref<2x10x16x128xf32, #tpu.memory_space<vmem>>, vector<2x1x16x128xf32>
    %980 = vector.shape_cast %979 : vector<2x1x16x128xf32> to vector<2x16x128xf32>
    %981 = vector.extract_strided_slice %978 {offsets = [0, 0, 0], sizes = [2, 1, 16], strides = [1, 1, 1]} : vector<2x10x16xf32> to vector<2x1x16xf32>
    %982 = vector.shape_cast %981 : vector<2x1x16xf32> to vector<2x16xf32>
    %983 = vector.shape_cast %982 : vector<2x16xf32> to vector<2x16x1xf32>
    %984 = vector.broadcast %983 : vector<2x16x1xf32> to vector<2x16x128xf32>
    %985 = arith.mulf %980, %984 : vector<2x16x128xf32>
    %cst_617 = arith.constant dense<0.000000e+00> : vector<2x128xf32>
    %986 = vector.multi_reduction <add>, %985, %cst_617 [1] : vector<2x16x128xf32> to vector<2x128xf32>
    %c0_618 = arith.constant 0 : index
    %c0_619 = arith.constant 0 : index
    %c0_620 = arith.constant 0 : index
    %987 = vector.load %arg6[%c0_618, %c0_619, %c0_620] : memref<2x10x128xf32, #tpu.memory_space<vmem>>, vector<2x1x128xf32>
    %988 = vector.shape_cast %987 : vector<2x1x128xf32> to vector<2x128xf32>
    %989 = arith.addf %988, %986 : vector<2x128xf32>
    %c0_621 = arith.constant 0 : index
    %c0_622 = arith.constant 0 : index
    %c0_623 = arith.constant 0 : index
    %990 = vector.load %arg6[%c0_621, %c0_622, %c0_623] : memref<2x10x128xf32, #tpu.memory_space<vmem>>, vector<2x1x128xf32>
    %991 = vector.shape_cast %990 : vector<2x1x128xf32> to vector<2x128xf32>
    %992 = vector.shape_cast %989 : vector<2x128xf32> to vector<2x1x128xf32>
    tpu.vector_store %arg6[%c0_621, %c0_622, %c0_623], %992 {strides = array<i32>} : memref<2x10x128xf32, #tpu.memory_space<vmem>>, vector<2x1x128xf32>,
    %c0_624 = arith.constant 0 : index
    %c1_625 = arith.constant 1 : index
    %c0_626 = arith.constant 0 : index
    %c0_627 = arith.constant 0 : index
    %993 = vector.load %arg5[%c0_624, %c1_625, %c0_626, %c0_627] : memref<2x10x16x128xf32, #tpu.memory_space<vmem>>, vector<2x1x16x128xf32>
    %994 = vector.shape_cast %993 : vector<2x1x16x128xf32> to vector<2x16x128xf32>
    %995 = vector.extract_strided_slice %978 {offsets = [0, 1, 0], sizes = [2, 1, 16], strides = [1, 1, 1]} : vector<2x10x16xf32> to vector<2x1x16xf32>
    %996 = vector.shape_cast %995 : vector<2x1x16xf32> to vector<2x16xf32>
    %997 = vector.shape_cast %996 : vector<2x16xf32> to vector<2x16x1xf32>
    %998 = vector.broadcast %997 : vector<2x16x1xf32> to vector<2x16x128xf32>
    %999 = arith.mulf %994, %998 : vector<2x16x128xf32>
    %cst_628 = arith.constant dense<0.000000e+00> : vector<2x128xf32>
    %1000 = vector.multi_reduction <add>, %999, %cst_628 [1] : vector<2x16x128xf32> to vector<2x128xf32>
    %c0_629 = arith.constant 0 : index
    %c1_630 = arith.constant 1 : index
    %c0_631 = arith.constant 0 : index
    %1001 = vector.load %arg6[%c0_629, %c1_630, %c0_631] : memref<2x10x128xf32, #tpu.memory_space<vmem>>, vector<2x1x128xf32>
    %1002 = vector.shape_cast %1001 : vector<2x1x128xf32> to vector<2x128xf32>
    %1003 = arith.addf %1002, %1000 : vector<2x128xf32>
    %c0_632 = arith.constant 0 : index
    %c1_633 = arith.constant 1 : index
    %c0_634 = arith.constant 0 : index
    %1004 = vector.load %arg6[%c0_632, %c1_633, %c0_634] : memref<2x10x128xf32, #tpu.memory_space<vmem>>, vector<2x1x128xf32>
    %1005 = vector.shape_cast %1004 : vector<2x1x128xf32> to vector<2x128xf32>
    %1006 = vector.shape_cast %1003 : vector<2x128xf32> to vector<2x1x128xf32>
    tpu.vector_store %arg6[%c0_632, %c1_633, %c0_634], %1006 {strides = array<i32>} : memref<2x10x128xf32, #tpu.memory_space<vmem>>, vector<2x1x128xf32>,
    %c0_635 = arith.constant 0 : index
    %c2_636 = arith.constant 2 : index
    %c0_637 = arith.constant 0 : index
    %c0_638 = arith.constant 0 : index
    %1007 = vector.load %arg5[%c0_635, %c2_636, %c0_637, %c0_638] : memref<2x10x16x128xf32, #tpu.memory_space<vmem>>, vector<2x1x16x128xf32>
    %1008 = vector.shape_cast %1007 : vector<2x1x16x128xf32> to vector<2x16x128xf32>
    %1009 = vector.extract_strided_slice %978 {offsets = [0, 2, 0], sizes = [2, 1, 16], strides = [1, 1, 1]} : vector<2x10x16xf32> to vector<2x1x16xf32>
    %1010 = vector.shape_cast %1009 : vector<2x1x16xf32> to vector<2x16xf32>
    %1011 = vector.shape_cast %1010 : vector<2x16xf32> to vector<2x16x1xf32>
    %1012 = vector.broadcast %1011 : vector<2x16x1xf32> to vector<2x16x128xf32>
    %1013 = arith.mulf %1008, %1012 : vector<2x16x128xf32>
    %cst_639 = arith.constant dense<0.000000e+00> : vector<2x128xf32>
    %1014 = vector.multi_reduction <add>, %1013, %cst_639 [1] : vector<2x16x128xf32> to vector<2x128xf32>
    %c0_640 = arith.constant 0 : index
    %c2_641 = arith.constant 2 : index
    %c0_642 = arith.constant 0 : index
    %1015 = vector.load %arg6[%c0_640, %c2_641, %c0_642] : memref<2x10x128xf32, #tpu.memory_space<vmem>>, vector<2x1x128xf32>
    %1016 = vector.shape_cast %1015 : vector<2x1x128xf32> to vector<2x128xf32>
    %1017 = arith.addf %1016, %1014 : vector<2x128xf32>
    %c0_643 = arith.constant 0 : index
    %c2_644 = arith.constant 2 : index
    %c0_645 = arith.constant 0 : index
    %1018 = vector.load %arg6[%c0_643, %c2_644, %c0_645] : memref<2x10x128xf32, #tpu.memory_space<vmem>>, vector<2x1x128xf32>
    %1019 = vector.shape_cast %1018 : vector<2x1x128xf32> to vector<2x128xf32>
    %1020 = vector.shape_cast %1017 : vector<2x128xf32> to vector<2x1x128xf32>
    tpu.vector_store %arg6[%c0_643, %c2_644, %c0_645], %1020 {strides = array<i32>} : memref<2x10x128xf32, #tpu.memory_space<vmem>>, vector<2x1x128xf32>,
    %c0_646 = arith.constant 0 : index
    %c3_647 = arith.constant 3 : index
    %c0_648 = arith.constant 0 : index
    %c0_649 = arith.constant 0 : index
    %1021 = vector.load %arg5[%c0_646, %c3_647, %c0_648, %c0_649] : memref<2x10x16x128xf32, #tpu.memory_space<vmem>>, vector<2x1x16x128xf32>
    %1022 = vector.shape_cast %1021 : vector<2x1x16x128xf32> to vector<2x16x128xf32>
    %1023 = vector.extract_strided_slice %978 {offsets = [0, 3, 0], sizes = [2, 1, 16], strides = [1, 1, 1]} : vector<2x10x16xf32> to vector<2x1x16xf32>
    %1024 = vector.shape_cast %1023 : vector<2x1x16xf32> to vector<2x16xf32>
    %1025 = vector.shape_cast %1024 : vector<2x16xf32> to vector<2x16x1xf32>
    %1026 = vector.broadcast %1025 : vector<2x16x1xf32> to vector<2x16x128xf32>
    %1027 = arith.mulf %1022, %1026 : vector<2x16x128xf32>
    %cst_650 = arith.constant dense<0.000000e+00> : vector<2x128xf32>
    %1028 = vector.multi_reduction <add>, %1027, %cst_650 [1] : vector<2x16x128xf32> to vector<2x128xf32>
    %c0_651 = arith.constant 0 : index
    %c3_652 = arith.constant 3 : index
    %c0_653 = arith.constant 0 : index
    %1029 = vector.load %arg6[%c0_651, %c3_652, %c0_653] : memref<2x10x128xf32, #tpu.memory_space<vmem>>, vector<2x1x128xf32>
    %1030 = vector.shape_cast %1029 : vector<2x1x128xf32> to vector<2x128xf32>
    %1031 = arith.addf %1030, %1028 : vector<2x128xf32>
    %c0_654 = arith.constant 0 : index
    %c3_655 = arith.constant 3 : index
    %c0_656 = arith.constant 0 : index
    %1032 = vector.load %arg6[%c0_654, %c3_655, %c0_656] : memref<2x10x128xf32, #tpu.memory_space<vmem>>, vector<2x1x128xf32>
    %1033 = vector.shape_cast %1032 : vector<2x1x128xf32> to vector<2x128xf32>
    %1034 = vector.shape_cast %1031 : vector<2x128xf32> to vector<2x1x128xf32>
    tpu.vector_store %arg6[%c0_654, %c3_655, %c0_656], %1034 {strides = array<i32>} : memref<2x10x128xf32, #tpu.memory_space<vmem>>, vector<2x1x128xf32>,
    %c0_657 = arith.constant 0 : index
    %c4_658 = arith.constant 4 : index
    %c0_659 = arith.constant 0 : index
    %c0_660 = arith.constant 0 : index
    %1035 = vector.load %arg5[%c0_657, %c4_658, %c0_659, %c0_660] : memref<2x10x16x128xf32, #tpu.memory_space<vmem>>, vector<2x1x16x128xf32>
    %1036 = vector.shape_cast %1035 : vector<2x1x16x128xf32> to vector<2x16x128xf32>
    %1037 = vector.extract_strided_slice %978 {offsets = [0, 4, 0], sizes = [2, 1, 16], strides = [1, 1, 1]} : vector<2x10x16xf32> to vector<2x1x16xf32>
    %1038 = vector.shape_cast %1037 : vector<2x1x16xf32> to vector<2x16xf32>
    %1039 = vector.shape_cast %1038 : vector<2x16xf32> to vector<2x16x1xf32>
    %1040 = vector.broadcast %1039 : vector<2x16x1xf32> to vector<2x16x128xf32>
    %1041 = arith.mulf %1036, %1040 : vector<2x16x128xf32>
    %cst_661 = arith.constant dense<0.000000e+00> : vector<2x128xf32>
    %1042 = vector.multi_reduction <add>, %1041, %cst_661 [1] : vector<2x16x128xf32> to vector<2x128xf32>
    %c0_662 = arith.constant 0 : index
    %c4_663 = arith.constant 4 : index
    %c0_664 = arith.constant 0 : index
    %1043 = vector.load %arg6[%c0_662, %c4_663, %c0_664] : memref<2x10x128xf32, #tpu.memory_space<vmem>>, vector<2x1x128xf32>
    %1044 = vector.shape_cast %1043 : vector<2x1x128xf32> to vector<2x128xf32>
    %1045 = arith.addf %1044, %1042 : vector<2x128xf32>
    %c0_665 = arith.constant 0 : index
    %c4_666 = arith.constant 4 : index
    %c0_667 = arith.constant 0 : index
    %1046 = vector.load %arg6[%c0_665, %c4_666, %c0_667] : memref<2x10x128xf32, #tpu.memory_space<vmem>>, vector<2x1x128xf32>
    %1047 = vector.shape_cast %1046 : vector<2x1x128xf32> to vector<2x128xf32>
    %1048 = vector.shape_cast %1045 : vector<2x128xf32> to vector<2x1x128xf32>
    tpu.vector_store %arg6[%c0_665, %c4_666, %c0_667], %1048 {strides = array<i32>} : memref<2x10x128xf32, #tpu.memory_space<vmem>>, vector<2x1x128xf32>,
    %c0_668 = arith.constant 0 : index
    %c5_669 = arith.constant 5 : index
    %c0_670 = arith.constant 0 : index
    %c0_671 = arith.constant 0 : index
    %1049 = vector.load %arg5[%c0_668, %c5_669, %c0_670, %c0_671] : memref<2x10x16x128xf32, #tpu.memory_space<vmem>>, vector<2x1x16x128xf32>
    %1050 = vector.shape_cast %1049 : vector<2x1x16x128xf32> to vector<2x16x128xf32>
    %1051 = vector.extract_strided_slice %978 {offsets = [0, 5, 0], sizes = [2, 1, 16], strides = [1, 1, 1]} : vector<2x10x16xf32> to vector<2x1x16xf32>
    %1052 = vector.shape_cast %1051 : vector<2x1x16xf32> to vector<2x16xf32>
    %1053 = vector.shape_cast %1052 : vector<2x16xf32> to vector<2x16x1xf32>
    %1054 = vector.broadcast %1053 : vector<2x16x1xf32> to vector<2x16x128xf32>
    %1055 = arith.mulf %1050, %1054 : vector<2x16x128xf32>
    %cst_672 = arith.constant dense<0.000000e+00> : vector<2x128xf32>
    %1056 = vector.multi_reduction <add>, %1055, %cst_672 [1] : vector<2x16x128xf32> to vector<2x128xf32>
    %c0_673 = arith.constant 0 : index
    %c5_674 = arith.constant 5 : index
    %c0_675 = arith.constant 0 : index
    %1057 = vector.load %arg6[%c0_673, %c5_674, %c0_675] : memref<2x10x128xf32, #tpu.memory_space<vmem>>, vector<2x1x128xf32>
    %1058 = vector.shape_cast %1057 : vector<2x1x128xf32> to vector<2x128xf32>
    %1059 = arith.addf %1058, %1056 : vector<2x128xf32>
    %c0_676 = arith.constant 0 : index
    %c5_677 = arith.constant 5 : index
    %c0_678 = arith.constant 0 : index
    %1060 = vector.load %arg6[%c0_676, %c5_677, %c0_678] : memref<2x10x128xf32, #tpu.memory_space<vmem>>, vector<2x1x128xf32>
    %1061 = vector.shape_cast %1060 : vector<2x1x128xf32> to vector<2x128xf32>
    %1062 = vector.shape_cast %1059 : vector<2x128xf32> to vector<2x1x128xf32>
    tpu.vector_store %arg6[%c0_676, %c5_677, %c0_678], %1062 {strides = array<i32>} : memref<2x10x128xf32, #tpu.memory_space<vmem>>, vector<2x1x128xf32>,
    %c0_679 = arith.constant 0 : index
    %c6_680 = arith.constant 6 : index
    %c0_681 = arith.constant 0 : index
    %c0_682 = arith.constant 0 : index
    %1063 = vector.load %arg5[%c0_679, %c6_680, %c0_681, %c0_682] : memref<2x10x16x128xf32, #tpu.memory_space<vmem>>, vector<2x1x16x128xf32>
    %1064 = vector.shape_cast %1063 : vector<2x1x16x128xf32> to vector<2x16x128xf32>
    %1065 = vector.extract_strided_slice %978 {offsets = [0, 6, 0], sizes = [2, 1, 16], strides = [1, 1, 1]} : vector<2x10x16xf32> to vector<2x1x16xf32>
    %1066 = vector.shape_cast %1065 : vector<2x1x16xf32> to vector<2x16xf32>
    %1067 = vector.shape_cast %1066 : vector<2x16xf32> to vector<2x16x1xf32>
    %1068 = vector.broadcast %1067 : vector<2x16x1xf32> to vector<2x16x128xf32>
    %1069 = arith.mulf %1064, %1068 : vector<2x16x128xf32>
    %cst_683 = arith.constant dense<0.000000e+00> : vector<2x128xf32>
    %1070 = vector.multi_reduction <add>, %1069, %cst_683 [1] : vector<2x16x128xf32> to vector<2x128xf32>
    %c0_684 = arith.constant 0 : index
    %c6_685 = arith.constant 6 : index
    %c0_686 = arith.constant 0 : index
    %1071 = vector.load %arg6[%c0_684, %c6_685, %c0_686] : memref<2x10x128xf32, #tpu.memory_space<vmem>>, vector<2x1x128xf32>
    %1072 = vector.shape_cast %1071 : vector<2x1x128xf32> to vector<2x128xf32>
    %1073 = arith.addf %1072, %1070 : vector<2x128xf32>
    %c0_687 = arith.constant 0 : index
    %c6_688 = arith.constant 6 : index
    %c0_689 = arith.constant 0 : index
    %1074 = vector.load %arg6[%c0_687, %c6_688, %c0_689] : memref<2x10x128xf32, #tpu.memory_space<vmem>>, vector<2x1x128xf32>
    %1075 = vector.shape_cast %1074 : vector<2x1x128xf32> to vector<2x128xf32>
    %1076 = vector.shape_cast %1073 : vector<2x128xf32> to vector<2x1x128xf32>
    tpu.vector_store %arg6[%c0_687, %c6_688, %c0_689], %1076 {strides = array<i32>} : memref<2x10x128xf32, #tpu.memory_space<vmem>>, vector<2x1x128xf32>,
    %c0_690 = arith.constant 0 : index
    %c7_691 = arith.constant 7 : index
    %c0_692 = arith.constant 0 : index
    %c0_693 = arith.constant 0 : index
    %1077 = vector.load %arg5[%c0_690, %c7_691, %c0_692, %c0_693] : memref<2x10x16x128xf32, #tpu.memory_space<vmem>>, vector<2x1x16x128xf32>
    %1078 = vector.shape_cast %1077 : vector<2x1x16x128xf32> to vector<2x16x128xf32>
    %1079 = vector.extract_strided_slice %978 {offsets = [0, 7, 0], sizes = [2, 1, 16], strides = [1, 1, 1]} : vector<2x10x16xf32> to vector<2x1x16xf32>
    %1080 = vector.shape_cast %1079 : vector<2x1x16xf32> to vector<2x16xf32>
    %1081 = vector.shape_cast %1080 : vector<2x16xf32> to vector<2x16x1xf32>
    %1082 = vector.broadcast %1081 : vector<2x16x1xf32> to vector<2x16x128xf32>
    %1083 = arith.mulf %1078, %1082 : vector<2x16x128xf32>
    %cst_694 = arith.constant dense<0.000000e+00> : vector<2x128xf32>
    %1084 = vector.multi_reduction <add>, %1083, %cst_694 [1] : vector<2x16x128xf32> to vector<2x128xf32>
    %c0_695 = arith.constant 0 : index
    %c7_696 = arith.constant 7 : index
    %c0_697 = arith.constant 0 : index
    %1085 = vector.load %arg6[%c0_695, %c7_696, %c0_697] : memref<2x10x128xf32, #tpu.memory_space<vmem>>, vector<2x1x128xf32>
    %1086 = vector.shape_cast %1085 : vector<2x1x128xf32> to vector<2x128xf32>
    %1087 = arith.addf %1086, %1084 : vector<2x128xf32>
    %c0_698 = arith.constant 0 : index
    %c7_699 = arith.constant 7 : index
    %c0_700 = arith.constant 0 : index
    %1088 = vector.load %arg6[%c0_698, %c7_699, %c0_700] : memref<2x10x128xf32, #tpu.memory_space<vmem>>, vector<2x1x128xf32>
    %1089 = vector.shape_cast %1088 : vector<2x1x128xf32> to vector<2x128xf32>
    %1090 = vector.shape_cast %1087 : vector<2x128xf32> to vector<2x1x128xf32>
    tpu.vector_store %arg6[%c0_698, %c7_699, %c0_700], %1090 {strides = array<i32>} : memref<2x10x128xf32, #tpu.memory_space<vmem>>, vector<2x1x128xf32>,
    %c0_701 = arith.constant 0 : index
    %c8_702 = arith.constant 8 : index
    %c0_703 = arith.constant 0 : index
    %c0_704 = arith.constant 0 : index
    %1091 = vector.load %arg5[%c0_701, %c8_702, %c0_703, %c0_704] : memref<2x10x16x128xf32, #tpu.memory_space<vmem>>, vector<2x1x16x128xf32>
    %1092 = vector.shape_cast %1091 : vector<2x1x16x128xf32> to vector<2x16x128xf32>
    %1093 = vector.extract_strided_slice %978 {offsets = [0, 8, 0], sizes = [2, 1, 16], strides = [1, 1, 1]} : vector<2x10x16xf32> to vector<2x1x16xf32>
    %1094 = vector.shape_cast %1093 : vector<2x1x16xf32> to vector<2x16xf32>
    %1095 = vector.shape_cast %1094 : vector<2x16xf32> to vector<2x16x1xf32>
    %1096 = vector.broadcast %1095 : vector<2x16x1xf32> to vector<2x16x128xf32>
    %1097 = arith.mulf %1092, %1096 : vector<2x16x128xf32>
    %cst_705 = arith.constant dense<0.000000e+00> : vector<2x128xf32>
    %1098 = vector.multi_reduction <add>, %1097, %cst_705 [1] : vector<2x16x128xf32> to vector<2x128xf32>
    %c0_706 = arith.constant 0 : index
    %c8_707 = arith.constant 8 : index
    %c0_708 = arith.constant 0 : index
    %1099 = vector.load %arg6[%c0_706, %c8_707, %c0_708] : memref<2x10x128xf32, #tpu.memory_space<vmem>>, vector<2x1x128xf32>
    %1100 = vector.shape_cast %1099 : vector<2x1x128xf32> to vector<2x128xf32>
    %1101 = arith.addf %1100, %1098 : vector<2x128xf32>
    %c0_709 = arith.constant 0 : index
    %c8_710 = arith.constant 8 : index
    %c0_711 = arith.constant 0 : index
    %1102 = vector.load %arg6[%c0_709, %c8_710, %c0_711] : memref<2x10x128xf32, #tpu.memory_space<vmem>>, vector<2x1x128xf32>
    %1103 = vector.shape_cast %1102 : vector<2x1x128xf32> to vector<2x128xf32>
    %1104 = vector.shape_cast %1101 : vector<2x128xf32> to vector<2x1x128xf32>
    tpu.vector_store %arg6[%c0_709, %c8_710, %c0_711], %1104 {strides = array<i32>} : memref<2x10x128xf32, #tpu.memory_space<vmem>>, vector<2x1x128xf32>,
    %c0_712 = arith.constant 0 : index
    %c9_713 = arith.constant 9 : index
    %c0_714 = arith.constant 0 : index
    %c0_715 = arith.constant 0 : index
    %1105 = vector.load %arg5[%c0_712, %c9_713, %c0_714, %c0_715] : memref<2x10x16x128xf32, #tpu.memory_space<vmem>>, vector<2x1x16x128xf32>
    %1106 = vector.shape_cast %1105 : vector<2x1x16x128xf32> to vector<2x16x128xf32>
    %1107 = vector.extract_strided_slice %978 {offsets = [0, 9, 0], sizes = [2, 1, 16], strides = [1, 1, 1]} : vector<2x10x16xf32> to vector<2x1x16xf32>
    %1108 = vector.shape_cast %1107 : vector<2x1x16xf32> to vector<2x16xf32>
    %1109 = vector.shape_cast %1108 : vector<2x16xf32> to vector<2x16x1xf32>
    %1110 = vector.broadcast %1109 : vector<2x16x1xf32> to vector<2x16x128xf32>
    %1111 = arith.mulf %1106, %1110 : vector<2x16x128xf32>
    %cst_716 = arith.constant dense<0.000000e+00> : vector<2x128xf32>
    %1112 = vector.multi_reduction <add>, %1111, %cst_716 [1] : vector<2x16x128xf32> to vector<2x128xf32>
    %c0_717 = arith.constant 0 : index
    %c9_718 = arith.constant 9 : index
    %c0_719 = arith.constant 0 : index
    %1113 = vector.load %arg6[%c0_717, %c9_718, %c0_719] : memref<2x10x128xf32, #tpu.memory_space<vmem>>, vector<2x1x128xf32>
    %1114 = vector.shape_cast %1113 : vector<2x1x128xf32> to vector<2x128xf32>
    %1115 = arith.addf %1114, %1112 : vector<2x128xf32>
    %c0_720 = arith.constant 0 : index
    %c9_721 = arith.constant 9 : index
    %c0_722 = arith.constant 0 : index
    %1116 = vector.load %arg6[%c0_720, %c9_721, %c0_722] : memref<2x10x128xf32, #tpu.memory_space<vmem>>, vector<2x1x128xf32>
    %1117 = vector.shape_cast %1116 : vector<2x1x128xf32> to vector<2x128xf32>
    %1118 = vector.shape_cast %1115 : vector<2x128xf32> to vector<2x1x128xf32>
    tpu.vector_store %arg6[%c0_720, %c9_721, %c0_722], %1118 {strides = array<i32>} : memref<2x10x128xf32, #tpu.memory_space<vmem>>, vector<2x1x128xf32>,
    %c0_723 = arith.constant 0 : index
    %c0_724 = arith.constant 0 : index
    %c0_725 = arith.constant 0 : index
    %1119 = vector.load %arg6[%c0_723, %c0_724, %c0_725] : memref<2x10x128xf32, #tpu.memory_space<vmem>>, vector<2x10x128xf32>
    %cst_726 = arith.constant dense<0xFF800000> : vector<2x128xf32>
    %1120 = vector.multi_reduction <maximumf>, %1119, %cst_726 [1] : vector<2x10x128xf32> to vector<2x128xf32>
    %1121 = vector.shape_cast %1120 : vector<2x128xf32> to vector<2x1x128xf32>
    %1122 = vector.broadcast %1121 : vector<2x1x128xf32> to vector<2x10x128xf32>
    %1123 = arith.subf %1119, %1122 : vector<2x10x128xf32>
    %1124 = math.exp %1123 : vector<2x10x128xf32>
    %cst_727 = arith.constant dense<0.000000e+00> : vector<2x128xf32>
    %1125 = vector.multi_reduction <add>, %1124, %cst_727 [1] : vector<2x10x128xf32> to vector<2x128xf32>
    %1126 = vector.shape_cast %1125 : vector<2x128xf32> to vector<2x1x128xf32>
    %1127 = vector.broadcast %1126 : vector<2x1x128xf32> to vector<2x10x128xf32>
    %1128 = arith.divf %1124, %1127 : vector<2x10x128xf32>
    %c0_728 = arith.constant 0 : index
    %c0_729 = arith.constant 0 : index
    %c0_730 = arith.constant 0 : index
    %c0_731 = arith.constant 0 : index
    %1129 = vector.load %arg5[%c0_728, %c0_729, %c0_730, %c0_731] : memref<2x10x16x128xf32, #tpu.memory_space<vmem>>, vector<2x1x16x128xf32>
    %1130 = vector.shape_cast %1129 : vector<2x1x16x128xf32> to vector<2x16x128xf32>
    %1131 = vector.extract_strided_slice %1128 {offsets = [0, 0, 0], sizes = [2, 1, 128], strides = [1, 1, 1]} : vector<2x10x128xf32> to vector<2x1x128xf32>
    %1132 = vector.shape_cast %1131 : vector<2x1x128xf32> to vector<2x128xf32>
    %1133 = vector.shape_cast %1132 : vector<2x128xf32> to vector<2x1x128xf32>
    %1134 = vector.broadcast %1133 : vector<2x1x128xf32> to vector<2x16x128xf32>
    %1135 = arith.mulf %1134, %1130 : vector<2x16x128xf32>
    %cst_732 = arith.constant dense<0.000000e+00> : vector<2x16xf32>
    %1136 = vector.multi_reduction <add>, %1135, %cst_732 [2] : vector<2x16x128xf32> to vector<2x16xf32>
    %c0_733 = arith.constant 0 : index
    %c0_734 = arith.constant 0 : index
    %c0_735 = arith.constant 0 : index
    %1137 = vector.load %arg7[%c0_733, %c0_734, %c0_735] : memref<2x10x16xf32, #tpu.memory_space<vmem>>, vector<2x1x16xf32>
    %1138 = vector.shape_cast %1137 : vector<2x1x16xf32> to vector<2x16xf32>
    %1139 = vector.shape_cast %1136 : vector<2x16xf32> to vector<2x1x16xf32>
    tpu.vector_store %arg7[%c0_733, %c0_734, %c0_735], %1139 {strides = array<i32>} : memref<2x10x16xf32, #tpu.memory_space<vmem>>, vector<2x1x16xf32>,
    %c0_736 = arith.constant 0 : index
    %c1_737 = arith.constant 1 : index
    %c0_738 = arith.constant 0 : index
    %c0_739 = arith.constant 0 : index
    %1140 = vector.load %arg5[%c0_736, %c1_737, %c0_738, %c0_739] : memref<2x10x16x128xf32, #tpu.memory_space<vmem>>, vector<2x1x16x128xf32>
    %1141 = vector.shape_cast %1140 : vector<2x1x16x128xf32> to vector<2x16x128xf32>
    %1142 = vector.extract_strided_slice %1128 {offsets = [0, 1, 0], sizes = [2, 1, 128], strides = [1, 1, 1]} : vector<2x10x128xf32> to vector<2x1x128xf32>
    %1143 = vector.shape_cast %1142 : vector<2x1x128xf32> to vector<2x128xf32>
    %1144 = vector.shape_cast %1143 : vector<2x128xf32> to vector<2x1x128xf32>
    %1145 = vector.broadcast %1144 : vector<2x1x128xf32> to vector<2x16x128xf32>
    %1146 = arith.mulf %1145, %1141 : vector<2x16x128xf32>
    %cst_740 = arith.constant dense<0.000000e+00> : vector<2x16xf32>
    %1147 = vector.multi_reduction <add>, %1146, %cst_740 [2] : vector<2x16x128xf32> to vector<2x16xf32>
    %c0_741 = arith.constant 0 : index
    %c1_742 = arith.constant 1 : index
    %c0_743 = arith.constant 0 : index
    %1148 = vector.load %arg7[%c0_741, %c1_742, %c0_743] : memref<2x10x16xf32, #tpu.memory_space<vmem>>, vector<2x1x16xf32>
    %1149 = vector.shape_cast %1148 : vector<2x1x16xf32> to vector<2x16xf32>
    %1150 = vector.shape_cast %1147 : vector<2x16xf32> to vector<2x1x16xf32>
    tpu.vector_store %arg7[%c0_741, %c1_742, %c0_743], %1150 {strides = array<i32>} : memref<2x10x16xf32, #tpu.memory_space<vmem>>, vector<2x1x16xf32>,
    %c0_744 = arith.constant 0 : index
    %c2_745 = arith.constant 2 : index
    %c0_746 = arith.constant 0 : index
    %c0_747 = arith.constant 0 : index
    %1151 = vector.load %arg5[%c0_744, %c2_745, %c0_746, %c0_747] : memref<2x10x16x128xf32, #tpu.memory_space<vmem>>, vector<2x1x16x128xf32>
    %1152 = vector.shape_cast %1151 : vector<2x1x16x128xf32> to vector<2x16x128xf32>
    %1153 = vector.extract_strided_slice %1128 {offsets = [0, 2, 0], sizes = [2, 1, 128], strides = [1, 1, 1]} : vector<2x10x128xf32> to vector<2x1x128xf32>
    %1154 = vector.shape_cast %1153 : vector<2x1x128xf32> to vector<2x128xf32>
    %1155 = vector.shape_cast %1154 : vector<2x128xf32> to vector<2x1x128xf32>
    %1156 = vector.broadcast %1155 : vector<2x1x128xf32> to vector<2x16x128xf32>
    %1157 = arith.mulf %1156, %1152 : vector<2x16x128xf32>
    %cst_748 = arith.constant dense<0.000000e+00> : vector<2x16xf32>
    %1158 = vector.multi_reduction <add>, %1157, %cst_748 [2] : vector<2x16x128xf32> to vector<2x16xf32>
    %c0_749 = arith.constant 0 : index
    %c2_750 = arith.constant 2 : index
    %c0_751 = arith.constant 0 : index
    %1159 = vector.load %arg7[%c0_749, %c2_750, %c0_751] : memref<2x10x16xf32, #tpu.memory_space<vmem>>, vector<2x1x16xf32>
    %1160 = vector.shape_cast %1159 : vector<2x1x16xf32> to vector<2x16xf32>
    %1161 = vector.shape_cast %1158 : vector<2x16xf32> to vector<2x1x16xf32>
    tpu.vector_store %arg7[%c0_749, %c2_750, %c0_751], %1161 {strides = array<i32>} : memref<2x10x16xf32, #tpu.memory_space<vmem>>, vector<2x1x16xf32>,
    %c0_752 = arith.constant 0 : index
    %c3_753 = arith.constant 3 : index
    %c0_754 = arith.constant 0 : index
    %c0_755 = arith.constant 0 : index
    %1162 = vector.load %arg5[%c0_752, %c3_753, %c0_754, %c0_755] : memref<2x10x16x128xf32, #tpu.memory_space<vmem>>, vector<2x1x16x128xf32>
    %1163 = vector.shape_cast %1162 : vector<2x1x16x128xf32> to vector<2x16x128xf32>
    %1164 = vector.extract_strided_slice %1128 {offsets = [0, 3, 0], sizes = [2, 1, 128], strides = [1, 1, 1]} : vector<2x10x128xf32> to vector<2x1x128xf32>
    %1165 = vector.shape_cast %1164 : vector<2x1x128xf32> to vector<2x128xf32>
    %1166 = vector.shape_cast %1165 : vector<2x128xf32> to vector<2x1x128xf32>
    %1167 = vector.broadcast %1166 : vector<2x1x128xf32> to vector<2x16x128xf32>
    %1168 = arith.mulf %1167, %1163 : vector<2x16x128xf32>
    %cst_756 = arith.constant dense<0.000000e+00> : vector<2x16xf32>
    %1169 = vector.multi_reduction <add>, %1168, %cst_756 [2] : vector<2x16x128xf32> to vector<2x16xf32>
    %c0_757 = arith.constant 0 : index
    %c3_758 = arith.constant 3 : index
    %c0_759 = arith.constant 0 : index
    %1170 = vector.load %arg7[%c0_757, %c3_758, %c0_759] : memref<2x10x16xf32, #tpu.memory_space<vmem>>, vector<2x1x16xf32>
    %1171 = vector.shape_cast %1170 : vector<2x1x16xf32> to vector<2x16xf32>
    %1172 = vector.shape_cast %1169 : vector<2x16xf32> to vector<2x1x16xf32>
    tpu.vector_store %arg7[%c0_757, %c3_758, %c0_759], %1172 {strides = array<i32>} : memref<2x10x16xf32, #tpu.memory_space<vmem>>, vector<2x1x16xf32>,
    %c0_760 = arith.constant 0 : index
    %c4_761 = arith.constant 4 : index
    %c0_762 = arith.constant 0 : index
    %c0_763 = arith.constant 0 : index
    %1173 = vector.load %arg5[%c0_760, %c4_761, %c0_762, %c0_763] : memref<2x10x16x128xf32, #tpu.memory_space<vmem>>, vector<2x1x16x128xf32>
    %1174 = vector.shape_cast %1173 : vector<2x1x16x128xf32> to vector<2x16x128xf32>
    %1175 = vector.extract_strided_slice %1128 {offsets = [0, 4, 0], sizes = [2, 1, 128], strides = [1, 1, 1]} : vector<2x10x128xf32> to vector<2x1x128xf32>
    %1176 = vector.shape_cast %1175 : vector<2x1x128xf32> to vector<2x128xf32>
    %1177 = vector.shape_cast %1176 : vector<2x128xf32> to vector<2x1x128xf32>
    %1178 = vector.broadcast %1177 : vector<2x1x128xf32> to vector<2x16x128xf32>
    %1179 = arith.mulf %1178, %1174 : vector<2x16x128xf32>
    %cst_764 = arith.constant dense<0.000000e+00> : vector<2x16xf32>
    %1180 = vector.multi_reduction <add>, %1179, %cst_764 [2] : vector<2x16x128xf32> to vector<2x16xf32>
    %c0_765 = arith.constant 0 : index
    %c4_766 = arith.constant 4 : index
    %c0_767 = arith.constant 0 : index
    %1181 = vector.load %arg7[%c0_765, %c4_766, %c0_767] : memref<2x10x16xf32, #tpu.memory_space<vmem>>, vector<2x1x16xf32>
    %1182 = vector.shape_cast %1181 : vector<2x1x16xf32> to vector<2x16xf32>
    %1183 = vector.shape_cast %1180 : vector<2x16xf32> to vector<2x1x16xf32>
    tpu.vector_store %arg7[%c0_765, %c4_766, %c0_767], %1183 {strides = array<i32>} : memref<2x10x16xf32, #tpu.memory_space<vmem>>, vector<2x1x16xf32>,
    %c0_768 = arith.constant 0 : index
    %c5_769 = arith.constant 5 : index
    %c0_770 = arith.constant 0 : index
    %c0_771 = arith.constant 0 : index
    %1184 = vector.load %arg5[%c0_768, %c5_769, %c0_770, %c0_771] : memref<2x10x16x128xf32, #tpu.memory_space<vmem>>, vector<2x1x16x128xf32>
    %1185 = vector.shape_cast %1184 : vector<2x1x16x128xf32> to vector<2x16x128xf32>
    %1186 = vector.extract_strided_slice %1128 {offsets = [0, 5, 0], sizes = [2, 1, 128], strides = [1, 1, 1]} : vector<2x10x128xf32> to vector<2x1x128xf32>
    %1187 = vector.shape_cast %1186 : vector<2x1x128xf32> to vector<2x128xf32>
    %1188 = vector.shape_cast %1187 : vector<2x128xf32> to vector<2x1x128xf32>
    %1189 = vector.broadcast %1188 : vector<2x1x128xf32> to vector<2x16x128xf32>
    %1190 = arith.mulf %1189, %1185 : vector<2x16x128xf32>
    %cst_772 = arith.constant dense<0.000000e+00> : vector<2x16xf32>
    %1191 = vector.multi_reduction <add>, %1190, %cst_772 [2] : vector<2x16x128xf32> to vector<2x16xf32>
    %c0_773 = arith.constant 0 : index
    %c5_774 = arith.constant 5 : index
    %c0_775 = arith.constant 0 : index
    %1192 = vector.load %arg7[%c0_773, %c5_774, %c0_775] : memref<2x10x16xf32, #tpu.memory_space<vmem>>, vector<2x1x16xf32>
    %1193 = vector.shape_cast %1192 : vector<2x1x16xf32> to vector<2x16xf32>
    %1194 = vector.shape_cast %1191 : vector<2x16xf32> to vector<2x1x16xf32>
    tpu.vector_store %arg7[%c0_773, %c5_774, %c0_775], %1194 {strides = array<i32>} : memref<2x10x16xf32, #tpu.memory_space<vmem>>, vector<2x1x16xf32>,
    %c0_776 = arith.constant 0 : index
    %c6_777 = arith.constant 6 : index
    %c0_778 = arith.constant 0 : index
    %c0_779 = arith.constant 0 : index
    %1195 = vector.load %arg5[%c0_776, %c6_777, %c0_778, %c0_779] : memref<2x10x16x128xf32, #tpu.memory_space<vmem>>, vector<2x1x16x128xf32>
    %1196 = vector.shape_cast %1195 : vector<2x1x16x128xf32> to vector<2x16x128xf32>
    %1197 = vector.extract_strided_slice %1128 {offsets = [0, 6, 0], sizes = [2, 1, 128], strides = [1, 1, 1]} : vector<2x10x128xf32> to vector<2x1x128xf32>
    %1198 = vector.shape_cast %1197 : vector<2x1x128xf32> to vector<2x128xf32>
    %1199 = vector.shape_cast %1198 : vector<2x128xf32> to vector<2x1x128xf32>
    %1200 = vector.broadcast %1199 : vector<2x1x128xf32> to vector<2x16x128xf32>
    %1201 = arith.mulf %1200, %1196 : vector<2x16x128xf32>
    %cst_780 = arith.constant dense<0.000000e+00> : vector<2x16xf32>
    %1202 = vector.multi_reduction <add>, %1201, %cst_780 [2] : vector<2x16x128xf32> to vector<2x16xf32>
    %c0_781 = arith.constant 0 : index
    %c6_782 = arith.constant 6 : index
    %c0_783 = arith.constant 0 : index
    %1203 = vector.load %arg7[%c0_781, %c6_782, %c0_783] : memref<2x10x16xf32, #tpu.memory_space<vmem>>, vector<2x1x16xf32>
    %1204 = vector.shape_cast %1203 : vector<2x1x16xf32> to vector<2x16xf32>
    %1205 = vector.shape_cast %1202 : vector<2x16xf32> to vector<2x1x16xf32>
    tpu.vector_store %arg7[%c0_781, %c6_782, %c0_783], %1205 {strides = array<i32>} : memref<2x10x16xf32, #tpu.memory_space<vmem>>, vector<2x1x16xf32>,
    %c0_784 = arith.constant 0 : index
    %c7_785 = arith.constant 7 : index
    %c0_786 = arith.constant 0 : index
    %c0_787 = arith.constant 0 : index
    %1206 = vector.load %arg5[%c0_784, %c7_785, %c0_786, %c0_787] : memref<2x10x16x128xf32, #tpu.memory_space<vmem>>, vector<2x1x16x128xf32>
    %1207 = vector.shape_cast %1206 : vector<2x1x16x128xf32> to vector<2x16x128xf32>
    %1208 = vector.extract_strided_slice %1128 {offsets = [0, 7, 0], sizes = [2, 1, 128], strides = [1, 1, 1]} : vector<2x10x128xf32> to vector<2x1x128xf32>
    %1209 = vector.shape_cast %1208 : vector<2x1x128xf32> to vector<2x128xf32>
    %1210 = vector.shape_cast %1209 : vector<2x128xf32> to vector<2x1x128xf32>
    %1211 = vector.broadcast %1210 : vector<2x1x128xf32> to vector<2x16x128xf32>
    %1212 = arith.mulf %1211, %1207 : vector<2x16x128xf32>
    %cst_788 = arith.constant dense<0.000000e+00> : vector<2x16xf32>
    %1213 = vector.multi_reduction <add>, %1212, %cst_788 [2] : vector<2x16x128xf32> to vector<2x16xf32>
    %c0_789 = arith.constant 0 : index
    %c7_790 = arith.constant 7 : index
    %c0_791 = arith.constant 0 : index
    %1214 = vector.load %arg7[%c0_789, %c7_790, %c0_791] : memref<2x10x16xf32, #tpu.memory_space<vmem>>, vector<2x1x16xf32>
    %1215 = vector.shape_cast %1214 : vector<2x1x16xf32> to vector<2x16xf32>
    %1216 = vector.shape_cast %1213 : vector<2x16xf32> to vector<2x1x16xf32>
    tpu.vector_store %arg7[%c0_789, %c7_790, %c0_791], %1216 {strides = array<i32>} : memref<2x10x16xf32, #tpu.memory_space<vmem>>, vector<2x1x16xf32>,
    %c0_792 = arith.constant 0 : index
    %c8_793 = arith.constant 8 : index
    %c0_794 = arith.constant 0 : index
    %c0_795 = arith.constant 0 : index
    %1217 = vector.load %arg5[%c0_792, %c8_793, %c0_794, %c0_795] : memref<2x10x16x128xf32, #tpu.memory_space<vmem>>, vector<2x1x16x128xf32>
    %1218 = vector.shape_cast %1217 : vector<2x1x16x128xf32> to vector<2x16x128xf32>
    %1219 = vector.extract_strided_slice %1128 {offsets = [0, 8, 0], sizes = [2, 1, 128], strides = [1, 1, 1]} : vector<2x10x128xf32> to vector<2x1x128xf32>
    %1220 = vector.shape_cast %1219 : vector<2x1x128xf32> to vector<2x128xf32>
    %1221 = vector.shape_cast %1220 : vector<2x128xf32> to vector<2x1x128xf32>
    %1222 = vector.broadcast %1221 : vector<2x1x128xf32> to vector<2x16x128xf32>
    %1223 = arith.mulf %1222, %1218 : vector<2x16x128xf32>
    %cst_796 = arith.constant dense<0.000000e+00> : vector<2x16xf32>
    %1224 = vector.multi_reduction <add>, %1223, %cst_796 [2] : vector<2x16x128xf32> to vector<2x16xf32>
    %c0_797 = arith.constant 0 : index
    %c8_798 = arith.constant 8 : index
    %c0_799 = arith.constant 0 : index
    %1225 = vector.load %arg7[%c0_797, %c8_798, %c0_799] : memref<2x10x16xf32, #tpu.memory_space<vmem>>, vector<2x1x16xf32>
    %1226 = vector.shape_cast %1225 : vector<2x1x16xf32> to vector<2x16xf32>
    %1227 = vector.shape_cast %1224 : vector<2x16xf32> to vector<2x1x16xf32>
    tpu.vector_store %arg7[%c0_797, %c8_798, %c0_799], %1227 {strides = array<i32>} : memref<2x10x16xf32, #tpu.memory_space<vmem>>, vector<2x1x16xf32>,
    %c0_800 = arith.constant 0 : index
    %c9_801 = arith.constant 9 : index
    %c0_802 = arith.constant 0 : index
    %c0_803 = arith.constant 0 : index
    %1228 = vector.load %arg5[%c0_800, %c9_801, %c0_802, %c0_803] : memref<2x10x16x128xf32, #tpu.memory_space<vmem>>, vector<2x1x16x128xf32>
    %1229 = vector.shape_cast %1228 : vector<2x1x16x128xf32> to vector<2x16x128xf32>
    %1230 = vector.extract_strided_slice %1128 {offsets = [0, 9, 0], sizes = [2, 1, 128], strides = [1, 1, 1]} : vector<2x10x128xf32> to vector<2x1x128xf32>
    %1231 = vector.shape_cast %1230 : vector<2x1x128xf32> to vector<2x128xf32>
    %1232 = vector.shape_cast %1231 : vector<2x128xf32> to vector<2x1x128xf32>
    %1233 = vector.broadcast %1232 : vector<2x1x128xf32> to vector<2x16x128xf32>
    %1234 = arith.mulf %1233, %1229 : vector<2x16x128xf32>
    %cst_804 = arith.constant dense<0.000000e+00> : vector<2x16xf32>
    %1235 = vector.multi_reduction <add>, %1234, %cst_804 [2] : vector<2x16x128xf32> to vector<2x16xf32>
    %c0_805 = arith.constant 0 : index
    %c9_806 = arith.constant 9 : index
    %c0_807 = arith.constant 0 : index
    %1236 = vector.load %arg7[%c0_805, %c9_806, %c0_807] : memref<2x10x16xf32, #tpu.memory_space<vmem>>, vector<2x1x16xf32>
    %1237 = vector.shape_cast %1236 : vector<2x1x16xf32> to vector<2x16xf32>
    %1238 = vector.shape_cast %1235 : vector<2x16xf32> to vector<2x1x16xf32>
    tpu.vector_store %arg7[%c0_805, %c9_806, %c0_807], %1238 {strides = array<i32>} : memref<2x10x16xf32, #tpu.memory_space<vmem>>, vector<2x1x16xf32>,
    %c0_808 = arith.constant 0 : index
    %c0_809 = arith.constant 0 : index
    %c0_810 = arith.constant 0 : index
    %1239 = vector.load %arg7[%c0_808, %c0_809, %c0_810] : memref<2x10x16xf32, #tpu.memory_space<vmem>>, vector<2x10x16xf32>
    %1240 = vector.broadcast %1 : vector<1x10x16xf32> to vector<2x10x16xf32>
    %1241 = arith.addf %1239, %1240 : vector<2x10x16xf32>
    %1242 = arith.mulf %1241, %1241 : vector<2x10x16xf32>
    %cst_811 = arith.constant dense<0.000000e+00> : vector<2x10xf32>
    %1243 = vector.multi_reduction <add>, %1242, %cst_811 [2] : vector<2x10x16xf32> to vector<2x10xf32>
    %1244 = vector.shape_cast %1243 : vector<2x10xf32> to vector<2x10x1xf32>
    %cst_812 = arith.constant 1.000000e+00 : f32
    %1245 = vector.broadcast %cst_812 : f32 to vector<2x10x1xf32>
    %1246 = arith.addf %1245, %1244 : vector<2x10x1xf32>
    %1247 = arith.divf %1244, %1246 : vector<2x10x1xf32>
    %1248 = vector.broadcast %1247 : vector<2x10x1xf32> to vector<2x10x16xf32>
    %1249 = arith.mulf %1248, %1241 : vector<2x10x16xf32>
    %cst_813 = arith.constant 1.000000e-16 : f32
    %1250 = vector.broadcast %cst_813 : f32 to vector<2x10x1xf32>
    %1251 = arith.addf %1244, %1250 : vector<2x10x1xf32>
    %1252 = math.rsqrt %1251 : vector<2x10x1xf32>
    %1253 = vector.broadcast %1252 : vector<2x10x1xf32> to vector<2x10x16xf32>
    %1254 = arith.mulf %1249, %1253 : vector<2x10x16xf32>
    %c0_814 = arith.constant 0 : index
    %c0_815 = arith.constant 0 : index
    %c0_816 = arith.constant 0 : index
    %1255 = vector.load %arg4[%c0_814, %c0_815, %c0_816] : memref<2x10x16xf32, #tpu.memory_space<vmem>>, vector<2x10x16xf32>
    tpu.vector_store %arg4[%c0_814, %c0_815, %c0_816], %1254 {strides = array<i32>} : memref<2x10x16xf32, #tpu.memory_space<vmem>>, vector<2x10x16xf32>,
    return
  }
  func.func @transform_0(%arg0: i32) -> (i32, i32, i32) {
    %c0_i32 = arith.constant 0 : i32
    %c0_i32_0 = arith.constant 0 : i32
    %c0_i32_1 = arith.constant 0 : i32
    return %arg0, %c0_i32, %c0_i32_0 : i32, i32, i32
  }
  func.func @transform_1(%arg0: i32) -> (i32, i32, i32, i32) {
    %c0_i32 = arith.constant 0 : i32
    %c0_i32_0 = arith.constant 0 : i32
    %c0_i32_1 = arith.constant 0 : i32
    %c0_i32_2 = arith.constant 0 : i32
    %c0_i32_3 = arith.constant 0 : i32
    return %c0_i32, %c0_i32_0, %c0_i32_1, %c0_i32_2 : i32, i32, i32, i32
  }
  func.func @transform_2(%arg0: i32) -> (i32, i32, i32) {
    %c0_i32 = arith.constant 0 : i32
    %c0_i32_0 = arith.constant 0 : i32
    %c0_i32_1 = arith.constant 0 : i32
    %c0_i32_2 = arith.constant 0 : i32
    return %c0_i32, %c0_i32_0, %c0_i32_1 : i32, i32, i32
  }
  func.func @transform_3(%arg0: i32) -> (i32, i32, i32) {
    %c0_i32 = arith.constant 0 : i32
    %c0_i32_0 = arith.constant 0 : i32
    %c0_i32_1 = arith.constant 0 : i32
    return %arg0, %c0_i32, %c0_i32_0 : i32, i32, i32
  }
}

</mosaic_0001>

<bundles_post_ra>
// kernel: class_capsules_forward.1
= control target key start
LH: loop header
LB: loop body
LE: loop exit
PB: predicated region body
PF: predicated region fallthrough
CT: control target
= control target key end

     0   :  { %v20_v0 = vlaneseq  ;;  %vm1001_vm0 = vcmask 130112   ;;  %vm1014_vm1 = vcmask 122880   ;;  %vm1411_vm2 = vcmask 123904   ;;  %s5533_s0 = inlined_call_operand.vmem [shape: f32[2,8,128], index: 0, kind: input, shape index: {}]   ;;  %s5534_s1 = inlined_call_operand.vmem [shape: f32[8,10,16,128], index: 1, kind: input, shape index: {}]   ;;  %s5535_s2 = inlined_call_operand.vmem [shape: f32[1,10,16], index: 2, kind: input, shape index: {}]   ;;  %s5536_s3 = inlined_call_operand.vmem [shape: f32[2,10,16], index: 3, kind: output, shape index: {}]  }
   0x1   :  { %v15_v2 = vld [vmem:[%s5533_s0 + $0x8] sm:$0xff]  ;;  %v3756_v8 = vld [vmem:[%s5534_s1 + $0x80] sm:$0xff]  ;;  %vm1407_vm3 = vcmask 130048   ;;  %vm1913_vm4 = vcmask 1041408  }
   0x2   :  { %v21_v1 = vshrl.u32 %v20_v0, 7  ;;  %v991_v3 = vand.u32 127, %v20_v0  ;;  %v3758_v13 = vld [vmem:[%s5534_s1 + $0x120] sm:$0xff]  ;;  %v3757_v46 = vld [vmem:[%s5534_s1 + $0x88] sm:$0xff] }
   0x3   :  { %v3760_v14 = vld [vmem:[%s5534_s1 + $0x1c0] sm:$0xff]  ;;  %v3759_v51 = vld [vmem:[%s5534_s1 + $0x128] sm:$0xff] }
   0x4   :  { %v3887_v4 = vsub.s32 0, %v21_v1  ;;  %v3889_v5 = vsub.s32 1, %v21_v1  ;;  %v3891_v6 = vsub.s32 2, %v21_v1  ;;  %v3893_v7 = vsub.s32 3, %v21_v1  ;;  %v3762_v19 = vld [vmem:[%s5534_s1 + $0x260] sm:$0xff]  ;;  %v3761_v52 = vld [vmem:[%s5534_s1 + $0x1c8] sm:$0xff] }
   0x5   :  { %v3898_v9 = vsub.s32 4, %v21_v1  ;;  %v3900_v10 = vsub.s32 5, %v21_v1  ;;  %v3902_v11 = vsub.s32 6, %v21_v1  ;;  %v3904_v12 = vsub.s32 7, %v21_v1  ;;  %v3764_v20 = vld [vmem:[%s5534_s1 + $0x300] sm:$0xff]  ;;  %v3763_v57 = vld [vmem:[%s5534_s1 + $0x268] sm:$0xff] }
   0x6   :  { %5631 = vst [vmem:[#allocation5_spill] sm:$0xff] %v3891_v6  ;;  %5632 = vst [vmem:[#allocation6_spill] sm:$0xff] %v3893_v7  ;;  %v3913_v15 = vrot.slane %v15_v2, %v3887_v4  ;;  %v3916_v16 = vrot.slane %v15_v2, %v3889_v5  ;;  %v3919_v17 = vrot.slane %v15_v2, %v3891_v6  ;;  %v14_v22 = vld [vmem:[%s5533_s0] sm:$0xff]  ;;  %v996_v33 = vadd.s32 4294967288, %v991_v3  ;;  %v3765_v62 = vld [vmem:[%s5534_s1 + $0x308] sm:$0xff] }
   0x7   :  { %5633 = vst [vmem:[#allocation7_spill] sm:$0xff] %v3898_v9  ;;  %5634 = vst [vmem:[#allocation8_spill] sm:$0xff] %v3900_v10  ;;  %v3922_v18 = vrot.slane %v15_v2, %v3893_v7  ;;  %v3931_v21 = vrot.slane %v15_v2, %v3898_v9  ;;  %v3937_v23 = vrot.slane %v15_v2, %v3900_v10  ;;  %v3766_v35 = vld [vmem:[%s5534_s1 + $0x3a0] sm:$0xff] }
   0x8   :  { %5635 = vst [vmem:[#allocation9_spill] sm:$0xff] %v3902_v11  ;;  %5636 = vst [vmem:[#allocation10_spill] sm:$0xff] %v3904_v12  ;;  %v797_v24 = vmul.f32 %v3756_v8, %v3913_v15  ;;  %v804_v25 = vmul.f32 %v3758_v13, %v3916_v16  ;;  %v815_v26 = vmul.f32 %v3760_v14, %v3919_v17  ;;  %v3768_v36 = vld [vmem:[%s5534_s1 + $0x440] sm:$0xff] }
   0x9   :  { %v3943_v27 = vrot.slane %v15_v2, %v3902_v11  ;;  %v3946_v28 = vrot.slane %v15_v2, %v3904_v12  ;;  %v826_v29 = vmul.f32 %v3762_v19, %v3922_v18  ;;  %v837_v30 = vmul.f32 %v3764_v20, %v3931_v21  ;;  %v3770_v37 = vld [vmem:[%s5534_s1 + $0x4e0] sm:$0xff] }
   0xa   :  { %v808_v31 = vadd.f32 %v804_v25, %v797_v24  ;;  %v3950_v32 = vsub.s32 %v991_v3, %v21_v1  ;;  %v3953_v34 = vrot.slane %v14_v22, %v3887_v4  ;;  %v3965_v38 = vrot.slane %v14_v22, %v3889_v5  ;;  %v3767_v3 = vld [vmem:[%s5534_s1 + $0x3a8] sm:$0xff] }
   0xb   :  { %v3968_v39 = vrot.slane %v14_v22, %v3891_v6  ;;  %v3971_v40 = vrot.slane %v14_v22, %v3893_v7  ;;  %v3974_v41 = vrot.slane %v14_v22, %v3898_v9  ;;  %v3976_v43 = vsub.s32 %v996_v33, %v21_v1 }
   0xc   :  { %5637 = vst [vmem:[#allocation11_spill] sm:$0xff] %v3950_v32  ;;  %v819_v42 = vadd.f32 %v815_v26, %v808_v31  ;;  %v3979_v44 = vrot.slane %v14_v22, %v3900_v10  ;;  %v3982_v45 = vrot.slane %v14_v22, %v3902_v11  ;;  %v3988_v47 = vrot.slane %v14_v22, %v3904_v12  ;;  %v3771_v22 = vld [vmem:[%s5534_s1 + $0x4e8] sm:$0xff] }
   0xd   :  { %5638 = vst [vmem:[#allocation12_spill] sm:$0xff] %v3976_v43  ;;  %v795_v48 = vmul.f32 %v3756_v8, %v3953_v34  ;;  %v802_v49 = vmul.f32 %v3758_v13, %v3965_v38  ;;  %v813_v50 = vmul.f32 %v3760_v14, %v3968_v39  ;;  %v848_v54 = vmul.f32 %v3766_v35, %v3937_v23 }
   0xe   :  { %v830_v53 = vadd.f32 %v826_v29, %v819_v42  ;;  %v859_v55 = vmul.f32 %v3768_v36, %v3943_v27  ;;  %v870_v56 = vmul.f32 %v3770_v37, %v3946_v28  ;;  %v824_v59 = vmul.f32 %v3762_v19, %v3971_v40 }
   0xf   :  { %v806_v58 = vadd.f32 %v802_v49, %v795_v48  ;;  %v835_v60 = vmul.f32 %v3764_v20, %v3974_v41  ;;  %v798_v61 = vmul.f32 %v3757_v46, %v3913_v15  ;;  %v846_v0 = vmul.f32 %v3766_v35, %v3979_v44  ;;  %v3769_v20 = vld [vmem:[%s5534_s1 + $0x448] sm:$0xff] }
  0x10   :  { %v841_v63 = vadd.f32 %v837_v30, %v830_v53  ;;  %v805_v1 = vmul.f32 %v3759_v51, %v3916_v16  ;;  %v816_v2 = vmul.f32 %v3761_v52, %v3919_v17  ;;  %v857_v13 = vmul.f32 %v3768_v36, %v3982_v45  ;;  %v4034_v36 = vld [vmem:[%s5534_s1 + $0x98] sm:$0xff] }
  0x11   :  { %v817_v8 = vadd.f32 %v813_v50, %v806_v58  ;;  %v868_v14 = vmul.f32 %v3770_v37, %v3988_v47  ;;  %v827_v19 = vmul.f32 %v3763_v57, %v3922_v18  ;;  %v838_v26 = vmul.f32 %v3765_v62, %v3931_v21  ;;  %v4039_v37 = vld [vmem:[%s5534_s1 + $0x138] sm:$0xff] }
  0x12   :  { %v852_v24 = vadd.f32 %v848_v54, %v841_v63  ;;  %v809_v25 = vadd.f32 %v805_v1, %v798_v61  ;;  %v796_v29 = vmul.f32 %v3757_v46, %v3953_v34  ;;  %v849_v31 = vmul.f32 %v3767_v3, %v3937_v23  ;;  %v4046_v50 = vld [vmem:[%s5534_s1 + $0x1d8] sm:$0xff] }
  0x13   :  { %v828_v30 = vadd.f32 %v824_v59, %v817_v8  ;;  %v803_v33 = vmul.f32 %v3759_v51, %v3965_v38  ;;  %v814_v35 = vmul.f32 %v3761_v52, %v3968_v39  ;;  %v860_v46 = vmul.f32 %v3769_v20, %v3943_v27 }
  0x14   :  { %v863_v42 = vadd.f32 %v859_v55, %v852_v24  ;;  %v820_v48 = vadd.f32 %v816_v2, %v809_v25  ;;  %v871_v49 = vmul.f32 %v3771_v22, %v3946_v28  ;;  %v825_v53 = vmul.f32 %v3763_v57, %v3971_v40  ;;  %v3779_v55 = vld [vmem:[%s5534_s1 + $0x278] sm:$0xff]  ;;  %v3776_v25 = vld [vmem:[%s5534_s1 + $0x1d0] sm:$0xff] }
  0x15   :  { %v839_v51 = vadd.f32 %v835_v60, %v828_v30  ;;  %v807_v52 = vadd.f32 %v803_v33, %v796_v29  ;;  %v836_v54 = vmul.f32 %v3765_v62, %v3974_v41  ;;  %v885_v61 = vmul.f32 %v4034_v36, %v3953_v34  ;;  %v3781_v62 = vld [vmem:[%s5534_s1 + $0x318] sm:$0xff] }
  0x16   :  { %v4053_v58 = vadd.f32 %v870_v56, %v863_v42  ;;  %v831_v59 = vadd.f32 %v827_v19, %v820_v48  ;;  %v892_v63 = vmul.f32 %v4039_v37, %v3965_v38  ;;  %v847_v2 = vmul.f32 %v3767_v3, %v3979_v44  ;;  %v3772_v56 = vld [vmem:[%s5534_s1 + $0x90] sm:$0xff]  ;;  %v3785_v42 = vld [vmem:[%s5534_s1 + $0x458] sm:$0xff] }
  0x17   :  { %v850_v1 = vadd.f32 %v846_v0, %v839_v51  ;;  %v818_v60 = vadd.f32 %v814_v35, %v807_v52  ;;  %v903_v57 = vmul.f32 %v4046_v50, %v3968_v39  ;;  %v914_v0 = vmul.f32 %v3779_v55, %v3971_v40  ;;  %v3774_v3 = vld [vmem:[%s5534_s1 + $0x130] sm:$0xff] }
  0x18   :  { %5639 = vst [vmem:[#allocation13_spill] sm:$0xff] %v4053_v58  ;;  %v1317_v8 = vmul.f32 0.1, %v4053_v58  ;;  %v842_v19 = vadd.f32 %v838_v26, %v831_v59  ;;  %v896_v24 = vadd.f32 %v892_v63, %v885_v61  ;;  %v858_v33 = vmul.f32 %v3769_v20, %v3982_v45  ;;  %v3783_v26 = vld [vmem:[%s5534_s1 + $0x3b8] sm:$0xff]  ;;  %v3778_v20 = vld [vmem:[%s5534_s1 + $0x270] sm:$0xff] }
  0x19   :  { %v861_v29 = vadd.f32 %v857_v13, %v850_v1  ;;  %v829_v30 = vadd.f32 %v825_v53, %v818_v60  ;;  %v869_v35 = vmul.f32 %v3771_v22, %v3988_v47  ;;  %v925_v52 = vmul.f32 %v3781_v62, %v3974_v41  ;;  %v3787_v59 = vld [vmem:[%s5534_s1 + $0x4f8] sm:$0xff]  ;;  %v3780_v63 = vld [vmem:[%s5534_s1 + $0x310] sm:$0xff] }
  0x1a   :  { %1323 = vadd.xlane.f32.xlu1 %v1317_v8  ;;  %v853_v48 = vadd.f32 %v849_v31, %v842_v19  ;;  %v907_v51 = vadd.f32 %v903_v57, %v896_v24  ;;  %v884_v13 = vmul.f32 %v3772_v56, %v3953_v34  ;;  %v891_v61 = vmul.f32 %v3774_v3, %v3965_v38 }
  0x1b   :  { %v4089_v22 = vadd.f32 %v868_v14, %v861_v29  ;;  %v840_v53 = vadd.f32 %v836_v54, %v829_v30  ;;  %v902_v31 = vmul.f32 %v3776_v25, %v3968_v39  ;;  %v936_v57 = vmul.f32 %v3783_v26, %v3979_v44  ;;  %v3782_v29 = vld [vmem:[%s5534_s1 + $0x3b0] sm:$0xff] }
  0x1c   :  { %v864_v1 = vadd.f32 %v860_v46, %v853_v48  ;;  %v918_v60 = vadd.f32 %v914_v0, %v907_v51  ;;  %v947_v14 = vmul.f32 %v3785_v42, %v3982_v45  ;;  %v895_v19 = vadd.f32 %v891_v61, %v884_v13  ;;  %v3786_v13 = vld [vmem:[%s5534_s1 + $0x4f0] sm:$0xff] }
  0x1d   :  { %5640 = vst [vmem:[#allocation14_spill] sm:$0xff] %v4089_v22  ;;  %v1315_v54 = vmul.f32 0.1, %v4089_v22  ;;  %v851_v8 = vadd.f32 %v847_v2, %v840_v53  ;;  %v913_v24 = vmul.f32 %v3778_v20, %v3971_v40  ;;  %v958_v46 = vmul.f32 %v3787_v59, %v3988_v47  ;;  %v3784_v2 = vld [vmem:[%s5534_s1 + $0x450] sm:$0xff] }
  0x1e   :  { %v4106_v30 = vadd.f32 %v871_v49, %v864_v1  ;;  %v929_v12 = vadd.f32 %v925_v52, %v918_v60  ;;  %v924_v0 = vmul.f32 %v3780_v63, %v3974_v41  ;;  %v906_v51 = vadd.f32 %v902_v31, %v895_v19 }
  0x1f   :  { %1319 = vadd.xlane.f32.xlu0 %v1315_v54  ;;  %v862_v48 = vadd.f32 %v858_v33, %v851_v8  ;;  %v887_v49 = vmul.f32 %v4034_v36, %v3913_v15  ;;  %v894_v52 = vmul.f32 %v4039_v37, %v3916_v16  ;;  %v935_v33 = vmul.f32 %v3782_v29, %v3979_v44 }
  0x20   :  { %5641 = vst [vmem:[#allocation15_spill] sm:$0xff] %v4106_v30  ;;  %v1318_v53 = vmul.f32 0.1, %v4106_v30  ;;  %v940_v61 = vadd.f32 %v936_v57, %v929_v12  ;;  %v905_v31 = vmul.f32 %v4046_v50, %v3919_v17  ;;  %v917_v60 = vadd.f32 %v913_v24, %v906_v51 }
  0x21   :  { %v4124_v1 = vadd.f32 %v869_v35, %v862_v48  ;;  %v898_v54 = vadd.f32 %v894_v52, %v887_v49  ;;  %v916_v8 = vmul.f32 %v3779_v55, %v3922_v18  ;;  %v946_v36 = vmul.f32 %v3784_v2, %v3982_v45  ;;  %v19_v48 = vld [vmem:[%s5534_s1 + $0x8] sm:$0xff] }
  0x22   :  { %1325 = vadd.xlane.f32.xlu1 %v1318_v53  ;;  %v951_v19 = vadd.f32 %v947_v14, %v940_v61  ;;  %v957_v37 = vmul.f32 %v3786_v13, %v3988_v47  ;;  %v927_v11 = vmul.f32 %v3781_v62, %v3931_v21  ;;  %v928_v57 = vadd.f32 %v924_v0, %v917_v60  ;;  %v3631_v62 = vld [vmem:[%s5534_s1 + $0xa8] sm:$0xff] }
  0x23   :  { %5642 = vst [vmem:[#allocation16_spill] sm:$0xff] %v4124_v1  ;;  %v1316_v12 = vmul.f32 0.1, %v4124_v1  ;;  %v909_v10 = vadd.f32 %v905_v31, %v898_v54  ;;  %v886_v50 = vmul.f32 %v3772_v56, %v3913_v15  ;;  %v938_v24 = vmul.f32 %v3783_v26, %v3937_v23  ;;  %v3635_v53 = vld [vmem:[%s5534_s1 + $0x1e8] sm:$0xff]  ;;  %v3630_v54 = vld [vmem:[%s5534_s1 + $0xa0] sm:$0xff] }
  0x24   :  { %v4132_v35 = vadd.f32 %v958_v46, %v951_v19  ;;  %v893_v55 = vmul.f32 %v3774_v3, %v3916_v16  ;;  %v904_v14 = vmul.f32 %v3776_v25, %v3919_v17  ;;  %v939_v0 = vadd.f32 %v935_v33, %v928_v57  ;;  %v3633_v3 = vld [vmem:[%s5534_s1 + $0x148] sm:$0xff] }
  0x25   :  { %1321 = vadd.xlane.f32.xlu0 %v1316_v12  ;;  %v920_v51 = vadd.f32 %v916_v8, %v909_v10  ;;  %v949_v56 = vmul.f32 %v3785_v42, %v3943_v27  ;;  %v960_v46 = vmul.f32 %v3787_v59, %v3946_v28  ;;  %v915_v49 = vmul.f32 %v3778_v20, %v3922_v18  ;;  %v3637_v33 = vld [vmem:[%s5534_s1 + $0x288] sm:$0xff]  ;;  %v18_v20 = vld [vmem:[%s5534_s1] sm:$0xff] }
  0x26   :  { %5643 = vst [vmem:[#allocation17_spill] sm:$0xff] %v4132_v35  ;;  %v1358_v25 = vmul.f32 0.1, %v4132_v35  ;;  %v897_v26 = vadd.f32 %v893_v55, %v886_v50  ;;  %v926_v52 = vmul.f32 %v3780_v63, %v3931_v21  ;;  %v950_v10 = vadd.f32 %v946_v36, %v939_v0  ;;  %v3639_v57 = vld [vmem:[%s5534_s1 + $0x328] sm:$0xff] }
  0x27   :  { %v931_v61 = vadd.f32 %v927_v11, %v920_v51  ;;  %v29_v42 = vmul.f32 %v3953_v34, %v19_v48  ;;  %v44_v59 = vmul.f32 %v3631_v62, %v3965_v38  ;;  %v937_v31 = vmul.f32 %v3782_v29, %v3937_v23  ;;  %v3641_v29 = vld [vmem:[%s5534_s1 + $0x3c8] sm:$0xff] }
  0x28   :  { %1363 = vadd.xlane.f32.xlu1 %v1358_v25  ;;  %v908_v63 = vadd.f32 %v904_v14, %v897_v26  ;;  %v948_v60 = vmul.f32 %v3784_v2, %v3943_v27  ;;  %v63_v11 = vmul.f32 %v3633_v3, %v3968_v39  ;;  %v4168_v8 = vadd.f32 %v957_v37, %v950_v10  ;;  %v3632_v2 = vld [vmem:[%s5534_s1 + $0x140] sm:$0xff]  ;;  %v3643_v26 = vld [vmem:[%s5534_s1 + $0x468] sm:$0xff] }
  0x29   :  { %v942_v19 = vadd.f32 %v938_v24, %v931_v61  ;;  %v48_v36 = vadd.f32 %v44_v59, %v29_v42  ;;  %v82_v12 = vmul.f32 %v3635_v53, %v3971_v40  ;;  %v959_v37 = vmul.f32 %v3786_v13, %v3946_v28  ;;  %v3634_v14 = vld [vmem:[%s5534_s1 + $0x1e0] sm:$0xff] }
  0x2a   :  { %5644 = vst [vmem:[#allocation18_spill] sm:$0xff] %v4168_v8  ;;  %v919_v50 = vadd.f32 %v915_v49, %v908_v63  ;;  %v101_v24 = vmul.f32 %v3637_v33, %v3974_v41  ;;  %v28_v55 = vmul.f32 %v3953_v34, %v18_v20  ;;  %v1357_v0 = vmul.f32 0.1, %v4168_v8  ;;  %v3636_v13 = vld [vmem:[%s5534_s1 + $0x280] sm:$0xff] }
  0x2b   :  { %v953_v51 = vadd.f32 %v949_v56, %v942_v19  ;;  %v67_v25 = vadd.f32 %v63_v11, %v48_v36  ;;  %v43_v49 = vmul.f32 %v3630_v54, %v3965_v38  ;;  %v120_v61 = vmul.f32 %v3639_v57, %v3979_v44  ;;  %v3638_v36 = vld [vmem:[%s5534_s1 + $0x320] sm:$0xff] }
  0x2c   :  { %v930_v10 = vadd.f32 %v926_v52, %v919_v50  ;;  %v139_v42 = vmul.f32 %v3641_v29, %v3982_v45  ;;  %v62_v59 = vmul.f32 %v3632_v2, %v3968_v39  ;;  %1361 = vadd.xlane.f32.xlu0 %v1357_v0  ;;  %v81_v19 = vmul.f32 %v3634_v14, %v3971_v40  ;;  %v3640_v52 = vld [vmem:[%s5534_s1 + $0x3c0] sm:$0xff] }
  0x2d   :  { %v4197_v56 = vadd.f32 %v960_v46, %v953_v51  ;;  %v86_v63 = vadd.f32 %v82_v12, %v67_v25  ;;  %v47_v11 = vadd.f32 %v43_v49, %v28_v55  ;;  %v158_v9 = vmul.f32 %v3643_v26, %v3988_v47  ;;  %v3642_v51 = vld [vmem:[%s5534_s1 + $0x460] sm:$0xff] }
  0x2e   :  { %v941_v50 = vadd.f32 %v937_v31, %v930_v10  ;;  %v100_v7 = vmul.f32 %v3636_v13, %v3974_v41  ;;  %v31_v46 = vmul.f32 %v3913_v15, %v19_v48  ;;  %v46_v25 = vmul.f32 %v3631_v62, %v3916_v16 }
  0x2f   :  { %5645 = vst [vmem:[#allocation19_spill] sm:$0xff] %v4197_v56  ;;  %v1360_v12 = vmul.f32 0.1, %v4197_v56  ;;  %v105_v55 = vadd.f32 %v101_v24, %v86_v63  ;;  %v66_v0 = vadd.f32 %v62_v59, %v47_v11  ;;  %v119_v6 = vmul.f32 %v3638_v36, %v3979_v44 }
  0x30   :  { %v952_v49 = vadd.f32 %v948_v60, %v941_v50  ;;  %v138_v31 = vmul.f32 %v3640_v52, %v3982_v45  ;;  %v65_v10 = vmul.f32 %v3633_v3, %v3919_v17  ;;  %v50_v35 = vadd.f32 %v46_v25, %v31_v46  ;;  %v3645_v3 = vld [vmem:[%s5534_s1 + $0x18] sm:$0xff]  ;;  %v3646_v25 = vld [vmem:[%s5534_s1 + $0xb0] sm:$0xff] }
  0x31   :  { %1367 = vadd.xlane.f32.xlu1 %v1360_v12  ;;  %v124_v8 = vadd.f32 %v120_v61, %v105_v55  ;;  %v85_v48 = vadd.f32 %v81_v19, %v66_v0  ;;  %v84_v24 = vmul.f32 %v3635_v53, %v3922_v18  ;;  %v157_v63 = vmul.f32 %v3642_v51, %v3988_v47  ;;  %v3651_v46 = vld [vmem:[%s5534_s1 + $0x1f8] sm:$0xff] }
  0x32   :  { %v4218_v59 = vadd.f32 %v959_v37, %v952_v49  ;;  %v103_v11 = vmul.f32 %v3637_v33, %v3931_v21  ;;  %v30_v62 = vmul.f32 %v3913_v15, %v18_v20  ;;  %v69_v56 = vadd.f32 %v65_v10, %v50_v35  ;;  %v3647_v35 = vld [vmem:[%s5534_s1 + $0xb8] sm:$0xff] }
  0x33   :  { %v143_v60 = vadd.f32 %v139_v42, %v124_v8  ;;  %v104_v50 = vadd.f32 %v100_v7, %v85_v48  ;;  %v45_v30 = vmul.f32 %v3630_v54, %v3916_v16  ;;  %v122_v53 = vmul.f32 %v3639_v57, %v3937_v23  ;;  %v3649_v54 = vld [vmem:[%s5534_s1 + $0x158] sm:$0xff] }
  0x34   :  { %5646 = vst [vmem:[#allocation20_spill] sm:$0xff] %v4218_v59  ;;  %v1359_v61 = vmul.f32 0.1, %v4218_v59  ;;  %v64_v37 = vmul.f32 %v3632_v2, %v3919_v17  ;;  %v83_v19 = vmul.f32 %v3634_v14, %v3922_v18  ;;  %v88_v8 = vadd.f32 %v84_v24, %v69_v56  ;;  %v3653_v12 = vld [vmem:[%s5534_s1 + $0x298] sm:$0xff]  ;;  %v3648_v24 = vld [vmem:[%s5534_s1 + $0x150] sm:$0xff] }
  0x35   :  { %v4231_v33 = vadd.f32 %v158_v9, %v143_v60  ;;  %v123_v20 = vadd.f32 %v119_v6, %v104_v50  ;;  %v49_v7 = vadd.f32 %v45_v30, %v30_v62  ;;  %v141_v57 = vmul.f32 %v3641_v29, %v3943_v27  ;;  %v3644_v29 = vld [vmem:[%s5534_s1 + $0x10] sm:$0xff] }
  0x36   :  { %1365 = vadd.xlane.f32.xlu0 %v1359_v61  ;;  %v160_v2 = vmul.f32 %v3643_v26, %v3946_v28  ;;  %v102_v14 = vmul.f32 %v3636_v13, %v3931_v21  ;;  %v173_v9 = vmul.f32 %v3645_v3, %v3953_v34  ;;  %v107_v42 = vadd.f32 %v103_v11, %v88_v8 }
  0x37   :  { %5647 = vst [vmem:[#allocation21_spill] sm:$0xff] %v4231_v33  ;;  %v975_v6 = vmul.f32 0.1, %v4231_v33  ;;  %v142_v30 = vadd.f32 %v138_v31, %v123_v20  ;;  %v68_v56 = vadd.f32 %v64_v37, %v49_v7  ;;  %v121_v26 = vmul.f32 %v3638_v36, %v3937_v23  ;;  %v3655_v36 = vld [vmem:[%s5534_s1 + $0x338] sm:$0xff]  ;;  %v3652_v20 = vld [vmem:[%s5534_s1 + $0x290] sm:$0xff] }
  0x38   :  { %v140_v13 = vmul.f32 %v3640_v52, %v3943_v27  ;;  %v180_v55 = vmul.f32 %v3647_v35, %v3965_v38  ;;  %v191_v0 = vmul.f32 %v3649_v54, %v3968_v39  ;;  %v126_v31 = vadd.f32 %v122_v53, %v107_v42  ;;  %v3657_v52 = vld [vmem:[%s5534_s1 + $0x3d8] sm:$0xff] }
  0x39   :  { %980 = vadd.xlane.f32.xlu1 %v975_v6  ;;  %v4260_v49 = vadd.f32 %v157_v63, %v142_v30  ;;  %v87_v10 = vadd.f32 %v83_v19, %v68_v56  ;;  %v159_v48 = vmul.f32 %v3642_v51, %v3946_v28  ;;  %v202_v63 = vmul.f32 %v3651_v46, %v3971_v40  ;;  %v3650_v51 = vld [vmem:[%s5534_s1 + $0x1f0] sm:$0xff]  ;;  %v3659_v37 = vld [vmem:[%s5534_s1 + $0x478] sm:$0xff] }
  0x3a   :  { %v184_v11 = vadd.f32 %v180_v55, %v173_v9  ;;  %v213_v62 = vmul.f32 %v3653_v12, %v3974_v41  ;;  %v172_v60 = vmul.f32 %v3644_v29, %v3953_v34  ;;  %v145_v61 = vadd.f32 %v141_v57, %v126_v31  ;;  %v3654_v56 = vld [vmem:[%s5534_s1 + $0x330] sm:$0xff] }
  0x3b   :  { %5648 = vst [vmem:[#allocation22_spill] sm:$0xff] %v4260_v49  ;;  %v974_v50 = vmul.f32 0.1, %v4260_v49  ;;  %v106_v53 = vadd.f32 %v102_v14, %v87_v10  ;;  %v179_v19 = vmul.f32 %v3646_v25, %v3965_v38  ;;  %v224_v7 = vmul.f32 %v3655_v36, %v3979_v44  ;;  %v4298_v55 = vld [vmem:[%s5534_s1 + $0x3d0] sm:$0xff] }
  0x3c   :  { %v195_v8 = vadd.f32 %v191_v0, %v184_v11  ;;  %v235_v9 = vmul.f32 %v3657_v52, %v3982_v45  ;;  %v190_v6 = vmul.f32 %v3648_v24, %v3968_v39  ;;  %v4289_v57 = vadd.f32 %v160_v2, %v145_v61 }
  0x3d   :  { %978 = vadd.xlane.f32.xlu0 %v974_v50  ;;  %v125_v14 = vadd.f32 %v121_v26, %v106_v53  ;;  %v183_v30 = vadd.f32 %v179_v19, %v172_v60  ;;  %v201_v42 = vmul.f32 %v3650_v51, %v3971_v40  ;;  %v246_v31 = vmul.f32 %v3659_v37, %v3988_v47  ;;  %v3658_v50 = vld [vmem:[%s5534_s1 + $0x470] sm:$0xff] }
  0x3e   :  { %5649 = vst [vmem:[#allocation23_spill] sm:$0xff] %v4289_v57  ;;  %v206_v0 = vadd.f32 %v202_v63, %v195_v8  ;;  %v212_v10 = vmul.f32 %v3652_v20, %v3974_v41  ;;  %v175_v2 = vmul.f32 %v3645_v3, %v3913_v15  ;;  %v977_v26 = vmul.f32 0.1, %v4289_v57 }
  0x3f   :  { %v144_v11 = vadd.f32 %v140_v13, %v125_v14  ;;  %v194_v60 = vadd.f32 %v190_v6, %v183_v30  ;;  %v182_v61 = vmul.f32 %v3647_v35, %v3916_v16  ;;  %v223_v19 = vmul.f32 %v3654_v56, %v3979_v44 }
  0x40   :  { %v217_v53 = vadd.f32 %v213_v62, %v206_v0  ;;  %v234_v63 = vmul.f32 %v4298_v55, %v3982_v45  ;;  %v193_v8 = vmul.f32 %v3649_v54, %v3919_v17  ;;  %984 = vadd.xlane.f32.xlu1 %v977_v26  ;;  %v204_v6 = vmul.f32 %v3651_v46, %v3922_v18 }
  0x41   :  { %v4312_v3 = vadd.f32 %v159_v48, %v144_v11  ;;  %v205_v57 = vadd.f32 %v201_v42, %v194_v60  ;;  %v186_v13 = vadd.f32 %v182_v61, %v175_v2  ;;  %v245_v30 = vmul.f32 %v3658_v50, %v3988_v47  ;;  %v3661_v48 = vld [vmem:[%s5534_s1 + $0x28] sm:$0xff] }
  0x42   :  { %v228_v14 = vadd.f32 %v224_v7, %v217_v53  ;;  %v215_v35 = vmul.f32 %v3653_v12, %v3931_v21  ;;  %v174_v62 = vmul.f32 %v3644_v29, %v3913_v15  ;;  %v181_v54 = vmul.f32 %v3646_v25, %v3916_v16  ;;  %v3663_v12 = vld [vmem:[%s5534_s1 + $0xc8] sm:$0xff] }
  0x43   :  { %5650 = vst [vmem:[#allocation24_spill] sm:$0xff] %v4312_v3  ;;  %v976_v0 = vmul.f32 0.1, %v4312_v3  ;;  %v216_v49 = vadd.f32 %v212_v10, %v205_v57  ;;  %v197_v33 = vadd.f32 %v193_v8, %v186_v13  ;;  %v226_v46 = vmul.f32 %v3655_v36, %v3937_v23  ;;  %v4336_v36 = vld [vmem:[%s5534_s1 + $0x208] sm:$0xff] }
  0x44   :  { %v239_v42 = vadd.f32 %v235_v9, %v228_v14  ;;  %v237_v7 = vmul.f32 %v3657_v52, %v3943_v27  ;;  %v192_v2 = vmul.f32 %v3648_v24, %v3919_v17  ;;  %v185_v10 = vadd.f32 %v181_v54, %v174_v62  ;;  %v3665_v9 = vld [vmem:[%s5534_s1 + $0x168] sm:$0xff]  ;;  %v3664_v62 = vld [vmem:[%s5534_s1 + $0x160] sm:$0xff] }
  0x45   :  { %982 = vadd.xlane.f32.xlu0 %v976_v0  ;;  %v227_v29 = vadd.f32 %v223_v19, %v216_v49  ;;  %v208_v57 = vadd.f32 %v204_v6, %v197_v33  ;;  %v203_v25 = vmul.f32 %v3650_v51, %v3922_v18  ;;  %v248_v24 = vmul.f32 %v3659_v37, %v3946_v28  ;;  %v3669_v61 = vld [vmem:[%s5534_s1 + $0x2a8] sm:$0xff] }
  0x46   :  { %v4338_v52 = vadd.f32 %v246_v31, %v239_v42  ;;  %v214_v26 = vmul.f32 %v3652_v20, %v3931_v21  ;;  %v262_v33 = vmul.f32 %v3661_v48, %v3953_v34  ;;  %v196_v51 = vadd.f32 %v192_v2, %v185_v10  ;;  %v3660_v31 = vld [vmem:[%s5534_s1 + $0x20] sm:$0xff]  ;;  %v3675_v42 = vld [vmem:[%s5534_s1 + $0x488] sm:$0xff] }
  0x47   :  { %v238_v49 = vadd.f32 %v234_v63, %v227_v29  ;;  %v219_v11 = vadd.f32 %v215_v35, %v208_v57  ;;  %v269_v60 = vmul.f32 %v3663_v12, %v3965_v38  ;;  %v225_v37 = vmul.f32 %v3654_v56, %v3937_v23  ;;  %v3671_v63 = vld [vmem:[%s5534_s1 + $0x348] sm:$0xff]  ;;  %v3662_v56 = vld [vmem:[%s5534_s1 + $0xc0] sm:$0xff] }
  0x48   :  { %5651 = vst [vmem:[#allocation25_spill] sm:$0xff] %v4338_v52  ;;  %v1022_v53 = vmul.f32 0.1, %v4338_v52  ;;  %v280_v20 = vmul.f32 %v3665_v9, %v3968_v39  ;;  %v291_v19 = vmul.f32 %v4336_v36, %v3971_v40  ;;  %v207_v6 = vadd.f32 %v203_v25, %v196_v51  ;;  %v3673_v35 = vld [vmem:[%s5534_s1 + $0x3e8] sm:$0xff]  ;;  %v3666_v25 = vld [vmem:[%s5534_s1 + $0x200] sm:$0xff] }
  0x49   :  { %v4358_v8 = vadd.f32 %v245_v30, %v238_v49  ;;  %v230_v13 = vadd.f32 %v226_v46, %v219_v11  ;;  %v273_v14 = vadd.f32 %v269_v60, %v262_v33  ;;  %v236_v30 = vmul.f32 %v4298_v55, %v3943_v27  ;;  %v3668_v55 = vld [vmem:[%s5534_s1 + $0x2a0] sm:$0xff] }
  0x4a   :  { %1027 = vadd.xlane.f32.xlu1 %v1022_v53  ;;  %v247_v0 = vmul.f32 %v3658_v50, %v3946_v28  ;;  %v302_v54 = vmul.f32 %v3669_v61, %v3974_v41  ;;  %v261_v46 = vmul.f32 %v3660_v31, %v3953_v34  ;;  %v218_v57 = vadd.f32 %v214_v26, %v207_v6  ;;  %v3670_v53 = vld [vmem:[%s5534_s1 + $0x340] sm:$0xff] }
  0x4b   :  { %5652 = vst [vmem:[#allocation26_spill] sm:$0xff] %v4358_v8  ;;  %v1021_v2 = vmul.f32 0.1, %v4358_v8  ;;  %v241_v29 = vadd.f32 %v237_v7, %v230_v13  ;;  %v284_v10 = vadd.f32 %v280_v20, %v273_v14  ;;  %v313_v50 = vmul.f32 %v3671_v63, %v3979_v44  ;;  %v3672_v20 = vld [vmem:[%s5534_s1 + $0x3e0] sm:$0xff] }
  0x4c   :  { %v324_v33 = vmul.f32 %v3673_v35, %v3982_v45  ;;  %v268_v49 = vmul.f32 %v3662_v56, %v3965_v38  ;;  %v279_v11 = vmul.f32 %v3664_v62, %v3968_v39  ;;  %v229_v26 = vadd.f32 %v225_v37, %v218_v57 }
  0x4d   :  { %1025 = vadd.xlane.f32.xlu0 %v1021_v2  ;;  %v4388_v7 = vadd.f32 %v248_v24, %v241_v29  ;;  %v295_v51 = vadd.f32 %v291_v19, %v284_v10  ;;  %v335_v60 = vmul.f32 %v3675_v42, %v3988_v47  ;;  %v290_v6 = vmul.f32 %v3666_v25, %v3971_v40  ;;  %v3674_v29 = vld [vmem:[%s5534_s1 + $0x480] sm:$0xff] }
  0x4e   :  { %v272_v13 = vadd.f32 %v268_v49, %v261_v46  ;;  %v301_v14 = vmul.f32 %v3668_v55, %v3974_v41  ;;  %v264_v24 = vmul.f32 %v3661_v48, %v3913_v15  ;;  %v240_v19 = vadd.f32 %v236_v30, %v229_v26 }
  0x4f   :  { %5653 = vst [vmem:[#allocation27_spill] sm:$0xff] %v4388_v7  ;;  %v1024_v37 = vmul.f32 0.1, %v4388_v7  ;;  %v306_v2 = vadd.f32 %v302_v54, %v295_v51  ;;  %v271_v57 = vmul.f32 %v3663_v12, %v3916_v16  ;;  %v312_v8 = vmul.f32 %v3670_v53, %v3979_v44 }
  0x50   :  { %v283_v10 = vadd.f32 %v279_v11, %v272_v13  ;;  %v323_v46 = vmul.f32 %v3672_v20, %v3982_v45  ;;  %v282_v49 = vmul.f32 %v3665_v9, %v3919_v17  ;;  %v4408_v52 = vadd.f32 %v247_v0, %v240_v19  ;;  %v3677_v0 = vld [vmem:[%s5534_s1 + $0x38] sm:$0xff] }
  0x51   :  { %1031 = vadd.xlane.f32.xlu1 %v1024_v37  ;;  %v317_v48 = vadd.f32 %v313_v50, %v306_v2  ;;  %v275_v7 = vadd.f32 %v271_v57, %v264_v24  ;;  %v293_v30 = vmul.f32 %v4336_v36, %v3922_v18  ;;  %v334_v26 = vmul.f32 %v3674_v29, %v3988_v47 }
  0x52   :  { %5654 = vst [vmem:[#allocation28_spill] sm:$0xff] %v4408_v52  ;;  %v294_v54 = vadd.f32 %v290_v6, %v283_v10  ;;  %v304_v12 = vmul.f32 %v3669_v61, %v3931_v21  ;;  %v263_v11 = vmul.f32 %v3660_v31, %v3913_v15  ;;  %v1023_v51 = vmul.f32 0.1, %v4408_v52  ;;  %v4426_v61 = vld [vmem:[%s5534_s1 + $0xd8] sm:$0xff] }
  0x53   :  { %v328_v13 = vadd.f32 %v324_v33, %v317_v48  ;;  %v286_v3 = vadd.f32 %v282_v49, %v275_v7  ;;  %v270_v9 = vmul.f32 %v3662_v56, %v3916_v16  ;;  %v315_v36 = vmul.f32 %v3671_v63, %v3937_v23  ;;  %v3681_v63 = vld [vmem:[%s5534_s1 + $0x178] sm:$0xff]  ;;  %v3678_v48 = vld [vmem:[%s5534_s1 + $0xd0] sm:$0xff] }
  0x54   :  { %v305_v50 = vadd.f32 %v301_v14, %v294_v54  ;;  %v326_v6 = vmul.f32 %v3673_v35, %v3943_v27  ;;  %v281_v24 = vmul.f32 %v3664_v62, %v3919_v17  ;;  %1029 = vadd.xlane.f32.xlu0 %v1023_v51  ;;  %v292_v7 = vmul.f32 %v3666_v25, %v3922_v18 }
  0x55   :  { %v4428_v31 = vadd.f32 %v335_v60, %v328_v13  ;;  %v297_v56 = vadd.f32 %v293_v30, %v286_v3  ;;  %v274_v33 = vadd.f32 %v270_v9, %v263_v11  ;;  %v337_v35 = vmul.f32 %v3675_v42, %v3946_v28  ;;  %v3683_v60 = vld [vmem:[%s5534_s1 + $0x218] sm:$0xff]  ;;  %v3676_v42 = vld [vmem:[%s5534_s1 + $0x30] sm:$0xff] }
  0x56   :  { %v316_v14 = vadd.f32 %v312_v8, %v305_v50  ;;  %v303_v62 = vmul.f32 %v3668_v55, %v3931_v21  ;;  %v351_v37 = vmul.f32 %v3677_v0, %v3953_v34  ;;  %v358_v25 = vmul.f32 %v4426_v61, %v3965_v38  ;;  %v3685_v8 = vld [vmem:[%s5534_s1 + $0x2b8] sm:$0xff] }
  0x57   :  { %5655 = vst [vmem:[#allocation29_spill] sm:$0xff] %v4428_v31  ;;  %v1064_v3 = vmul.f32 0.1, %v4428_v31  ;;  %v308_v19 = vadd.f32 %v304_v12, %v297_v56  ;;  %v285_v2 = vadd.f32 %v281_v24, %v274_v33  ;;  %v314_v57 = vmul.f32 %v3670_v53, %v3937_v23  ;;  %v3680_v53 = vld [vmem:[%s5534_s1 + $0x170] sm:$0xff]  ;;  %v3689_v33 = vld [vmem:[%s5534_s1 + $0x3f8] sm:$0xff] }
  0x58   :  { %v327_v55 = vadd.f32 %v323_v46, %v316_v14  ;;  %v325_v10 = vmul.f32 %v3672_v20, %v3943_v27  ;;  %v369_v49 = vmul.f32 %v3681_v63, %v3968_v39  ;;  %v362_v12 = vadd.f32 %v358_v25, %v351_v37  ;;  %v3687_v46 = vld [vmem:[%s5534_s1 + $0x358] sm:$0xff]  ;;  %v3682_v20 = vld [vmem:[%s5534_s1 + $0x210] sm:$0xff] }
  0x59   :  { %1069 = vadd.xlane.f32.xlu1 %v1064_v3  ;;  %v319_v30 = vadd.f32 %v315_v36, %v308_v19  ;;  %v296_v54 = vadd.f32 %v292_v7, %v285_v2  ;;  %v380_v11 = vmul.f32 %v3683_v60, %v3971_v40  ;;  %v336_v13 = vmul.f32 %v3674_v29, %v3946_v28  ;;  %v3691_v7 = vld [vmem:[%s5534_s1 + $0x498] sm:$0xff]  ;;  %v3684_v29 = vld [vmem:[%s5534_s1 + $0x2b0] sm:$0xff] }
  0x5a   :  { %v4465_v51 = vadd.f32 %v334_v26, %v327_v55  ;;  %v391_v9 = vmul.f32 %v3685_v8, %v3974_v41  ;;  %v350_v50 = vmul.f32 %v3676_v42, %v3953_v34  ;;  %v373_v56 = vadd.f32 %v369_v49, %v362_v12  ;;  %v3686_v55 = vld [vmem:[%s5534_s1 + $0x350] sm:$0xff] }
  0x5b   :  { %v330_v36 = vadd.f32 %v326_v6, %v319_v30  ;;  %v307_v24 = vadd.f32 %v303_v62, %v296_v54  ;;  %v357_v26 = vmul.f32 %v3678_v48, %v3965_v38  ;;  %v402_v6 = vmul.f32 %v3687_v46, %v3979_v44  ;;  %v3688_v49 = vld [vmem:[%s5534_s1 + $0x3f0] sm:$0xff] }
  0x5c   :  { %5656 = vst [vmem:[#allocation30_spill] sm:$0xff] %v4465_v51  ;;  %v1063_v14 = vmul.f32 0.1, %v4465_v51  ;;  %v368_v62 = vmul.f32 %v3680_v53, %v3968_v39  ;;  %v379_v37 = vmul.f32 %v3682_v20, %v3971_v40  ;;  %v384_v2 = vadd.f32 %v380_v11, %v373_v56 }
  0x5d   :  { %v4484_v3 = vadd.f32 %v337_v35, %v330_v36  ;;  %v318_v19 = vadd.f32 %v314_v57, %v307_v24  ;;  %v361_v25 = vadd.f32 %v357_v26, %v350_v50  ;;  %v413_v30 = vmul.f32 %v3689_v33, %v3982_v45  ;;  %v3690_v35 = vld [vmem:[%s5534_s1 + $0x490] sm:$0xff] }
  0x5e   :  { %1067 = vadd.xlane.f32.xlu0 %v1063_v14  ;;  %v424_v54 = vmul.f32 %v3691_v7, %v3988_v47  ;;  %v390_v12 = vmul.f32 %v3684_v29, %v3974_v41  ;;  %v353_v57 = vmul.f32 %v3677_v0, %v3913_v15  ;;  %v395_v36 = vadd.f32 %v391_v9, %v384_v2 }
  0x5f   :  { %5657 = vst [vmem:[#allocation31_spill] sm:$0xff] %v4484_v3  ;;  %v1066_v11 = vmul.f32 0.1, %v4484_v3  ;;  %v329_v50 = vadd.f32 %v325_v10, %v318_v19  ;;  %v372_v24 = vadd.f32 %v368_v62, %v361_v25  ;;  %v401_v56 = vmul.f32 %v3686_v55, %v3979_v44 }
  0x60   :  { %v412_v26 = vmul.f32 %v3688_v49, %v3982_v45  ;;  %v360_v14 = vmul.f32 %v4426_v61, %v3916_v16  ;;  %v371_v51 = vmul.f32 %v3681_v63, %v3919_v17  ;;  %v406_v52 = vadd.f32 %v402_v6, %v395_v36 }
  0x61   :  { %1073 = vadd.xlane.f32.xlu1 %v1066_v11  ;;  %v4505_v31 = vadd.f32 %v336_v13, %v329_v50  ;;  %v383_v59 = vadd.f32 %v379_v37, %v372_v24  ;;  %v423_v0 = vmul.f32 %v3690_v35, %v3988_v47  ;;  %v382_v10 = vmul.f32 %v3683_v60, %v3922_v18  ;;  %v3693_v13 = vld [vmem:[%s5534_s1 + $0x48] sm:$0xff] }
  0x62   :  { %v364_v3 = vadd.f32 %v360_v14, %v353_v57  ;;  %v393_v9 = vmul.f32 %v3685_v8, %v3931_v21  ;;  %v352_v62 = vmul.f32 %v3676_v42, %v3913_v15  ;;  %v417_v2 = vadd.f32 %v413_v30, %v406_v52  ;;  %v3695_v8 = vld [vmem:[%s5534_s1 + $0xe8] sm:$0xff] }
  0x63   :  { %5658 = vst [vmem:[#allocation32_spill] sm:$0xff] %v4505_v31  ;;  %v1065_v19 = vmul.f32 0.1, %v4505_v31  ;;  %v394_v61 = vadd.f32 %v390_v12, %v383_v59  ;;  %v359_v63 = vmul.f32 %v3678_v48, %v3916_v16  ;;  %v404_v37 = vmul.f32 %v3687_v46, %v3937_v23  ;;  %v3699_v30 = vld [vmem:[%s5534_s1 + $0x228] sm:$0xff] }
  0x64   :  { %v375_v6 = vadd.f32 %v371_v51, %v364_v3  ;;  %v415_v25 = vmul.f32 %v3689_v33, %v3943_v27  ;;  %v370_v60 = vmul.f32 %v3680_v53, %v3919_v17  ;;  %v4522_v52 = vadd.f32 %v424_v54, %v417_v2  ;;  %v3697_v51 = vld [vmem:[%s5534_s1 + $0x188] sm:$0xff] }
  0x65   :  { %1071 = vadd.xlane.f32.xlu0 %v1065_v19  ;;  %v405_v59 = vadd.f32 %v401_v56, %v394_v61  ;;  %v363_v42 = vadd.f32 %v359_v63, %v352_v62  ;;  %v381_v48 = vmul.f32 %v3682_v20, %v3922_v18  ;;  %v426_v33 = vmul.f32 %v3691_v7, %v3946_v28  ;;  %v3701_v11 = vld [vmem:[%s5534_s1 + $0x2c8] sm:$0xff]  ;;  %v3692_v7 = vld [vmem:[%s5534_s1 + $0x40] sm:$0xff] }
  0x66   :  { %5659 = vst [vmem:[#allocation33_spill] sm:$0xff] %v4522_v52  ;;  %v386_v46 = vadd.f32 %v382_v10, %v375_v6  ;;  %v392_v53 = vmul.f32 %v3684_v29, %v3931_v21  ;;  %v440_v3 = vmul.f32 %v3693_v13, %v3953_v34  ;;  %v1106_v54 = vmul.f32 0.1, %v4522_v52  ;;  %v3694_v56 = vld [vmem:[%s5534_s1 + $0xe0] sm:$0xff] }
  0x67   :  { %v416_v12 = vadd.f32 %v412_v26, %v405_v59  ;;  %v374_v57 = vadd.f32 %v370_v60, %v363_v42  ;;  %v447_v20 = vmul.f32 %v3695_v8, %v3965_v38  ;;  %v403_v50 = vmul.f32 %v3686_v55, %v3937_v23  ;;  %v3705_v55 = vld [vmem:[%s5534_s1 + $0x408] sm:$0xff]  ;;  %v3698_v63 = vld [vmem:[%s5534_s1 + $0x220] sm:$0xff] }
  0x68   :  { %v397_v29 = vadd.f32 %v393_v9, %v386_v46  ;;  %v414_v36 = vmul.f32 %v3688_v49, %v3943_v27  ;;  %v458_v24 = vmul.f32 %v3697_v51, %v3968_v39  ;;  %1111 = vadd.xlane.f32.xlu1 %v1106_v54  ;;  %v469_v62 = vmul.f32 %v3699_v30, %v3971_v40  ;;  %v3703_v9 = vld [vmem:[%s5534_s1 + $0x368] sm:$0xff]  ;;  %v3696_v49 = vld [vmem:[%s5534_s1 + $0x180] sm:$0xff] }
  0x69   :  { %v4548_v26 = vadd.f32 %v423_v0, %v416_v12  ;;  %v385_v14 = vadd.f32 %v381_v48, %v374_v57  ;;  %v451_v10 = vadd.f32 %v447_v20, %v440_v3  ;;  %v425_v0 = vmul.f32 %v3690_v35, %v3946_v28  ;;  %v3707_v42 = vld [vmem:[%s5534_s1 + $0x4a8] sm:$0xff]  ;;  %v3700_v35 = vld [vmem:[%s5534_s1 + $0x2c0] sm:$0xff] }
  0x6a   :  { %v408_v19 = vadd.f32 %v404_v37, %v397_v29  ;;  %v480_v2 = vmul.f32 %v3701_v11, %v3974_v41  ;;  %v439_v61 = vmul.f32 %v3692_v7, %v3953_v34  ;;  %v446_v37 = vmul.f32 %v3694_v56, %v3965_v38  ;;  %v3702_v29 = vld [vmem:[%s5534_s1 + $0x360] sm:$0xff] }
  0x6b   :  { %5660 = vst [vmem:[#allocation34_spill] sm:$0xff] %v4548_v26  ;;  %v1105_v6 = vmul.f32 0.1, %v4548_v26  ;;  %v396_v60 = vadd.f32 %v392_v53, %v385_v14  ;;  %v462_v59 = vadd.f32 %v458_v24, %v451_v10  ;;  %v491_v46 = vmul.f32 %v3703_v9, %v3979_v44 }
  0x6c   :  { %v419_v48 = vadd.f32 %v415_v25, %v408_v19  ;;  %v502_v3 = vmul.f32 %v3705_v55, %v3982_v45  ;;  %v457_v54 = vmul.f32 %v3696_v49, %v3968_v39  ;;  %v450_v57 = vadd.f32 %v446_v37, %v439_v61 }
  0x6d   :  { %1109 = vadd.xlane.f32.xlu0 %v1105_v6  ;;  %v407_v53 = vadd.f32 %v403_v50, %v396_v60  ;;  %v473_v12 = vadd.f32 %v469_v62, %v462_v59  ;;  %v468_v20 = vmul.f32 %v3698_v63, %v3971_v40  ;;  %v513_v25 = vmul.f32 %v3707_v42, %v3988_v47  ;;  %v3704_v50 = vld [vmem:[%s5534_s1 + $0x400] sm:$0xff] }
  0x6e   :  { %v4581_v24 = vadd.f32 %v426_v33, %v419_v48  ;;  %v479_v14 = vmul.f32 %v3700_v35, %v3974_v41  ;;  %v442_v10 = vmul.f32 %v3693_v13, %v3913_v15  ;;  %v461_v6 = vadd.f32 %v457_v54, %v450_v57  ;;  %v3706_v62 = vld [vmem:[%s5534_s1 + $0x4a0] sm:$0xff] }
  0x6f   :  { %v418_v19 = vadd.f32 %v414_v36, %v407_v53  ;;  %v484_v26 = vadd.f32 %v480_v2, %v473_v12  ;;  %v449_v33 = vmul.f32 %v3695_v8, %v3916_v16  ;;  %v490_v60 = vmul.f32 %v3702_v29, %v3979_v44 }
  0x70   :  { %5661 = vst [vmem:[#allocation35_spill] sm:$0xff] %v4581_v24  ;;  %v1108_v61 = vmul.f32 0.1, %v4581_v24  ;;  %v460_v59 = vmul.f32 %v3697_v51, %v3919_v17  ;;  %v471_v13 = vmul.f32 %v3699_v30, %v3922_v18  ;;  %v472_v37 = vadd.f32 %v468_v20, %v461_v6  ;;  %v3709_v30 = vld [vmem:[%s5534_s1 + $0x58] sm:$0xff] }
  0x71   :  { %v4597_v36 = vadd.f32 %v425_v0, %v418_v19  ;;  %v495_v2 = vadd.f32 %v491_v46, %v484_v26  ;;  %v453_v48 = vadd.f32 %v449_v33, %v442_v10  ;;  %v501_v54 = vmul.f32 %v3704_v50, %v3982_v45  ;;  %v3717_v33 = vld [vmem:[%s5534_s1 + $0x2d8] sm:$0xff] }
  0x72   :  { %1115 = vadd.xlane.f32.xlu1 %v1108_v61  ;;  %v512_v53 = vmul.f32 %v3706_v62, %v3988_v47  ;;  %v482_v8 = vmul.f32 %v3701_v11, %v3931_v21  ;;  %v441_v12 = vmul.f32 %v3692_v7, %v3913_v15  ;;  %v483_v51 = vadd.f32 %v479_v14, %v472_v37  ;;  %v3711_v11 = vld [vmem:[%s5534_s1 + $0xf8] sm:$0xff] }
  0x73   :  { %5662 = vst [vmem:[#allocation36_spill] sm:$0xff] %v4597_v36  ;;  %v1107_v57 = vmul.f32 0.1, %v4597_v36  ;;  %v506_v24 = vadd.f32 %v502_v3, %v495_v2  ;;  %v464_v52 = vadd.f32 %v460_v59, %v453_v48  ;;  %v493_v26 = vmul.f32 %v3703_v9, %v3937_v23  ;;  %v3713_v9 = vld [vmem:[%s5534_s1 + $0x198] sm:$0xff] }
  0x74   :  { %v504_v0 = vmul.f32 %v3705_v55, %v3943_v27  ;;  %v448_v46 = vmul.f32 %v3694_v56, %v3916_v16  ;;  %v459_v20 = vmul.f32 %v3696_v49, %v3919_v17  ;;  %v494_v3 = vadd.f32 %v490_v60, %v483_v51 }
  0x75   :  { %1113 = vadd.xlane.f32.xlu0 %v1107_v57  ;;  %v4614_v7 = vadd.f32 %v513_v25, %v506_v24  ;;  %v475_v14 = vadd.f32 %v471_v13, %v464_v52  ;;  %v515_v10 = vmul.f32 %v3707_v42, %v3946_v28  ;;  %v470_v56 = vmul.f32 %v3698_v63, %v3922_v18  ;;  %v3715_v24 = vld [vmem:[%s5534_s1 + $0x238] sm:$0xff]  ;;  %v3708_v63 = vld [vmem:[%s5534_s1 + $0x50] sm:$0xff] }
  0x76   :  { %v452_v55 = vadd.f32 %v448_v46, %v441_v12  ;;  %v481_v49 = vmul.f32 %v3700_v35, %v3931_v21  ;;  %v529_v19 = vmul.f32 %v3709_v30, %v3953_v34  ;;  %v505_v52 = vadd.f32 %v501_v54, %v494_v3  ;;  %v3710_v13 = vld [vmem:[%s5534_s1 + $0xf0] sm:$0xff] }
  0x77   :  { %5663 = vst [vmem:[#allocation37_spill] sm:$0xff] %v4614_v7  ;;  %v1148_v25 = vmul.f32 0.1, %v4614_v7  ;;  %v486_v6 = vadd.f32 %v482_v8, %v475_v14  ;;  %v536_v42 = vmul.f32 %v3711_v11, %v3965_v38  ;;  %v492_v61 = vmul.f32 %v3702_v29, %v3937_v23  ;;  %v3719_v8 = vld [vmem:[%s5534_s1 + $0x378] sm:$0xff] }
  0x78   :  { %v463_v35 = vadd.f32 %v459_v20, %v452_v55  ;;  %v503_v60 = vmul.f32 %v3704_v50, %v3943_v27  ;;  %v547_v59 = vmul.f32 %v3713_v9, %v3968_v39  ;;  %v4640_v2 = vadd.f32 %v512_v53, %v505_v52  ;;  %v3721_v29 = vld [vmem:[%s5534_s1 + $0x418] sm:$0xff]  ;;  %v3712_v50 = vld [vmem:[%s5534_s1 + $0x190] sm:$0xff] }
  0x79   :  { %1153 = vadd.xlane.f32.xlu1 %v1148_v25  ;;  %v497_v37 = vadd.f32 %v493_v26, %v486_v6  ;;  %v540_v48 = vadd.f32 %v536_v42, %v529_v19  ;;  %v558_v54 = vmul.f32 %v3715_v24, %v3971_v40  ;;  %v514_v53 = vmul.f32 %v3706_v62, %v3946_v28  ;;  %v3714_v26 = vld [vmem:[%s5534_s1 + $0x230] sm:$0xff]  ;;  %v3723_v14 = vld [vmem:[%s5534_s1 + $0x4b8] sm:$0xff] }
  0x7a   :  { %5664 = vst [vmem:[#allocation38_spill] sm:$0xff] %v4640_v2  ;;  %v474_v12 = vadd.f32 %v470_v56, %v463_v35  ;;  %v569_v57 = vmul.f32 %v3717_v33, %v3974_v41  ;;  %v528_v51 = vmul.f32 %v3708_v63, %v3953_v34  ;;  %v1147_v46 = vmul.f32 0.1, %v4640_v2  ;;  %v3716_v62 = vld [vmem:[%s5534_s1 + $0x2d0] sm:$0xff] }
  0x7b   :  { %v508_v20 = vadd.f32 %v504_v0, %v497_v37  ;;  %v551_v3 = vadd.f32 %v547_v59, %v540_v48  ;;  %v535_v55 = vmul.f32 %v3710_v13, %v3965_v38  ;;  %v580_v19 = vmul.f32 %v3719_v8, %v3979_v44  ;;  %v3718_v59 = vld [vmem:[%s5534_s1 + $0x370] sm:$0xff] }
  0x7c   :  { %v485_v56 = vadd.f32 %v481_v49, %v474_v12  ;;  %v591_v25 = vmul.f32 %v3721_v29, %v3982_v45  ;;  %v546_v52 = vmul.f32 %v3712_v50, %v3968_v39  ;;  %1151 = vadd.xlane.f32.xlu0 %v1147_v46  ;;  %v557_v35 = vmul.f32 %v3714_v26, %v3971_v40  ;;  %v3720_v49 = vld [vmem:[%s5534_s1 + $0x410] sm:$0xff] }
  0x7d   :  { %v4669_v0 = vadd.f32 %v515_v10, %v508_v20  ;;  %v562_v6 = vadd.f32 %v558_v54, %v551_v3  ;;  %v539_v42 = vadd.f32 %v535_v55, %v528_v51  ;;  %v602_v48 = vmul.f32 %v3723_v14, %v3988_v47  ;;  %v3722_v20 = vld [vmem:[%s5534_s1 + $0x4b0] sm:$0xff] }
  0x7e   :  { %v496_v37 = vadd.f32 %v492_v61, %v485_v56  ;;  %v568_v12 = vmul.f32 %v3716_v62, %v3974_v41  ;;  %v531_v10 = vmul.f32 %v3709_v30, %v3913_v15  ;;  %v538_v3 = vmul.f32 %v3711_v11, %v3916_v16 }
  0x7f   :  { %5665 = vst [vmem:[#allocation39_spill] sm:$0xff] %v4669_v0  ;;  %v1150_v54 = vmul.f32 0.1, %v4669_v0  ;;  %v573_v51 = vadd.f32 %v569_v57, %v562_v6  ;;  %v550_v46 = vadd.f32 %v546_v52, %v539_v42  ;;  %v579_v2 = vmul.f32 %v3718_v59, %v3979_v44 }
  0x80   :  { %v507_v55 = vadd.f32 %v503_v60, %v496_v37  ;;  %v590_v61 = vmul.f32 %v3720_v49, %v3982_v45  ;;  %v549_v56 = vmul.f32 %v3713_v9, %v3919_v17  ;;  %v542_v36 = vadd.f32 %v538_v3, %v531_v10  ;;  %v3725_v9 = vld [vmem:[%s5534_s1 + $0x68] sm:$0xff]  ;;  %v3726_v3 = vld [vmem:[%s5534_s1 + $0x100] sm:$0xff] }
  0x81   :  { %1157 = vadd.xlane.f32.xlu1 %v1150_v54  ;;  %v584_v7 = vadd.f32 %v580_v19, %v573_v51  ;;  %v561_v30 = vadd.f32 %v557_v35, %v550_v46  ;;  %v560_v57 = vmul.f32 %v3715_v24, %v3922_v18  ;;  %v601_v6 = vmul.f32 %v3722_v20, %v3988_v47  ;;  %v3731_v10 = vld [vmem:[%s5534_s1 + $0x248] sm:$0xff] }
  0x82   :  { %v4690_v52 = vadd.f32 %v514_v53, %v507_v55  ;;  %v571_v42 = vmul.f32 %v3717_v33, %v3931_v21  ;;  %v530_v11 = vmul.f32 %v3708_v63, %v3913_v15  ;;  %v553_v0 = vadd.f32 %v549_v56, %v542_v36  ;;  %v3727_v36 = vld [vmem:[%s5534_s1 + $0x108] sm:$0xff] }
  0x83   :  { %v595_v60 = vadd.f32 %v591_v25, %v584_v7  ;;  %v572_v37 = vadd.f32 %v568_v12, %v561_v30  ;;  %v537_v31 = vmul.f32 %v3710_v13, %v3916_v16  ;;  %v582_v24 = vmul.f32 %v3719_v8, %v3937_v23  ;;  %v3729_v13 = vld [vmem:[%s5534_s1 + $0x1a8] sm:$0xff] }
  0x84   :  { %5666 = vst [vmem:[#allocation40_spill] sm:$0xff] %v4690_v52  ;;  %v1149_v19 = vmul.f32 0.1, %v4690_v52  ;;  %v548_v53 = vmul.f32 %v3712_v50, %v3919_v17  ;;  %v559_v35 = vmul.f32 %v3714_v26, %v3922_v18  ;;  %v564_v7 = vadd.f32 %v560_v57, %v553_v0  ;;  %v3733_v54 = vld [vmem:[%s5534_s1 + $0x2e8] sm:$0xff]  ;;  %v3728_v57 = vld [vmem:[%s5534_s1 + $0x1a0] sm:$0xff] }
  0x85   :  { %v4703_v33 = vadd.f32 %v602_v48, %v595_v60  ;;  %v583_v63 = vadd.f32 %v579_v2, %v572_v37  ;;  %v541_v25 = vadd.f32 %v537_v31, %v530_v11  ;;  %v593_v8 = vmul.f32 %v3721_v29, %v3943_v27  ;;  %v3724_v29 = vld [vmem:[%s5534_s1 + $0x60] sm:$0xff] }
  0x86   :  { %1155 = vadd.xlane.f32.xlu0 %v1149_v19  ;;  %v604_v50 = vmul.f32 %v3723_v14, %v3946_v28  ;;  %v570_v26 = vmul.f32 %v3716_v62, %v3931_v21  ;;  %v618_v48 = vmul.f32 %v3725_v9, %v3953_v34  ;;  %v575_v0 = vadd.f32 %v571_v42, %v564_v7 }
  0x87   :  { %5667 = vst [vmem:[#allocation41_spill] sm:$0xff] %v4703_v33  ;;  %v1190_v2 = vmul.f32 0.1, %v4703_v33  ;;  %v594_v31 = vadd.f32 %v590_v61, %v583_v63  ;;  %v552_v12 = vadd.f32 %v548_v53, %v541_v25  ;;  %v581_v14 = vmul.f32 %v3718_v59, %v3937_v23  ;;  %v3735_v59 = vld [vmem:[%s5534_s1 + $0x388] sm:$0xff]  ;;  %v3732_v63 = vld [vmem:[%s5534_s1 + $0x2e0] sm:$0xff] }
  0x88   :  { %v592_v62 = vmul.f32 %v3720_v49, %v3943_v27  ;;  %v625_v51 = vmul.f32 %v3727_v36, %v3965_v38  ;;  %v636_v46 = vmul.f32 %v3729_v13, %v3968_v39  ;;  %v586_v61 = vadd.f32 %v582_v24, %v575_v0  ;;  %v3737_v49 = vld [vmem:[%s5534_s1 + $0x428] sm:$0xff] }
  0x89   :  { %1195 = vadd.xlane.f32.xlu1 %v1190_v2  ;;  %v4732_v55 = vadd.f32 %v601_v6, %v594_v31  ;;  %v563_v56 = vadd.f32 %v559_v35, %v552_v12  ;;  %v603_v30 = vmul.f32 %v3722_v20, %v3946_v28  ;;  %v647_v6 = vmul.f32 %v3731_v10, %v3971_v40  ;;  %v3730_v20 = vld [vmem:[%s5534_s1 + $0x240] sm:$0xff]  ;;  %v3739_v53 = vld [vmem:[%s5534_s1 + $0x4c8] sm:$0xff] }
  0x8a   :  { %v629_v42 = vadd.f32 %v625_v51, %v618_v48  ;;  %v658_v11 = vmul.f32 %v3733_v54, %v3974_v41  ;;  %v617_v60 = vmul.f32 %v3724_v29, %v3953_v34  ;;  %v597_v19 = vadd.f32 %v593_v8, %v586_v61  ;;  %v3734_v12 = vld [vmem:[%s5534_s1 + $0x380] sm:$0xff] }
  0x8b   :  { %5668 = vst [vmem:[#allocation42_spill] sm:$0xff] %v4732_v55  ;;  %v1189_v37 = vmul.f32 0.1, %v4732_v55  ;;  %v574_v24 = vadd.f32 %v570_v26, %v563_v56  ;;  %v624_v35 = vmul.f32 %v3726_v3, %v3965_v38  ;;  %v669_v25 = vmul.f32 %v3735_v59, %v3979_v44  ;;  %v3736_v51 = vld [vmem:[%s5534_s1 + $0x420] sm:$0xff] }
  0x8c   :  { %v640_v7 = vadd.f32 %v636_v46, %v629_v42  ;;  %v680_v48 = vmul.f32 %v3737_v49, %v3982_v45  ;;  %v635_v2 = vmul.f32 %v3728_v57, %v3968_v39  ;;  %v4761_v8 = vadd.f32 %v604_v50, %v597_v19 }
  0x8d   :  { %1193 = vadd.xlane.f32.xlu0 %v1189_v37  ;;  %v585_v26 = vadd.f32 %v581_v14, %v574_v24  ;;  %v628_v31 = vadd.f32 %v624_v35, %v617_v60  ;;  %v646_v0 = vmul.f32 %v3730_v20, %v3971_v40  ;;  %v691_v61 = vmul.f32 %v3739_v53, %v3988_v47  ;;  %v4777_v37 = vld [vmem:[%s5534_s1 + $0x4c0] sm:$0xff] }
  0x8e   :  { %5669 = vst [vmem:[#allocation43_spill] sm:$0xff] %v4761_v8  ;;  %v651_v46 = vadd.f32 %v647_v6, %v640_v7  ;;  %v657_v56 = vmul.f32 %v3732_v63, %v3974_v41  ;;  %v620_v50 = vmul.f32 %v3725_v9, %v3913_v15  ;;  %v1192_v14 = vmul.f32 0.1, %v4761_v8 }
  0x8f   :  { %v596_v42 = vadd.f32 %v592_v62, %v585_v26  ;;  %v639_v60 = vadd.f32 %v635_v2, %v628_v31  ;;  %v627_v19 = vmul.f32 %v3727_v36, %v3916_v16  ;;  %v668_v6 = vmul.f32 %v3734_v12, %v3979_v44 }
  0x90   :  { %v662_v24 = vadd.f32 %v658_v11, %v651_v46  ;;  %v679_v35 = vmul.f32 %v3736_v51, %v3982_v45  ;;  %v638_v7 = vmul.f32 %v3729_v13, %v3919_v17  ;;  %1199 = vadd.xlane.f32.xlu1 %v1192_v14  ;;  %v649_v2 = vmul.f32 %v3731_v10, %v3922_v18 }
  0x91   :  { %v4783_v9 = vadd.f32 %v603_v30, %v596_v42  ;;  %v650_v8 = vadd.f32 %v646_v0, %v639_v60  ;;  %v631_v62 = vadd.f32 %v627_v19, %v620_v50  ;;  %v690_v31 = vmul.f32 %v4777_v37, %v3988_v47  ;;  %v3741_v30 = vld [vmem:[%s5534_s1 + $0x78] sm:$0xff] }
  0x92   :  { %v673_v26 = vadd.f32 %v669_v25, %v662_v24  ;;  %v660_v36 = vmul.f32 %v3733_v54, %v3931_v21  ;;  %v619_v11 = vmul.f32 %v3724_v29, %v3913_v15  ;;  %v626_v13 = vmul.f32 %v3726_v3, %v3916_v16  ;;  %v3743_v54 = vld [vmem:[%s5534_s1 + $0x118] sm:$0xff] }
  0x93   :  { %v1191_v46 = vmul.f32 0.1, %v4783_v9  ;;  %v661_v55 = vadd.f32 %v657_v56, %v650_v8  ;;  %v642_v33 = vadd.f32 %v638_v7, %v631_v62  ;;  %v671_v10 = vmul.f32 %v3735_v59, %v3937_v23  ;;  %v3747_v59 = vld [vmem:[%s5534_s1 + $0x258] sm:$0xff] }
  0x94   :  { %v684_v0 = vadd.f32 %v680_v48, %v673_v26  ;;  %v682_v25 = vmul.f32 %v3737_v49, %v3943_v27  ;;  %v637_v50 = vmul.f32 %v3728_v57, %v3919_v17  ;;  %v630_v56 = vadd.f32 %v626_v13, %v619_v11  ;;  %v3745_v48 = vld [vmem:[%s5534_s1 + $0x1b8] sm:$0xff]  ;;  %v3742_v26 = vld [vmem:[%s5534_s1 + $0x110] sm:$0xff] }
  0x95   :  { %1197 = vadd.xlane.f32.xlu0 %v1191_v46  ;;  %v672_v29 = vadd.f32 %v668_v6, %v661_v55  ;;  %v653_v8 = vadd.f32 %v649_v2, %v642_v33  ;;  %v648_v3 = vmul.f32 %v3730_v20, %v3922_v18  ;;  %v693_v57 = vmul.f32 %v3739_v53, %v3946_v28  ;;  %v3749_v19 = vld [vmem:[%s5534_s1 + $0x2f8] sm:$0xff] }
  0x96   :  { %v4808_v49 = vadd.f32 %v691_v61, %v684_v0  ;;  %v659_v14 = vmul.f32 %v3732_v63, %v3931_v21  ;;  %v707_v55 = vmul.f32 %v3741_v30, %v3953_v34  ;;  %v641_v60 = vadd.f32 %v637_v50, %v630_v56  ;;  %v3740_v61 = vld [vmem:[%s5534_s1 + $0x70] sm:$0xff] }
  0x97   :  { %v683_v33 = vadd.f32 %v679_v35, %v672_v29  ;;  %v664_v42 = vadd.f32 %v660_v36, %v653_v8  ;;  %v714_v20 = vmul.f32 %v3743_v54, %v3965_v38  ;;  %v670_v53 = vmul.f32 %v3734_v12, %v3937_v23  ;;  %v3744_v36 = vld [vmem:[%s5534_s1 + $0x1b0] sm:$0xff]  ;;  %v3753_v29 = vld [vmem:[%s5534_s1 + $0x438] sm:$0xff] }
  0x98   :  { %v1232_v24 = vmul.f32 0.1, %v4808_v49  ;;  %v725_v63 = vmul.f32 %v3745_v48, %v3968_v39  ;;  %v736_v6 = vmul.f32 %v3747_v59, %v3971_v40  ;;  %v652_v62 = vadd.f32 %v648_v3, %v641_v60 }
  0x99   :  { %v4824_v35 = vadd.f32 %v690_v31, %v683_v33  ;;  %v675_v7 = vadd.f32 %v671_v10, %v664_v42  ;;  %v718_v2 = vadd.f32 %v714_v20, %v707_v55  ;;  %v681_v12 = vmul.f32 %v3736_v51, %v3943_v27  ;;  %v3751_v31 = vld [vmem:[%s5534_s1 + $0x398] sm:$0xff]  ;;  %v3746_v51 = vld [vmem:[%s5534_s1 + $0x250] sm:$0xff] }
  0x9a   :  { %1237 = vadd.xlane.f32.xlu1 %v1232_v24  ;;  %v747_v11 = vmul.f32 %v3749_v19, %v3974_v41  ;;  %v706_v46 = vmul.f32 %v3740_v61, %v3953_v34  ;;  %v663_v10 = vadd.f32 %v659_v14, %v652_v62  ;;  %v692_v8 = vmul.f32 %v4777_v37, %v3946_v28  ;;  %v3755_v33 = vld [vmem:[%s5534_s1 + $0x4d8] sm:$0xff]  ;;  %v3748_v42 = vld [vmem:[%s5534_s1 + $0x2f0] sm:$0xff] }
  0x9b   :  { %v1231_v13 = vmul.f32 0.1, %v4824_v35  ;;  %v686_v0 = vadd.f32 %v682_v25, %v675_v7  ;;  %v729_v50 = vadd.f32 %v725_v63, %v718_v2  ;;  %v713_v56 = vmul.f32 %v3742_v26, %v3965_v38 }
  0x9c   :  { %v724_v34 = vmul.f32 %v3744_v36, %v3968_v39  ;;  %v674_v25 = vadd.f32 %v670_v53, %v663_v10  ;;  %v758_v55 = vmul.f32 %v3751_v31, %v3979_v44  ;;  %v769_v37 = vmul.f32 %v3753_v29, %v3982_v45  ;;  %v3750_v53 = vld [vmem:[%s5534_s1 + $0x390] sm:$0xff] }
  0x9d   :  { %1235 = vadd.xlane.f32.xlu0 %v1231_v13  ;;  %v4849_v3 = vadd.f32 %v693_v57, %v686_v0  ;;  %v740_v14 = vadd.f32 %v736_v6, %v729_v50  ;;  %v717_v38 = vadd.f32 %v713_v56, %v706_v46  ;;  %v735_v39 = vmul.f32 %v3746_v51, %v3971_v40  ;;  %v3754_v50 = vld [vmem:[%s5534_s1 + $0x4d0] sm:$0xff] }
  0x9e   :  { %v709_v57 = vmul.f32 %v3741_v30, %v3913_v15  ;;  %v685_v20 = vadd.f32 %v681_v12, %v674_v25  ;;  %v716_v63 = vmul.f32 %v3743_v54, %v3916_v16  ;;  %v780_v6 = vmul.f32 %v3755_v33, %v3988_v47  ;;  %v3752_v12 = vld [vmem:[%s5534_s1 + $0x430] sm:$0xff] }
  0x9f   :  { %v1234_v60 = vmul.f32 0.1, %v4849_v3  ;;  %v751_v24 = vadd.f32 %v747_v11, %v740_v14  ;;  %v728_v7 = vadd.f32 %v724_v34, %v717_v38  ;;  %v746_v62 = vmul.f32 %v3748_v42, %v3974_v41 }
  0xa0   :  { %v727_v2 = vmul.f32 %v3745_v48, %v3919_v17  ;;  %v4869_v40 = vadd.f32 %v692_v8, %v685_v20  ;;  %v720_v11 = vadd.f32 %v716_v63, %v709_v57  ;;  %v738_v46 = vmul.f32 %v3747_v59, %v3922_v18 }
  0xa1   :  { %1241 = vadd.xlane.f32.xlu1 %v1234_v60  ;;  %v762_v30 = vadd.f32 %v758_v55, %v751_v24  ;;  %v739_v13 = vadd.f32 %v735_v39, %v728_v7  ;;  %v757_v54 = vmul.f32 %v3750_v53, %v3979_v44  ;;  %v749_v0 = vmul.f32 %v3749_v19, %v3931_v21 }
  0xa2   :  { %5670 = vst [vmem:[#allocation44_spill] sm:$0xff] %v4869_v40  ;;  %v708_v41 = vmul.f32 %v3740_v61, %v3913_v15  ;;  %v1233_v48 = vmul.f32 0.1, %v4869_v40  ;;  %v731_v8 = vadd.f32 %v727_v2, %v720_v11  ;;  %v715_v56 = vmul.f32 %v3742_v26, %v3916_v16 }
  0xa3   :  { %v773_v10 = vadd.f32 %v769_v37, %v762_v30  ;;  %v750_v34 = vadd.f32 %v746_v62, %v739_v13  ;;  %v768_v59 = vmul.f32 %v3752_v12, %v3982_v45  ;;  %v760_v25 = vmul.f32 %v3751_v31, %v3937_v23  ;;  %v1324_v55 = vpop.xlane.xlu1 %1323 }
  0xa4   :  { %v726_v44 = vmul.f32 %v3744_v36, %v3919_v17  ;;  %1239 = vadd.xlane.f32.xlu0 %v1233_v48  ;;  %v742_v15 = vadd.f32 %v738_v46, %v731_v8  ;;  %v719_v61 = vadd.f32 %v715_v56, %v708_v41  ;;  %v737_v14 = vmul.f32 %v3746_v51, %v3922_v18  ;;  %v17_v56 = vld [vmem:[%s5535_s2 + $0x8] sm:$0x3] }
  0xa5   :  { %v4886_v19 = vadd.f32 %v780_v6, %v773_v10  ;;  %v761_v37 = vadd.f32 %v757_v54, %v750_v34  ;;  %v779_v38 = vmul.f32 %v3754_v50, %v3988_v47  ;;  %v771_v16 = vmul.f32 %v3753_v29, %v3943_v27 }
  0xa6   :  { %v753_v45 = vadd.f32 %v749_v0, %v742_v15  ;;  %v730_v39 = vadd.f32 %v726_v44, %v719_v61  ;;  %v748_v31 = vmul.f32 %v3748_v42, %v3931_v21  ;;  %v782_v60 = vmul.f32 %v3755_v33, %v3946_v28 }
  0xa7   :  { %5671 = vst [vmem:[#allocation45_spill] sm:$0xff] %v4886_v19  ;;  %v1274_v26 = vmul.f32 0.1, %v4886_v19  ;;  %v772_v17 = vadd.f32 %v768_v59, %v761_v37  ;;  %v759_v18 = vmul.f32 %v3750_v53, %v3937_v23  ;;  %v770_v29 = vmul.f32 %v3752_v12, %v3943_v27 }
  0xa8   :  { %v1320_v36 = vpop.xlane.xlu0 %1319  ;;  %v764_v57 = vadd.f32 %v760_v25, %v753_v45  ;;  %v741_v20 = vadd.f32 %v737_v14, %v730_v39  ;;  %v1343_v21 = vrot.slane %v1324_v55, %v3950_v32  ;;  %v781_v23 = vmul.f32 %v3754_v50, %v3946_v28 }
  0xa9   :  { %1279 = vadd.xlane.f32.xlu1 %v1274_v26  ;;  %v4895_v51 = vadd.f32 %v779_v38, %v772_v17  ;;  %v1334_v30 = vrot.slane %v1320_v36, %v3950_v32 }
  0xaa   :  { %v775_v47 = vadd.f32 %v771_v16, %v764_v57  ;;  %v752_v24 = vadd.f32 %v748_v31, %v741_v20 }
  0xab   :  { %5672 = vst [vmem:[#allocation46_spill] sm:$0xff] %v4895_v51  ;;  %v1326_v63 = vpop.xlane.xlu1 %1325  ;;  %v1273_v6 = vmul.f32 0.1, %v4895_v51 }
  0xac   :  { %v1347_v42 = vrot.slane %v1326_v63, %v3976_v43  ;;  %v4901_v7 = vadd.f32 %v782_v60, %v775_v47  ;;  %v763_v33 = vadd.f32 %v759_v18, %v752_v24 }
  0xad   :  { %1277 = vadd.xlane.f32.xlu0 %v1273_v6 }
  0xae   :  { %5673 = vst [vmem:[#allocation47_spill] sm:$0xff] %v4901_v7  ;;  %v1348_v53 = vsel %vm1001_vm0, %v1347_v42, %v1343_v21  ;;  %v1322_v62 = vpop.xlane.xlu0 %1321  ;;  %v1276_v27 = vmul.f32 0.1, %v4901_v7  ;;  %v774_v2 = vadd.f32 %v770_v29, %v763_v33 }
  0xaf   :  { %1352 = vst.msk [vmem:[#allocation4 + $0x18] sm:$0x1] %vm1014_vm1, %v1348_v53  ;;  %v1338_v12 = vrot.slane %v1322_v62, %v3976_v43 }
  0xb0   :  { %1283 = vadd.xlane.f32.xlu1 %v1276_v27  ;;  %v4909_v11 = vadd.f32 %v781_v23, %v774_v2 }
  0xb1   :  { %v1339_v46 = vsel %vm1001_vm0, %v1338_v12, %v1334_v30  ;;  %v1364_v28 = vpop.xlane.xlu1 %1363 }
  0xb2   :  { %5674 = vst [vmem:[#allocation48_spill] sm:$0xff] %v4909_v11  ;;  %1351 = vst.msk [vmem:[#allocation4 + $0x8] sm:$0x1] %vm1014_vm1, %v1339_v46  ;;  %v1275_v13 = vmul.f32 0.1, %v4909_v11  ;;  %v1380_v54 = vrot.slane %v1364_v28, %v3976_v43 }
  0xb4   :  { %1281 = vadd.xlane.f32.xlu0 %v1275_v13 }
  0xb5   :  { %v1362_v0 = vpop.xlane.xlu0 %1361 }
  0xb6   :  { %v1376_v41 = vrot.slane %v1362_v0, %v3950_v32 }
  0xb8   :  { %v1381_v48 = vsel %vm1001_vm0, %v1380_v54, %v1376_v41 }
  0xb9   :  { %1393 = vst.msk [vmem:[#allocation4 + $0x9] sm:$0x1] %vm1014_vm1, %v1381_v48 }
  0xba   :  { %v1368_v10 = vpop.xlane.xlu1 %1367 }
  0xbb   :  { %v1389_v50 = vrot.slane %v1368_v10, %v3976_v43 }
  0xbf   :  { %v1366_v8 = vpop.xlane.xlu0 %1365 }
  0xc0   :  { %v1385_v34 = vrot.slane %v1366_v8, %v3950_v32  ;;  %v1396_v59 = vld [vmem:[#allocation4 + $0x8] sm:$0x3] }
  0xc1   :  { %v4924_v15 = vadd.f32 %v1396_v59, %v17_v56 }
  0xc2   :  { %v1390_v25 = vsel %vm1001_vm0, %v1389_v50, %v1385_v34  ;;  %v981_v44 = vpop.xlane.xlu1 %980 }
  0xc3   :  { %1394 = vst.msk [vmem:[#allocation4 + $0x19] sm:$0x1] %vm1014_vm1, %v1390_v25  ;;  %v1404_v61 = vmul.f32 %v4924_v15, %v4924_v15  ;;  %v1000_v14 = vrot.slane %v981_v44, %v3976_v43 }
  0xc5   :  { %v1412_v37 = vsel %vm1411_vm2, %v1404_v61, 0.0 }
  0xc6   :  { %v979_v55 = vpop.xlane.xlu0 %978  ;;  %1413 = vadd.xlane.f32.xlu0 %v1412_v37 }
  0xc7   :  { %v995_v38 = vrot.slane %v979_v55, %v3950_v32 }
  0xc9   :  { %v1002_v16 = vsel %vm1001_vm0, %v1000_v14, %v995_v38  ;;  %v985_v26 = vpop.xlane.xlu1 %984 }
  0xca   :  { %1015 = vst.msk [vmem:[#allocation4] sm:$0x1] %vm1014_vm1, %v1002_v16  ;;  %v1398_v45 = vld [vmem:[#allocation4 + $0x18] sm:$0x3]  ;;  %v1010_v31 = vrot.slane %v985_v26, %v3976_v43 }
  0xcb   :  { %v4934_v39 = vadd.f32 %v1398_v45, %v17_v56 }
  0xcd   :  { %v1406_v17 = vmul.f32 %v4934_v39, %v4934_v39 }
  0xce   :  { %v983_v36 = vpop.xlane.xlu0 %982 }
  0xcf   :  { %v1006_v57 = vrot.slane %v983_v36, %v3950_v32  ;;  %v1418_v60 = vsel %vm1411_vm2, %v1406_v17, 0.0 }
  0xd0   :  { %1419 = vadd.xlane.f32.xlu1 %v1418_v60 }
  0xd1   :  { %v1011_v20 = vsel %vm1001_vm0, %v1010_v31, %v1006_v57 }
  0xd2   :  { %1016 = vst.msk [vmem:[#allocation4 + $0x10] sm:$0x1] %vm1014_vm1, %v1011_v20 }
  0xd3   :  { %v1028_v18 = vpop.xlane.xlu1 %1027 }
  0xd4   :  { %v1044_v47 = vrot.slane %v1028_v18, %v3976_v43 }
  0xd6   :  { %v1026_v24 = vpop.xlane.xlu0 %1025 }
  0xd7   :  { %v1040_v29 = vrot.slane %v1026_v24, %v3950_v32 }
  0xd9   :  { %v1045_v63 = vsel %vm1001_vm0, %v1044_v47, %v1040_v29 }
  0xda   :  { %1057 = vst.msk [vmem:[#allocation4 + $0x1] sm:$0x1] %vm1014_vm1, %v1045_v63  ;;  %v1032_v6 = vpop.xlane.xlu1 %1031 }
  0xdb   :  { %v1053_v21 = vrot.slane %v1032_v6, %v3976_v43 }
  0xdd   :  { %v1030_v42 = vpop.xlane.xlu0 %1029 }
  0xde   :  { %v1049_v33 = vrot.slane %v1030_v42, %v3950_v32 }
  0xe0   :  { %v1054_v23 = vsel %vm1001_vm0, %v1053_v21, %v1049_v33 }
  0xe1   :  { %1058 = vst.msk [vmem:[#allocation4 + $0x11] sm:$0x1] %vm1014_vm1, %v1054_v23 }
  0xe2   :  { %v1070_v53 = vpop.xlane.xlu1 %1069 }
  0xe3   :  { %v1086_v62 = vrot.slane %v1070_v53, %v3976_v43 }
  0xe7   :  { %v1068_v27 = vpop.xlane.xlu0 %1067 }
  0xe8   :  { %v1082_v2 = vrot.slane %v1068_v27, %v3950_v32 }
  0xea   :  { %v1087_v30 = vsel %vm1001_vm0, %v1086_v62, %v1082_v2  ;;  %v1074_v12 = vpop.xlane.xlu1 %1073 }
  0xeb   :  { %1099 = vst.msk [vmem:[#allocation4 + $0x2] sm:$0x1] %vm1014_vm1, %v1087_v30  ;;  %v1095_v46 = vrot.slane %v1074_v12, %v3976_v43 }
  0xee   :  { %v1072_v28 = vpop.xlane.xlu0 %1071 }
  0xef   :  { %v1091_v13 = vrot.slane %v1072_v28, %v3950_v32 }
  0xf1   :  { %v1096_v54 = vsel %vm1001_vm0, %v1095_v46, %v1091_v13  ;;  %v1112_v0 = vpop.xlane.xlu1 %1111 }
  0xf2   :  { %1100 = vst.msk [vmem:[#allocation4 + $0x12] sm:$0x1] %vm1014_vm1, %v1096_v54  ;;  %v1128_v41 = vrot.slane %v1112_v0, %v3976_v43 }
  0xf6   :  { %v1110_v48 = vpop.xlane.xlu0 %1109 }
  0xf7   :  { %v1124_v10 = vrot.slane %v1110_v48, %v3950_v32 }
  0xf9   :  { %v1129_v50 = vsel %vm1001_vm0, %v1128_v41, %v1124_v10 }
  0xfa   :  { %1141 = vst.msk [vmem:[#allocation4 + $0x3] sm:$0x1] %vm1014_vm1, %v1129_v50  ;;  %v16_v50 = vld [vmem:[%s5535_s2] sm:$0xff] }
  0xfb   :  { %v1116_v8 = vpop.xlane.xlu1 %1115 }
  0xfc   :  { %v1137_v56 = vrot.slane %v1116_v8, %v3976_v43 }
  0xfe   :  { %v1114_v34 = vpop.xlane.xlu0 %1113 }
  0xff   :  { %v1133_v59 = vrot.slane %v1114_v34, %v3950_v32 }
 0x101   :  { %v1138_v25 = vsel %vm1001_vm0, %v1137_v56, %v1133_v59 }
 0x102   :  { %1142 = vst.msk [vmem:[#allocation4 + $0x13] sm:$0x1] %vm1014_vm1, %v1138_v25  ;;  %v1154_v44 = vpop.xlane.xlu1 %1153 }
 0x103   :  { %v1170_v61 = vrot.slane %v1154_v44, %v3976_v43 }
 0x105   :  { %v1152_v14 = vpop.xlane.xlu0 %1151 }
 0x106   :  { %v1166_v55 = vrot.slane %v1152_v14, %v3950_v32 }
 0x108   :  { %v1171_v37 = vsel %vm1001_vm0, %v1170_v61, %v1166_v55 }
 0x109   :  { %1183 = vst.msk [vmem:[#allocation4 + $0x4] sm:$0x1] %vm1014_vm1, %v1171_v37 }
 0x10a   :  { %v1158_v38 = vpop.xlane.xlu1 %1157 }
 0x10b   :  { %v1179_v16 = vrot.slane %v1158_v38, %v3976_v43 }
 0x10f   :  { %v1156_v26 = vpop.xlane.xlu0 %1155 }
 0x110   :  { %v1175_v45 = vrot.slane %v1156_v26, %v3950_v32 }
 0x112   :  { %v1180_v31 = vsel %vm1001_vm0, %v1179_v16, %v1175_v45  ;;  %v1196_v17 = vpop.xlane.xlu1 %1195 }
 0x113   :  { %1184 = vst.msk [vmem:[#allocation4 + $0x14] sm:$0x1] %vm1014_vm1, %v1180_v31  ;;  %v1212_v36 = vrot.slane %v1196_v17, %v3976_v43 }
 0x116   :  { %v1194_v57 = vpop.xlane.xlu0 %1193 }
 0x117   :  { %v1208_v60 = vrot.slane %v1194_v57, %v3950_v32 }
 0x119   :  { %v1213_v20 = vsel %vm1001_vm0, %v1212_v36, %v1208_v60  ;;  %v1200_v18 = vpop.xlane.xlu1 %1199 }
 0x11a   :  { %1225 = vst.msk [vmem:[#allocation4 + $0x5] sm:$0x1] %vm1014_vm1, %v1213_v20  ;;  %v1221_v47 = vrot.slane %v1200_v18, %v3976_v43 }
 0x11e   :  { %v1198_v24 = vpop.xlane.xlu0 %1197 }
 0x11f   :  { %v1217_v29 = vrot.slane %v1198_v24, %v3950_v32 }
 0x121   :  { %v1222_v63 = vsel %vm1001_vm0, %v1221_v47, %v1217_v29 }
 0x122   :  { %1226 = vst.msk [vmem:[#allocation4 + $0x15] sm:$0x1] %vm1014_vm1, %v1222_v63 }
 0x123   :  { %v1238_v6 = vpop.xlane.xlu1 %1237 }
 0x124   :  { %v1254_v21 = vrot.slane %v1238_v6, %v3976_v43 }
 0x126   :  { %v1236_v42 = vpop.xlane.xlu0 %1235 }
 0x127   :  { %v1250_v33 = vrot.slane %v1236_v42, %v3950_v32 }
 0x129   :  { %v1255_v23 = vsel %vm1001_vm0, %v1254_v21, %v1250_v33 }
 0x12a   :  { %1267 = vst.msk [vmem:[#allocation4 + $0x6] sm:$0x1] %vm1014_vm1, %v1255_v23  ;;  %v1242_v53 = vpop.xlane.xlu1 %1241 }
 0x12b   :  { %v1263_v62 = vrot.slane %v1242_v53, %v3976_v43 }
 0x12d   :  { %v1240_v27 = vpop.xlane.xlu0 %1239 }
 0x12e   :  { %v1259_v2 = vrot.slane %v1240_v27, %v3950_v32 }
 0x130   :  { %v1264_v30 = vsel %vm1001_vm0, %v1263_v62, %v1259_v2 }
 0x131   :  { %1268 = vst.msk [vmem:[#allocation4 + $0x16] sm:$0x1] %vm1014_vm1, %v1264_v30 }
 0x132   :  { %v1280_v12 = vpop.xlane.xlu1 %1279 }
 0x133   :  { %v1296_v46 = vrot.slane %v1280_v12, %v3976_v43 }
 0x136   :  { %v1278_v28 = vpop.xlane.xlu0 %1277 }
 0x137   :  { %v1292_v13 = vrot.slane %v1278_v28, %v3950_v32 }
 0x139   :  { %v1297_v54 = vsel %vm1001_vm0, %v1296_v46, %v1292_v13  ;;  %v1284_v0 = vpop.xlane.xlu1 %1283 }
 0x13a   :  { %1309 = vst.msk [vmem:[#allocation4 + $0x7] sm:$0x1] %vm1014_vm1, %v1297_v54  ;;  %v1305_v41 = vrot.slane %v1284_v0, %v3976_v43 }
 0x13d   :  { %v1282_v48 = vpop.xlane.xlu0 %1281 }
 0x13e   :  { %v1301_v10 = vrot.slane %v1282_v48, %v3950_v32 }
 0x140   :  { %v1306_v8 = vsel %vm1001_vm0, %v1305_v41, %v1301_v10 }
 0x141   :  { %v1395_v56 = vld [vmem:[#allocation4] sm:$0xff]  ;;  %1310 = vst.msk [vmem:[#allocation4 + $0x17] sm:$0x1] %vm1014_vm1, %v1306_v8 }
 0x142   :  { %v1399_v34 = vadd.f32 %v1395_v56, %v16_v50 }
 0x144   :  { %v1403_v59 = vmul.f32 %v1399_v34, %v1399_v34 }
 0x146   :  { %v1408_v25 = vsel %vm1407_vm3, %v1403_v59, 0.0 }
 0x147   :  { %1409 = vadd.xlane.f32.xlu0 %v1408_v25 }
 0x148   :  { %v1397_v44 = vld [vmem:[#allocation4 + $0x10] sm:$0xff] }
 0x149   :  { %v5003_v61 = vadd.f32 %v1397_v44, %v16_v50 }
 0x14b   :  { %v1405_v14 = vmul.f32 %v5003_v61, %v5003_v61 }
 0x14d   :  { %v1415_v55 = vsel %vm1407_vm3, %v1405_v14, 0.0 }
 0x14e   :  { %1416 = vadd.xlane.f32.xlu1 %v1415_v55 }
 0x14f   :  { %v1414_v37 = vpop.xlane.xlu0 %1413 }
 0x150   :  { %v1422_v38 = vadd.f32 1.0, %v1414_v37  ;;  %v1438_v16 = vadd.f32 1e-16, %v1414_v37 }
 0x152   :  { %3788 = vrcp.f32 %v1422_v38 }
 0x153   :  { %3790 = vrsqrt.f32 %v1438_v16 }
 0x159   :  { %v1420_v26 = vpop.xlane.xlu1 %1419 }
 0x15a   :  { %v1424_v45 = vadd.f32 1.0, %v1420_v26  ;;  %v1440_v31 = vadd.f32 1e-16, %v1420_v26 }
 0x15c   :  { %3792 = vrcp.f32 %v1424_v45 }
 0x15d   :  { %3794 = vrsqrt.f32 %v1440_v31 }
 0x15f   :  { %v3789_v17 = vpop.eup %3788 }
 0x160   :  { %v1428_v36 = vmul.f32 %v3789_v17, %v1414_v37  ;;  %v3791_v60 = vpop.eup %3790 }
 0x162   :  { %v1434_v57 = vmul.f32 %v1428_v36, %v4924_v15 }
 0x164   :  { %v1446_v20 = vmul.f32 %v3791_v60, %v1434_v57 }
 0x166   :  { %v1824_v18 = vrot.slane %v1446_v20, %v3887_v4  ;;  %v1870_v29 = vrot.slane %v1446_v20, %v3889_v5  ;;  %v5676_v20 = vld [vmem:[#allocation17_spill] sm:$0xff] }
 0x168   :  { %1830 = vbcast.lane.b32.xlu1 %v1824_v18, 264  ;;  %1826 = vbcast.lane.b32.xlu0 %v1824_v18, 256 }
 0x169   :  { %v3793_v47 = vpop.eup %3792 }
 0x16a   :  { %v1432_v24 = vmul.f32 %v3793_v47, %v1420_v26  ;;  %v3795_v6 = vpop.eup %3794  ;;  %v5675_v26 = vld [vmem:[#allocation15_spill] sm:$0xff] }
 0x16c   :  { %v1436_v63 = vmul.f32 %v1432_v24, %v4934_v39  ;;  %1872 = vbcast.lane.b32.xlu0 %v1870_v29, 256 }
 0x16e   :  { %v1448_v21 = vmul.f32 %v3795_v6, %v1436_v63  ;;  %v5677_v63 = vld [vmem:[#allocation18_spill] sm:$0xff] }
 0x170   :  { %v1835_v42 = vrot.slane %v1448_v21, %v3887_v4  ;;  %v1881_v33 = vrot.slane %v1448_v21, %v3889_v5 }
 0x172   :  { %1837 = vbcast.lane.b32.xlu1 %v1835_v42, 256  ;;  %1883 = vbcast.lane.b32.xlu0 %v1881_v33, 256 }
 0x176   :  { %1841 = vbcast.lane.b32.xlu1 %v1835_v42, 264 }
 0x17a   :  { %1876 = vbcast.lane.b32.xlu1 %v1870_v29, 264 }
 0x17e   :  { %1887 = vbcast.lane.b32.xlu1 %v1881_v33, 264 }
 0x1d0   :  { %v1410_v15 = vpop.xlane.xlu0 %1409 }
 0x1d1   :  { %v1421_v23 = vadd.f32 1.0, %v1410_v15  ;;  %v1437_v53 = vadd.f32 1e-16, %v1410_v15 }
 0x1d3   :  { %3796 = vrcp.f32 %v1421_v23  ;;  %v5679_v23 = vld [vmem:[#allocation19_spill] sm:$0xff] }
 0x1d4   :  { %3798 = vrsqrt.f32 %v1437_v53 }
 0x1d7   :  { %v1417_v62 = vpop.xlane.xlu1 %1416 }
 0x1d8   :  { %v1423_v27 = vadd.f32 1.0, %v1417_v62  ;;  %v1439_v39 = vadd.f32 1e-16, %v1417_v62 }
 0x1da   :  { %3800 = vrcp.f32 %v1423_v27  ;;  %v1827_v2 = vpop.permute.xlu0 %1826 }
 0x1db   :  { %v1831_v30 = vpop.permute.xlu1 %1830  ;;  %v1843_v12 = vmul.f32 %v1827_v2, %v4089_v22  ;;  %3802 = vrsqrt.f32 %v1439_v39 }
 0x1dc   :  { %v1844_v46 = vmul.f32 %v1831_v30, %v4124_v1 }
 0x1de   :  { %v1847_v28 = vadd.f32 %v1844_v46, %v1843_v12  ;;  %v1873_v14 = vpop.permute.xlu0 %1872 }
 0x1df   :  { %v1889_v6 = vmul.f32 %v1873_v14, %v5677_v63 }
 0x1e0   :  { %v3797_v13 = vpop.eup %3796  ;;  %v1848_v54 = vrot.slane %v1847_v28, 4 }
 0x1e1   :  { %v1426_v0 = vmul.f32 %v3797_v13, %v1410_v15  ;;  %v3799_v50 = vpop.eup %3798 }
 0x1e2   :  { %v1849_v41 = vadd.f32 %v1848_v54, %v1847_v28 }
 0x1e3   :  { %v1433_v48 = vmul.f32 %v1426_v0, %v1399_v34 }
 0x1e4   :  { %v1838_v10 = vpop.permute.xlu1 %1837  ;;  %v1850_v8 = vrot.slane %v1849_v41, 2  ;;  %v1884_v24 = vpop.permute.xlu0 %1883 }
 0x1e5   :  { %v5016_v56 = vmul.f32 %v3799_v50, %v1433_v48  ;;  %v1845_v16 = vmul.f32 %v1838_v10, %v4053_v58  ;;  %v5680_v50 = vld [vmem:[#allocation5_spill] sm:$0xff] }
 0x1e6   :  { %v1851_v59 = vadd.f32 %v1850_v8, %v1849_v41 }
 0x1e7   :  { %v3801_v25 = vpop.eup %3800  ;;  %v1456_v44 = vrot.slane %v5016_v56, %v3887_v4  ;;  %v1502_v27 = vrot.slane %v5016_v56, %v3889_v5  ;;  %v1548_v8 = vrot.slane %v5016_v56, %v5680_v50 }
 0x1e8   :  { %v1842_v55 = vpop.permute.xlu1 %1841  ;;  %v1430_v37 = vmul.f32 %v3801_v25, %v1417_v62  ;;  %v1852_v38 = vrot.slane %v1851_v59, 1  ;;  %v3803_v31 = vpop.eup %3802 }
 0x1e9   :  { %1462 = vbcast.lane.b32.xlu1 %v1456_v44, 264  ;;  %1458 = vbcast.lane.b32.xlu0 %v1456_v44, 256  ;;  %v1846_v34 = vmul.f32 %v1842_v55, %v5675_v26 }
 0x1ea   :  { %v1435_v45 = vmul.f32 %v1430_v37, %v5003_v61  ;;  %v1853_v17 = vadd.f32 %v1852_v38, %v1851_v59  ;;  %v5678_v61 = vld [vmem:[#allocation20_spill] sm:$0xff]  ;;  %v5681_v38 = vld [vmem:[#allocation6_spill] sm:$0xff] }
 0x1eb   :  { %v1854_v36 = vadd.f32 %v1846_v34, %v1845_v16  ;;  %v1891_v33 = vmul.f32 %v1884_v24, %v5678_v61  ;;  %v1594_v16 = vrot.slane %v5016_v56, %v5681_v38 }
 0x1ec   :  { %v1877_v57 = vpop.permute.xlu1 %1876  ;;  %v5023_v60 = vmul.f32 %v3803_v31, %v1435_v45  ;;  %1861 = vst [vmem:[#allocation3 + $0x8] sm:$0x1] %v1853_v17  ;;  %v5682_v45 = vld [vmem:[#allocation7_spill] sm:$0xff] }
 0x1ed   :  { %v1890_v18 = vmul.f32 %v1877_v57, %v5676_v20  ;;  %v1855_v47 = vrot.slane %v1854_v36, 4  ;;  %v1640_v31 = vrot.slane %v5016_v56, %v5682_v45 }
 0x1ee   :  { %v1467_v29 = vrot.slane %v5023_v60, %v3887_v4  ;;  %v1513_v13 = vrot.slane %v5023_v60, %v3889_v5  ;;  %v1559_v55 = vrot.slane %v5023_v60, %v5680_v50  ;;  %v1605_v34 = vrot.slane %v5023_v60, %v5681_v38 }
 0x1ef   :  { %v1856_v21 = vadd.f32 %v1855_v47, %v1854_v36  ;;  %v1893_v15 = vadd.f32 %v1890_v18, %v1889_v6  ;;  %v1651_v17 = vrot.slane %v5023_v60, %v5682_v45  ;;  %v5683_v36 = vld [vmem:[#allocation8_spill] sm:$0xff]  ;;  %v5684_v47 = vld [vmem:[#allocation9_spill] sm:$0xff]  ;;  %v5685_v6 = vld [vmem:[#allocation10_spill] sm:$0xff] }
 0x1f0   :  { %v1888_v42 = vpop.permute.xlu1 %1887  ;;  %1473 = vbcast.lane.b32.xlu1 %v1467_v29, 264  ;;  %1469 = vbcast.lane.b32.xlu0 %v1467_v29, 256  ;;  %v1686_v57 = vrot.slane %v5016_v56, %v5683_v36  ;;  %v1697_v18 = vrot.slane %v5023_v60, %v5683_v36  ;;  %v1732_v24 = vrot.slane %v5016_v56, %v5684_v47 }
 0x1f1   :  { %v1892_v53 = vmul.f32 %v1888_v42, %v5679_v23  ;;  %v1857_v62 = vrot.slane %v1856_v21, 2  ;;  %v1894_v39 = vrot.slane %v1893_v15, 4  ;;  %v1743_v29 = vrot.slane %v5023_v60, %v5684_v47 }
 0x1f2   :  { %v1789_v42 = vrot.slane %v5023_v60, %v5685_v6 }
 0x1f3   :  { %v1900_v2 = vadd.f32 %v1892_v53, %v1891_v33  ;;  %v1858_v30 = vadd.f32 %v1857_v62, %v1856_v21  ;;  %v1895_v12 = vadd.f32 %v1894_v39, %v1893_v15  ;;  %v1778_v21 = vrot.slane %v5016_v56, %v5685_v6  ;;  %v5686_v53 = vld [vmem:[#allocation21_spill] sm:$0xff] }
 0x1f4   :  { %1508 = vbcast.lane.b32.xlu1 %v1502_v27, 264  ;;  %1504 = vbcast.lane.b32.xlu0 %v1502_v27, 256  ;;  %v5687_v27 = vld [vmem:[#allocation22_spill] sm:$0xff] }
 0x1f5   :  { %v1901_v46 = vrot.slane %v1900_v2, 4  ;;  %v1859_v28 = vrot.slane %v1858_v30, 1  ;;  %v1896_v54 = vrot.slane %v1895_v12, 2 }
 0x1f7   :  { %v1902_v0 = vadd.f32 %v1901_v46, %v1900_v2  ;;  %v1860_v41 = vadd.f32 %v1859_v28, %v1858_v30  ;;  %v1897_v48 = vadd.f32 %v1896_v54, %v1895_v12  ;;  %v5689_v54 = vld [vmem:[#allocation24_spill] sm:$0xff] }
 0x1f8   :  { %1519 = vbcast.lane.b32.xlu1 %v1513_v13, 264  ;;  %1515 = vbcast.lane.b32.xlu0 %v1513_v13, 256  ;;  %v5688_v13 = vld [vmem:[#allocation23_spill] sm:$0xff] }
 0x1f9   :  { %v1903_v10 = vrot.slane %v1902_v0, 2  ;;  %1862 = vst [vmem:[#allocation3 + $0x18] sm:$0x1] %v1860_v41  ;;  %v1898_v59 = vrot.slane %v1897_v48, 1 }
 0x1fb   :  { %v1904_v25 = vadd.f32 %v1903_v10, %v1902_v0  ;;  %v1899_v44 = vadd.f32 %v1898_v59, %v1897_v48 }
 0x1fc   :  { %1554 = vbcast.lane.b32.xlu1 %v1548_v8, 264  ;;  %1550 = vbcast.lane.b32.xlu0 %v1548_v8, 256 }
 0x1fd   :  { %v1905_v14 = vrot.slane %v1904_v25, 1  ;;  %1907 = vst [vmem:[#allocation3 + $0x9] sm:$0x1] %v1899_v44 }
 0x1ff   :  { %v1906_v37 = vadd.f32 %v1905_v14, %v1904_v25  ;;  %v5690_v25 = vld [vmem:[#allocation25_spill] sm:$0xff]  ;;  %v5691_v14 = vld [vmem:[#allocation26_spill] sm:$0xff] }
 0x200   :  { %1565 = vbcast.lane.b32.xlu1 %v1559_v55, 264  ;;  %1561 = vbcast.lane.b32.xlu0 %v1559_v55, 256 }
 0x201   :  { %1908 = vst [vmem:[#allocation3 + $0x19] sm:$0x1] %v1906_v37 }
 0x204   :  { %1600 = vbcast.lane.b32.xlu1 %v1594_v16, 264  ;;  %1596 = vbcast.lane.b32.xlu0 %v1594_v16, 256 }
 0x208   :  { %1611 = vbcast.lane.b32.xlu1 %v1605_v34, 264  ;;  %1607 = vbcast.lane.b32.xlu0 %v1605_v34, 256 }
 0x20c   :  { %1646 = vbcast.lane.b32.xlu1 %v1640_v31, 264  ;;  %1642 = vbcast.lane.b32.xlu0 %v1640_v31, 256 }
 0x210   :  { %1657 = vbcast.lane.b32.xlu1 %v1651_v17, 264  ;;  %1653 = vbcast.lane.b32.xlu0 %v1651_v17, 256 }
 0x214   :  { %1692 = vbcast.lane.b32.xlu1 %v1686_v57, 264  ;;  %1688 = vbcast.lane.b32.xlu0 %v1686_v57, 256 }
 0x218   :  { %1703 = vbcast.lane.b32.xlu1 %v1697_v18, 264  ;;  %1699 = vbcast.lane.b32.xlu0 %v1697_v18, 256 }
 0x21c   :  { %1738 = vbcast.lane.b32.xlu1 %v1732_v24, 264  ;;  %1734 = vbcast.lane.b32.xlu0 %v1732_v24, 256 }
 0x220   :  { %1749 = vbcast.lane.b32.xlu1 %v1743_v29, 264  ;;  %1745 = vbcast.lane.b32.xlu0 %v1743_v29, 256  ;;  %v5692_v29 = vld [vmem:[#allocation27_spill] sm:$0xff] }
 0x224   :  { %1784 = vbcast.lane.b32.xlu1 %v1778_v21, 264  ;;  %1780 = vbcast.lane.b32.xlu0 %v1778_v21, 256 }
 0x228   :  { %1795 = vbcast.lane.b32.xlu1 %v1789_v42, 264  ;;  %1791 = vbcast.lane.b32.xlu0 %v1789_v42, 256  ;;  %v5693_v42 = vld [vmem:[#allocation28_spill] sm:$0xff] }
 0x25b   :  { %v1463_v33 = vpop.permute.xlu1 %1462  ;;  %v1459_v15 = vpop.permute.xlu0 %1458 }
 0x25c   :  { %v1476_v62 = vmul.f32 %v1463_v33, %v5686_v53  ;;  %v1475_v39 = vmul.f32 %v1459_v15, %v5687_v27 }
 0x25e   :  { %v1479_v2 = vadd.f32 %v1476_v62, %v1475_v39 }
 0x260   :  { %v1480_v30 = vrot.slane %v1479_v2, 4 }
 0x262   :  { %v1481_v12 = vadd.f32 %v1480_v30, %v1479_v2  ;;  %v1474_v46 = vpop.permute.xlu1 %1473  ;;  %v1470_v28 = vpop.permute.xlu0 %1469 }
 0x263   :  { %v1478_v56 = vmul.f32 %v1474_v46, %v5688_v13  ;;  %v1477_v0 = vmul.f32 %v1470_v28, %v5689_v54 }
 0x264   :  { %v1482_v41 = vrot.slane %v1481_v12, 2 }
 0x265   :  { %v1486_v48 = vadd.f32 %v1478_v56, %v1477_v0  ;;  %v5694_v56 = vld [vmem:[#allocation29_spill] sm:$0xff] }
 0x266   :  { %v1483_v60 = vadd.f32 %v1482_v41, %v1481_v12  ;;  %v1509_v10 = vpop.permute.xlu1 %1508  ;;  %v1505_v8 = vpop.permute.xlu0 %1504  ;;  %v5695_v41 = vld [vmem:[#allocation30_spill] sm:$0xff] }
 0x267   :  { %v1487_v59 = vrot.slane %v1486_v48, 4  ;;  %v1522_v44 = vmul.f32 %v1509_v10, %v5690_v25  ;;  %v1521_v55 = vmul.f32 %v1505_v8, %v5691_v14 }
 0x268   :  { %v1484_v37 = vrot.slane %v1483_v60, 1 }
 0x269   :  { %v1488_v16 = vadd.f32 %v1487_v59, %v1486_v48  ;;  %v1525_v34 = vadd.f32 %v1522_v44, %v1521_v55 }
 0x26a   :  { %v1485_v31 = vadd.f32 %v1484_v37, %v1483_v60  ;;  %v1520_v17 = vpop.permute.xlu1 %1519  ;;  %v1516_v57 = vpop.permute.xlu0 %1515 }
 0x26b   :  { %v1489_v18 = vrot.slane %v1488_v16, 2  ;;  %v1526_v24 = vrot.slane %v1525_v34, 4  ;;  %v1524_v21 = vmul.f32 %v1520_v17, %v5692_v29  ;;  %v1523_v33 = vmul.f32 %v1516_v57, %v5693_v42  ;;  %v5697_v17 = vld [vmem:[#allocation32_spill] sm:$0xff] }
 0x26c   :  { %1493 = vst [vmem:[#allocation3] sm:$0x1] %v1485_v31 }
 0x26d   :  { %v1490_v15 = vadd.f32 %v1489_v18, %v1488_v16  ;;  %v1527_v62 = vadd.f32 %v1526_v24, %v1525_v34  ;;  %v1532_v39 = vadd.f32 %v1524_v21, %v1523_v33  ;;  %v5696_v34 = vld [vmem:[#allocation31_spill] sm:$0xff] }
 0x26e   :  { %v1555_v2 = vpop.permute.xlu1 %1554  ;;  %v1551_v30 = vpop.permute.xlu0 %1550 }
 0x26f   :  { %v1491_v12 = vrot.slane %v1490_v15, 1  ;;  %v1528_v46 = vrot.slane %v1527_v62, 2  ;;  %v1533_v28 = vrot.slane %v1532_v39, 4  ;;  %v1568_v0 = vmul.f32 %v1555_v2, %v5694_v56 }
 0x270   :  { %v1567_v48 = vmul.f32 %v1551_v30, %v5695_v41 }
 0x271   :  { %v1492_v60 = vadd.f32 %v1491_v12, %v1490_v15  ;;  %v1529_v10 = vadd.f32 %v1528_v46, %v1527_v62  ;;  %v1534_v8 = vadd.f32 %v1533_v28, %v1532_v39  ;;  %v5698_v39 = vld [vmem:[#allocation33_spill] sm:$0xff]  ;;  %v5699_v46 = vld [vmem:[#allocation34_spill] sm:$0xff] }
 0x272   :  { %v1571_v59 = vadd.f32 %v1568_v0, %v1567_v48  ;;  %v1566_v44 = vpop.permute.xlu1 %1565  ;;  %v1562_v55 = vpop.permute.xlu0 %1561 }
 0x273   :  { %1494 = vst [vmem:[#allocation3 + $0x10] sm:$0x1] %v1492_v60  ;;  %v1530_v37 = vrot.slane %v1529_v10, 1  ;;  %v1535_v16 = vrot.slane %v1534_v8, 2  ;;  %v1570_v31 = vmul.f32 %v1566_v44, %v5696_v34  ;;  %v1569_v57 = vmul.f32 %v1562_v55, %v5697_v17 }
 0x274   :  { %v1572_v18 = vrot.slane %v1571_v59, 4 }
 0x275   :  { %v1531_v24 = vadd.f32 %v1530_v37, %v1529_v10  ;;  %v1536_v21 = vadd.f32 %v1535_v16, %v1534_v8  ;;  %v1578_v33 = vadd.f32 %v1570_v31, %v1569_v57  ;;  %v5701_v16 = vld [vmem:[#allocation36_spill] sm:$0xff] }
 0x276   :  { %v1573_v2 = vadd.f32 %v1572_v18, %v1571_v59  ;;  %v1601_v32 = vpop.permute.xlu1 %1600  ;;  %v1597_v30 = vpop.permute.xlu0 %1596  ;;  %v5700_v59 = vld [vmem:[#allocation35_spill] sm:$0xff] }
 0x277   :  { %1539 = vst [vmem:[#allocation3 + $0x1] sm:$0x1] %v1531_v24  ;;  %v1537_v15 = vrot.slane %v1536_v21, 1  ;;  %v1579_v62 = vrot.slane %v1578_v33, 4  ;;  %v1614_v12 = vmul.f32 %v1601_v32, %v5698_v39  ;;  %v1613_v28 = vmul.f32 %v1597_v30, %v5699_v46 }
 0x278   :  { %v1574_v0 = vrot.slane %v1573_v2, 2 }
 0x279   :  { %v1538_v48 = vadd.f32 %v1537_v15, %v1536_v21  ;;  %v1580_v60 = vadd.f32 %v1579_v62, %v1578_v33  ;;  %v1617_v44 = vadd.f32 %v1614_v12, %v1613_v28  ;;  %v5703_v12 = vld [vmem:[#allocation38_spill] sm:$0xff] }
 0x27a   :  { %v1575_v43 = vadd.f32 %v1574_v0, %v1573_v2  ;;  %v1612_v55 = vpop.permute.xlu1 %1611  ;;  %v1608_v6 = vpop.permute.xlu0 %1607  ;;  %v5702_v2 = vld [vmem:[#allocation37_spill] sm:$0xff] }
 0x27b   :  { %1540 = vst [vmem:[#allocation3 + $0x11] sm:$0x1] %v1538_v48  ;;  %v1581_v10 = vrot.slane %v1580_v60, 2  ;;  %v1618_v8 = vrot.slane %v1617_v44, 4  ;;  %v1616_v37 = vmul.f32 %v1612_v55, %v5700_v59  ;;  %v1615_v31 = vmul.f32 %v1608_v6, %v5701_v16 }
 0x27c   :  { %v1576_v57 = vrot.slane %v1575_v43, 1 }
 0x27d   :  { %v1582_v18 = vadd.f32 %v1581_v10, %v1580_v60  ;;  %v1619_v24 = vadd.f32 %v1618_v8, %v1617_v44  ;;  %v1624_v32 = vadd.f32 %v1616_v37, %v1615_v31 }
 0x27e   :  { %v1577_v47 = vadd.f32 %v1576_v57, %v1575_v43  ;;  %v1647_v30 = vpop.permute.xlu1 %1646  ;;  %v1643_v36 = vpop.permute.xlu0 %1642  ;;  %v5704_v43 = vld [vmem:[#allocation39_spill] sm:$0xff] }
 0x27f   :  { %v1583_v21 = vrot.slane %v1582_v18, 1  ;;  %v1620_v33 = vrot.slane %v1619_v24, 2  ;;  %v1625_v15 = vrot.slane %v1624_v32, 4  ;;  %v1660_v62 = vmul.f32 %v1647_v30, %v5702_v2 }
 0x280   :  { %1585 = vst [vmem:[#allocation3 + $0x2] sm:$0x1] %v1577_v47  ;;  %v1659_v28 = vmul.f32 %v1643_v36, %v5703_v12 }
 0x281   :  { %v1584_v0 = vadd.f32 %v1583_v21, %v1582_v18  ;;  %v1621_v48 = vadd.f32 %v1620_v33, %v1619_v24  ;;  %v1626_v55 = vadd.f32 %v1625_v15, %v1624_v32  ;;  %v5705_v32 = vld [vmem:[#allocation41_spill] sm:$0xff]  ;;  %v5706_v33 = vld [vmem:[#allocation42_spill] sm:$0xff] }
 0x282   :  { %v1663_v46 = vadd.f32 %v1660_v62, %v1659_v28  ;;  %v1658_v6 = vpop.permute.xlu1 %1657  ;;  %v1654_v16 = vpop.permute.xlu0 %1653 }
 0x283   :  { %1586 = vst [vmem:[#allocation3 + $0x12] sm:$0x1] %v1584_v0  ;;  %v1622_v60 = vrot.slane %v1621_v48, 1  ;;  %v1627_v44 = vrot.slane %v1626_v55, 2  ;;  %v1662_v10 = vmul.f32 %v1658_v6, %v5704_v43  ;;  %v1661_v8 = vmul.f32 %v1654_v16, %v4690_v52 }
 0x284   :  { %v1664_v37 = vrot.slane %v1663_v46, 4 }
 0x285   :  { %v1623_v31 = vadd.f32 %v1622_v60, %v1621_v48  ;;  %v1628_v57 = vadd.f32 %v1627_v44, %v1626_v55  ;;  %v1670_v30 = vadd.f32 %v1662_v10, %v1661_v8 }
 0x286   :  { %v1665_v47 = vadd.f32 %v1664_v37, %v1663_v46  ;;  %v1693_v2 = vpop.permute.xlu1 %1692  ;;  %v1689_v36 = vpop.permute.xlu0 %1688  ;;  %v5707_v46 = vld [vmem:[#allocation43_spill] sm:$0xff] }
 0x287   :  { %1631 = vst [vmem:[#allocation3 + $0x3] sm:$0x1] %v1623_v31  ;;  %v1629_v18 = vrot.slane %v1628_v57, 1  ;;  %v1671_v24 = vrot.slane %v1670_v30, 4  ;;  %v1706_v21 = vmul.f32 %v1693_v2, %v5705_v32  ;;  %v1705_v15 = vmul.f32 %v1689_v36, %v5706_v33 }
 0x288   :  { %v1666_v62 = vrot.slane %v1665_v47, 2 }
 0x289   :  { %v1630_v28 = vadd.f32 %v1629_v18, %v1628_v57  ;;  %v1672_v0 = vadd.f32 %v1671_v24, %v1670_v30  ;;  %v1709_v6 = vadd.f32 %v1706_v21, %v1705_v15 }
 0x28a   :  { %v1667_v12 = vadd.f32 %v1666_v62, %v1665_v47  ;;  %v1704_v16 = vpop.permute.xlu1 %1703  ;;  %v1700_v52 = vpop.permute.xlu0 %1699 }
 0x28b   :  { %1632 = vst [vmem:[#allocation3 + $0x13] sm:$0x1] %v1630_v28  ;;  %v1673_v48 = vrot.slane %v1672_v0, 2  ;;  %v1710_v55 = vrot.slane %v1709_v6, 4  ;;  %v1708_v60 = vmul.f32 %v1704_v16, %v5707_v46  ;;  %v1707_v44 = vmul.f32 %v1700_v52, %v4783_v9 }
 0x28c   :  { %v1668_v10 = vrot.slane %v1667_v12, 1 }
 0x28d   :  { %v1674_v8 = vadd.f32 %v1673_v48, %v1672_v0  ;;  %v1711_v37 = vadd.f32 %v1710_v55, %v1709_v6  ;;  %v1716_v2 = vadd.f32 %v1708_v60, %v1707_v44 }
 0x28e   :  { %v1669_v31 = vadd.f32 %v1668_v10, %v1667_v12  ;;  %v1739_v36 = vpop.permute.xlu1 %1738  ;;  %v1735_v33 = vpop.permute.xlu0 %1734 }
 0x28f   :  { %v1675_v57 = vrot.slane %v1674_v8, 1  ;;  %v1712_v30 = vrot.slane %v1711_v37, 2  ;;  %v1717_v18 = vrot.slane %v1716_v2, 4  ;;  %v1752_v47 = vmul.f32 %v1739_v36, %v4808_v49 }
 0x290   :  { %1677 = vst [vmem:[#allocation3 + $0x4] sm:$0x1] %v1669_v31  ;;  %v1751_v24 = vmul.f32 %v1735_v33, %v4824_v35 }
 0x291   :  { %v1676_v21 = vadd.f32 %v1675_v57, %v1674_v8  ;;  %v1713_v15 = vadd.f32 %v1712_v30, %v1711_v37  ;;  %v1718_v62 = vadd.f32 %v1717_v18, %v1716_v2 }
 0x292   :  { %v1755_v28 = vadd.f32 %v1752_v47, %v1751_v24  ;;  %v1750_v52 = vpop.permute.xlu1 %1749  ;;  %v1746_v16 = vpop.permute.xlu0 %1745 }
 0x293   :  { %1678 = vst [vmem:[#allocation3 + $0x14] sm:$0x1] %v1676_v21  ;;  %v1714_v0 = vrot.slane %v1713_v15, 1  ;;  %v1719_v6 = vrot.slane %v1718_v62, 2  ;;  %v1754_v12 = vmul.f32 %v1750_v52, %v4849_v3  ;;  %v1753_v48 = vmul.f32 %v1746_v16, %v4869_v40 }
 0x294   :  { %v1756_v55 = vrot.slane %v1755_v28, 4 }
 0x295   :  { %v1715_v60 = vadd.f32 %v1714_v0, %v1713_v15  ;;  %v1720_v44 = vadd.f32 %v1719_v6, %v1718_v62  ;;  %v1762_v10 = vadd.f32 %v1754_v12, %v1753_v48 }
 0x296   :  { %v1757_v31 = vadd.f32 %v1756_v55, %v1755_v28  ;;  %v1785_v36 = vpop.permute.xlu1 %1784  ;;  %v1781_v33 = vpop.permute.xlu0 %1780 }
 0x297   :  { %1723 = vst [vmem:[#allocation3 + $0x5] sm:$0x1] %v1715_v60  ;;  %v1721_v8 = vrot.slane %v1720_v44, 1  ;;  %v1763_v37 = vrot.slane %v1762_v10, 4  ;;  %v1798_v2 = vmul.f32 %v1785_v36, %v4886_v19  ;;  %v1797_v57 = vmul.f32 %v1781_v33, %v4895_v51 }
 0x298   :  { %v1758_v30 = vrot.slane %v1757_v31, 2 }
 0x299   :  { %v1722_v18 = vadd.f32 %v1721_v8, %v1720_v44  ;;  %v1764_v47 = vadd.f32 %v1763_v37, %v1762_v10  ;;  %v1801_v24 = vadd.f32 %v1798_v2, %v1797_v57 }
 0x29a   :  { %v1759_v21 = vadd.f32 %v1758_v30, %v1757_v31  ;;  %v1796_v52 = vpop.permute.xlu1 %1795  ;;  %v1792_v16 = vpop.permute.xlu0 %1791 }
 0x29b   :  { %1724 = vst [vmem:[#allocation3 + $0x15] sm:$0x1] %v1722_v18  ;;  %v1765_v15 = vrot.slane %v1764_v47, 2  ;;  %v1802_v62 = vrot.slane %v1801_v24, 4  ;;  %v1800_v28 = vmul.f32 %v1796_v52, %v4901_v7  ;;  %v1799_v0 = vmul.f32 %v1792_v16, %v4909_v11 }
 0x29c   :  { %v1760_v6 = vrot.slane %v1759_v21, 1 }
 0x29d   :  { %v1766_v12 = vadd.f32 %v1765_v15, %v1764_v47  ;;  %v1803_v48 = vadd.f32 %v1802_v62, %v1801_v24  ;;  %v1808_v55 = vadd.f32 %v1800_v28, %v1799_v0  ;;  %v1910_v47 = vld [vmem:[#allocation3 + $0x8] sm:$0x3]  ;;  %v1912_v15 = vld [vmem:[#allocation3 + $0x18] sm:$0x3] }
 0x29e   :  { %v1761_v60 = vadd.f32 %v1760_v6, %v1759_v21  ;;  %v1914_v21 = vsel %vm1913_vm4, %v1910_v47, -inf  ;;  %v1922_v0 = vsel %vm1913_vm4, %v1912_v15, -inf }
 0x29f   :  { %v1767_v36 = vrot.slane %v1766_v12, 1  ;;  %v1804_v33 = vrot.slane %v1803_v48, 2  ;;  %v1809_v44 = vrot.slane %v1808_v55, 4 }
 0x2a0   :  { %1769 = vst [vmem:[#allocation3 + $0x6] sm:$0x1] %v1761_v60 }
 0x2a1   :  { %v1768_v10 = vadd.f32 %v1767_v36, %v1766_v12  ;;  %v1805_v31 = vadd.f32 %v1804_v33, %v1803_v48  ;;  %v1810_v8 = vadd.f32 %v1809_v44, %v1808_v55 }
 0x2a3   :  { %1770 = vst [vmem:[#allocation3 + $0x16] sm:$0x1] %v1768_v10  ;;  %v1806_v37 = vrot.slane %v1805_v31, 1  ;;  %v1811_v2 = vrot.slane %v1810_v8, 2 }
 0x2a5   :  { %v1807_v57 = vadd.f32 %v1806_v37, %v1805_v31  ;;  %v1812_v30 = vadd.f32 %v1811_v2, %v1810_v8 }
 0x2a7   :  { %1815 = vst [vmem:[#allocation3 + $0x7] sm:$0x1] %v1807_v57  ;;  %v1813_v18 = vrot.slane %v1812_v30, 1 }
 0x2a9   :  { %v1814_v52 = vadd.f32 %v1813_v18, %v1812_v30 }
 0x2ab   :  { %1816 = vst [vmem:[#allocation3 + $0x17] sm:$0x1] %v1814_v52 }
 0x2ae   :  { %v1909_v24 = vld [vmem:[#allocation3] sm:$0xff] }
 0x2af   :  { %v1915_v16 = vmax.f32 %v1909_v24, %v1914_v21 }
 0x2b1   :  { %v1916_v62 = vrot.slane %v1915_v16, 4 }
 0x2b2   :  { %v1911_v28 = vld [vmem:[#allocation3 + $0x10] sm:$0xff] }
 0x2b3   :  { %v1917_v6 = vmax.f32 %v1915_v16, %v1916_v62  ;;  %v1923_v12 = vmax.f32 %v1911_v28, %v1922_v0 }
 0x2b5   :  { %v1918_v48 = vrot.slane %v1917_v6, 2  ;;  %v1924_v55 = vrot.slane %v1923_v12, 4 }
 0x2b7   :  { %v1919_v60 = vmax.f32 %v1917_v6, %v1918_v48  ;;  %v1925_v36 = vmax.f32 %v1923_v12, %v1924_v55 }
 0x2b9   :  { %v1920_v33 = vrot.slane %v1919_v60, 1  ;;  %v1926_v44 = vrot.slane %v1925_v36, 2 }
 0x2bb   :  { %v1921_v10 = vmax.f32 %v1919_v60, %v1920_v33  ;;  %v1927_v31 = vmax.f32 %v1925_v36, %v1926_v44 }
 0x2bd   :  { %v1930_v8 = vsub.f32 %v1909_v24, %v1921_v10  ;;  %v1931_v37 = vsub.f32 %v1910_v47, %v1921_v10  ;;  %v1928_v2 = vrot.slane %v1927_v31, 1 }
 0x2bf   :  { %v1934_v57 = vmul.f32 1.442695, %v1930_v8  ;;  %v1936_v30 = vmul.f32 1.442695, %v1931_v37  ;;  %v1929_v18 = vmax.f32 %v1927_v31, %v1928_v2 }
 0x2c1   :  { %3804 = vpow2.f32 %v1934_v57  ;;  %v1932_v52 = vsub.f32 %v1911_v28, %v1929_v18  ;;  %v1933_v21 = vsub.f32 %v1912_v15, %v1929_v18 }
 0x2c2   :  { %3806 = vpow2.f32 %v1936_v30 }
 0x2c3   :  { %v1938_v16 = vmul.f32 1.442695, %v1932_v52  ;;  %v1940_v62 = vmul.f32 1.442695, %v1933_v21 }
 0x2c5   :  { %3808 = vpow2.f32 %v1938_v16 }
 0x2c6   :  { %3810 = vpow2.f32 %v1940_v62 }
 0x2ce   :  { %v3805_v0 = vpop.eup %3804 }
 0x2cf   :  { %v3807_v6 = vpop.eup %3806 }
 0x2d0   :  { %v1942_v12 = vsel %vm1913_vm4, %v3807_v6, 0.0 }
 0x2d1   :  { %v1943_v48 = vadd.f32 %v3805_v0, %v1942_v12 }
 0x2d2   :  { %v3809_v55 = vpop.eup %3808 }
 0x2d3   :  { %v3811_v24 = vpop.eup %3810  ;;  %v1944_v47 = vrot.slane %v1943_v48, 4 }
 0x2d4   :  { %v1950_v60 = vsel %vm1913_vm4, %v3811_v24, 0.0 }
 0x2d5   :  { %v1945_v36 = vadd.f32 %v1944_v47, %v1943_v48  ;;  %v1951_v33 = vadd.f32 %v3809_v55, %v1950_v60 }
 0x2d7   :  { %v1946_v44 = vrot.slane %v1945_v36, 2  ;;  %v1952_v28 = vrot.slane %v1951_v33, 4 }
 0x2d9   :  { %v1947_v15 = vadd.f32 %v1946_v44, %v1945_v36  ;;  %v1953_v10 = vadd.f32 %v1952_v28, %v1951_v33 }
 0x2db   :  { %v1948_v31 = vrot.slane %v1947_v15, 1  ;;  %v1954_v8 = vrot.slane %v1953_v10, 2 }
 0x2dd   :  { %v1949_v37 = vadd.f32 %v1948_v31, %v1947_v15  ;;  %v1955_v2 = vadd.f32 %v1954_v8, %v1953_v10 }
 0x2df   :  { %3812 = vrcp.f32 %v1949_v37  ;;  %v1956_v57 = vrot.slane %v1955_v2, 1 }
 0x2e1   :  { %v1957_v30 = vadd.f32 %v1956_v57, %v1955_v2 }
 0x2e3   :  { %3814 = vrcp.f32 %v1957_v30 }
 0x2ec   :  { %v3813_v18 = vpop.eup %3812 }
 0x2ed   :  { %v1960_v52 = vmul.f32 %v3813_v18, %v3807_v6  ;;  %v5100_v36 = vmul.f32 %v3813_v18, %v3805_v0 }
 0x2ef   :  { %v2371_v21 = vrot.slane %v1960_v52, %v3887_v4  ;;  %v2421_v48 = vrot.slane %v1960_v52, %v3889_v5  ;;  %v1971_v10 = vrot.slane %v5100_v36, %v3887_v4  ;;  %v2021_v2 = vrot.slane %v5100_v36, %v3889_v5 }
 0x2f0   :  { %v3815_v16 = vpop.eup %3814 }
 0x2f1   :  { %v2377_v62 = vmul.f32 %v2371_v21, %v4124_v1  ;;  %v2376_v12 = vmul.f32 %v2371_v21, %v4089_v22  ;;  %v1963_v47 = vmul.f32 %v3815_v16, %v3811_v24  ;;  %v2427_v33 = vmul.f32 %v2421_v48, %v5676_v20 }
 0x2f2   :  { %v5105_v28 = vmul.f32 %v3815_v16, %v3809_v55  ;;  %v1977_v0 = vmul.f32 %v1971_v10, %v5686_v53  ;;  %v2426_v31 = vmul.f32 %v2421_v48, %v5677_v63  ;;  %v1976_v57 = vmul.f32 %v1971_v10, %v5687_v27 }
 0x2f3   :  { %2382 = vadd.xlane.f32.xlu1 %v2377_v62  ;;  %2380 = vadd.xlane.f32.xlu0 %v2376_v12  ;;  %v2375_v60 = vrot.slane %v1963_v47, %v3887_v4  ;;  %v2425_v44 = vrot.slane %v1963_v47, %v3889_v5  ;;  %v2027_v30 = vmul.f32 %v2021_v2, %v5690_v25 }
 0x2f4   :  { %v1975_v8 = vrot.slane %v5105_v28, %v3887_v4  ;;  %v2025_v18 = vrot.slane %v5105_v28, %v3889_v5  ;;  %v2071_v16 = vrot.slane %v5100_v36, %v5680_v50  ;;  %v2026_v12 = vmul.f32 %v2021_v2, %v5691_v14 }
 0x2f5   :  { %v2378_v6 = vmul.f32 %v2375_v60, %v4053_v58  ;;  %v2429_v15 = vmul.f32 %v2425_v44, %v5679_v23  ;;  %v2379_v24 = vmul.f32 %v2375_v60, %v5675_v26  ;;  %v2428_v55 = vmul.f32 %v2425_v44, %v5678_v61 }
 0x2f6   :  { %v1979_v37 = vmul.f32 %v1975_v8, %v5688_v13  ;;  %v2029_v52 = vmul.f32 %v2025_v18, %v5692_v29  ;;  %v1978_v21 = vmul.f32 %v1975_v8, %v5689_v54  ;;  %v2077_v62 = vmul.f32 %v2071_v16, %v5694_v56 }
 0x2f7   :  { %2432 = vadd.xlane.f32.xlu1 %v2427_v33  ;;  %2384 = vadd.xlane.f32.xlu0 %v2378_v6  ;;  %v2075_v48 = vrot.slane %v5105_v28, %v5680_v50  ;;  %v2028_v60 = vmul.f32 %v2025_v18, %v5693_v42  ;;  %v2121_v33 = vrot.slane %v5100_v36, %v5681_v38 }
 0x2f8   :  { %v2076_v44 = vmul.f32 %v2071_v16, %v5695_v41  ;;  %v2175_v2 = vrot.slane %v5105_v28, %v5682_v45 }
 0x2f9   :  { %v2079_v47 = vmul.f32 %v2075_v48, %v5696_v34  ;;  %v2127_v6 = vmul.f32 %v2121_v33, %v5698_v39  ;;  %v2078_v10 = vmul.f32 %v2075_v48, %v5697_v17 }
 0x2fb   :  { %2436 = vadd.xlane.f32.xlu1 %v2429_v15  ;;  %2386 = vadd.xlane.f32.xlu0 %v2379_v24  ;;  %v2125_v15 = vrot.slane %v5105_v28, %v5681_v38 }
 0x2fd   :  { %v2129_v24 = vmul.f32 %v2125_v15, %v5700_v59 }
 0x2ff   :  { %1982 = vadd.xlane.f32.xlu1 %v1977_v0  ;;  %2430 = vadd.xlane.f32.xlu0 %v2426_v31  ;;  %v2171_v0 = vrot.slane %v5100_v36, %v5682_v45  ;;  %v5708_v31 = vld [vmem:[#allocation37_spill] sm:$0xff] }
 0x301   :  { %v2177_v8 = vmul.f32 %v2171_v0, %v5708_v31 }
 0x303   :  { %2434 = vadd.xlane.f32.xlu0 %v2428_v55  ;;  %1986 = vadd.xlane.f32.xlu1 %v1979_v37  ;;  %v5709_v55 = vld [vmem:[#allocation34_spill] sm:$0xff] }
 0x304   :  { %v2126_v37 = vmul.f32 %v2121_v33, %v5709_v55 }
 0x307   :  { %1980 = vadd.xlane.f32.xlu0 %v1976_v57  ;;  %2032 = vadd.xlane.f32.xlu1 %v2027_v30  ;;  %v2179_v57 = vmul.f32 %v2175_v2, %v5704_v43  ;;  %v5710_v30 = vld [vmem:[#allocation36_spill] sm:$0xff] }
 0x308   :  { %v2128_v18 = vmul.f32 %v2125_v15, %v5710_v30 }
 0x30b   :  { %2036 = vadd.xlane.f32.xlu1 %v2029_v52  ;;  %1984 = vadd.xlane.f32.xlu0 %v1978_v21  ;;  %v5711_v52 = vld [vmem:[#allocation8_spill] sm:$0xff] }
 0x30c   :  { %v2221_v21 = vrot.slane %v5100_v36, %v5711_v52  ;;  %v2225_v48 = vrot.slane %v5105_v28, %v5711_v52 }
 0x30e   :  { %v2227_v16 = vmul.f32 %v2221_v21, %v5705_v32 }
 0x30f   :  { %2082 = vadd.xlane.f32.xlu1 %v2077_v62  ;;  %2030 = vadd.xlane.f32.xlu0 %v2026_v12  ;;  %v5712_v62 = vld [vmem:[#allocation38_spill] sm:$0xff] }
 0x310   :  { %v2176_v12 = vmul.f32 %v2171_v0, %v5712_v62 }
 0x313   :  { %2086 = vadd.xlane.f32.xlu1 %v2079_v47  ;;  %2034 = vadd.xlane.f32.xlu0 %v2028_v60  ;;  %v2229_v47 = vmul.f32 %v2225_v48, %v5707_v46  ;;  %v5713_v60 = vld [vmem:[#allocation40_spill] sm:$0xff] }
 0x314   :  { %v2178_v33 = vmul.f32 %v2175_v2, %v5713_v60 }
 0x317   :  { %2132 = vadd.xlane.f32.xlu1 %v2127_v6  ;;  %2080 = vadd.xlane.f32.xlu0 %v2076_v44  ;;  %v5714_v6 = vld [vmem:[#allocation9_spill] sm:$0xff] }
 0x318   :  { %v2271_v44 = vrot.slane %v5100_v36, %v5714_v6  ;;  %v2275_v0 = vrot.slane %v5105_v28, %v5714_v6 }
 0x31a   :  { %v2277_v15 = vmul.f32 %v2271_v44, %v4808_v49 }
 0x31b   :  { %2136 = vadd.xlane.f32.xlu1 %v2129_v24  ;;  %2084 = vadd.xlane.f32.xlu0 %v2078_v10  ;;  %v5715_v24 = vld [vmem:[#allocation42_spill] sm:$0xff] }
 0x31c   :  { %v2226_v10 = vmul.f32 %v2221_v21, %v5715_v24 }
 0x31f   :  { %2182 = vadd.xlane.f32.xlu1 %v2177_v8  ;;  %2130 = vadd.xlane.f32.xlu0 %v2126_v37  ;;  %v2279_v8 = vmul.f32 %v2275_v0, %v4849_v3  ;;  %v2228_v37 = vmul.f32 %v2225_v48, %v4783_v9 }
 0x323   :  { %2186 = vadd.xlane.f32.xlu1 %v2179_v57  ;;  %2134 = vadd.xlane.f32.xlu0 %v2128_v18  ;;  %v5716_v57 = vld [vmem:[#allocation10_spill] sm:$0xff] }
 0x324   :  { %v2321_v2 = vrot.slane %v5100_v36, %v5716_v57  ;;  %v2325_v21 = vrot.slane %v5105_v28, %v5716_v57 }
 0x326   :  { %v2327_v18 = vmul.f32 %v2321_v2, %v4886_v19  ;;  %v2326_v48 = vmul.f32 %v2321_v2, %v4895_v51  ;;  %v2328_v36 = vmul.f32 %v2325_v21, %v4909_v11 }
 0x327   :  { %2232 = vadd.xlane.f32.xlu1 %v2227_v16  ;;  %2180 = vadd.xlane.f32.xlu0 %v2176_v12  ;;  %v2276_v16 = vmul.f32 %v2271_v44, %v4824_v35  ;;  %v2329_v12 = vmul.f32 %v2325_v21, %v4901_v7  ;;  %v5717_v44 = vld [vmem:[#allocation12_spill] sm:$0xff] }
 0x32b   :  { %2236 = vadd.xlane.f32.xlu1 %v2229_v47  ;;  %2184 = vadd.xlane.f32.xlu0 %v2178_v33  ;;  %v2278_v47 = vmul.f32 %v2275_v0, %v4869_v40 }
 0x32f   :  { %2282 = vadd.xlane.f32.xlu1 %v2277_v15  ;;  %2230 = vadd.xlane.f32.xlu0 %v2226_v10 }
 0x333   :  { %2286 = vadd.xlane.f32.xlu1 %v2279_v8  ;;  %2234 = vadd.xlane.f32.xlu0 %v2228_v37  ;;  %v5718_v8 = vld [vmem:[#allocation11_spill] sm:$0xff] }
 0x337   :  { %2332 = vadd.xlane.f32.xlu1 %v2327_v18  ;;  %2280 = vadd.xlane.f32.xlu0 %v2276_v16 }
 0x33b   :  { %2336 = vadd.xlane.f32.xlu1 %v2329_v12  ;;  %2284 = vadd.xlane.f32.xlu0 %v2278_v47 }
 0x33f   :  { %2330 = vadd.xlane.f32.xlu0 %v2326_v48 }
 0x343   :  { %2334 = vadd.xlane.f32.xlu0 %v2328_v36 }
 0x37c   :  { %v2383_v33 = vpop.xlane.xlu1 %2382  ;;  %v2381_v15 = vpop.xlane.xlu0 %2380 }
 0x37d   :  { %v2399_v10 = vrot.slane %v2383_v33, %v5717_v44  ;;  %v2395_v28 = vrot.slane %v2381_v15, %v5718_v8 }
 0x37f   :  { %v2400_v37 = vsel %vm1001_vm0, %v2399_v10, %v2395_v28 }
 0x380   :  { %2412 = vst.msk [vmem:[#allocation4 + $0x8] sm:$0x1] %vm1014_vm1, %v2400_v37  ;;  %v2433_v18 = vpop.xlane.xlu1 %2432  ;;  %v2385_v0 = vpop.xlane.xlu0 %2384 }
 0x381   :  { %v2404_v2 = vrot.slane %v2385_v0, %v5718_v8  ;;  %v2449_v33 = vrot.slane %v2433_v18, %v5717_v44 }
 0x384   :  { %v2437_v16 = vpop.xlane.xlu1 %2436  ;;  %v2387_v12 = vpop.xlane.xlu0 %2386 }
 0x385   :  { %v2408_v47 = vrot.slane %v2387_v12, %v5717_v44  ;;  %v2458_v0 = vrot.slane %v2437_v16, %v5717_v44  ;;  %v3860_v16 = vld [vmem:[%s5535_s2 + $0x8] sm:$0x3] }
 0x387   :  { %v2409_v21 = vsel %vm1001_vm0, %v2408_v47, %v2404_v2 }
 0x388   :  { %2413 = vst.msk [vmem:[#allocation4 + $0x18] sm:$0x1] %vm1014_vm1, %v2409_v21  ;;  %v1983_v48 = vpop.xlane.xlu1 %1982  ;;  %v2431_v36 = vpop.xlane.xlu0 %2430 }
 0x389   :  { %v2445_v15 = vrot.slane %v2431_v36, %v5718_v8  ;;  %v1999_v18 = vrot.slane %v1983_v48, %v5717_v44 }
 0x38b   :  { %v2450_v10 = vsel %vm1001_vm0, %v2449_v33, %v2445_v15 }
 0x38c   :  { %2462 = vst.msk [vmem:[#allocation4 + $0x9] sm:$0x1] %vm1014_vm1, %v2450_v10  ;;  %v1987_v28 = vpop.xlane.xlu1 %1986  ;;  %v2435_v37 = vpop.xlane.xlu0 %2434 }
 0x38d   :  { %v2454_v12 = vrot.slane %v2435_v37, %v5718_v8 }
 0x38f   :  { %v2459_v2 = vsel %vm1001_vm0, %v2458_v0, %v2454_v12  ;;  %v2008_v0 = vrot.slane %v1987_v28, %v5717_v44 }
 0x390   :  { %2463 = vst.msk [vmem:[#allocation4 + $0x19] sm:$0x1] %vm1014_vm1, %v2459_v2  ;;  %v2033_v47 = vpop.xlane.xlu1 %2032  ;;  %v1981_v21 = vpop.xlane.xlu0 %1980 }
 0x391   :  { %v1995_v36 = vrot.slane %v1981_v21, %v5718_v8 }
 0x393   :  { %v2000_v33 = vsel %vm1001_vm0, %v1999_v18, %v1995_v36  ;;  %v2465_v15 = vld [vmem:[#allocation4 + $0x8] sm:$0x3] }
 0x394   :  { %2012 = vst.msk [vmem:[#allocation4] sm:$0x1] %vm1014_vm1, %v2000_v33  ;;  %v2037_v10 = vpop.xlane.xlu1 %2036  ;;  %v1985_v11 = vpop.xlane.xlu0 %1984  ;;  %v5198_v37 = vadd.f32 %v3860_v16, %v2465_v15  ;;  %v2049_v15 = vrot.slane %v2033_v47, %v5717_v44 }
 0x395   :  { %v2004_v12 = vrot.slane %v1985_v11, %v5718_v8 }
 0x396   :  { %v2473_v48 = vmul.f32 %v5198_v37, %v5198_v37 }
 0x397   :  { %v2009_v2 = vsel %vm1001_vm0, %v2008_v0, %v2004_v12  ;;  %v2467_v21 = vld [vmem:[#allocation4 + $0x18] sm:$0x3] }
 0x398   :  { %2013 = vst.msk [vmem:[#allocation4 + $0x10] sm:$0x1] %vm1014_vm1, %v2009_v2  ;;  %v2083_v18 = vpop.xlane.xlu1 %2082  ;;  %v2031_v36 = vpop.xlane.xlu0 %2030  ;;  %v2479_v33 = vsel %vm1411_vm2, %v2473_v48, 0.0  ;;  %v5207_v7 = vadd.f32 %v3860_v16, %v2467_v21  ;;  %v2058_v48 = vrot.slane %v2037_v10, %v5717_v44 }
 0x399   :  { %v2045_v28 = vrot.slane %v2031_v36, %v5718_v8  ;;  %2480 = vadd.xlane.f32.xlu0 %v2479_v33  ;;  %v2099_v33 = vrot.slane %v2083_v18, %v5717_v44 }
 0x39a   :  { %v2475_v11 = vmul.f32 %v5207_v7, %v5207_v7 }
 0x39b   :  { %v2050_v51 = vsel %vm1001_vm0, %v2049_v15, %v2045_v28 }
 0x39c   :  { %2062 = vst.msk [vmem:[#allocation4 + $0x1] sm:$0x1] %vm1014_vm1, %v2050_v51  ;;  %v2087_v0 = vpop.xlane.xlu1 %2086  ;;  %v2035_v12 = vpop.xlane.xlu0 %2034  ;;  %v2485_v2 = vsel %vm1411_vm2, %v2475_v11, 0.0 }
 0x39d   :  { %v2054_v16 = vrot.slane %v2035_v12, %v5718_v8  ;;  %2486 = vadd.xlane.f32.xlu1 %v2485_v2  ;;  %v2108_v10 = vrot.slane %v2087_v0, %v5717_v44 }
 0x39f   :  { %v2059_v47 = vsel %vm1001_vm0, %v2058_v48, %v2054_v16 }
 0x3a0   :  { %2063 = vst.msk [vmem:[#allocation4 + $0x11] sm:$0x1] %vm1014_vm1, %v2059_v47  ;;  %v2133_v21 = vpop.xlane.xlu1 %2132  ;;  %v2081_v36 = vpop.xlane.xlu0 %2080 }
 0x3a1   :  { %v2095_v15 = vrot.slane %v2081_v36, %v5718_v8  ;;  %v2149_v18 = vrot.slane %v2133_v21, %v5717_v44 }
 0x3a3   :  { %v2100_v51 = vsel %vm1001_vm0, %v2099_v33, %v2095_v15 }
 0x3a4   :  { %2112 = vst.msk [vmem:[#allocation4 + $0x2] sm:$0x1] %vm1014_vm1, %v2100_v51  ;;  %v2137_v28 = vpop.xlane.xlu1 %2136  ;;  %v2085_v11 = vpop.xlane.xlu0 %2084 }
 0x3a5   :  { %v2104_v12 = vrot.slane %v2085_v11, %v5718_v8  ;;  %v2158_v0 = vrot.slane %v2137_v28, %v5717_v44 }
 0x3a7   :  { %v2109_v2 = vsel %vm1001_vm0, %v2108_v10, %v2104_v12 }
 0x3a8   :  { %2113 = vst.msk [vmem:[#allocation4 + $0x12] sm:$0x1] %vm1014_vm1, %v2109_v2  ;;  %v2183_v48 = vpop.xlane.xlu1 %2182  ;;  %v2131_v16 = vpop.xlane.xlu0 %2130 }
 0x3a9   :  { %v2145_v47 = vrot.slane %v2131_v16, %v5718_v8  ;;  %v2199_v21 = vrot.slane %v2183_v48, %v5717_v44 }
 0x3ab   :  { %v2150_v36 = vsel %vm1001_vm0, %v2149_v18, %v2145_v47 }
 0x3ac   :  { %2162 = vst.msk [vmem:[#allocation4 + $0x3] sm:$0x1] %vm1014_vm1, %v2150_v36  ;;  %v2187_v33 = vpop.xlane.xlu1 %2186  ;;  %v2135_v15 = vpop.xlane.xlu0 %2134 }
 0x3ad   :  { %v2154_v51 = vrot.slane %v2135_v15, %v5718_v8  ;;  %v2208_v28 = vrot.slane %v2187_v33, %v5717_v44 }
 0x3af   :  { %v2159_v11 = vsel %vm1001_vm0, %v2158_v0, %v2154_v51 }
 0x3b0   :  { %2163 = vst.msk [vmem:[#allocation4 + $0x13] sm:$0x1] %vm1014_vm1, %v2159_v11  ;;  %v2233_v10 = vpop.xlane.xlu1 %2232  ;;  %v2181_v12 = vpop.xlane.xlu0 %2180 }
 0x3b1   :  { %v2195_v2 = vrot.slane %v2181_v12, %v5718_v8  ;;  %v2249_v48 = vrot.slane %v2233_v10, %v5717_v44 }
 0x3b3   :  { %v2200_v16 = vsel %vm1001_vm0, %v2199_v21, %v2195_v2 }
 0x3b4   :  { %2212 = vst.msk [vmem:[#allocation4 + $0x4] sm:$0x1] %vm1014_vm1, %v2200_v16  ;;  %v2237_v18 = vpop.xlane.xlu1 %2236  ;;  %v2185_v47 = vpop.xlane.xlu0 %2184 }
 0x3b5   :  { %v2204_v36 = vrot.slane %v2185_v47, %v5718_v8  ;;  %v2258_v2 = vrot.slane %v2237_v18, %v5717_v44 }
 0x3b7   :  { %v2209_v15 = vsel %vm1001_vm0, %v2208_v28, %v2204_v36 }
 0x3b8   :  { %2213 = vst.msk [vmem:[#allocation4 + $0x14] sm:$0x1] %vm1014_vm1, %v2209_v15  ;;  %v2283_v0 = vpop.xlane.xlu1 %2282  ;;  %v2231_v51 = vpop.xlane.xlu0 %2230 }
 0x3b9   :  { %v2245_v11 = vrot.slane %v2231_v51, %v5718_v8  ;;  %v2299_v36 = vrot.slane %v2283_v0, %v5717_v44 }
 0x3bb   :  { %v2250_v12 = vsel %vm1001_vm0, %v2249_v48, %v2245_v11 }
 0x3bc   :  { %2262 = vst.msk [vmem:[#allocation4 + $0x5] sm:$0x1] %vm1014_vm1, %v2250_v12  ;;  %v2235_v21 = vpop.xlane.xlu0 %2234  ;;  %v2287_v16 = vpop.xlane.xlu1 %2286 }
 0x3bd   :  { %v2254_v33 = vrot.slane %v2235_v21, %v5718_v8  ;;  %v2308_v18 = vrot.slane %v2287_v16, %v5717_v44 }
 0x3bf   :  { %v2259_v47 = vsel %vm1001_vm0, %v2258_v2, %v2254_v33 }
 0x3c0   :  { %2263 = vst.msk [vmem:[#allocation4 + $0x15] sm:$0x1] %vm1014_vm1, %v2259_v47  ;;  %v2281_v28 = vpop.xlane.xlu0 %2280  ;;  %v2333_v51 = vpop.xlane.xlu1 %2332 }
 0x3c1   :  { %v2295_v10 = vrot.slane %v2281_v28, %v5718_v8  ;;  %v2349_v2 = vrot.slane %v2333_v51, %v5717_v44  ;;  %v3861_v51 = vld [vmem:[%s5535_s2] sm:$0xff] }
 0x3c3   :  { %v2300_v15 = vsel %vm1001_vm0, %v2299_v36, %v2295_v10 }
 0x3c4   :  { %2312 = vst.msk [vmem:[#allocation4 + $0x6] sm:$0x1] %vm1014_vm1, %v2300_v15  ;;  %v2285_v48 = vpop.xlane.xlu0 %2284  ;;  %v2337_v33 = vpop.xlane.xlu1 %2336 }
 0x3c5   :  { %v2304_v11 = vrot.slane %v2285_v48, %v5718_v8  ;;  %v2358_v36 = vrot.slane %v2337_v33, %v5717_v44 }
 0x3c7   :  { %v2309_v12 = vsel %vm1001_vm0, %v2308_v18, %v2304_v11 }
 0x3c8   :  { %2313 = vst.msk [vmem:[#allocation4 + $0x16] sm:$0x1] %vm1014_vm1, %v2309_v12  ;;  %v2331_v21 = vpop.xlane.xlu0 %2330 }
 0x3c9   :  { %v2345_v0 = vrot.slane %v2331_v21, %v5718_v8 }
 0x3cb   :  { %v2350_v47 = vsel %vm1001_vm0, %v2349_v2, %v2345_v0 }
 0x3cc   :  { %2362 = vst.msk [vmem:[#allocation4 + $0x7] sm:$0x1] %vm1014_vm1, %v2350_v47  ;;  %v2335_v28 = vpop.xlane.xlu0 %2334 }
 0x3cd   :  { %v2354_v16 = vrot.slane %v2335_v28, %v5718_v8 }
 0x3cf   :  { %v2359_v10 = vsel %vm1001_vm0, %v2358_v36, %v2354_v16 }
 0x3d0   :  { %2363 = vst.msk [vmem:[#allocation4 + $0x17] sm:$0x1] %vm1014_vm1, %v2359_v10 }
 0x3d3   :  { %v2464_v15 = vld [vmem:[#allocation4] sm:$0xff] }
 0x3d4   :  { %v2468_v48 = vadd.f32 %v3861_v51, %v2464_v15 }
 0x3d6   :  { %v2472_v18 = vmul.f32 %v2468_v48, %v2468_v48 }
 0x3d7   :  { %v2466_v11 = vld [vmem:[#allocation4 + $0x10] sm:$0xff] }
 0x3d8   :  { %v2476_v12 = vsel %vm1407_vm3, %v2472_v18, 0.0  ;;  %v2470_v21 = vadd.f32 %v3861_v51, %v2466_v11 }
 0x3d9   :  { %2477 = vadd.xlane.f32.xlu0 %v2476_v12 }
 0x3da   :  { %v2474_v2 = vmul.f32 %v2470_v21, %v2470_v21 }
 0x3dc   :  { %v2482_v0 = vsel %vm1407_vm3, %v2474_v2, 0.0 }
 0x3dd   :  { %2483 = vadd.xlane.f32.xlu1 %v2482_v0 }
 0x422   :  { %v2481_v33 = vpop.xlane.xlu0 %2480 }
 0x423   :  { %v2489_v47 = vadd.f32 1.0, %v2481_v33  ;;  %v2505_v28 = vadd.f32 1e-16, %v2481_v33 }
 0x425   :  { %3816 = vrcp.f32 %v2489_v47 }
 0x426   :  { %v2487_v36 = vpop.xlane.xlu1 %2486  ;;  %3818 = vrsqrt.f32 %v2505_v28 }
 0x427   :  { %v2491_v16 = vadd.f32 1.0, %v2487_v36  ;;  %v2507_v10 = vadd.f32 1e-16, %v2487_v36 }
 0x429   :  { %3820 = vrcp.f32 %v2491_v16 }
 0x42a   :  { %3822 = vrsqrt.f32 %v2507_v10 }
 0x432   :  { %v3817_v15 = vpop.eup %3816 }
 0x433   :  { %v2495_v8 = vmul.f32 %v3817_v15, %v2481_v33  ;;  %v3819_v44 = vpop.eup %3818 }
 0x435   :  { %v2501_v51 = vmul.f32 %v2495_v8, %v5198_v37 }
 0x436   :  { %v3821_v18 = vpop.eup %3820 }
 0x437   :  { %v2499_v11 = vmul.f32 %v3821_v18, %v2487_v36  ;;  %v2513_v12 = vmul.f32 %v3819_v44, %v2501_v51  ;;  %v3823_v19 = vpop.eup %3822 }
 0x439   :  { %v2503_v2 = vmul.f32 %v2499_v11, %v5207_v7  ;;  %v2923_v0 = vrot.slane %v2513_v12, %v3887_v4  ;;  %v2973_v16 = vrot.slane %v2513_v12, %v3889_v5 }
 0x43b   :  { %2929 = vbcast.lane.b32.xlu1 %v2923_v0, 264  ;;  %2925 = vbcast.lane.b32.xlu0 %v2923_v0, 256  ;;  %v2515_v47 = vmul.f32 %v3823_v19, %v2503_v2 }
 0x43d   :  { %v2934_v28 = vrot.slane %v2515_v47, %v3887_v4  ;;  %v2984_v33 = vrot.slane %v2515_v47, %v3889_v5 }
 0x43f   :  { %2936 = vbcast.lane.b32.xlu1 %v2934_v28, 256  ;;  %2975 = vbcast.lane.b32.xlu0 %v2973_v16, 256 }
 0x443   :  { %2940 = vbcast.lane.b32.xlu1 %v2934_v28, 264  ;;  %2986 = vbcast.lane.b32.xlu0 %v2984_v33, 256 }
 0x447   :  { %2979 = vbcast.lane.b32.xlu1 %v2973_v16, 264 }
 0x44b   :  { %2990 = vbcast.lane.b32.xlu1 %v2984_v33, 264 }
 0x462   :  { %v2478_v44 = vpop.xlane.xlu0 %2477 }
 0x463   :  { %v2488_v7 = vadd.f32 1.0, %v2478_v44  ;;  %v2504_v8 = vadd.f32 1e-16, %v2478_v44 }
 0x465   :  { %3824 = vrcp.f32 %v2488_v7 }
 0x466   :  { %v2484_v37 = vpop.xlane.xlu1 %2483  ;;  %3826 = vrsqrt.f32 %v2504_v8 }
 0x467   :  { %v2490_v36 = vadd.f32 1.0, %v2484_v37  ;;  %v2506_v19 = vadd.f32 1e-16, %v2484_v37 }
 0x469   :  { %3828 = vrcp.f32 %v2490_v36 }
 0x46a   :  { %3830 = vrsqrt.f32 %v2506_v19 }
 0x472   :  { %v3825_v10 = vpop.eup %3824 }
 0x473   :  { %v2493_v15 = vmul.f32 %v3825_v10, %v2478_v44  ;;  %v3827_v51 = vpop.eup %3826 }
 0x475   :  { %v2500_v18 = vmul.f32 %v2493_v15, %v2468_v48 }
 0x476   :  { %v3829_v11 = vpop.eup %3828 }
 0x477   :  { %v2512_v12 = vmul.f32 %v3827_v51, %v2500_v18  ;;  %v2497_v2 = vmul.f32 %v3829_v11, %v2484_v37  ;;  %v3831_v28 = vpop.eup %3830 }
 0x479   :  { %v2502_v0 = vmul.f32 %v2497_v2, %v2470_v21  ;;  %v2523_v47 = vrot.slane %v2512_v12, %v3887_v4  ;;  %v2573_v7 = vrot.slane %v2512_v12, %v3889_v5  ;;  %v2623_v21 = vrot.slane %v2512_v12, %v5680_v50 }
 0x47a   :  { %v2673_v8 = vrot.slane %v2512_v12, %v5681_v38  ;;  %v2723_v36 = vrot.slane %v2512_v12, %v5682_v45  ;;  %v2773_v10 = vrot.slane %v2512_v12, %v5711_v52  ;;  %v2823_v51 = vrot.slane %v2512_v12, %v5714_v6 }
 0x47b   :  { %v2514_v16 = vmul.f32 %v3831_v28, %v2502_v0  ;;  %2529 = vbcast.lane.b32.xlu1 %v2523_v47, 264  ;;  %2525 = vbcast.lane.b32.xlu0 %v2523_v47, 256 }
 0x47d   :  { %v2534_v33 = vrot.slane %v2514_v16, %v3887_v4  ;;  %v2584_v48 = vrot.slane %v2514_v16, %v3889_v5  ;;  %v2634_v44 = vrot.slane %v2514_v16, %v5680_v50  ;;  %v2684_v37 = vrot.slane %v2514_v16, %v5681_v38 }
 0x47e   :  { %v2734_v19 = vrot.slane %v2514_v16, %v5682_v45  ;;  %v2784_v15 = vrot.slane %v2514_v16, %v5711_v52  ;;  %v2834_v2 = vrot.slane %v2514_v16, %v5714_v6 }
 0x47f   :  { %2540 = vbcast.lane.b32.xlu1 %v2534_v33, 264  ;;  %2536 = vbcast.lane.b32.xlu0 %v2534_v33, 256 }
 0x483   :  { %2579 = vbcast.lane.b32.xlu1 %v2573_v7, 264  ;;  %2575 = vbcast.lane.b32.xlu0 %v2573_v7, 256  ;;  %v2873_v7 = vrot.slane %v2512_v12, %v5716_v57 }
 0x487   :  { %2590 = vbcast.lane.b32.xlu1 %v2584_v48, 264  ;;  %2586 = vbcast.lane.b32.xlu0 %v2584_v48, 256 }
 0x48b   :  { %2629 = vbcast.lane.b32.xlu1 %v2623_v21, 264  ;;  %2625 = vbcast.lane.b32.xlu0 %v2623_v21, 256 }
 0x48f   :  { %2640 = vbcast.lane.b32.xlu1 %v2634_v44, 264  ;;  %2636 = vbcast.lane.b32.xlu0 %v2634_v44, 256 }
 0x493   :  { %2679 = vbcast.lane.b32.xlu1 %v2673_v8, 264  ;;  %2675 = vbcast.lane.b32.xlu0 %v2673_v8, 256 }
 0x497   :  { %2690 = vbcast.lane.b32.xlu1 %v2684_v37, 264  ;;  %2686 = vbcast.lane.b32.xlu0 %v2684_v37, 256  ;;  %v2884_v37 = vrot.slane %v2514_v16, %v5716_v57 }
 0x49b   :  { %2729 = vbcast.lane.b32.xlu1 %v2723_v36, 264  ;;  %2725 = vbcast.lane.b32.xlu0 %v2723_v36, 256 }
 0x49f   :  { %2740 = vbcast.lane.b32.xlu1 %v2734_v19, 264  ;;  %2736 = vbcast.lane.b32.xlu0 %v2734_v19, 256 }
 0x4a3   :  { %2779 = vbcast.lane.b32.xlu1 %v2773_v10, 264  ;;  %2775 = vbcast.lane.b32.xlu0 %v2773_v10, 256 }
 0x4a7   :  { %2790 = vbcast.lane.b32.xlu1 %v2784_v15, 264  ;;  %2786 = vbcast.lane.b32.xlu0 %v2784_v15, 256 }
 0x4ab   :  { %2829 = vbcast.lane.b32.xlu1 %v2823_v51, 264  ;;  %2825 = vbcast.lane.b32.xlu0 %v2823_v51, 256 }
 0x4ad   :  { %v2930_v18 = vpop.permute.xlu1 %2929  ;;  %v2926_v11 = vpop.permute.xlu0 %2925 }
 0x4ae   :  { %v2943_v0 = vmul.f32 %v2930_v18, %v4124_v1  ;;  %v2942_v47 = vmul.f32 %v2926_v11, %v4089_v22 }
 0x4af   :  { %2840 = vbcast.lane.b32.xlu1 %v2834_v2, 264  ;;  %2836 = vbcast.lane.b32.xlu0 %v2834_v2, 256 }
 0x4b0   :  { %v2946_v28 = vadd.f32 %v2943_v0, %v2942_v47 }
 0x4b1   :  { %v2937_v33 = vpop.permute.xlu1 %2936  ;;  %v2976_v44 = vpop.permute.xlu0 %2975 }
 0x4b2   :  { %v2947_v48 = vrot.slane %v2946_v28, 4  ;;  %v2944_v19 = vmul.f32 %v2937_v33, %v4053_v58  ;;  %v2992_v12 = vmul.f32 %v2976_v44, %v5677_v63 }
 0x4b3   :  { %2879 = vbcast.lane.b32.xlu1 %v2873_v7, 264  ;;  %2875 = vbcast.lane.b32.xlu0 %v2873_v7, 256 }
 0x4b4   :  { %v2948_v21 = vadd.f32 %v2947_v48, %v2946_v28  ;;  %v2960_v48 = vld [vmem:[#allocation3 + $0x8] sm:$0x1] }
 0x4b5   :  { %v2941_v8 = vpop.permute.xlu1 %2940  ;;  %v2987_v0 = vpop.permute.xlu0 %2986 }
 0x4b6   :  { %v2949_v36 = vrot.slane %v2948_v21, 2  ;;  %v2945_v10 = vmul.f32 %v2941_v8, %v5675_v26  ;;  %v2994_v33 = vmul.f32 %v2987_v0, %v5678_v61 }
 0x4b7   :  { %2890 = vbcast.lane.b32.xlu1 %v2884_v37, 264  ;;  %2886 = vbcast.lane.b32.xlu0 %v2884_v37, 256 }
 0x4b8   :  { %v2950_v15 = vadd.f32 %v2949_v36, %v2948_v21  ;;  %v2953_v51 = vadd.f32 %v2945_v10, %v2944_v19 }
 0x4b9   :  { %v2980_v18 = vpop.permute.xlu1 %2979 }
 0x4ba   :  { %v2951_v11 = vrot.slane %v2950_v15, 1  ;;  %v2954_v2 = vrot.slane %v2953_v51, 4  ;;  %v2993_v47 = vmul.f32 %v2980_v18, %v5676_v20  ;;  %v5720_v20 = vld [vmem:[#allocation46_spill] sm:$0xff] }
 0x4bc   :  { %v2952_v28 = vadd.f32 %v2951_v11, %v2950_v15  ;;  %v2955_v7 = vadd.f32 %v2954_v2, %v2953_v51  ;;  %v2996_v16 = vadd.f32 %v2993_v47, %v2992_v12  ;;  %v2961_v11 = vld [vmem:[#allocation3 + $0x18] sm:$0x1] }
 0x4bd   :  { %v2991_v58 = vpop.permute.xlu1 %2990 }
 0x4be   :  { %v2962_v8 = vadd.f32 %v2960_v48, %v2952_v28  ;;  %v2956_v22 = vrot.slane %v2955_v7, 2  ;;  %v2997_v37 = vrot.slane %v2996_v16, 4  ;;  %v2995_v21 = vmul.f32 %v2991_v58, %v5679_v23  ;;  %v3010_v48 = vld [vmem:[#allocation3 + $0x9] sm:$0x1] }
 0x4c0   :  { %2964 = vst [vmem:[#allocation3 + $0x8] sm:$0x1] %v2962_v8  ;;  %v2957_v36 = vadd.f32 %v2956_v22, %v2955_v7  ;;  %v2998_v19 = vadd.f32 %v2997_v37, %v2996_v16  ;;  %v3003_v44 = vadd.f32 %v2995_v21, %v2994_v33  ;;  %v3011_v7 = vld [vmem:[#allocation3 + $0x19] sm:$0x1] }
 0x4c2   :  { %v2958_v10 = vrot.slane %v2957_v36, 1  ;;  %v2999_v63 = vrot.slane %v2998_v19, 2  ;;  %v3004_v26 = vrot.slane %v3003_v44, 4 }
 0x4c4   :  { %v2959_v18 = vadd.f32 %v2958_v10, %v2957_v36  ;;  %v3000_v15 = vadd.f32 %v2999_v63, %v2998_v19  ;;  %v3005_v51 = vadd.f32 %v3004_v26, %v3003_v44 }
 0x4c6   :  { %v2963_v12 = vadd.f32 %v2961_v11, %v2959_v18  ;;  %v3001_v2 = vrot.slane %v3000_v15, 1  ;;  %v3006_v0 = vrot.slane %v3005_v51, 2 }
 0x4c8   :  { %2965 = vst [vmem:[#allocation3 + $0x18] sm:$0x1] %v2963_v12  ;;  %v3002_v47 = vadd.f32 %v3001_v2, %v3000_v15  ;;  %v3007_v28 = vadd.f32 %v3006_v0, %v3005_v51 }
 0x4ca   :  { %v3012_v61 = vadd.f32 %v3010_v48, %v3002_v47  ;;  %v3008_v58 = vrot.slane %v3007_v28, 1 }
 0x4cc   :  { %3014 = vst [vmem:[#allocation3 + $0x9] sm:$0x1] %v3012_v61  ;;  %v3009_v22 = vadd.f32 %v3008_v58, %v3007_v28 }
 0x4ce   :  { %v3013_v16 = vadd.f32 %v3011_v7, %v3009_v22 }
 0x4d0   :  { %3015 = vst [vmem:[#allocation3 + $0x19] sm:$0x1] %v3013_v16 }
 0x4ed   :  { %v2530_v33 = vpop.permute.xlu1 %2529  ;;  %v2526_v8 = vpop.permute.xlu0 %2525 }
 0x4ee   :  { %v2543_v63 = vmul.f32 %v2530_v33, %v5686_v53  ;;  %v2542_v26 = vmul.f32 %v2526_v8, %v5687_v27 }
 0x4f0   :  { %v2546_v37 = vadd.f32 %v2543_v63, %v2542_v26 }
 0x4f1   :  { %v2541_v21 = vpop.permute.xlu1 %2540  ;;  %v2537_v36 = vpop.permute.xlu0 %2536 }
 0x4f2   :  { %v2547_v19 = vrot.slane %v2546_v37, 4  ;;  %v2545_v44 = vmul.f32 %v2541_v21, %v5688_v13  ;;  %v2544_v10 = vmul.f32 %v2537_v36, %v5689_v54  ;;  %v2560_v36 = vld [vmem:[#allocation3] sm:$0x1] }
 0x4f4   :  { %v2548_v18 = vadd.f32 %v2547_v19, %v2546_v37  ;;  %v2553_v61 = vadd.f32 %v2545_v44, %v2544_v10 }
 0x4f5   :  { %v2580_v15 = vpop.permute.xlu1 %2579  ;;  %v2576_v51 = vpop.permute.xlu0 %2575 }
 0x4f6   :  { %v2549_v11 = vrot.slane %v2548_v18, 2  ;;  %v2554_v12 = vrot.slane %v2553_v61, 4  ;;  %v2593_v2 = vmul.f32 %v2580_v15, %v5690_v25  ;;  %v2592_v0 = vmul.f32 %v2576_v51, %v5691_v14 }
 0x4f8   :  { %v2550_v47 = vadd.f32 %v2549_v11, %v2548_v18  ;;  %v2555_v28 = vadd.f32 %v2554_v12, %v2553_v61  ;;  %v2596_v48 = vadd.f32 %v2593_v2, %v2592_v0 }
 0x4f9   :  { %v2591_v58 = vpop.permute.xlu1 %2590  ;;  %v2587_v22 = vpop.permute.xlu0 %2586 }
 0x4fa   :  { %v2551_v7 = vrot.slane %v2550_v47, 1  ;;  %v2556_v16 = vrot.slane %v2555_v28, 2  ;;  %v2597_v33 = vrot.slane %v2596_v48, 4  ;;  %v2595_v8 = vmul.f32 %v2591_v58, %v5692_v29  ;;  %v2561_v58 = vld [vmem:[#allocation3 + $0x10] sm:$0x1] }
 0x4fb   :  { %v2594_v63 = vmul.f32 %v2587_v22, %v5693_v42 }
 0x4fc   :  { %v2552_v26 = vadd.f32 %v2551_v7, %v2550_v47  ;;  %v2557_v37 = vadd.f32 %v2556_v16, %v2555_v28  ;;  %v2598_v21 = vadd.f32 %v2597_v33, %v2596_v48 }
 0x4fd   :  { %v2603_v19 = vadd.f32 %v2595_v8, %v2594_v63  ;;  %v2630_v44 = vpop.permute.xlu1 %2629  ;;  %v2626_v10 = vpop.permute.xlu0 %2625 }
 0x4fe   :  { %v2562_v15 = vadd.f32 %v2560_v36, %v2552_v26  ;;  %v2558_v18 = vrot.slane %v2557_v37, 1  ;;  %v2599_v61 = vrot.slane %v2598_v21, 2  ;;  %v2643_v51 = vmul.f32 %v2630_v44, %v5694_v56 }
 0x4ff   :  { %v2604_v11 = vrot.slane %v2603_v19, 4  ;;  %v2642_v12 = vmul.f32 %v2626_v10, %v5695_v41  ;;  %v2610_v10 = vld [vmem:[#allocation3 + $0x1] sm:$0x1] }
 0x500   :  { %2564 = vst [vmem:[#allocation3] sm:$0x1] %v2562_v15  ;;  %v2559_v2 = vadd.f32 %v2558_v18, %v2557_v37  ;;  %v2600_v0 = vadd.f32 %v2599_v61, %v2598_v21 }
 0x501   :  { %v2605_v22 = vadd.f32 %v2604_v11, %v2603_v19  ;;  %v2646_v47 = vadd.f32 %v2643_v51, %v2642_v12  ;;  %v2641_v28 = vpop.permute.xlu1 %2640  ;;  %v2637_v48 = vpop.permute.xlu0 %2636 }
 0x502   :  { %v2563_v7 = vadd.f32 %v2561_v58, %v2559_v2  ;;  %v2601_v16 = vrot.slane %v2600_v0, 1  ;;  %v2645_v33 = vmul.f32 %v2641_v28, %v5696_v34  ;;  %v2644_v8 = vmul.f32 %v2637_v48, %v5697_v17 }
 0x503   :  { %v2606_v63 = vrot.slane %v2605_v22, 2  ;;  %v2647_v26 = vrot.slane %v2646_v47, 4 }
 0x504   :  { %2565 = vst [vmem:[#allocation3 + $0x10] sm:$0x1] %v2563_v7  ;;  %v2602_v36 = vadd.f32 %v2601_v16, %v2600_v0  ;;  %v2653_v44 = vadd.f32 %v2645_v33, %v2644_v8  ;;  %v2611_v33 = vld [vmem:[#allocation3 + $0x11] sm:$0x1] }
 0x505   :  { %v2607_v15 = vadd.f32 %v2606_v63, %v2605_v22  ;;  %v2648_v37 = vadd.f32 %v2647_v26, %v2646_v47  ;;  %v2680_v21 = vpop.permute.xlu1 %2679  ;;  %v2676_v18 = vpop.permute.xlu0 %2675 }
 0x506   :  { %v2612_v19 = vadd.f32 %v2610_v10, %v2602_v36  ;;  %v2654_v61 = vrot.slane %v2653_v44, 4  ;;  %v2693_v51 = vmul.f32 %v2680_v21, %v5698_v39  ;;  %v2692_v11 = vmul.f32 %v2676_v18, %v5709_v55 }
 0x507   :  { %v2608_v12 = vrot.slane %v2607_v15, 1  ;;  %v2649_v2 = vrot.slane %v2648_v37, 2 }
 0x508   :  { %2614 = vst [vmem:[#allocation3 + $0x1] sm:$0x1] %v2612_v19  ;;  %v2655_v58 = vadd.f32 %v2654_v61, %v2653_v44  ;;  %v2696_v28 = vadd.f32 %v2693_v51, %v2692_v11 }
 0x509   :  { %v2609_v48 = vadd.f32 %v2608_v12, %v2607_v15  ;;  %v2650_v7 = vadd.f32 %v2649_v2, %v2648_v37  ;;  %v2691_v0 = vpop.permute.xlu1 %2690  ;;  %v2687_v16 = vpop.permute.xlu0 %2686  ;;  %v2660_v15 = vld [vmem:[#allocation3 + $0x2] sm:$0x1] }
 0x50a   :  { %v2656_v22 = vrot.slane %v2655_v58, 2  ;;  %v2697_v47 = vrot.slane %v2696_v28, 4  ;;  %v2695_v8 = vmul.f32 %v2691_v0, %v5700_v59  ;;  %v2694_v63 = vmul.f32 %v2687_v16, %v5710_v30 }
 0x50b   :  { %v2613_v26 = vadd.f32 %v2611_v33, %v2609_v48  ;;  %v2651_v36 = vrot.slane %v2650_v7, 1 }
 0x50c   :  { %v2657_v10 = vadd.f32 %v2656_v22, %v2655_v58  ;;  %v2698_v21 = vadd.f32 %v2697_v47, %v2696_v28  ;;  %v2703_v18 = vadd.f32 %v2695_v8, %v2694_v63  ;;  %v2661_v58 = vld [vmem:[#allocation3 + $0x12] sm:$0x1] }
 0x50d   :  { %2615 = vst [vmem:[#allocation3 + $0x11] sm:$0x1] %v2613_v26  ;;  %v2652_v19 = vadd.f32 %v2651_v36, %v2650_v7  ;;  %v2730_v44 = vpop.permute.xlu1 %2729  ;;  %v2726_v61 = vpop.permute.xlu0 %2725 }
 0x50e   :  { %v2658_v37 = vrot.slane %v2657_v10, 1  ;;  %v2699_v51 = vrot.slane %v2698_v21, 2  ;;  %v2704_v11 = vrot.slane %v2703_v18, 4  ;;  %v2743_v12 = vmul.f32 %v2730_v44, %v5708_v31 }
 0x50f   :  { %v2662_v2 = vadd.f32 %v2660_v15, %v2652_v19  ;;  %v2742_v0 = vmul.f32 %v2726_v61, %v5712_v62  ;;  %v2710_v61 = vld [vmem:[#allocation3 + $0x3] sm:$0x1] }
 0x510   :  { %v2659_v23 = vadd.f32 %v2658_v37, %v2657_v10  ;;  %v2700_v16 = vadd.f32 %v2699_v51, %v2698_v21  ;;  %v2705_v48 = vadd.f32 %v2704_v11, %v2703_v18 }
 0x511   :  { %2664 = vst [vmem:[#allocation3 + $0x2] sm:$0x1] %v2662_v2  ;;  %v2746_v28 = vadd.f32 %v2743_v12, %v2742_v0  ;;  %v2741_v33 = vpop.permute.xlu1 %2740  ;;  %v2737_v22 = vpop.permute.xlu0 %2736 }
 0x512   :  { %v2663_v7 = vadd.f32 %v2661_v58, %v2659_v23  ;;  %v2701_v47 = vrot.slane %v2700_v16, 1  ;;  %v2706_v8 = vrot.slane %v2705_v48, 2  ;;  %v2745_v63 = vmul.f32 %v2741_v33, %v5704_v43  ;;  %v2711_v33 = vld [vmem:[#allocation3 + $0x13] sm:$0x1] }
 0x513   :  { %v2747_v26 = vrot.slane %v2746_v28, 4  ;;  %v2744_v36 = vmul.f32 %v2737_v22, %v5713_v60 }
 0x514   :  { %2665 = vst [vmem:[#allocation3 + $0x12] sm:$0x1] %v2663_v7  ;;  %v2702_v19 = vadd.f32 %v2701_v47, %v2700_v16  ;;  %v2707_v44 = vadd.f32 %v2706_v8, %v2705_v48 }
 0x515   :  { %v2748_v10 = vadd.f32 %v2747_v26, %v2746_v28  ;;  %v2753_v21 = vadd.f32 %v2745_v63, %v2744_v36  ;;  %v2780_v18 = vpop.permute.xlu1 %2779  ;;  %v2776_v15 = vpop.permute.xlu0 %2775 }
 0x516   :  { %v2712_v37 = vadd.f32 %v2710_v61, %v2702_v19  ;;  %v2708_v51 = vrot.slane %v2707_v44, 1  ;;  %v2793_v11 = vmul.f32 %v2780_v18, %v5705_v32  ;;  %v2792_v23 = vmul.f32 %v2776_v15, %v5715_v24 }
 0x517   :  { %v2749_v12 = vrot.slane %v2748_v10, 2  ;;  %v2754_v2 = vrot.slane %v2753_v21, 4 }
 0x518   :  { %2714 = vst [vmem:[#allocation3 + $0x3] sm:$0x1] %v2712_v37  ;;  %v2709_v0 = vadd.f32 %v2708_v51, %v2707_v44  ;;  %v2796_v58 = vadd.f32 %v2793_v11, %v2792_v23  ;;  %v2760_v51 = vld [vmem:[#allocation3 + $0x4] sm:$0x1] }
 0x519   :  { %v2750_v22 = vadd.f32 %v2749_v12, %v2748_v10  ;;  %v2755_v16 = vadd.f32 %v2754_v2, %v2753_v21  ;;  %v2791_v48 = vpop.permute.xlu1 %2790  ;;  %v2787_v7 = vpop.permute.xlu0 %2786 }
 0x51a   :  { %v2713_v28 = vadd.f32 %v2711_v33, %v2709_v0  ;;  %v2797_v47 = vrot.slane %v2796_v58, 4  ;;  %v2795_v8 = vmul.f32 %v2791_v48, %v5707_v46  ;;  %v2794_v63 = vmul.f32 %v2787_v7, %v4783_v9 }
 0x51b   :  { %v2751_v26 = vrot.slane %v2750_v22, 1  ;;  %v2756_v36 = vrot.slane %v2755_v16, 2 }
 0x51c   :  { %2715 = vst [vmem:[#allocation3 + $0x13] sm:$0x1] %v2713_v28  ;;  %v2798_v19 = vadd.f32 %v2797_v47, %v2796_v58  ;;  %v2803_v61 = vadd.f32 %v2795_v8, %v2794_v63 }
 0x51d   :  { %v2752_v18 = vadd.f32 %v2751_v26, %v2750_v22  ;;  %v2757_v15 = vadd.f32 %v2756_v36, %v2755_v16  ;;  %v2830_v44 = vpop.permute.xlu1 %2829  ;;  %v2826_v37 = vpop.permute.xlu0 %2825  ;;  %v2761_v22 = vld [vmem:[#allocation3 + $0x14] sm:$0x1] }
 0x51e   :  { %v2799_v10 = vrot.slane %v2798_v19, 2  ;;  %v2804_v21 = vrot.slane %v2803_v61, 4  ;;  %v2843_v11 = vmul.f32 %v2830_v44, %v4808_v49  ;;  %v2842_v23 = vmul.f32 %v2826_v37, %v4824_v35 }
 0x51f   :  { %v2762_v12 = vadd.f32 %v2760_v51, %v2752_v18  ;;  %v2758_v2 = vrot.slane %v2757_v15, 1 }
 0x520   :  { %v2800_v0 = vadd.f32 %v2799_v10, %v2798_v19  ;;  %v2805_v33 = vadd.f32 %v2804_v21, %v2803_v61  ;;  %v2846_v48 = vadd.f32 %v2843_v11, %v2842_v23  ;;  %v2810_v19 = vld [vmem:[#allocation3 + $0x5] sm:$0x1] }
 0x521   :  { %2764 = vst [vmem:[#allocation3 + $0x4] sm:$0x1] %v2762_v12  ;;  %v2759_v7 = vadd.f32 %v2758_v2, %v2757_v15  ;;  %v2841_v58 = vpop.permute.xlu1 %2840  ;;  %v2837_v28 = vpop.permute.xlu0 %2836  ;;  %v5719_v23 = vld [vmem:[#allocation45_spill] sm:$0xff] }
 0x522   :  { %v2801_v16 = vrot.slane %v2800_v0, 1  ;;  %v2806_v47 = vrot.slane %v2805_v33, 2  ;;  %v2847_v8 = vrot.slane %v2846_v48, 4  ;;  %v2845_v63 = vmul.f32 %v2841_v58, %v4849_v3 }
 0x523   :  { %v2763_v26 = vadd.f32 %v2761_v22, %v2759_v7  ;;  %v2844_v36 = vmul.f32 %v2837_v28, %v4869_v40  ;;  %v2811_v28 = vld [vmem:[#allocation3 + $0x15] sm:$0x1] }
 0x524   :  { %v2802_v44 = vadd.f32 %v2801_v16, %v2800_v0  ;;  %v2807_v37 = vadd.f32 %v2806_v47, %v2805_v33  ;;  %v2848_v18 = vadd.f32 %v2847_v8, %v2846_v48  ;;  %v5721_v8 = vld [vmem:[#allocation47_spill] sm:$0xff] }
 0x525   :  { %2765 = vst [vmem:[#allocation3 + $0x14] sm:$0x1] %v2763_v26  ;;  %v2853_v61 = vadd.f32 %v2845_v63, %v2844_v36  ;;  %v2880_v51 = vpop.permute.xlu1 %2879  ;;  %v2876_v10 = vpop.permute.xlu0 %2875  ;;  %v5722_v26 = vld [vmem:[#allocation48_spill] sm:$0xff] }
 0x526   :  { %v2812_v15 = vadd.f32 %v2810_v19, %v2802_v44  ;;  %v2808_v21 = vrot.slane %v2807_v37, 1  ;;  %v2849_v11 = vrot.slane %v2848_v18, 2  ;;  %v2893_v12 = vmul.f32 %v2880_v51, %v5719_v23 }
 0x527   :  { %v2854_v2 = vrot.slane %v2853_v61, 4  ;;  %v2892_v1 = vmul.f32 %v2876_v10, %v5720_v20  ;;  %v2860_v10 = vld [vmem:[#allocation3 + $0x6] sm:$0x1] }
 0x528   :  { %2814 = vst [vmem:[#allocation3 + $0x5] sm:$0x1] %v2812_v15  ;;  %v2809_v7 = vadd.f32 %v2808_v21, %v2807_v37  ;;  %v2850_v58 = vadd.f32 %v2849_v11, %v2848_v18 }
 0x529   :  { %v2855_v0 = vadd.f32 %v2854_v2, %v2853_v61  ;;  %v2896_v33 = vadd.f32 %v2893_v12, %v2892_v1  ;;  %v2891_v48 = vpop.permute.xlu1 %2890  ;;  %v2887_v22 = vpop.permute.xlu0 %2886 }
 0x52a   :  { %v2813_v16 = vadd.f32 %v2811_v28, %v2809_v7  ;;  %v2851_v47 = vrot.slane %v2850_v58, 1  ;;  %v2895_v63 = vmul.f32 %v2891_v48, %v5721_v8  ;;  %v2894_v36 = vmul.f32 %v2887_v22, %v5722_v26  ;;  %v2861_v7 = vld [vmem:[#allocation3 + $0x16] sm:$0x1] }
 0x52b   :  { %v2856_v44 = vrot.slane %v2855_v0, 2  ;;  %v2897_v19 = vrot.slane %v2896_v33, 4 }
 0x52c   :  { %2815 = vst [vmem:[#allocation3 + $0x15] sm:$0x1] %v2813_v16  ;;  %v2852_v51 = vadd.f32 %v2851_v47, %v2850_v58  ;;  %v2903_v40 = vadd.f32 %v2895_v63, %v2894_v36  ;;  %v2910_v58 = vld [vmem:[#allocation3 + $0x7] sm:$0x1] }
 0x52d   :  { %v2857_v15 = vadd.f32 %v2856_v44, %v2855_v0  ;;  %v2898_v37 = vadd.f32 %v2897_v19, %v2896_v33  ;;  %v2911_v33 = vld [vmem:[#allocation3 + $0x17] sm:$0x1]  ;;  %v3017_v44 = vld [vmem:[#allocation3 + $0x8] sm:$0x3]  ;;  %v3019_v19 = vld [vmem:[#allocation3 + $0x18] sm:$0x3] }
 0x52e   :  { %v2862_v18 = vadd.f32 %v2860_v10, %v2852_v51  ;;  %v2904_v21 = vrot.slane %v2903_v40, 4 }
 0x52f   :  { %v2858_v61 = vrot.slane %v2857_v15, 1  ;;  %v2899_v1 = vrot.slane %v2898_v37, 2 }
 0x530   :  { %2864 = vst [vmem:[#allocation3 + $0x6] sm:$0x1] %v2862_v18  ;;  %v2905_v11 = vadd.f32 %v2904_v21, %v2903_v40  ;;  %v3020_v40 = vsel %vm1913_vm4, %v3017_v44, -inf }
 0x531   :  { %v2859_v12 = vadd.f32 %v2858_v61, %v2857_v15  ;;  %v2900_v2 = vadd.f32 %v2899_v1, %v2898_v37  ;;  %v3028_v15 = vsel %vm1913_vm4, %v3019_v19, -inf }
 0x532   :  { %v2906_v28 = vrot.slane %v2905_v11, 2 }
 0x533   :  { %v2863_v48 = vadd.f32 %v2861_v7, %v2859_v12  ;;  %v2901_v22 = vrot.slane %v2900_v2, 1 }
 0x534   :  { %v2907_v26 = vadd.f32 %v2906_v28, %v2905_v11 }
 0x535   :  { %2865 = vst [vmem:[#allocation3 + $0x16] sm:$0x1] %v2863_v48  ;;  %v2902_v16 = vadd.f32 %v2901_v22, %v2900_v2 }
 0x536   :  { %v2908_v47 = vrot.slane %v2907_v26, 1 }
 0x537   :  { %v2912_v63 = vadd.f32 %v2910_v58, %v2902_v16 }
 0x538   :  { %v2909_v0 = vadd.f32 %v2908_v47, %v2907_v26 }
 0x539   :  { %2914 = vst [vmem:[#allocation3 + $0x7] sm:$0x1] %v2912_v63 }
 0x53a   :  { %v2913_v36 = vadd.f32 %v2911_v33, %v2909_v0 }
 0x53c   :  { %2915 = vst [vmem:[#allocation3 + $0x17] sm:$0x1] %v2913_v36 }
 0x540   :  { %v3016_v51 = vld [vmem:[#allocation3] sm:$0xff] }
 0x541   :  { %v3021_v10 = vmax.f32 %v3016_v51, %v3020_v40 }
 0x543   :  { %v3022_v37 = vrot.slane %v3021_v10, 4  ;;  %v3018_v18 = vld [vmem:[#allocation3 + $0x10] sm:$0xff] }
 0x544   :  { %v3029_v21 = vmax.f32 %v3018_v18, %v3028_v15 }
 0x545   :  { %v3023_v61 = vmax.f32 %v3021_v10, %v3022_v37 }
 0x546   :  { %v3030_v1 = vrot.slane %v3029_v21, 4 }
 0x547   :  { %v3024_v11 = vrot.slane %v3023_v61, 2 }
 0x548   :  { %v3031_v12 = vmax.f32 %v3029_v21, %v3030_v1 }
 0x549   :  { %v3025_v26 = vmax.f32 %v3023_v61, %v3024_v11 }
 0x54a   :  { %v3032_v2 = vrot.slane %v3031_v12, 2 }
 0x54b   :  { %v3026_v7 = vrot.slane %v3025_v26, 1 }
 0x54c   :  { %v3033_v28 = vmax.f32 %v3031_v12, %v3032_v2 }
 0x54d   :  { %v3027_v48 = vmax.f32 %v3025_v26, %v3026_v7 }
 0x54e   :  { %v3034_v22 = vrot.slane %v3033_v28, 1 }
 0x54f   :  { %v3036_v16 = vsub.f32 %v3016_v51, %v3027_v48  ;;  %v3037_v58 = vsub.f32 %v3017_v44, %v3027_v48 }
 0x550   :  { %v3035_v47 = vmax.f32 %v3033_v28, %v3034_v22 }
 0x551   :  { %v3040_v63 = vmul.f32 1.442695, %v3036_v16  ;;  %v3042_v0 = vmul.f32 1.442695, %v3037_v58 }
 0x552   :  { %v3038_v33 = vsub.f32 %v3018_v18, %v3035_v47  ;;  %v3039_v36 = vsub.f32 %v3019_v19, %v3035_v47 }
 0x553   :  { %3832 = vpow2.f32 %v3040_v63 }
 0x554   :  { %3834 = vpow2.f32 %v3042_v0  ;;  %v3044_v40 = vmul.f32 1.442695, %v3038_v33  ;;  %v3046_v10 = vmul.f32 1.442695, %v3039_v36 }
 0x556   :  { %3836 = vpow2.f32 %v3044_v40 }
 0x557   :  { %3838 = vpow2.f32 %v3046_v10 }
 0x560   :  { %v3833_v15 = vpop.eup %3832 }
 0x561   :  { %v3835_v37 = vpop.eup %3834 }
 0x562   :  { %v3048_v21 = vsel %vm1913_vm4, %v3835_v37, 0.0 }
 0x563   :  { %v3837_v61 = vpop.eup %3836  ;;  %v3049_v1 = vadd.f32 %v3833_v15, %v3048_v21 }
 0x564   :  { %v3839_v11 = vpop.eup %3838 }
 0x565   :  { %v3050_v51 = vrot.slane %v3049_v1, 4  ;;  %v3056_v44 = vsel %vm1913_vm4, %v3839_v11, 0.0 }
 0x566   :  { %v3057_v12 = vadd.f32 %v3837_v61, %v3056_v44 }
 0x567   :  { %v3051_v26 = vadd.f32 %v3050_v51, %v3049_v1 }
 0x568   :  { %v3058_v18 = vrot.slane %v3057_v12, 4 }
 0x569   :  { %v3052_v19 = vrot.slane %v3051_v26, 2 }
 0x56a   :  { %v3059_v2 = vadd.f32 %v3058_v18, %v3057_v12 }
 0x56b   :  { %v3053_v7 = vadd.f32 %v3052_v19, %v3051_v26 }
 0x56c   :  { %v3060_v28 = vrot.slane %v3059_v2, 2 }
 0x56d   :  { %v3054_v48 = vrot.slane %v3053_v7, 1 }
 0x56e   :  { %v3061_v22 = vadd.f32 %v3060_v28, %v3059_v2 }
 0x56f   :  { %v3055_v16 = vadd.f32 %v3054_v48, %v3053_v7 }
 0x570   :  { %v3062_v58 = vrot.slane %v3061_v22, 1 }
 0x571   :  { %3840 = vrcp.f32 %v3055_v16  ;;  %v5724_v16 = vld [vmem:[#allocation16_spill] sm:$0xff] }
 0x572   :  { %v3063_v47 = vadd.f32 %v3062_v58, %v3061_v22  ;;  %v5723_v22 = vld [vmem:[#allocation44_spill] sm:$0xff] }
 0x574   :  { %3842 = vrcp.f32 %v3063_v47 }
 0x57e   :  { %v3841_v63 = vpop.eup %3840 }
 0x57f   :  { %v5339_v0 = vmul.f32 %v3841_v63, %v3833_v15  ;;  %v5341_v33 = vmul.f32 %v3841_v63, %v3835_v37  ;;  %v5726_v63 = vld [vmem:[#allocation48_spill] sm:$0xff] }
 0x581   :  { %v3843_v36 = vpop.eup %3842  ;;  %v3077_v40 = vrot.slane %v5339_v0, %v3887_v4  ;;  %v3127_v51 = vrot.slane %v5339_v0, %v3889_v5  ;;  %v3177_v12 = vrot.slane %v5339_v0, %v5680_v50  ;;  %v3227_v19 = vrot.slane %v5339_v0, %v5681_v38 }
 0x582   :  { %v5345_v10 = vmul.f32 %v3843_v36, %v3837_v61  ;;  %v5361_v26 = vmul.f32 %v3843_v36, %v3839_v11  ;;  %v5727_v36 = vld [vmem:[#allocation17_spill] sm:$0xff] }
 0x583   :  { %v3083_v21 = vmul.f32 %v3077_v40, %v5686_v53  ;;  %v3082_v1 = vmul.f32 %v3077_v40, %v5687_v27  ;;  %v3133_v37 = vmul.f32 %v3127_v51, %v5690_v25  ;;  %v3132_v25 = vmul.f32 %v3127_v51, %v5691_v14  ;;  %v5730_v51 = vld [vmem:[#allocation13_spill] sm:$0xff] }
 0x584   :  { %v3081_v44 = vrot.slane %v5345_v10, %v3887_v4  ;;  %v3131_v61 = vrot.slane %v5345_v10, %v3889_v5  ;;  %v3181_v18 = vrot.slane %v5345_v10, %v5680_v50  ;;  %v3233_v11 = vmul.f32 %v3227_v19, %v5698_v39 }
 0x585   :  { %3088 = vadd.xlane.f32.xlu1 %v3083_v21  ;;  %3086 = vadd.xlane.f32.xlu0 %v3082_v1  ;;  %v3231_v14 = vrot.slane %v5345_v10, %v5681_v38  ;;  %v3232_v39 = vmul.f32 %v3227_v19, %v5709_v55  ;;  %v3331_v55 = vrot.slane %v5345_v10, %v5711_v52 }
 0x586   :  { %v3084_v15 = vmul.f32 %v3081_v44, %v5689_v54  ;;  %v3135_v53 = vmul.f32 %v3131_v61, %v5692_v29  ;;  %v3085_v27 = vmul.f32 %v3081_v44, %v5688_v13  ;;  %v3183_v54 = vmul.f32 %v3177_v12, %v5694_v56 }
 0x587   :  { %v3185_v29 = vmul.f32 %v3181_v18, %v5696_v34  ;;  %v3134_v13 = vmul.f32 %v3131_v61, %v5693_v42  ;;  %v3182_v56 = vmul.f32 %v3177_v12, %v5695_v41  ;;  %v3235_v50 = vmul.f32 %v3231_v14, %v5700_v59  ;;  %v5733_v12 = vld [vmem:[#allocation12_spill] sm:$0xff] }
 0x588   :  { %v3184_v34 = vmul.f32 %v3181_v18, %v5697_v17  ;;  %v3277_v42 = vrot.slane %v5339_v0, %v5682_v45  ;;  %v3281_v41 = vrot.slane %v5345_v10, %v5682_v45  ;;  %v3234_v59 = vmul.f32 %v3231_v14, %v5710_v30 }
 0x589   :  { %3138 = vadd.xlane.f32.xlu1 %v3133_v37  ;;  %3090 = vadd.xlane.f32.xlu0 %v3084_v15  ;;  %v3327_v17 = vrot.slane %v5339_v0, %v5711_v52  ;;  %v3335_v45 = vmul.f32 %v3331_v55, %v5707_v46  ;;  %v3377_v30 = vrot.slane %v5339_v0, %v5714_v6  ;;  %v5731_v15 = vld [vmem:[#allocation18_spill] sm:$0xff] }
 0x58a   :  { %v3283_v2 = vmul.f32 %v3277_v42, %v5708_v31  ;;  %v3285_v38 = vmul.f32 %v3281_v41, %v5704_v43  ;;  %v3282_v31 = vmul.f32 %v3277_v42, %v5712_v62  ;;  %v3284_v43 = vmul.f32 %v3281_v41, %v5713_v60 }
 0x58b   :  { %v3333_v7 = vmul.f32 %v3327_v17, %v5705_v32  ;;  %v3383_v28 = vmul.f32 %v3377_v30, %v4808_v49  ;;  %v3332_v32 = vmul.f32 %v3327_v17, %v5715_v24  ;;  %v3381_v62 = vrot.slane %v5345_v10, %v5714_v6 }
 0x58c   :  { %v3334_v46 = vmul.f32 %v3331_v55, %v4783_v9  ;;  %v3427_v60 = vrot.slane %v5339_v0, %v5716_v57  ;;  %v3382_v49 = vmul.f32 %v3377_v30, %v4824_v35  ;;  %v3431_v24 = vrot.slane %v5345_v10, %v5716_v57  ;;  %v5725_v57 = vld [vmem:[#allocation15_spill] sm:$0xff]  ;;  %v5728_v10 = vld [vmem:[#allocation14_spill] sm:$0xff] }
 0x58d   :  { %3142 = vadd.xlane.f32.xlu1 %v3135_v53  ;;  %3092 = vadd.xlane.f32.xlu0 %v3085_v27  ;;  %v3385_v52 = vmul.f32 %v3381_v62, %v4849_v3  ;;  %v3384_v3 = vmul.f32 %v3381_v62, %v5723_v22  ;;  %v3477_v9 = vrot.slane %v5341_v33, %v3887_v4 }
 0x58e   :  { %v3433_v48 = vmul.f32 %v3427_v60, %v5719_v23  ;;  %v3435_v6 = vmul.f32 %v3431_v24, %v5721_v8  ;;  %v3432_v23 = vmul.f32 %v3427_v60, %v5720_v20  ;;  %v3481_v35 = vrot.slane %v5361_v26, %v3887_v4  ;;  %v5729_v4 = vld [vmem:[#allocation19_spill] sm:$0xff] }
 0x58f   :  { %v3483_v58 = vmul.f32 %v3477_v9, %v5724_v16  ;;  %v3434_v8 = vmul.f32 %v3431_v24, %v5726_v63  ;;  %v3527_v0 = vrot.slane %v5341_v33, %v3889_v5  ;;  %v3482_v21 = vmul.f32 %v3477_v9, %v5728_v10  ;;  %v5732_v33 = vld [vmem:[#allocation20_spill] sm:$0xff] }
 0x590   :  { %v3485_v47 = vmul.f32 %v3481_v35, %v5725_v57  ;;  %v3531_v20 = vrot.slane %v5361_v26, %v3889_v5  ;;  %v3484_v44 = vmul.f32 %v3481_v35, %v5730_v51 }
 0x591   :  { %3188 = vadd.xlane.f32.xlu1 %v3183_v54  ;;  %3136 = vadd.xlane.f32.xlu0 %v3132_v25  ;;  %v3533_v40 = vmul.f32 %v3527_v0, %v5727_v36  ;;  %v3532_v37 = vmul.f32 %v3527_v0, %v5731_v15  ;;  %v5734_v25 = vld [vmem:[#allocation11_spill] sm:$0xff] }
 0x592   :  { %v3535_v1 = vmul.f32 %v3531_v20, %v5729_v4  ;;  %v3534_v61 = vmul.f32 %v3531_v20, %v5732_v33 }
 0x595   :  { %3192 = vadd.xlane.f32.xlu1 %v3185_v29  ;;  %3140 = vadd.xlane.f32.xlu0 %v3134_v13 }
 0x599   :  { %3238 = vadd.xlane.f32.xlu1 %v3233_v11  ;;  %3186 = vadd.xlane.f32.xlu0 %v3182_v56 }
 0x59d   :  { %3242 = vadd.xlane.f32.xlu1 %v3235_v50  ;;  %3190 = vadd.xlane.f32.xlu0 %v3184_v34 }
 0x5a1   :  { %3288 = vadd.xlane.f32.xlu1 %v3283_v2  ;;  %3236 = vadd.xlane.f32.xlu0 %v3232_v39 }
 0x5a5   :  { %3292 = vadd.xlane.f32.xlu1 %v3285_v38  ;;  %3240 = vadd.xlane.f32.xlu0 %v3234_v59 }
 0x5a9   :  { %3338 = vadd.xlane.f32.xlu1 %v3333_v7  ;;  %3286 = vadd.xlane.f32.xlu0 %v3282_v31 }
 0x5ad   :  { %3342 = vadd.xlane.f32.xlu1 %v3335_v45  ;;  %3290 = vadd.xlane.f32.xlu0 %v3284_v43 }
 0x5b1   :  { %3388 = vadd.xlane.f32.xlu1 %v3383_v28  ;;  %3336 = vadd.xlane.f32.xlu0 %v3332_v32 }
 0x5b5   :  { %3392 = vadd.xlane.f32.xlu1 %v3385_v52  ;;  %3340 = vadd.xlane.f32.xlu0 %v3334_v46 }
 0x5b9   :  { %3438 = vadd.xlane.f32.xlu1 %v3433_v48  ;;  %3386 = vadd.xlane.f32.xlu0 %v3382_v49 }
 0x5bd   :  { %3442 = vadd.xlane.f32.xlu1 %v3435_v6  ;;  %3390 = vadd.xlane.f32.xlu0 %v3384_v3 }
 0x5c1   :  { %3488 = vadd.xlane.f32.xlu1 %v3483_v58  ;;  %3436 = vadd.xlane.f32.xlu0 %v3432_v23 }
 0x5c5   :  { %3492 = vadd.xlane.f32.xlu1 %v3485_v47  ;;  %3440 = vadd.xlane.f32.xlu0 %v3434_v8 }
 0x5c9   :  { %3538 = vadd.xlane.f32.xlu1 %v3533_v40  ;;  %3486 = vadd.xlane.f32.xlu0 %v3482_v21 }
 0x5cd   :  { %3542 = vadd.xlane.f32.xlu1 %v3535_v1  ;;  %3490 = vadd.xlane.f32.xlu0 %v3484_v44 }
 0x5d1   :  { %3536 = vadd.xlane.f32.xlu0 %v3532_v37 }
 0x5d5   :  { %3540 = vadd.xlane.f32.xlu0 %v3534_v61 }
 0x60e   :  { %v3089_v53 = vpop.xlane.xlu1 %3088  ;;  %v3087_v27 = vpop.xlane.xlu0 %3086 }
 0x60f   :  { %v3105_v54 = vrot.slane %v3089_v53, %v5733_v12  ;;  %v3101_v5 = vrot.slane %v3087_v27, %v5734_v25 }
 0x611   :  { %v3106_v26 = vsel %vm1001_vm0, %v3105_v54, %v3101_v5 }
 0x612   :  { %3118 = vst.msk [vmem:[#allocation4] sm:$0x1] %vm1014_vm1, %v3106_v26  ;;  %v3139_v18 = vpop.xlane.xlu1 %3138  ;;  %v3091_v29 = vpop.xlane.xlu0 %3090 }
 0x613   :  { %v3110_v11 = vrot.slane %v3091_v29, %v5734_v25  ;;  %v3155_v42 = vrot.slane %v3139_v18, %v5733_v12 }
 0x616   :  { %v3143_v13 = vpop.xlane.xlu1 %3142  ;;  %v3093_v19 = vpop.xlane.xlu0 %3092 }
 0x617   :  { %v3114_v56 = vrot.slane %v3093_v19, %v5733_v12  ;;  %v3164_v59 = vrot.slane %v3143_v13, %v5733_v12 }
 0x619   :  { %v3115_v14 = vsel %vm1001_vm0, %v3114_v56, %v3110_v11 }
 0x61a   :  { %3119 = vst.msk [vmem:[#allocation4 + $0x10] sm:$0x1] %vm1014_vm1, %v3115_v14  ;;  %v3189_v50 = vpop.xlane.xlu1 %3188  ;;  %v3137_v34 = vpop.xlane.xlu0 %3136 }
 0x61b   :  { %v3151_v2 = vrot.slane %v3137_v34, %v5734_v25  ;;  %v3205_v45 = vrot.slane %v3189_v50, %v5733_v12 }
 0x61d   :  { %v3156_v39 = vsel %vm1001_vm0, %v3155_v42, %v3151_v2 }
 0x61e   :  { %3168 = vst.msk [vmem:[#allocation4 + $0x1] sm:$0x1] %vm1014_vm1, %v3156_v39  ;;  %v3193_v41 = vpop.xlane.xlu1 %3192  ;;  %v3141_v38 = vpop.xlane.xlu0 %3140 }
 0x61f   :  { %v3160_v17 = vrot.slane %v3141_v38, %v5734_v25  ;;  %v3214_v62 = vrot.slane %v3193_v41, %v5733_v12 }
 0x621   :  { %v3165_v7 = vsel %vm1001_vm0, %v3164_v59, %v3160_v17 }
 0x622   :  { %3169 = vst.msk [vmem:[#allocation4 + $0x11] sm:$0x1] %vm1014_vm1, %v3165_v7  ;;  %v3239_v31 = vpop.xlane.xlu1 %3238  ;;  %v3187_v55 = vpop.xlane.xlu0 %3186 }
 0x623   :  { %v3201_v43 = vrot.slane %v3187_v55, %v5734_v25  ;;  %v3255_v49 = vrot.slane %v3239_v31, %v5733_v12 }
 0x625   :  { %v3206_v30 = vsel %vm1001_vm0, %v3205_v45, %v3201_v43 }
 0x626   :  { %3218 = vst.msk [vmem:[#allocation4 + $0x2] sm:$0x1] %vm1014_vm1, %v3206_v30  ;;  %v3243_v28 = vpop.xlane.xlu1 %3242  ;;  %v3191_v32 = vpop.xlane.xlu0 %3190 }
 0x627   :  { %v3210_v52 = vrot.slane %v3191_v32, %v5734_v25  ;;  %v3264_v9 = vrot.slane %v3243_v28, %v5733_v12  ;;  %v3862_v28 = vld [vmem:[%s5535_s2] sm:$0xff] }
 0x629   :  { %v3215_v46 = vsel %vm1001_vm0, %v3214_v62, %v3210_v52 }
 0x62a   :  { %3219 = vst.msk [vmem:[#allocation4 + $0x12] sm:$0x1] %vm1014_vm1, %v3215_v46  ;;  %v3289_v60 = vpop.xlane.xlu1 %3288  ;;  %v3237_v48 = vpop.xlane.xlu0 %3236 }
 0x62b   :  { %v3251_v24 = vrot.slane %v3237_v48, %v5734_v25  ;;  %v3305_v57 = vrot.slane %v3289_v60, %v5733_v12 }
 0x62d   :  { %v3256_v6 = vsel %vm1001_vm0, %v3255_v49, %v3251_v24 }
 0x62e   :  { %3268 = vst.msk [vmem:[#allocation4 + $0x3] sm:$0x1] %vm1014_vm1, %v3256_v6  ;;  %v3293_v22 = vpop.xlane.xlu1 %3292  ;;  %v3241_v3 = vpop.xlane.xlu0 %3240 }
 0x62f   :  { %v3260_v16 = vrot.slane %v3241_v3, %v5734_v25  ;;  %v3314_v36 = vrot.slane %v3293_v22, %v5733_v12 }
 0x631   :  { %v3265_v58 = vsel %vm1001_vm0, %v3264_v9, %v3260_v16 }
 0x632   :  { %3269 = vst.msk [vmem:[#allocation4 + $0x13] sm:$0x1] %vm1014_vm1, %v3265_v58  ;;  %v3339_v23 = vpop.xlane.xlu1 %3338  ;;  %v3287_v35 = vpop.xlane.xlu0 %3286 }
 0x633   :  { %v3301_v47 = vrot.slane %v3287_v35, %v5734_v25  ;;  %v3355_v4 = vrot.slane %v3339_v23, %v5733_v12 }
 0x635   :  { %v3306_v63 = vsel %vm1001_vm0, %v3305_v57, %v3301_v47 }
 0x636   :  { %3318 = vst.msk [vmem:[#allocation4 + $0x4] sm:$0x1] %vm1014_vm1, %v3306_v63  ;;  %v3343_v8 = vpop.xlane.xlu1 %3342  ;;  %v3291_v0 = vpop.xlane.xlu0 %3290 }
 0x637   :  { %v3310_v40 = vrot.slane %v3291_v0, %v5734_v25  ;;  %v3364_v37 = vrot.slane %v3343_v8, %v5733_v12  ;;  %v3863_v0 = vld [vmem:[%s5535_s2 + $0x8] sm:$0x3] }
 0x639   :  { %v3315_v10 = vsel %vm1001_vm0, %v3314_v36, %v3310_v40 }
 0x63a   :  { %3319 = vst.msk [vmem:[#allocation4 + $0x14] sm:$0x1] %vm1014_vm1, %v3315_v10  ;;  %v3389_v21 = vpop.xlane.xlu1 %3388  ;;  %v3337_v20 = vpop.xlane.xlu0 %3336 }
 0x63b   :  { %v3351_v1 = vrot.slane %v3337_v20, %v5734_v25  ;;  %v3405_v54 = vrot.slane %v3389_v21, %v5733_v12 }
 0x63d   :  { %v3356_v51 = vsel %vm1001_vm0, %v3355_v4, %v3351_v1 }
 0x63e   :  { %3368 = vst.msk [vmem:[#allocation4 + $0x5] sm:$0x1] %vm1014_vm1, %v3356_v51  ;;  %v3393_v44 = vpop.xlane.xlu1 %3392  ;;  %v3341_v15 = vpop.xlane.xlu0 %3340 }
 0x63f   :  { %v3360_v33 = vrot.slane %v3341_v15, %v5734_v25  ;;  %v3414_v13 = vrot.slane %v3393_v44, %v5733_v12 }
 0x641   :  { %v3365_v61 = vsel %vm1001_vm0, %v3364_v37, %v3360_v33 }
 0x642   :  { %3369 = vst.msk [vmem:[#allocation4 + $0x15] sm:$0x1] %vm1014_vm1, %v3365_v61  ;;  %v3439_v53 = vpop.xlane.xlu1 %3438  ;;  %v3387_v27 = vpop.xlane.xlu0 %3386 }
 0x643   :  { %v3401_v5 = vrot.slane %v3387_v27, %v5734_v25  ;;  %v3455_v50 = vrot.slane %v3439_v53, %v5733_v12 }
 0x645   :  { %v3406_v26 = vsel %vm1001_vm0, %v3405_v54, %v3401_v5 }
 0x646   :  { %3418 = vst.msk [vmem:[#allocation4 + $0x6] sm:$0x1] %vm1014_vm1, %v3406_v26  ;;  %v3443_v18 = vpop.xlane.xlu1 %3442  ;;  %v3391_v29 = vpop.xlane.xlu0 %3390 }
 0x647   :  { %v3410_v19 = vrot.slane %v3391_v29, %v5734_v25  ;;  %v3464_v39 = vrot.slane %v3443_v18, %v5733_v12 }
 0x649   :  { %v3415_v11 = vsel %vm1001_vm0, %v3414_v13, %v3410_v19 }
 0x64a   :  { %3419 = vst.msk [vmem:[#allocation4 + $0x16] sm:$0x1] %vm1014_vm1, %v3415_v11  ;;  %v3489_v56 = vpop.xlane.xlu1 %3488  ;;  %v3437_v14 = vpop.xlane.xlu0 %3436 }
 0x64b   :  { %v3451_v34 = vrot.slane %v3437_v14, %v5734_v25  ;;  %v3505_v7 = vrot.slane %v3489_v56, %v5733_v12 }
 0x64d   :  { %v3456_v42 = vsel %vm1001_vm0, %v3455_v50, %v3451_v34 }
 0x64e   :  { %3468 = vst.msk [vmem:[#allocation4 + $0x7] sm:$0x1] %vm1014_vm1, %v3456_v42  ;;  %v3441_v2 = vpop.xlane.xlu0 %3440  ;;  %v3493_v38 = vpop.xlane.xlu1 %3492 }
 0x64f   :  { %v3460_v41 = vrot.slane %v3441_v2, %v5734_v25  ;;  %v3514_v62 = vrot.slane %v3493_v38, %v5733_v12 }
 0x651   :  { %v3465_v59 = vsel %vm1001_vm0, %v3464_v39, %v3460_v41 }
 0x652   :  { %3469 = vst.msk [vmem:[#allocation4 + $0x17] sm:$0x1] %vm1014_vm1, %v3465_v59  ;;  %v3487_v17 = vpop.xlane.xlu0 %3486  ;;  %v3539_v43 = vpop.xlane.xlu1 %3538 }
 0x653   :  { %v3501_v31 = vrot.slane %v3487_v17, %v5734_v25  ;;  %v3555_v22 = vrot.slane %v3539_v43, %v5733_v12 }
 0x655   :  { %v3506_v55 = vsel %vm1001_vm0, %v3505_v7, %v3501_v31  ;;  %v3570_v45 = vld [vmem:[#allocation4] sm:$0xff] }
 0x656   :  { %3518 = vst.msk [vmem:[#allocation4 + $0x8] sm:$0x1] %vm1014_vm1, %v3506_v55  ;;  %v3491_v30 = vpop.xlane.xlu0 %3490  ;;  %v3574_v32 = vadd.f32 %v3862_v28, %v3570_v45  ;;  %v3543_v9 = vpop.xlane.xlu1 %3542 }
 0x657   :  { %v3510_v52 = vrot.slane %v3491_v30, %v5734_v25  ;;  %v3564_v57 = vrot.slane %v3543_v9, %v5733_v12 }
 0x658   :  { %v3578_v46 = vmul.f32 %v3574_v32, %v3574_v32 }
 0x659   :  { %v3515_v60 = vsel %vm1001_vm0, %v3514_v62, %v3510_v52  ;;  %v3572_v48 = vld [vmem:[#allocation4 + $0x10] sm:$0xff] }
 0x65a   :  { %3519 = vst.msk [vmem:[#allocation4 + $0x18] sm:$0x1] %vm1014_vm1, %v3515_v60  ;;  %v3537_v49 = vpop.xlane.xlu0 %3536  ;;  %v3582_v24 = vsel %vm1407_vm3, %v3578_v46, 0.0  ;;  %v3576_v6 = vadd.f32 %v3862_v28, %v3572_v48 }
 0x65b   :  { %v3551_v3 = vrot.slane %v3537_v49, %v5734_v25  ;;  %3583 = vadd.xlane.f32.xlu0 %v3582_v24 }
 0x65c   :  { %v3580_v16 = vmul.f32 %v3576_v6, %v3576_v6 }
 0x65d   :  { %v3556_v58 = vsel %vm1001_vm0, %v3555_v22, %v3551_v3 }
 0x65e   :  { %3568 = vst.msk [vmem:[#allocation4 + $0x9] sm:$0x1] %vm1014_vm1, %v3556_v58  ;;  %v3541_v23 = vpop.xlane.xlu0 %3540  ;;  %v3588_v35 = vsel %vm1407_vm3, %v3580_v16, 0.0 }
 0x65f   :  { %v3560_v47 = vrot.slane %v3541_v23, %v5734_v25  ;;  %3589 = vadd.xlane.f32.xlu0 %v3588_v35 }
 0x661   :  { %v3565_v63 = vsel %vm1001_vm0, %v3564_v57, %v3560_v47 }
 0x662   :  { %3569 = vst.msk [vmem:[#allocation4 + $0x19] sm:$0x1] %vm1014_vm1, %v3565_v63 }
 0x665   :  { %v3571_v8 = vld [vmem:[#allocation4 + $0x8] sm:$0x3] }
 0x666   :  { %v3575_v36 = vadd.f32 %v3863_v0, %v3571_v8 }
 0x668   :  { %v3579_v40 = vmul.f32 %v3575_v36, %v3575_v36 }
 0x669   :  { %v3573_v10 = vld [vmem:[#allocation4 + $0x18] sm:$0x3] }
 0x66a   :  { %v3585_v21 = vsel %vm1411_vm2, %v3579_v40, 0.0  ;;  %v3577_v20 = vadd.f32 %v3863_v0, %v3573_v10 }
 0x66b   :  { %3586 = vadd.xlane.f32.xlu1 %v3585_v21 }
 0x66c   :  { %v3581_v12 = vmul.f32 %v3577_v20, %v3577_v20 }
 0x66e   :  { %v3591_v25 = vsel %vm1411_vm2, %v3581_v12, 0.0 }
 0x66f   :  { %3592 = vadd.xlane.f32.xlu1 %v3591_v25 }
 0x6e4   :  { %v3584_v4 = vpop.xlane.xlu0 %3583 }
 0x6e5   :  { %v3594_v1 = vadd.f32 1.0, %v3584_v4  ;;  %v3610_v51 = vadd.f32 1e-16, %v3584_v4 }
 0x6e7   :  { %3844 = vrcp.f32 %v3594_v1 }
 0x6e8   :  { %v3590_v44 = vpop.xlane.xlu0 %3589  ;;  %3846 = vrsqrt.f32 %v3610_v51 }
 0x6e9   :  { %v3596_v15 = vadd.f32 1.0, %v3590_v44  ;;  %v3612_v37 = vadd.f32 1e-16, %v3590_v44 }
 0x6eb   :  { %3848 = vrcp.f32 %v3596_v15 }
 0x6ec   :  { %3850 = vrsqrt.f32 %v3612_v37 }
 0x6f4   :  { %v3845_v33 = vpop.eup %3844  ;;  %v3587_v61 = vpop.xlane.xlu1 %3586 }
 0x6f5   :  { %v3599_v53 = vmul.f32 %v3845_v33, %v3584_v4  ;;  %v3595_v27 = vadd.f32 1.0, %v3587_v61  ;;  %v3611_v54 = vadd.f32 1e-16, %v3587_v61  ;;  %v3847_v5 = vpop.eup %3846 }
 0x6f7   :  { %v3606_v26 = vmul.f32 %v3599_v53, %v3574_v32  ;;  %3852 = vrcp.f32 %v3595_v27 }
 0x6f8   :  { %v3849_v18 = vpop.eup %3848  ;;  %v3593_v29 = vpop.xlane.xlu1 %3592  ;;  %3854 = vrsqrt.f32 %v3611_v54 }
 0x6f9   :  { %v3618_v13 = vmul.f32 %v3847_v5, %v3606_v26  ;;  %v3603_v19 = vmul.f32 %v3849_v18, %v3590_v44  ;;  %v3597_v11 = vadd.f32 1.0, %v3593_v29  ;;  %v3613_v14 = vadd.f32 1e-16, %v3593_v29  ;;  %v3851_v50 = vpop.eup %3850 }
 0x6fb   :  { %3622 = vst.msk [vmem:[%s5536_s3] sm:$0xff] %vm1407_vm3, %v3618_v13  ;;  %v3608_v56 = vmul.f32 %v3603_v19, %v3576_v6  ;;  %3856 = vrcp.f32 %v3597_v11 }
 0x6fc   :  { %3858 = vrsqrt.f32 %v3613_v14 }
 0x6fd   :  { %v3620_v34 = vmul.f32 %v3851_v50, %v3608_v56 }
 0x6ff   :  { %3624 = vst.msk [vmem:[%s5536_s3 + $0x10] sm:$0xff] %vm1407_vm3, %v3620_v34 }
 0x704   :  { %v3853_v42 = vpop.eup %3852 }
 0x705   :  { %v3601_v2 = vmul.f32 %v3853_v42, %v3587_v61  ;;  %v3855_v39 = vpop.eup %3854 }
 0x707   :  { %v3607_v41 = vmul.f32 %v3601_v2, %v3575_v36 }
 0x708   :  { %v3857_v38 = vpop.eup %3856 }
 0x709   :  { %v3619_v59 = vmul.f32 %v3855_v39, %v3607_v41  ;;  %v3605_v17 = vmul.f32 %v3857_v38, %v3593_v29  ;;  %v3859_v31 = vpop.eup %3858 }
 0x70b   :  { %3623 = vst.msk [vmem:[%s5536_s3 + $0x8] sm:$0x3] %vm1411_vm2, %v3619_v59  ;;  %v3609_v7 = vmul.f32 %v3605_v17, %v3577_v20 }
 0x70d   :  { %v3621_v55 = vmul.f32 %v3859_v31, %v3609_v7 }
 0x70f   :  { %3625 = vst.msk [vmem:[%s5536_s3 + $0x18] sm:$0x3] %vm1411_vm2, %v3621_v55 }

</bundles_post_ra>
